<compile_context>
chip_gen: v6e
topology: v6e:2x2x1
jax: 0.10.0
libtpu: 0.0.40
codegen_flags: <defaults>
</compile_context>

<pallas_src>
import functools
import numpy as np
import jax
import jax.numpy as jnp
from jax.experimental import pallas as pl
from jax.experimental.pallas import tpu as pltpu

# ------------------------- config (small demo shapes) -----------------------
OBS_SHAPE = (16, 16, 4)       # (H, W, C) -- 'MiniGrid' branch (3 conv layers)
NUM_ACTIONS = 6
HIDDEN = 256                  # reduced from 1024 in the reference module
T, B = 4, 2


# ------------------------- fused matmul + bias + activation ------------------
def _mm_bias_act_kernel(x_ref, w_ref, b_ref, o_ref, *, act):
    y = jnp.dot(x_ref[...], w_ref[...], preferred_element_type=jnp.float32)
    y = y + b_ref[...]
    if act == "relu":
        y = jnp.maximum(y, 0.0)
    elif act == "elu":
        # ELU(alpha=1); min() avoids exp overflow of the branch jnp.where discards.
        y = jnp.where(y > 0.0, y, jnp.exp(jnp.minimum(y, 0.0)) - 1.0)
    o_ref[...] = y


def linear_act(x, w, b, act="none"):
    """Fused (x @ w + b) + activation as a single full-block Pallas call."""
    M, K = x.shape
    K2, N = w.shape
    assert K == K2
    kernel = functools.partial(_mm_bias_act_kernel, act=act)
    return pl.pallas_call(
        kernel,
        out_shape=jax.ShapeDtypeStruct((M, N), jnp.float32),
    )(x, w, b)


# ------------------------- fused FC trunk -------------------------------------
def _fc_trunk_kernel(x_ref, w1_ref, b1_ref, w2_ref, b2_ref, wih0_ref, bl0_ref,
                     hidden_ref, xproj_ref):
    # FC1 -> ReLU -> FC2 -> ReLU, weights resident in VMEM, chained in-kernel.
    h1 = jnp.dot(x_ref[...], w1_ref[...], preferred_element_type=jnp.float32)
    h1 = jnp.maximum(h1 + b1_ref[...], 0.0)
    h2 = jnp.dot(h1, w2_ref[...], preferred_element_type=jnp.float32)
    h2 = jnp.maximum(h2 + b2_ref[...], 0.0)
    hidden_ref[...] = h2
    # Hoisted LSTM layer-0 input projection for all timesteps (one M=T*B matmul
    # instead of T sequential M=B matmuls on the recurrent critical path).
    xproj_ref[...] = (jnp.dot(h2, wih0_ref[...], preferred_element_type=jnp.float32)
                      + bl0_ref[...])


def fc_trunk(x, fc1_w, fc1_b, fc2_w, fc2_b, wih0, b0):
    M = x.shape[0]
    Hn = fc2_w.shape[1]
    G = wih0.shape[1]
    return pl.pallas_call(
        _fc_trunk_kernel,
        out_shape=(jax.ShapeDtypeStruct((M, Hn), jnp.float32),
                   jax.ShapeDtypeStruct((M, G), jnp.float32)),
    )(x, fc1_w, fc1_b, fc2_w, fc2_b, wih0, b0)


# ------------------------- 2-layer LSTM + fused heads -------------------------
def _lstm_core_kernel(xproj_ref, nd_ref, whh0_ref, wih1_ref, whh1_ref, b1_ref,
                      wh_ref, bh_ref, h0_ref, c0_ref,
                      head_ref, hT_ref, cT_ref):
    H = whh0_ref.shape[0]
    t = pl.program_id(0)

    @pl.when(t == 0)
    def _():
        hT_ref[...] = h0_ref[...]
        cT_ref[...] = c0_ref[...]

    nd = nd_ref[0]                               # (B, 1) notdone mask
    h_all = hT_ref[...] * nd[None, :, :]         # (2, B, H)
    c_all = cT_ref[...] * nd[None, :, :]

    def gates_to_hc(gates, c_prev):
        i = jax.nn.sigmoid(gates[:, 0 * H:1 * H])
        f = jax.nn.sigmoid(gates[:, 1 * H:2 * H])
        g = jnp.tanh(gates[:, 2 * H:3 * H])
        o = jax.nn.sigmoid(gates[:, 3 * H:4 * H])
        c_new = f * c_prev + i * g
        h_new = o * jnp.tanh(c_new)
        return h_new, c_new

    # layer 0: input projection (x_t @ W_ih0 + b_ih0 + b_hh0) precomputed in trunk
    g0 = xproj_ref[0] + jnp.dot(h_all[0], whh0_ref[...],
                                preferred_element_type=jnp.float32)
    h0n, c0n = gates_to_hc(g0, c_all[0])

    # layer 1
    g1 = (jnp.dot(h0n, wih1_ref[...], preferred_element_type=jnp.float32)
          + jnp.dot(h_all[1], whh1_ref[...], preferred_element_type=jnp.float32)
          + b1_ref[...])
    h1n, c1n = gates_to_hc(g1, c_all[1])

    # fused, column-merged policy+baseline head: cols [0:A] logits, col A baseline
    head_ref[0] = (jnp.dot(h1n, wh_ref[...], preferred_element_type=jnp.float32)
                   + bh_ref[...])

    hT_ref[0] = h0n
    hT_ref[1] = h1n
    cT_ref[0] = c0n
    cT_ref[1] = c1n


def lstm_core(xproj, nd, whh0, wih1, whh1, b1, w_head, b_head, h0, c0):
    """xproj: (T,B,4H) hoisted layer-0 input projection; nd: (T,B,1);
    h0/c0: (2,B,H).  Grid over time; h/c states resident in VMEM output blocks."""
    Tn, Bn, G = xproj.shape
    H = whh0.shape[0]
    NH = w_head.shape[1]
    full = lambda shape: pl.BlockSpec(shape, lambda t, _s=shape: (0,) * len(_s))
    in_specs = [
        pl.BlockSpec((1, Bn, G), lambda t: (t, 0, 0)),   # xproj_t
        pl.BlockSpec((1, Bn, 1), lambda t: (t, 0, 0)),   # notdone_t
        full(whh0.shape), full(wih1.shape), full(whh1.shape), full(b1.shape),
        full(w_head.shape), full(b_head.shape),
        full(h0.shape), full(c0.shape),
    ]
    out_specs = (
        pl.BlockSpec((1, Bn, NH), lambda t: (t, 0, 0)),  # fused head output
        full(h0.shape),                                  # h_T (resident accumulator)
        full(c0.shape),                                  # c_T (resident accumulator)
    )
    out_shape = (
        jax.ShapeDtypeStruct((Tn, Bn, NH), jnp.float32),
        jax.ShapeDtypeStruct((2, Bn, H), jnp.float32),
        jax.ShapeDtypeStruct((2, Bn, H), jnp.float32),
    )
    return pl.pallas_call(
        _lstm_core_kernel,
        grid=(Tn,),
        in_specs=in_specs,
        out_specs=out_specs,
        out_shape=out_shape,
        compiler_params=pltpu.CompilerParams(dimension_semantics=("arbitrary",)),
    )(xproj, nd, whh0, wih1, whh1, b1, w_head, b_head, h0, c0)


# ------------------------- conv via im2col + Pallas matmul --------------------
def conv3x3_s2_p1_elu(x, w, b):
    """x: (N, W, H, C); w: (9*C, Cout) with patch order (kh, kw, c); b: (1, Cout)."""
    N, W, H, C = x.shape
    Wo = (W - 1) // 2 + 1
    Ho = (H - 1) // 2 + 1
    xp = jnp.pad(x, ((0, 0), (1, 1), (1, 1), (0, 0)))
    patches = []
    for kh in range(3):
        for kw in range(3):
            patches.append(
                jax.lax.slice(xp,
                              (0, kh, kw, 0),
                              (N, kh + 2 * (Wo - 1) + 1, kw + 2 * (Ho - 1) + 1, C),
                              strides=(1, 2, 2, 1)))
    # TODO(synk): im2col is still JAX glue (XLA-fused); a fully in-kernel gather
    # was left out to keep Mosaic lowering on the proven path at these tiny sizes.
    patches = jnp.concatenate(patches, axis=-1).reshape(N * Wo * Ho, 9 * C)
    y = linear_act(patches, w, b, act="elu")
    return y.reshape(N, Wo, Ho, -1)


# ------------------------- parameters (deterministic) -------------------------
def _orthogonal(key, shape, gain):
    return jax.nn.initializers.orthogonal(scale=gain)(key, shape, jnp.float32)


def init_params(key, obs_shape, num_actions, hidden):
    H_in, W_in, C_in = obs_shape
    relu_gain = float(np.sqrt(2.0))
    keys = jax.random.split(key, 16)
    params = {}

    # 'MiniGrid' feat_extract: 3 x [Conv2d(3x3, stride 2, pad 1, 32ch) + ELU]
    convs = []
    c_prev = C_in
    for i in range(3):
        w = _orthogonal(keys[i], (9 * c_prev, 32), relu_gain)
        b = jnp.zeros((1, 32), jnp.float32)
        convs.append((w, b))
        c_prev = 32
    params["convs"] = convs

    w_sp, h_sp = W_in, H_in
    for _ in range(3):
        w_sp = (w_sp - 1) // 2 + 1
        h_sp = (h_sp - 1) // 2 + 1
    conv_out = 32 * w_sp * h_sp

    params["fc1_w"] = _orthogonal(keys[3], (conv_out, hidden), relu_gain)
    params["fc1_b"] = jnp.zeros((1, hidden), jnp.float32)
    params["fc2_w"] = _orthogonal(keys[4], (hidden, hidden), relu_gain)
    params["fc2_b"] = jnp.zeros((1, hidden), jnp.float32)

    # LSTM(hidden, hidden, num_layers=2) -- PyTorch default uniform init
    k = 1.0 / np.sqrt(hidden)
    uni = lambda kk, shape: jax.random.uniform(kk, shape, jnp.float32, -k, k)
    params["lstm"] = (
        uni(keys[5], (hidden, 4 * hidden)),                              # W_ih l0 (T)
        uni(keys[6], (hidden, 4 * hidden)),                              # W_hh l0 (T)
        uni(keys[7], (1, 4 * hidden)) + uni(keys[8], (1, 4 * hidden)),   # b_ih+b_hh l0
        uni(keys[9], (hidden, 4 * hidden)),                              # W_ih l1 (T)
        uni(keys[10], (hidden, 4 * hidden)),                             # W_hh l1 (T)
        uni(keys[11], (1, 4 * hidden)) + uni(keys[12], (1, 4 * hidden)), # b_ih+b_hh l1
    )

    params["pi_w"] = _orthogonal(keys[13], (hidden, num_actions), 1.0)
    params["pi_b"] = jnp.zeros((1, num_actions), jnp.float32)
    params["v_w"] = _orthogonal(keys[14], (hidden, 1), 1.0)
    params["v_b"] = jnp.zeros((1, 1), jnp.float32)
    return params


# ------------------------- forward pass ---------------------------------------
def policy_net_forward(params, frame, done, core_state):
    """frame: (T, B, H, W, C); done: (T, B); core_state: ((2,B,H), (2,B,H))."""
    Tn, Bn = frame.shape[0], frame.shape[1]
    num_actions = params["pi_w"].shape[1]

    x = frame.reshape((Tn * Bn,) + frame.shape[2:]).astype(jnp.float32)  # (N,H,W,C)
    # mirror torch transpose(1, 3): conv over spatial (W, H), channels last here
    x = jnp.transpose(x, (0, 2, 1, 3))                                   # (N,W,H,C)

    for (w, b) in params["convs"]:
        x = conv3x3_s2_p1_elu(x, w, b)

    # flatten in PyTorch (N, C, W', H') order
    x = jnp.transpose(x, (0, 3, 1, 2)).reshape(Tn * Bn, -1)

    wih0, whh0, b0, wih1, whh1, b1 = params["lstm"]

    # one fused call: FC1+ReLU -> FC2+ReLU -> hoisted LSTM layer-0 input proj
    hidden, xproj = fc_trunk(x, params["fc1_w"], params["fc1_b"],
                             params["fc2_w"], params["fc2_b"], wih0, b0)

    notdone = jnp.abs(1.0 - done.astype(jnp.float32)).reshape(Tn, Bn, 1)
    xproj = xproj.reshape(Tn, Bn, -1)
    h0, c0 = core_state

    # merged policy+baseline head weights, applied in-kernel to each LSTM output
    w_head = jnp.concatenate([params["pi_w"], params["v_w"]], axis=1)    # (H, A+1)
    b_head = jnp.concatenate([params["pi_b"], params["v_b"]], axis=1)    # (1, A+1)

    head, hT, cT = lstm_core(xproj, notdone, whh0, wih1, whh1, b1,
                             w_head, b_head, h0, c0)

    head2 = head.reshape(Tn * Bn, -1)
    policy_logits = head2[:, :num_actions]
    baseline = head2[:, num_actions]

    # eval-mode action selection (argmax over actions).
    # TODO(synk): training-mode torch.multinomial sampling and the optional
    # exploration_logits / exploration_discount path are not implemented.
    action = jnp.argmax(policy_logits, axis=1)

    outputs = dict(
        policy_logits=policy_logits.reshape(Tn, Bn, -1),
        baseline=baseline.reshape(Tn, Bn),
        action=action.reshape(Tn, Bn),
        policy_hiddens=hidden,
    )
    return outputs, (hT, cT)


# ------------------------- demo -----------------------------------------------
if __name__ == "__main__":
    key = jax.random.PRNGKey(0)
    pkey, fkey, dkey = jax.random.split(key, 3)
    params = init_params(pkey, OBS_SHAPE, NUM_ACTIONS, HIDDEN)

    frame = jax.random.randint(fkey, (T, B) + OBS_SHAPE, 0, 256).astype(jnp.float32)
    done = (jax.random.uniform(dkey, (T, B)) < 0.2).astype(jnp.float32)
    core_state = (jnp.zeros((2, B, HIDDEN), jnp.float32),
                  jnp.zeros((2, B, HIDDEN), jnp.float32))

    fwd = jax.jit(policy_net_forward)
    outputs, new_state = fwd(params, frame, done, core_state)
    (outputs, new_state) = jax.block_until_ready((outputs, new_state))

    assert outputs["policy_logits"].shape == (T, B, NUM_ACTIONS)
    assert outputs["baseline"].shape == (T, B)
    assert outputs["action"].shape == (T, B)
    assert outputs["policy_hiddens"].shape == (T * B, HIDDEN)
    assert new_state[0].shape == (2, B, HIDDEN) and new_state[1].shape == (2, B, HIDDEN)
    print("KERNEL_OK")
</pallas_src>

<mosaic_0001>
module attributes {stable_mosaic.version = 11 : i64} {
  func.func @_mm_bias_act_kernel(%arg0: memref<512x36xf32, #tpu.memory_space<vmem>>, %arg1: memref<36x32xf32, #tpu.memory_space<vmem>>, %arg2: memref<1x32xf32, #tpu.memory_space<vmem>>, %arg3: memref<512x32xf32, #tpu.memory_space<vmem>>) attributes {dimension_semantics = [], scalar_prefetch = 0 : i64, scratch_operands = 0 : i64, tpu.core_type = #tpu.core_type<tc>} {
    %c0 = arith.constant 0 : index
    %c0_0 = arith.constant 0 : index
    %0 = vector.load %arg0[%c0, %c0_0] : memref<512x36xf32, #tpu.memory_space<vmem>>, vector<512x36xf32>
    %c0_1 = arith.constant 0 : index
    %c0_2 = arith.constant 0 : index
    %1 = vector.load %arg1[%c0_1, %c0_2] : memref<36x32xf32, #tpu.memory_space<vmem>>, vector<36x32xf32>
    %cst = arith.constant dense<0.000000e+00> : vector<512x32xf32>
    %2 = tpu.matmul %0, %1, %cst {dimension_numbers = #tpu.dot_dimension_numbers<[1], [0], [0], [1], [0, 0, 1, 1], [], []>} : vector<512x36xf32>, vector<36x32xf32>, vector<512x32xf32> -> vector<512x32xf32>
    %c0_3 = arith.constant 0 : index
    %c0_4 = arith.constant 0 : index
    %3 = vector.load %arg2[%c0_3, %c0_4] : memref<1x32xf32, #tpu.memory_space<vmem>>, vector<1x32xf32>
    %4 = vector.broadcast %3 : vector<1x32xf32> to vector<512x32xf32>
    %5 = arith.addf %2, %4 : vector<512x32xf32>
    %cst_5 = arith.constant 0.000000e+00 : f32
    %6 = vector.broadcast %cst_5 : f32 to vector<512x32xf32>
    %7 = arith.cmpf ogt, %5, %6 : vector<512x32xf32>
    %cst_6 = arith.constant 0.000000e+00 : f32
    %8 = vector.broadcast %cst_6 : f32 to vector<512x32xf32>
    %9 = arith.minimumf %5, %8 : vector<512x32xf32>
    %10 = math.exp %9 : vector<512x32xf32>
    %cst_7 = arith.constant 1.000000e+00 : f32
    %11 = vector.broadcast %cst_7 : f32 to vector<512x32xf32>
    %12 = arith.subf %10, %11 : vector<512x32xf32>
    %13 = arith.select %7, %5, %12 : vector<512x32xi1>, vector<512x32xf32>
    %c0_8 = arith.constant 0 : index
    %c0_9 = arith.constant 0 : index
    %14 = vector.load %arg3[%c0_8, %c0_9] : memref<512x32xf32, #tpu.memory_space<vmem>>, vector<512x32xf32>
    tpu.vector_store %arg3[%c0_8, %c0_9], %13 {strides = array<i32>} : memref<512x32xf32, #tpu.memory_space<vmem>>, vector<512x32xf32>,
    return
  }
}

module attributes {stable_mosaic.version = 11 : i64} {
  func.func @_mm_bias_act_kernel(%arg0: memref<128x288xf32, #tpu.memory_space<vmem>>, %arg1: memref<288x32xf32, #tpu.memory_space<vmem>>, %arg2: memref<1x32xf32, #tpu.memory_space<vmem>>, %arg3: memref<128x32xf32, #tpu.memory_space<vmem>>) attributes {dimension_semantics = [], scalar_prefetch = 0 : i64, scratch_operands = 0 : i64, tpu.core_type = #tpu.core_type<tc>} {
    %c0 = arith.constant 0 : index
    %c0_0 = arith.constant 0 : index
    %0 = vector.load %arg0[%c0, %c0_0] : memref<128x288xf32, #tpu.memory_space<vmem>>, vector<128x288xf32>
    %c0_1 = arith.constant 0 : index
    %c0_2 = arith.constant 0 : index
    %1 = vector.load %arg1[%c0_1, %c0_2] : memref<288x32xf32, #tpu.memory_space<vmem>>, vector<288x32xf32>
    %cst = arith.constant dense<0.000000e+00> : vector<128x32xf32>
    %2 = tpu.matmul %0, %1, %cst {dimension_numbers = #tpu.dot_dimension_numbers<[1], [0], [0], [1], [0, 0, 1, 1], [], []>} : vector<128x288xf32>, vector<288x32xf32>, vector<128x32xf32> -> vector<128x32xf32>
    %c0_3 = arith.constant 0 : index
    %c0_4 = arith.constant 0 : index
    %3 = vector.load %arg2[%c0_3, %c0_4] : memref<1x32xf32, #tpu.memory_space<vmem>>, vector<1x32xf32>
    %4 = vector.broadcast %3 : vector<1x32xf32> to vector<128x32xf32>
    %5 = arith.addf %2, %4 : vector<128x32xf32>
    %cst_5 = arith.constant 0.000000e+00 : f32
    %6 = vector.broadcast %cst_5 : f32 to vector<128x32xf32>
    %7 = arith.cmpf ogt, %5, %6 : vector<128x32xf32>
    %cst_6 = arith.constant 0.000000e+00 : f32
    %8 = vector.broadcast %cst_6 : f32 to vector<128x32xf32>
    %9 = arith.minimumf %5, %8 : vector<128x32xf32>
    %10 = math.exp %9 : vector<128x32xf32>
    %cst_7 = arith.constant 1.000000e+00 : f32
    %11 = vector.broadcast %cst_7 : f32 to vector<128x32xf32>
    %12 = arith.subf %10, %11 : vector<128x32xf32>
    %13 = arith.select %7, %5, %12 : vector<128x32xi1>, vector<128x32xf32>
    %c0_8 = arith.constant 0 : index
    %c0_9 = arith.constant 0 : index
    %14 = vector.load %arg3[%c0_8, %c0_9] : memref<128x32xf32, #tpu.memory_space<vmem>>, vector<128x32xf32>
    tpu.vector_store %arg3[%c0_8, %c0_9], %13 {strides = array<i32>} : memref<128x32xf32, #tpu.memory_space<vmem>>, vector<128x32xf32>,
    return
  }
}

module attributes {stable_mosaic.version = 11 : i64} {
  func.func @_mm_bias_act_kernel(%arg0: memref<32x288xf32, #tpu.memory_space<vmem>>, %arg1: memref<288x32xf32, #tpu.memory_space<vmem>>, %arg2: memref<1x32xf32, #tpu.memory_space<vmem>>, %arg3: memref<32x32xf32, #tpu.memory_space<vmem>>) attributes {dimension_semantics = [], scalar_prefetch = 0 : i64, scratch_operands = 0 : i64, tpu.core_type = #tpu.core_type<tc>} {
    %c0 = arith.constant 0 : index
    %c0_0 = arith.constant 0 : index
    %0 = vector.load %arg0[%c0, %c0_0] : memref<32x288xf32, #tpu.memory_space<vmem>>, vector<32x288xf32>
    %c0_1 = arith.constant 0 : index
    %c0_2 = arith.constant 0 : index
    %1 = vector.load %arg1[%c0_1, %c0_2] : memref<288x32xf32, #tpu.memory_space<vmem>>, vector<288x32xf32>
    %cst = arith.constant dense<0.000000e+00> : vector<32x32xf32>
    %2 = tpu.matmul %0, %1, %cst {dimension_numbers = #tpu.dot_dimension_numbers<[1], [0], [0], [1], [0, 0, 1, 1], [], []>} : vector<32x288xf32>, vector<288x32xf32>, vector<32x32xf32> -> vector<32x32xf32>
    %c0_3 = arith.constant 0 : index
    %c0_4 = arith.constant 0 : index
    %3 = vector.load %arg2[%c0_3, %c0_4] : memref<1x32xf32, #tpu.memory_space<vmem>>, vector<1x32xf32>
    %4 = vector.broadcast %3 : vector<1x32xf32> to vector<32x32xf32>
    %5 = arith.addf %2, %4 : vector<32x32xf32>
    %cst_5 = arith.constant 0.000000e+00 : f32
    %6 = vector.broadcast %cst_5 : f32 to vector<32x32xf32>
    %7 = arith.cmpf ogt, %5, %6 : vector<32x32xf32>
    %cst_6 = arith.constant 0.000000e+00 : f32
    %8 = vector.broadcast %cst_6 : f32 to vector<32x32xf32>
    %9 = arith.minimumf %5, %8 : vector<32x32xf32>
    %10 = math.exp %9 : vector<32x32xf32>
    %cst_7 = arith.constant 1.000000e+00 : f32
    %11 = vector.broadcast %cst_7 : f32 to vector<32x32xf32>
    %12 = arith.subf %10, %11 : vector<32x32xf32>
    %13 = arith.select %7, %5, %12 : vector<32x32xi1>, vector<32x32xf32>
    %c0_8 = arith.constant 0 : index
    %c0_9 = arith.constant 0 : index
    %14 = vector.load %arg3[%c0_8, %c0_9] : memref<32x32xf32, #tpu.memory_space<vmem>>, vector<32x32xf32>
    tpu.vector_store %arg3[%c0_8, %c0_9], %13 {strides = array<i32>} : memref<32x32xf32, #tpu.memory_space<vmem>>, vector<32x32xf32>,
    return
  }
}

module attributes {stable_mosaic.version = 11 : i64} {
  func.func @_fc_trunk_kernel(%arg0: memref<8x128xf32, #tpu.memory_space<vmem>>, %arg1: memref<128x256xf32, #tpu.memory_space<vmem>>, %arg2: memref<1x256xf32, #tpu.memory_space<vmem>>, %arg3: memref<256x256xf32, #tpu.memory_space<vmem>>, %arg4: memref<1x256xf32, #tpu.memory_space<vmem>>, %arg5: memref<256x1024xf32, #tpu.memory_space<vmem>>, %arg6: memref<1x1024xf32, #tpu.memory_space<vmem>>, %arg7: memref<8x256xf32, #tpu.memory_space<vmem>>, %arg8: memref<8x1024xf32, #tpu.memory_space<vmem>>) attributes {dimension_semantics = [], scalar_prefetch = 0 : i64, scratch_operands = 0 : i64, tpu.core_type = #tpu.core_type<tc>} {
    %c0 = arith.constant 0 : index
    %c0_0 = arith.constant 0 : index
    %0 = vector.load %arg0[%c0, %c0_0] : memref<8x128xf32, #tpu.memory_space<vmem>>, vector<8x128xf32>
    %c0_1 = arith.constant 0 : index
    %c0_2 = arith.constant 0 : index
    %1 = vector.load %arg1[%c0_1, %c0_2] : memref<128x256xf32, #tpu.memory_space<vmem>>, vector<128x256xf32>
    %cst = arith.constant dense<0.000000e+00> : vector<8x256xf32>
    %2 = tpu.matmul %0, %1, %cst {dimension_numbers = #tpu.dot_dimension_numbers<[1], [0], [0], [1], [0, 0, 1, 1], [], []>} : vector<8x128xf32>, vector<128x256xf32>, vector<8x256xf32> -> vector<8x256xf32>
    %c0_3 = arith.constant 0 : index
    %c0_4 = arith.constant 0 : index
    %3 = vector.load %arg2[%c0_3, %c0_4] : memref<1x256xf32, #tpu.memory_space<vmem>>, vector<1x256xf32>
    %4 = vector.broadcast %3 : vector<1x256xf32> to vector<8x256xf32>
    %5 = arith.addf %2, %4 : vector<8x256xf32>
    %cst_5 = arith.constant 0.000000e+00 : f32
    %6 = vector.broadcast %cst_5 : f32 to vector<8x256xf32>
    %7 = arith.maximumf %5, %6 : vector<8x256xf32>
    %c0_6 = arith.constant 0 : index
    %c0_7 = arith.constant 0 : index
    %8 = vector.load %arg3[%c0_6, %c0_7] : memref<256x256xf32, #tpu.memory_space<vmem>>, vector<256x256xf32>
    %cst_8 = arith.constant dense<0.000000e+00> : vector<8x256xf32>
    %9 = tpu.matmul %7, %8, %cst_8 {dimension_numbers = #tpu.dot_dimension_numbers<[1], [0], [0], [1], [0, 0, 1, 1], [], []>} : vector<8x256xf32>, vector<256x256xf32>, vector<8x256xf32> -> vector<8x256xf32>
    %c0_9 = arith.constant 0 : index
    %c0_10 = arith.constant 0 : index
    %10 = vector.load %arg4[%c0_9, %c0_10] : memref<1x256xf32, #tpu.memory_space<vmem>>, vector<1x256xf32>
    %11 = vector.broadcast %10 : vector<1x256xf32> to vector<8x256xf32>
    %12 = arith.addf %9, %11 : vector<8x256xf32>
    %cst_11 = arith.constant 0.000000e+00 : f32
    %13 = vector.broadcast %cst_11 : f32 to vector<8x256xf32>
    %14 = arith.maximumf %12, %13 : vector<8x256xf32>
    %c0_12 = arith.constant 0 : index
    %c0_13 = arith.constant 0 : index
    %15 = vector.load %arg7[%c0_12, %c0_13] : memref<8x256xf32, #tpu.memory_space<vmem>>, vector<8x256xf32>
    tpu.vector_store %arg7[%c0_12, %c0_13], %14 {strides = array<i32>} : memref<8x256xf32, #tpu.memory_space<vmem>>, vector<8x256xf32>,
    %c0_14 = arith.constant 0 : index
    %c0_15 = arith.constant 0 : index
    %16 = vector.load %arg5[%c0_14, %c0_15] : memref<256x1024xf32, #tpu.memory_space<vmem>>, vector<256x1024xf32>
    %cst_16 = arith.constant dense<0.000000e+00> : vector<8x1024xf32>
    %17 = tpu.matmul %14, %16, %cst_16 {dimension_numbers = #tpu.dot_dimension_numbers<[1], [0], [0], [1], [0, 0, 1, 1], [], []>} : vector<8x256xf32>, vector<256x1024xf32>, vector<8x1024xf32> -> vector<8x1024xf32>
    %c0_17 = arith.constant 0 : index
    %c0_18 = arith.constant 0 : index
    %18 = vector.load %arg6[%c0_17, %c0_18] : memref<1x1024xf32, #tpu.memory_space<vmem>>, vector<1x1024xf32>
    %19 = vector.broadcast %18 : vector<1x1024xf32> to vector<8x1024xf32>
    %20 = arith.addf %17, %19 : vector<8x1024xf32>
    %c0_19 = arith.constant 0 : index
    %c0_20 = arith.constant 0 : index
    %21 = vector.load %arg8[%c0_19, %c0_20] : memref<8x1024xf32, #tpu.memory_space<vmem>>, vector<8x1024xf32>
    tpu.vector_store %arg8[%c0_19, %c0_20], %20 {strides = array<i32>} : memref<8x1024xf32, #tpu.memory_space<vmem>>, vector<8x1024xf32>,
    return
  }
}

module attributes {stable_mosaic.version = 11 : i64} {
  func.func @_lstm_core_kernel(%arg0: i32, %arg1: memref<1x2x1024xf32, #tpu.memory_space<vmem>>, %arg2: memref<1x2x1xf32, #tpu.memory_space<vmem>>, %arg3: memref<256x1024xf32, #tpu.memory_space<vmem>>, %arg4: memref<256x1024xf32, #tpu.memory_space<vmem>>, %arg5: memref<256x1024xf32, #tpu.memory_space<vmem>>, %arg6: memref<1x1024xf32, #tpu.memory_space<vmem>>, %arg7: memref<256x7xf32, #tpu.memory_space<vmem>>, %arg8: memref<1x7xf32, #tpu.memory_space<vmem>>, %arg9: memref<2x2x256xf32, #tpu.memory_space<vmem>>, %arg10: memref<2x2x256xf32, #tpu.memory_space<vmem>>, %arg11: memref<1x2x7xf32, #tpu.memory_space<vmem>>, %arg12: memref<2x2x256xf32, #tpu.memory_space<vmem>>, %arg13: memref<2x2x256xf32, #tpu.memory_space<vmem>>) attributes {dimension_semantics = [#tpu.dimension_semantics<arbitrary>], iteration_bounds = array<i64: 4>, scalar_prefetch = 0 : i64, scratch_operands = 0 : i64, tpu.core_type = #tpu.core_type<tc>, window_params = [{transform_indices = @transform_0, window_bounds = array<i64: 1, 2, 1024>}, {transform_indices = @transform_1, window_bounds = array<i64: 1, 2, 1>}, {pipeline_mode = #tpu.pipeline_mode<synchronous>, transform_indices = @transform_2, window_bounds = array<i64: 256, 1024>}, {pipeline_mode = #tpu.pipeline_mode<synchronous>, transform_indices = @transform_3, window_bounds = array<i64: 256, 1024>}, {pipeline_mode = #tpu.pipeline_mode<synchronous>, transform_indices = @transform_4, window_bounds = array<i64: 256, 1024>}, {pipeline_mode = #tpu.pipeline_mode<synchronous>, transform_indices = @transform_5, window_bounds = array<i64: 1, 1024>}, {pipeline_mode = #tpu.pipeline_mode<synchronous>, transform_indices = @transform_6, window_bounds = array<i64: 256, 7>}, {pipeline_mode = #tpu.pipeline_mode<synchronous>, transform_indices = @transform_7, window_bounds = array<i64: 1, 7>}, {pipeline_mode = #tpu.pipeline_mode<synchronous>, transform_indices = @transform_8, window_bounds = array<i64: 2, 2, 256>}, {pipeline_mode = #tpu.pipeline_mode<synchronous>, transform_indices = @transform_9, window_bounds = array<i64: 2, 2, 256>}, {transform_indices = @transform_10, window_bounds = array<i64: 1, 2, 7>}, {pipeline_mode = #tpu.pipeline_mode<synchronous>, transform_indices = @transform_11, window_bounds = array<i64: 2, 2, 256>}, {pipeline_mode = #tpu.pipeline_mode<synchronous>, transform_indices = @transform_12, window_bounds = array<i64: 2, 2, 256>}]} {
    %c0_i32 = arith.constant 0 : i32
    %0 = arith.cmpi eq, %arg0, %c0_i32 : i32
    %1 = arith.extui %0 : i1 to i32
    %c0_i32_0 = arith.constant 0 : i32
    %2 = arith.cmpi ne, %1, %c0_i32_0 : i32
    scf.if %2 {
      %c0_47 = arith.constant 0 : index
      %c0_48 = arith.constant 0 : index
      %c0_49 = arith.constant 0 : index
      %104 = vector.load %arg9[%c0_47, %c0_48, %c0_49] : memref<2x2x256xf32, #tpu.memory_space<vmem>>, vector<2x2x256xf32>
      %c0_50 = arith.constant 0 : index
      %c0_51 = arith.constant 0 : index
      %c0_52 = arith.constant 0 : index
      %105 = vector.load %arg12[%c0_50, %c0_51, %c0_52] : memref<2x2x256xf32, #tpu.memory_space<vmem>>, vector<2x2x256xf32>
      tpu.vector_store %arg12[%c0_50, %c0_51, %c0_52], %104 {strides = array<i32>} : memref<2x2x256xf32, #tpu.memory_space<vmem>>, vector<2x2x256xf32>,
      %c0_53 = arith.constant 0 : index
      %c0_54 = arith.constant 0 : index
      %c0_55 = arith.constant 0 : index
      %106 = vector.load %arg10[%c0_53, %c0_54, %c0_55] : memref<2x2x256xf32, #tpu.memory_space<vmem>>, vector<2x2x256xf32>
      %c0_56 = arith.constant 0 : index
      %c0_57 = arith.constant 0 : index
      %c0_58 = arith.constant 0 : index
      %107 = vector.load %arg13[%c0_56, %c0_57, %c0_58] : memref<2x2x256xf32, #tpu.memory_space<vmem>>, vector<2x2x256xf32>
      tpu.vector_store %arg13[%c0_56, %c0_57, %c0_58], %106 {strides = array<i32>} : memref<2x2x256xf32, #tpu.memory_space<vmem>>, vector<2x2x256xf32>,
    } else {
    }
    %c0 = arith.constant 0 : index
    %c0_1 = arith.constant 0 : index
    %c0_2 = arith.constant 0 : index
    %3 = vector.load %arg2[%c0, %c0_1, %c0_2] : memref<1x2x1xf32, #tpu.memory_space<vmem>>, vector<1x2x1xf32>
    %4 = vector.shape_cast %3 : vector<1x2x1xf32> to vector<2x1xf32>
    %c0_3 = arith.constant 0 : index
    %c0_4 = arith.constant 0 : index
    %c0_5 = arith.constant 0 : index
    %5 = vector.load %arg12[%c0_3, %c0_4, %c0_5] : memref<2x2x256xf32, #tpu.memory_space<vmem>>, vector<2x2x256xf32>
    %6 = vector.shape_cast %4 : vector<2x1xf32> to vector<1x2x1xf32>
    %7 = vector.broadcast %6 : vector<1x2x1xf32> to vector<2x2x256xf32>
    %8 = arith.mulf %5, %7 : vector<2x2x256xf32>
    %c0_6 = arith.constant 0 : index
    %c0_7 = arith.constant 0 : index
    %c0_8 = arith.constant 0 : index
    %9 = vector.load %arg13[%c0_6, %c0_7, %c0_8] : memref<2x2x256xf32, #tpu.memory_space<vmem>>, vector<2x2x256xf32>
    %10 = vector.shape_cast %4 : vector<2x1xf32> to vector<1x2x1xf32>
    %11 = vector.broadcast %10 : vector<1x2x1xf32> to vector<2x2x256xf32>
    %12 = arith.mulf %9, %11 : vector<2x2x256xf32>
    %c0_9 = arith.constant 0 : index
    %c0_10 = arith.constant 0 : index
    %c0_11 = arith.constant 0 : index
    %13 = vector.load %arg1[%c0_9, %c0_10, %c0_11] : memref<1x2x1024xf32, #tpu.memory_space<vmem>>, vector<1x2x1024xf32>
    %14 = vector.shape_cast %13 : vector<1x2x1024xf32> to vector<2x1024xf32>
    %15 = vector.extract_strided_slice %8 {offsets = [0, 0, 0], sizes = [1, 2, 256], strides = [1, 1, 1]} : vector<2x2x256xf32> to vector<1x2x256xf32>
    %16 = vector.shape_cast %15 : vector<1x2x256xf32> to vector<2x256xf32>
    %c0_12 = arith.constant 0 : index
    %c0_13 = arith.constant 0 : index
    %17 = vector.load %arg3[%c0_12, %c0_13] : memref<256x1024xf32, #tpu.memory_space<vmem>>, vector<256x1024xf32>
    %cst = arith.constant dense<0.000000e+00> : vector<2x1024xf32>
    %18 = tpu.matmul %16, %17, %cst {dimension_numbers = #tpu.dot_dimension_numbers<[1], [0], [0], [1], [0, 0, 1, 1], [], []>} : vector<2x256xf32>, vector<256x1024xf32>, vector<2x1024xf32> -> vector<2x1024xf32>
    %19 = arith.addf %14, %18 : vector<2x1024xf32>
    %20 = vector.extract_strided_slice %12 {offsets = [0, 0, 0], sizes = [1, 2, 256], strides = [1, 1, 1]} : vector<2x2x256xf32> to vector<1x2x256xf32>
    %21 = vector.shape_cast %20 : vector<1x2x256xf32> to vector<2x256xf32>
    %22 = vector.extract_strided_slice %19 {offsets = [0, 0], sizes = [2, 256], strides = [1, 1]} : vector<2x1024xf32> to vector<2x256xf32>
    %23 = arith.negf %22 : vector<2x256xf32>
    %24 = math.exp %23 : vector<2x256xf32>
    %cst_14 = arith.constant 1.000000e+00 : f32
    %25 = vector.broadcast %cst_14 : f32 to vector<2x256xf32>
    %26 = arith.addf %25, %24 : vector<2x256xf32>
    %27 = arith.divf %25, %26 : vector<2x256xf32>
    %28 = vector.extract_strided_slice %19 {offsets = [0, 256], sizes = [2, 256], strides = [1, 1]} : vector<2x1024xf32> to vector<2x256xf32>
    %29 = arith.negf %28 : vector<2x256xf32>
    %30 = math.exp %29 : vector<2x256xf32>
    %cst_15 = arith.constant 1.000000e+00 : f32
    %31 = vector.broadcast %cst_15 : f32 to vector<2x256xf32>
    %32 = arith.addf %31, %30 : vector<2x256xf32>
    %33 = arith.divf %31, %32 : vector<2x256xf32>
    %34 = vector.extract_strided_slice %19 {offsets = [0, 512], sizes = [2, 256], strides = [1, 1]} : vector<2x1024xf32> to vector<2x256xf32>
    %35 = math.tanh %34 : vector<2x256xf32>
    %36 = vector.extract_strided_slice %19 {offsets = [0, 768], sizes = [2, 256], strides = [1, 1]} : vector<2x1024xf32> to vector<2x256xf32>
    %37 = arith.negf %36 : vector<2x256xf32>
    %38 = math.exp %37 : vector<2x256xf32>
    %cst_16 = arith.constant 1.000000e+00 : f32
    %39 = vector.broadcast %cst_16 : f32 to vector<2x256xf32>
    %40 = arith.addf %39, %38 : vector<2x256xf32>
    %41 = arith.divf %39, %40 : vector<2x256xf32>
    %42 = arith.mulf %33, %21 : vector<2x256xf32>
    %43 = arith.mulf %27, %35 : vector<2x256xf32>
    %44 = arith.addf %42, %43 : vector<2x256xf32>
    %45 = math.tanh %44 : vector<2x256xf32>
    %46 = arith.mulf %41, %45 : vector<2x256xf32>
    %c0_17 = arith.constant 0 : index
    %c0_18 = arith.constant 0 : index
    %47 = vector.load %arg4[%c0_17, %c0_18] : memref<256x1024xf32, #tpu.memory_space<vmem>>, vector<256x1024xf32>
    %cst_19 = arith.constant dense<0.000000e+00> : vector<2x1024xf32>
    %48 = tpu.matmul %46, %47, %cst_19 {dimension_numbers = #tpu.dot_dimension_numbers<[1], [0], [0], [1], [0, 0, 1, 1], [], []>} : vector<2x256xf32>, vector<256x1024xf32>, vector<2x1024xf32> -> vector<2x1024xf32>
    %49 = vector.extract_strided_slice %8 {offsets = [1, 0, 0], sizes = [1, 2, 256], strides = [1, 1, 1]} : vector<2x2x256xf32> to vector<1x2x256xf32>
    %50 = vector.shape_cast %49 : vector<1x2x256xf32> to vector<2x256xf32>
    %c0_20 = arith.constant 0 : index
    %c0_21 = arith.constant 0 : index
    %51 = vector.load %arg5[%c0_20, %c0_21] : memref<256x1024xf32, #tpu.memory_space<vmem>>, vector<256x1024xf32>
    %cst_22 = arith.constant dense<0.000000e+00> : vector<2x1024xf32>
    %52 = tpu.matmul %50, %51, %cst_22 {dimension_numbers = #tpu.dot_dimension_numbers<[1], [0], [0], [1], [0, 0, 1, 1], [], []>} : vector<2x256xf32>, vector<256x1024xf32>, vector<2x1024xf32> -> vector<2x1024xf32>
    %53 = arith.addf %48, %52 : vector<2x1024xf32>
    %c0_23 = arith.constant 0 : index
    %c0_24 = arith.constant 0 : index
    %54 = vector.load %arg6[%c0_23, %c0_24] : memref<1x1024xf32, #tpu.memory_space<vmem>>, vector<1x1024xf32>
    %55 = vector.broadcast %54 : vector<1x1024xf32> to vector<2x1024xf32>
    %56 = arith.addf %53, %55 : vector<2x1024xf32>
    %57 = vector.extract_strided_slice %12 {offsets = [1, 0, 0], sizes = [1, 2, 256], strides = [1, 1, 1]} : vector<2x2x256xf32> to vector<1x2x256xf32>
    %58 = vector.shape_cast %57 : vector<1x2x256xf32> to vector<2x256xf32>
    %59 = vector.extract_strided_slice %56 {offsets = [0, 0], sizes = [2, 256], strides = [1, 1]} : vector<2x1024xf32> to vector<2x256xf32>
    %60 = arith.negf %59 : vector<2x256xf32>
    %61 = math.exp %60 : vector<2x256xf32>
    %cst_25 = arith.constant 1.000000e+00 : f32
    %62 = vector.broadcast %cst_25 : f32 to vector<2x256xf32>
    %63 = arith.addf %62, %61 : vector<2x256xf32>
    %64 = arith.divf %62, %63 : vector<2x256xf32>
    %65 = vector.extract_strided_slice %56 {offsets = [0, 256], sizes = [2, 256], strides = [1, 1]} : vector<2x1024xf32> to vector<2x256xf32>
    %66 = arith.negf %65 : vector<2x256xf32>
    %67 = math.exp %66 : vector<2x256xf32>
    %cst_26 = arith.constant 1.000000e+00 : f32
    %68 = vector.broadcast %cst_26 : f32 to vector<2x256xf32>
    %69 = arith.addf %68, %67 : vector<2x256xf32>
    %70 = arith.divf %68, %69 : vector<2x256xf32>
    %71 = vector.extract_strided_slice %56 {offsets = [0, 512], sizes = [2, 256], strides = [1, 1]} : vector<2x1024xf32> to vector<2x256xf32>
    %72 = math.tanh %71 : vector<2x256xf32>
    %73 = vector.extract_strided_slice %56 {offsets = [0, 768], sizes = [2, 256], strides = [1, 1]} : vector<2x1024xf32> to vector<2x256xf32>
    %74 = arith.negf %73 : vector<2x256xf32>
    %75 = math.exp %74 : vector<2x256xf32>
    %cst_27 = arith.constant 1.000000e+00 : f32
    %76 = vector.broadcast %cst_27 : f32 to vector<2x256xf32>
    %77 = arith.addf %76, %75 : vector<2x256xf32>
    %78 = arith.divf %76, %77 : vector<2x256xf32>
    %79 = arith.mulf %70, %58 : vector<2x256xf32>
    %80 = arith.mulf %64, %72 : vector<2x256xf32>
    %81 = arith.addf %79, %80 : vector<2x256xf32>
    %82 = math.tanh %81 : vector<2x256xf32>
    %83 = arith.mulf %78, %82 : vector<2x256xf32>
    %c0_28 = arith.constant 0 : index
    %c0_29 = arith.constant 0 : index
    %84 = vector.load %arg7[%c0_28, %c0_29] : memref<256x7xf32, #tpu.memory_space<vmem>>, vector<256x7xf32>
    %cst_30 = arith.constant dense<0.000000e+00> : vector<2x7xf32>
    %85 = tpu.matmul %83, %84, %cst_30 {dimension_numbers = #tpu.dot_dimension_numbers<[1], [0], [0], [1], [0, 0, 1, 1], [], []>} : vector<2x256xf32>, vector<256x7xf32>, vector<2x7xf32> -> vector<2x7xf32>
    %c0_31 = arith.constant 0 : index
    %c0_32 = arith.constant 0 : index
    %86 = vector.load %arg8[%c0_31, %c0_32] : memref<1x7xf32, #tpu.memory_space<vmem>>, vector<1x7xf32>
    %87 = vector.broadcast %86 : vector<1x7xf32> to vector<2x7xf32>
    %88 = arith.addf %85, %87 : vector<2x7xf32>
    %c0_33 = arith.constant 0 : index
    %c0_34 = arith.constant 0 : index
    %c0_35 = arith.constant 0 : index
    %89 = vector.load %arg11[%c0_33, %c0_34, %c0_35] : memref<1x2x7xf32, #tpu.memory_space<vmem>>, vector<1x2x7xf32>
    %90 = vector.shape_cast %89 : vector<1x2x7xf32> to vector<2x7xf32>
    %91 = vector.shape_cast %88 : vector<2x7xf32> to vector<1x2x7xf32>
    tpu.vector_store %arg11[%c0_33, %c0_34, %c0_35], %91 {strides = array<i32>} : memref<1x2x7xf32, #tpu.memory_space<vmem>>, vector<1x2x7xf32>,
    %c0_36 = arith.constant 0 : index
    %c0_37 = arith.constant 0 : index
    %c0_38 = arith.constant 0 : index
    %92 = vector.load %arg12[%c0_36, %c0_37, %c0_38] : memref<2x2x256xf32, #tpu.memory_space<vmem>>, vector<1x2x256xf32>
    %93 = vector.shape_cast %92 : vector<1x2x256xf32> to vector<2x256xf32>
    %94 = vector.shape_cast %46 : vector<2x256xf32> to vector<1x2x256xf32>
    tpu.vector_store %arg12[%c0_36, %c0_37, %c0_38], %94 {strides = array<i32>} : memref<2x2x256xf32, #tpu.memory_space<vmem>>, vector<1x2x256xf32>,
    %c1 = arith.constant 1 : index
    %c0_39 = arith.constant 0 : index
    %c0_40 = arith.constant 0 : index
    %95 = vector.load %arg12[%c1, %c0_39, %c0_40] : memref<2x2x256xf32, #tpu.memory_space<vmem>>, vector<1x2x256xf32>
    %96 = vector.shape_cast %95 : vector<1x2x256xf32> to vector<2x256xf32>
    %97 = vector.shape_cast %83 : vector<2x256xf32> to vector<1x2x256xf32>
    tpu.vector_store %arg12[%c1, %c0_39, %c0_40], %97 {strides = array<i32>} : memref<2x2x256xf32, #tpu.memory_space<vmem>>, vector<1x2x256xf32>,
    %c0_41 = arith.constant 0 : index
    %c0_42 = arith.constant 0 : index
    %c0_43 = arith.constant 0 : index
    %98 = vector.load %arg13[%c0_41, %c0_42, %c0_43] : memref<2x2x256xf32, #tpu.memory_space<vmem>>, vector<1x2x256xf32>
    %99 = vector.shape_cast %98 : vector<1x2x256xf32> to vector<2x256xf32>
    %100 = vector.shape_cast %44 : vector<2x256xf32> to vector<1x2x256xf32>
    tpu.vector_store %arg13[%c0_41, %c0_42, %c0_43], %100 {strides = array<i32>} : memref<2x2x256xf32, #tpu.memory_space<vmem>>, vector<1x2x256xf32>,
    %c1_44 = arith.constant 1 : index
    %c0_45 = arith.constant 0 : index
    %c0_46 = arith.constant 0 : index
    %101 = vector.load %arg13[%c1_44, %c0_45, %c0_46] : memref<2x2x256xf32, #tpu.memory_space<vmem>>, vector<1x2x256xf32>
    %102 = vector.shape_cast %101 : vector<1x2x256xf32> to vector<2x256xf32>
    %103 = vector.shape_cast %81 : vector<2x256xf32> to vector<1x2x256xf32>
    tpu.vector_store %arg13[%c1_44, %c0_45, %c0_46], %103 {strides = array<i32>} : memref<2x2x256xf32, #tpu.memory_space<vmem>>, vector<1x2x256xf32>,
    return
  }
  func.func @transform_0(%arg0: i32) -> (i32, i32, i32) {
    %c0_i32 = arith.constant 0 : i32
    %c0_i32_0 = arith.constant 0 : i32
    %c0_i32_1 = arith.constant 0 : i32
    return %arg0, %c0_i32, %c0_i32_0 : i32, i32, i32
  }
  func.func @transform_1(%arg0: i32) -> (i32, i32, i32) {
    %c0_i32 = arith.constant 0 : i32
    %c0_i32_0 = arith.constant 0 : i32
    %c0_i32_1 = arith.constant 0 : i32
    return %arg0, %c0_i32, %c0_i32_0 : i32, i32, i32
  }
  func.func @transform_2(%arg0: i32) -> (i32, i32) {
    %c0_i32 = arith.constant 0 : i32
    %c0_i32_0 = arith.constant 0 : i32
    %c0_i32_1 = arith.constant 0 : i32
    return %c0_i32, %c0_i32_0 : i32, i32
  }
  func.func @transform_3(%arg0: i32) -> (i32, i32) {
    %c0_i32 = arith.constant 0 : i32
    %c0_i32_0 = arith.constant 0 : i32
    %c0_i32_1 = arith.constant 0 : i32
    return %c0_i32, %c0_i32_0 : i32, i32
  }
  func.func @transform_4(%arg0: i32) -> (i32, i32) {
    %c0_i32 = arith.constant 0 : i32
    %c0_i32_0 = arith.constant 0 : i32
    %c0_i32_1 = arith.constant 0 : i32
    return %c0_i32, %c0_i32_0 : i32, i32
  }
  func.func @transform_5(%arg0: i32) -> (i32, i32) {
    %c0_i32 = arith.constant 0 : i32
    %c0_i32_0 = arith.constant 0 : i32
    %c0_i32_1 = arith.constant 0 : i32
    return %c0_i32, %c0_i32_0 : i32, i32
  }
  func.func @transform_6(%arg0: i32) -> (i32, i32) {
    %c0_i32 = arith.constant 0 : i32
    %c0_i32_0 = arith.constant 0 : i32
    %c0_i32_1 = arith.constant 0 : i32
    return %c0_i32, %c0_i32_0 : i32, i32
  }
  func.func @transform_7(%arg0: i32) -> (i32, i32) {
    %c0_i32 = arith.constant 0 : i32
    %c0_i32_0 = arith.constant 0 : i32
    %c0_i32_1 = arith.constant 0 : i32
    return %c0_i32, %c0_i32_0 : i32, i32
  }
  func.func @transform_8(%arg0: i32) -> (i32, i32, i32) {
    %c0_i32 = arith.constant 0 : i32
    %c0_i32_0 = arith.constant 0 : i32
    %c0_i32_1 = arith.constant 0 : i32
    %c0_i32_2 = arith.constant 0 : i32
    return %c0_i32, %c0_i32_0, %c0_i32_1 : i32, i32, i32
  }
  func.func @transform_9(%arg0: i32) -> (i32, i32, i32) {
    %c0_i32 = arith.constant 0 : i32
    %c0_i32_0 = arith.constant 0 : i32
    %c0_i32_1 = arith.constant 0 : i32
    %c0_i32_2 = arith.constant 0 : i32
    return %c0_i32, %c0_i32_0, %c0_i32_1 : i32, i32, i32
  }
  func.func @transform_10(%arg0: i32) -> (i32, i32, i32) {
    %c0_i32 = arith.constant 0 : i32
    %c0_i32_0 = arith.constant 0 : i32
    %c0_i32_1 = arith.constant 0 : i32
    return %arg0, %c0_i32, %c0_i32_0 : i32, i32, i32
  }
  func.func @transform_11(%arg0: i32) -> (i32, i32, i32) {
    %c0_i32 = arith.constant 0 : i32
    %c0_i32_0 = arith.constant 0 : i32
    %c0_i32_1 = arith.constant 0 : i32
    %c0_i32_2 = arith.constant 0 : i32
    return %c0_i32, %c0_i32_0, %c0_i32_1 : i32, i32, i32
  }
  func.func @transform_12(%arg0: i32) -> (i32, i32, i32) {
    %c0_i32 = arith.constant 0 : i32
    %c0_i32_0 = arith.constant 0 : i32
    %c0_i32_1 = arith.constant 0 : i32
    %c0_i32_2 = arith.constant 0 : i32
    return %c0_i32, %c0_i32_0, %c0_i32_1 : i32, i32, i32
  }
}

</mosaic_0001>

<bundles_post_ra>
// kernel: policy_net_forward.5
= control target key start
LH: loop header
LB: loop body
LE: loop exit
PB: predicated region body
PF: predicated region fallthrough
CT: control target
= control target key end

     0   :  { %vm283_vm0 = vcmask 1043456   ;;  %vm90_vm1 = vcmask 293888   ;;  %vm1056_vm2 = vcmask 261120   ;;  %s2616_s1 = inlined_call_operand.vmem [shape: f32[36,32], index: 1, kind: input, shape index: {}]   ;;  %s2617_s0 = inlined_call_operand.vmem [shape: f32[512,36], index: 0, kind: input, shape index: {}]   ;;  %s2618_s2 = inlined_call_operand.vmem [shape: f32[1,32], index: 2, kind: input, shape index: {}]   ;;  %s2619_s3 = inlined_call_operand.vmem [shape: f32[512,32], index: 3, kind: output, shape index: {}]  }
   0x1   :  { %v82_v0 = vld [vmem:[%s2616_s1 + $0x20] sm:$0xf]  ;;  %v81_v1 = vld [vmem:[%s2616_s1 + $0x18] sm:$0xff]  ;;  %v80_v2 = vld [vmem:[%s2616_s1 + $0x10] sm:$0xff] }
   0x2   :  { %1324 = vmatprep.subr.msk.mxu0 %vm283_vm0, %v82_v0  ;;  %1430 = vmatprep.subr.msk.mxu1 %vm283_vm0, %v82_v0  ;;  %v79_v3 = vld [vmem:[%s2616_s1 + $0x8] sm:$0xff]  ;;  %v78_v4 = vld [vmem:[%s2616_s1] sm:$0xff]  ;;  %v16_v9 = vld [vmem:[%s2617_s0 + $0x10] sm:$0xff] }
   0x3   :  { %1325 = vmatpush3.msk.msra.mxu0 %vm283_vm0, %v82_v0  ;;  %1435 = vmatpush3.msk.msra.mxu1 %vm283_vm0, %v82_v0  ;;  %v14_v5 = vld [vmem:[%s2617_s0] sm:$0xff]  ;;  %v15_v7 = vld [vmem:[%s2617_s0 + $0x8] sm:$0xff]  ;;  %v48_v10 = vld [vmem:[%s2617_s0 + $0x110] sm:$0xff] }
   0x4   :  { %1326 = vmatprep.subr.mxu0 %v81_v1  ;;  %1431 = vmatprep.subr.mxu1 %v81_v1  ;;  %v46_v6 = vld [vmem:[%s2617_s0 + $0x100] sm:$0xff]  ;;  %v47_v8 = vld [vmem:[%s2617_s0 + $0x108] sm:$0xff]  ;;  %v17_v11 = vld [vmem:[%s2617_s0 + $0x18] sm:$0xff] }
   0x5   :  { %1327 = vmatpush3.msra.mxu0 %v81_v1  ;;  %1436 = vmatpush3.msra.mxu1 %v81_v1  ;;  %v49_v12 = vld [vmem:[%s2617_s0 + $0x118] sm:$0xff]  ;;  %v18_v13 = vld [vmem:[%s2617_s0 + $0x20] sm:$0xff]  ;;  %v19_v15 = vld [vmem:[%s2617_s0 + $0x28] sm:$0xff] }
   0x6   :  { %1328 = vmatprep.subr.mxu0 %v80_v2  ;;  %1432 = vmatprep.subr.mxu1 %v80_v2  ;;  %v50_v14 = vld [vmem:[%s2617_s0 + $0x120] sm:$0xff]  ;;  %v51_v16 = vld [vmem:[%s2617_s0 + $0x128] sm:$0xff]  ;;  %v20_v17 = vld [vmem:[%s2617_s0 + $0x30] sm:$0xff] }
   0x7   :  { %1329 = vmatpush3.msra.mxu0 %v80_v2  ;;  %1437 = vmatpush3.msra.mxu1 %v80_v2  ;;  %v52_v18 = vld [vmem:[%s2617_s0 + $0x130] sm:$0xff]  ;;  %v21_v19 = vld [vmem:[%s2617_s0 + $0x38] sm:$0xff]  ;;  %v22_v21 = vld [vmem:[%s2617_s0 + $0x40] sm:$0xff] }
   0x8   :  { %1330 = vmatprep.subr.mxu0 %v79_v3  ;;  %1433 = vmatprep.subr.mxu1 %v79_v3  ;;  %v53_v20 = vld [vmem:[%s2617_s0 + $0x138] sm:$0xff]  ;;  %v54_v22 = vld [vmem:[%s2617_s0 + $0x140] sm:$0xff]  ;;  %v23_v23 = vld [vmem:[%s2617_s0 + $0x48] sm:$0xff] }
   0x9   :  { %1331 = vmatpush3.msra.mxu0 %v79_v3  ;;  %1438 = vmatpush3.msra.mxu1 %v79_v3  ;;  %v55_v24 = vld [vmem:[%s2617_s0 + $0x148] sm:$0xff]  ;;  %v24_v25 = vld [vmem:[%s2617_s0 + $0x50] sm:$0xff]  ;;  %v25_v27 = vld [vmem:[%s2617_s0 + $0x58] sm:$0xff] }
   0xa   :  { %1332 = vmatprep.subr.mxu0 %v78_v4  ;;  %1434 = vmatprep.subr.mxu1 %v78_v4  ;;  %v56_v26 = vld [vmem:[%s2617_s0 + $0x150] sm:$0xff]  ;;  %v57_v28 = vld [vmem:[%s2617_s0 + $0x158] sm:$0xff]  ;;  %v26_v29 = vld [vmem:[%s2617_s0 + $0x60] sm:$0xff] }
   0xb   :  { %1333 = vmatpush3.msra.mxu0 %v78_v4  ;;  %1439 = vmatpush3.msra.mxu1 %v78_v4  ;;  %v58_v30 = vld [vmem:[%s2617_s0 + $0x160] sm:$0xff]  ;;  %v27_v31 = vld [vmem:[%s2617_s0 + $0x68] sm:$0xff]  ;;  %v28_v33 = vld [vmem:[%s2617_s0 + $0x70] sm:$0xff] }
   0xc   :  { %1334 = vmatprep.mubr.msk.f32.mxu0 %vm90_vm1, %v14_v5  ;;  %1382 = vmatprep.mubr.msk.f32.mxu1 %vm90_vm1, %v46_v6  ;;  %v59_v32 = vld [vmem:[%s2617_s0 + $0x168] sm:$0xff]  ;;  %v60_v34 = vld [vmem:[%s2617_s0 + $0x170] sm:$0xff]  ;;  %v29_v35 = vld [vmem:[%s2617_s0 + $0x78] sm:$0xff] }
   0xd   :  { %1335 = vmatmul.mubr.msk.f32.vlgmr.msra.gmra.mxu0 %vm90_vm1, %v15_v7  ;;  %1383 = vmatmul.mubr.msk.f32.vlgmr.msra.gmra.mxu1 %vm90_vm1, %v47_v8  ;;  %v61_v36 = vld [vmem:[%s2617_s0 + $0x178] sm:$0xff]  ;;  %v30_v37 = vld [vmem:[%s2617_s0 + $0x80] sm:$0xff]  ;;  %v31_v39 = vld [vmem:[%s2617_s0 + $0x88] sm:$0xff] }
   0xe   :  { %1337 = vmatprep.mubr.msk.f32.mxu0 %vm90_vm1, %v16_v9  ;;  %1385 = vmatprep.mubr.msk.f32.mxu1 %vm90_vm1, %v48_v10  ;;  %v62_v38 = vld [vmem:[%s2617_s0 + $0x180] sm:$0xff]  ;;  %v63_v40 = vld [vmem:[%s2617_s0 + $0x188] sm:$0xff]  ;;  %v32_v41 = vld [vmem:[%s2617_s0 + $0x90] sm:$0xff] }
   0xf   :  { %v64_v42 = vld [vmem:[%s2617_s0 + $0x190] sm:$0xff]  ;;  %v33_v43 = vld [vmem:[%s2617_s0 + $0x98] sm:$0xff]  ;;  %v34_v45 = vld [vmem:[%s2617_s0 + $0xa0] sm:$0xff] }
  0x10   :  { %v65_v44 = vld [vmem:[%s2617_s0 + $0x198] sm:$0xff]  ;;  %v66_v46 = vld [vmem:[%s2617_s0 + $0x1a0] sm:$0xff]  ;;  %v35_v47 = vld [vmem:[%s2617_s0 + $0xa8] sm:$0xff] }
  0x11   :  { %1338 = vmatmul.mubr.msk.f32.gmra.mxu0 %vm90_vm1, %v17_v11  ;;  %1386 = vmatmul.mubr.msk.f32.gmra.mxu1 %vm90_vm1, %v49_v12  ;;  %v67_v48 = vld [vmem:[%s2617_s0 + $0x1a8] sm:$0xff]  ;;  %v36_v49 = vld [vmem:[%s2617_s0 + $0xb0] sm:$0xff]  ;;  %v37_v51 = vld [vmem:[%s2617_s0 + $0xb8] sm:$0xff] }
  0x12   :  { %1340 = vmatprep.mubr.msk.f32.mxu0 %vm90_vm1, %v18_v13  ;;  %1388 = vmatprep.mubr.msk.f32.mxu1 %vm90_vm1, %v50_v14  ;;  %v68_v50 = vld [vmem:[%s2617_s0 + $0x1b0] sm:$0xff]  ;;  %v69_v52 = vld [vmem:[%s2617_s0 + $0x1b8] sm:$0xff]  ;;  %v38_v53 = vld [vmem:[%s2617_s0 + $0xc0] sm:$0xff] }
  0x13   :  { %v70_v54 = vld [vmem:[%s2617_s0 + $0x1c0] sm:$0xff]  ;;  %v39_v55 = vld [vmem:[%s2617_s0 + $0xc8] sm:$0xff]  ;;  %v40_v57 = vld [vmem:[%s2617_s0 + $0xd0] sm:$0xff] }
  0x14   :  { %v71_v56 = vld [vmem:[%s2617_s0 + $0x1c8] sm:$0xff]  ;;  %v72_v58 = vld [vmem:[%s2617_s0 + $0x1d0] sm:$0xff]  ;;  %v41_v59 = vld [vmem:[%s2617_s0 + $0xd8] sm:$0xff] }
  0x15   :  { %1341 = vmatmul.mubr.msk.f32.gmra.mxu0 %vm90_vm1, %v19_v15  ;;  %1389 = vmatmul.mubr.msk.f32.gmra.mxu1 %vm90_vm1, %v51_v16  ;;  %v73_v60 = vld [vmem:[%s2617_s0 + $0x1d8] sm:$0xff]  ;;  %v42_v61 = vld [vmem:[%s2617_s0 + $0xe0] sm:$0xff]  ;;  %v43_v63 = vld [vmem:[%s2617_s0 + $0xe8] sm:$0xff] }
  0x16   :  { %1343 = vmatprep.mubr.msk.f32.mxu0 %vm90_vm1, %v20_v17  ;;  %1391 = vmatprep.mubr.msk.f32.mxu1 %vm90_vm1, %v52_v18  ;;  %v74_v62 = vld [vmem:[%s2617_s0 + $0x1e0] sm:$0xff]  ;;  %v75_v0 = vld [vmem:[%s2617_s0 + $0x1e8] sm:$0xff]  ;;  %v44_v1 = vld [vmem:[%s2617_s0 + $0xf0] sm:$0xff] }
  0x17   :  { %v76_v2 = vld [vmem:[%s2617_s0 + $0x1f0] sm:$0xff]  ;;  %v45_v3 = vld [vmem:[%s2617_s0 + $0xf8] sm:$0xff]  ;;  %v1863_v5 = vld [vmem:[%s2618_s2] ss:$0 sm:$0xff] }
  0x18   :  { %v77_v4 = vld [vmem:[%s2617_s0 + $0x1f8] sm:$0xff] }
  0x19   :  { %1344 = vmatmul.mubr.msk.f32.gmra.mxu0 %vm90_vm1, %v21_v19  ;;  %1392 = vmatmul.mubr.msk.f32.gmra.mxu1 %vm90_vm1, %v53_v20 }
  0x1a   :  { %1346 = vmatprep.mubr.msk.f32.mxu0 %vm90_vm1, %v22_v21  ;;  %1394 = vmatprep.mubr.msk.f32.mxu1 %vm90_vm1, %v54_v22 }
  0x1d   :  { %1347 = vmatmul.mubr.msk.f32.gmra.mxu0 %vm90_vm1, %v23_v23  ;;  %1395 = vmatmul.mubr.msk.f32.gmra.mxu1 %vm90_vm1, %v55_v24 }
  0x1e   :  { %1349 = vmatprep.mubr.msk.f32.mxu0 %vm90_vm1, %v24_v25  ;;  %1397 = vmatprep.mubr.msk.f32.mxu1 %vm90_vm1, %v56_v26 }
  0x21   :  { %1350 = vmatmul.mubr.msk.f32.gmra.mxu0 %vm90_vm1, %v25_v27  ;;  %1398 = vmatmul.mubr.msk.f32.gmra.mxu1 %vm90_vm1, %v57_v28 }
  0x22   :  { %1352 = vmatprep.mubr.msk.f32.mxu0 %vm90_vm1, %v26_v29  ;;  %1400 = vmatprep.mubr.msk.f32.mxu1 %vm90_vm1, %v58_v30 }
  0x25   :  { %1353 = vmatmul.mubr.msk.f32.gmra.mxu0 %vm90_vm1, %v27_v31  ;;  %1401 = vmatmul.mubr.msk.f32.gmra.mxu1 %vm90_vm1, %v59_v32 }
  0x26   :  { %1355 = vmatprep.mubr.msk.f32.mxu0 %vm90_vm1, %v28_v33  ;;  %1403 = vmatprep.mubr.msk.f32.mxu1 %vm90_vm1, %v60_v34 }
  0x29   :  { %1356 = vmatmul.mubr.msk.f32.gmra.mxu0 %vm90_vm1, %v29_v35  ;;  %1404 = vmatmul.mubr.msk.f32.gmra.mxu1 %vm90_vm1, %v61_v36 }
  0x2a   :  { %1358 = vmatprep.mubr.msk.f32.mxu0 %vm90_vm1, %v30_v37  ;;  %1406 = vmatprep.mubr.msk.f32.mxu1 %vm90_vm1, %v62_v38 }
  0x2d   :  { %1359 = vmatmul.mubr.msk.f32.gmra.mxu0 %vm90_vm1, %v31_v39  ;;  %1407 = vmatmul.mubr.msk.f32.gmra.mxu1 %vm90_vm1, %v63_v40 }
  0x2e   :  { %1361 = vmatprep.mubr.msk.f32.mxu0 %vm90_vm1, %v32_v41  ;;  %1409 = vmatprep.mubr.msk.f32.mxu1 %vm90_vm1, %v64_v42 }
  0x31   :  { %1362 = vmatmul.mubr.msk.f32.gmra.mxu0 %vm90_vm1, %v33_v43  ;;  %1410 = vmatmul.mubr.msk.f32.gmra.mxu1 %vm90_vm1, %v65_v44 }
  0x32   :  { %1364 = vmatprep.mubr.msk.f32.mxu0 %vm90_vm1, %v34_v45  ;;  %1412 = vmatprep.mubr.msk.f32.mxu1 %vm90_vm1, %v66_v46 }
  0x35   :  { %1365 = vmatmul.mubr.msk.f32.gmra.mxu0 %vm90_vm1, %v35_v47  ;;  %1413 = vmatmul.mubr.msk.f32.gmra.mxu1 %vm90_vm1, %v67_v48 }
  0x36   :  { %1367 = vmatprep.mubr.msk.f32.mxu0 %vm90_vm1, %v36_v49  ;;  %1415 = vmatprep.mubr.msk.f32.mxu1 %vm90_vm1, %v68_v50 }
  0x39   :  { %1368 = vmatmul.mubr.msk.f32.gmra.mxu0 %vm90_vm1, %v37_v51  ;;  %1416 = vmatmul.mubr.msk.f32.gmra.mxu1 %vm90_vm1, %v69_v52 }
  0x3a   :  { %1370 = vmatprep.mubr.msk.f32.mxu0 %vm90_vm1, %v38_v53  ;;  %1418 = vmatprep.mubr.msk.f32.mxu1 %vm90_vm1, %v70_v54 }
  0x3d   :  { %1371 = vmatmul.mubr.msk.f32.gmra.mxu0 %vm90_vm1, %v39_v55  ;;  %1419 = vmatmul.mubr.msk.f32.gmra.mxu1 %vm90_vm1, %v71_v56 }
  0x3e   :  { %1373 = vmatprep.mubr.msk.f32.mxu0 %vm90_vm1, %v40_v57  ;;  %1421 = vmatprep.mubr.msk.f32.mxu1 %vm90_vm1, %v72_v58 }
  0x41   :  { %1374 = vmatmul.mubr.msk.f32.gmra.mxu0 %vm90_vm1, %v41_v59  ;;  %1422 = vmatmul.mubr.msk.f32.gmra.mxu1 %vm90_vm1, %v73_v60 }
  0x42   :  { %1376 = vmatprep.mubr.msk.f32.mxu0 %vm90_vm1, %v42_v61  ;;  %1424 = vmatprep.mubr.msk.f32.mxu1 %vm90_vm1, %v74_v62 }
  0x45   :  { %1377 = vmatmul.mubr.msk.f32.gmra.mxu0 %vm90_vm1, %v43_v63  ;;  %1425 = vmatmul.mubr.msk.f32.gmra.mxu1 %vm90_vm1, %v75_v0 }
  0x46   :  { %1379 = vmatprep.mubr.msk.f32.mxu0 %vm90_vm1, %v44_v1  ;;  %1427 = vmatprep.mubr.msk.f32.mxu1 %vm90_vm1, %v76_v2 }
  0x49   :  { %1380 = vmatmul.mubr.msk.f32.gmra.mxu0 %vm90_vm1, %v45_v3  ;;  %1428 = vmatmul.mubr.msk.f32.gmra.mxu1 %vm90_vm1, %v77_v4 }
  0xcd   :  { %v1336_v6 = vpop.f32.mrf.mxu0  ;;  %v1384_v7 = vpop.f32.mrf.mxu1 }
  0xce   :  { %v1866_v8 = vadd.f32 %v1336_v6, %v1863_v5  ;;  %v1869_v9 = vadd.f32 %v1384_v7, %v1863_v5 }
  0xcf   :  { %v353_v10 = vpop.f32.mrf.mxu0  ;;  %v513_v11 = vpop.f32.mrf.mxu1 }
  0xd0   :  { %v737_v12 = vmin.f32 %v1866_v8, 0.0  ;;  %v769_v13 = vmin.f32 %v1869_v9, 0.0  ;;  %v1874_v14 = vadd.f32 %v1863_v5, %v353_v10  ;;  %v1877_v15 = vadd.f32 %v1863_v5, %v513_v11 }
  0xd1   :  { %v1339_v16 = vpop.f32.mrf.mxu0  ;;  %v1387_v17 = vpop.f32.mrf.mxu1  ;;  %vm673_vm3 = vcmp.gt.f32.partialorder %v1866_v8, 0.0  ;;  %vm705_vm4 = vcmp.gt.f32.partialorder %v1869_v9, 0.0 }
  0xd2   :  { %v802_v18 = vmul.f32 1.442695, %v737_v12  ;;  %v866_v19 = vmul.f32 1.442695, %v769_v13  ;;  %v1880_v20 = vadd.f32 %v1339_v16, %v1863_v5  ;;  %v1883_v21 = vadd.f32 %v1387_v17, %v1863_v5 }
  0xd3   :  { %v736_v22 = vmin.f32 %v1874_v14, 0.0  ;;  %v768_v23 = vmin.f32 %v1877_v15, 0.0  ;;  %v363_v24 = vpop.f32.mrf.mxu0  ;;  %v523_v25 = vpop.f32.mrf.mxu1  ;;  %vm672_vm5 = vcmp.gt.f32.partialorder %v1874_v14, 0.0  ;;  %vm704_vm6 = vcmp.gt.f32.partialorder %v1877_v15, 0.0 }
  0xd4   :  { %1440 = vpow2.f32 %v802_v18  ;;  %v739_v26 = vmin.f32 %v1880_v20, 0.0  ;;  %v771_v29 = vmin.f32 %v1883_v21, 0.0  ;;  %v1890_v33 = vadd.f32 %v1863_v5, %v363_v24 }
  0xd5   :  { %1442 = vpow2.f32 %v866_v19  ;;  %v800_v27 = vmul.f32 1.442695, %v736_v22  ;;  %v864_v28 = vmul.f32 1.442695, %v768_v23  ;;  %v1342_v30 = vpop.f32.mrf.mxu0  ;;  %v1390_v31 = vpop.f32.mrf.mxu1  ;;  %v1893_v34 = vadd.f32 %v1863_v5, %v523_v25 }
  0xd6   :  { %v806_v32 = vmul.f32 1.442695, %v739_v26  ;;  %v1896_v35 = vadd.f32 %v1342_v30, %v1863_v5  ;;  %v870_v36 = vmul.f32 1.442695, %v771_v29  ;;  %v1899_v37 = vadd.f32 %v1390_v31, %v1863_v5 }
  0xd7   :  { %1444 = vpow2.f32 %v800_v27  ;;  %v373_v38 = vpop.f32.mrf.mxu0  ;;  %v533_v39 = vpop.f32.mrf.mxu1  ;;  %v738_v40 = vmin.f32 %v1890_v33, 0.0  ;;  %v770_v41 = vmin.f32 %v1893_v34, 0.0  ;;  %vm675_vm7 = vcmp.gt.f32.partialorder %v1880_v20, 0.0 }
  0xd8   :  { %1446 = vpow2.f32 %v864_v28  ;;  %v741_v42 = vmin.f32 %v1896_v35, 0.0  ;;  %v773_v46 = vmin.f32 %v1899_v37, 0.0  ;;  %v1906_v49 = vadd.f32 %v1863_v5, %v373_v38 }
  0xd9   :  { %1448 = vpow2.f32 %v806_v32  ;;  %v1345_v43 = vpop.f32.mrf.mxu0  ;;  %v1393_v44 = vpop.f32.mrf.mxu1  ;;  %v804_v45 = vmul.f32 1.442695, %v738_v40  ;;  %v868_v47 = vmul.f32 1.442695, %v770_v41  ;;  %v1909_v50 = vadd.f32 %v1863_v5, %v533_v39 }
  0xda   :  { %1450 = vpow2.f32 %v870_v36  ;;  %v810_v48 = vmul.f32 1.442695, %v741_v42  ;;  %v874_v53 = vmul.f32 1.442695, %v773_v46  ;;  %v1912_v54 = vadd.f32 %v1345_v43, %v1863_v5 }
  0xdb   :  { %v383_v51 = vpop.f32.mrf.mxu0  ;;  %v543_v52 = vpop.f32.mrf.mxu1  ;;  %1452 = vpow2.f32 %v804_v45  ;;  %v1915_v55 = vadd.f32 %v1393_v44, %v1863_v5  ;;  %v740_v56 = vmin.f32 %v1906_v49, 0.0  ;;  %v772_v59 = vmin.f32 %v1909_v50, 0.0 }
  0xdc   :  { %1454 = vpow2.f32 %v868_v47  ;;  %v743_v60 = vmin.f32 %v1912_v54, 0.0  ;;  %v1927_v3 = vadd.f32 %v1863_v5, %v383_v51  ;;  %v1930_v4 = vadd.f32 %v1863_v5, %v543_v52 }
  0xdd   :  { %v1348_v57 = vpop.f32.mrf.mxu0  ;;  %v1396_v58 = vpop.f32.mrf.mxu1  ;;  %1456 = vpow2.f32 %v810_v48  ;;  %v808_v61 = vmul.f32 1.442695, %v740_v56  ;;  %v775_v62 = vmin.f32 %v1915_v55, 0.0  ;;  %v872_v1 = vmul.f32 1.442695, %v772_v59 }
  0xde   :  { %1458 = vpow2.f32 %v874_v53  ;;  %v814_v2 = vmul.f32 1.442695, %v743_v60  ;;  %vm707_vm8 = vcmp.gt.f32.partialorder %v1883_v21, 0.0  ;;  %v1934_v10 = vadd.f32 %v1348_v57, %v1863_v5 }
  0xdf   :  { %v393_v63 = vpop.f32.mrf.mxu0  ;;  %v553_v0 = vpop.f32.mrf.mxu1  ;;  %1460 = vpow2.f32 %v808_v61  ;;  %v878_v7 = vmul.f32 1.442695, %v775_v62  ;;  %v742_v17 = vmin.f32 %v1927_v3, 0.0  ;;  %v1940_v18 = vadd.f32 %v1396_v58, %v1863_v5 }
  0xe0   :  { %1462 = vpow2.f32 %v872_v1  ;;  %vm674_vm9 = vcmp.gt.f32.partialorder %v1890_v33, 0.0  ;;  %v774_v22 = vmin.f32 %v1930_v4, 0.0  ;;  %vm706_vm10 = vcmp.gt.f32.partialorder %v1893_v34, 0.0 }
  0xe1   :  { %v1441_v6 = vpop.eup %1440  ;;  %v1351_v11 = vpop.f32.mrf.mxu0  ;;  %1464 = vpow2.f32 %v814_v2  ;;  %v812_v27 = vmul.f32 1.442695, %v742_v17  ;;  %v745_v32 = vmin.f32 %v1934_v10, 0.0  ;;  %vm677_vm11 = vcmp.gt.f32.partialorder %v1896_v35, 0.0 }
  0xe2   :  { %v1936_v12 = vpop.f32.mrf.mxu1  ;;  %v1443_v13 = vpop.eup %1442  ;;  %v1192_v16 = vadd.f32 -1.0, %v1441_v6  ;;  %1466 = vpow2.f32 %v878_v7  ;;  %v876_v31 = vmul.f32 1.442695, %v774_v22  ;;  %v777_v39 = vmin.f32 %v1940_v18, 0.0 }
  0xe3   :  { %v1224_v19 = vadd.f32 -1.0, %v1443_v13  ;;  %v1944_v23 = vpop.f32.mrf.mxu0  ;;  %1468 = vpow2.f32 %v812_v27  ;;  %v818_v43 = vmul.f32 1.442695, %v745_v32  ;;  %v1981_v47 = vadd.f32 %v1863_v5, %v393_v63 }
  0xe4   :  { %v1946_v24 = vpop.f32.mrf.mxu1  ;;  %v1445_v25 = vpop.eup %1444  ;;  %v993_v26 = vsel %vm673_vm3, %v1866_v8, %v1192_v16  ;;  %1470 = vpow2.f32 %v876_v31  ;;  %v882_v46 = vmul.f32 1.442695, %v777_v39  ;;  %v1996_v52 = vadd.f32 %v1351_v11, %v1863_v5 }
  0xe5   :  { %v1447_v28 = vpop.eup %1446  ;;  %1058 = vst.msk [vmem:[%s2619_s3 + $0x8] sm:$0xff] %vm1056_vm2, %v993_v26  ;;  %v1025_v29 = vsel %vm705_vm4, %v1869_v9, %v1224_v19  ;;  %v1191_v30 = vadd.f32 -1.0, %v1445_v25  ;;  %v1960_v36 = vpop.f32.mrf.mxu0  ;;  %1472 = vpow2.f32 %v818_v43  ;;  %vm709_vm12 = vcmp.gt.f32.partialorder %v1899_v37, 0.0 }
  0xe6   :  { %v1449_v8 = vpop.eup %1448  ;;  %1090 = vst.msk [vmem:[%s2619_s3 + $0x108] sm:$0xff] %vm1056_vm2, %v1025_v29  ;;  %v1223_v38 = vadd.f32 -1.0, %v1447_v28  ;;  %v1968_v40 = vpop.f32.mrf.mxu1  ;;  %1474 = vpow2.f32 %v882_v46  ;;  %vm676_vm13 = vcmp.gt.f32.partialorder %v1906_v49, 0.0  ;;  %v744_v60 = vmin.f32 %v1981_v47, 0.0 }
  0xe7   :  { %v1451_v9 = vpop.eup %1450  ;;  %v992_v41 = vsel %vm672_vm5, %v1874_v14, %v1191_v30  ;;  %v1194_v42 = vadd.f32 -1.0, %v1449_v8  ;;  %v1983_v48 = vpop.f32.mrf.mxu0  ;;  %vm708_vm14 = vcmp.gt.f32.partialorder %v1909_v50, 0.0  ;;  %v2038_v17 = vadd.f32 %v1936_v12, %v1863_v5 }
  0xe8   :  { %1057 = vst.msk [vmem:[%s2619_s3] sm:$0xff] %vm1056_vm2, %v992_v41  ;;  %v1024_v44 = vsel %vm704_vm6, %v1877_v15, %v1223_v38  ;;  %v1226_v45 = vadd.f32 -1.0, %v1451_v9  ;;  %v1453_v14 = vpop.eup %1452  ;;  %v1993_v15 = vadd.f32 %v1863_v5, %v553_v0  ;;  %v747_v0 = vmin.f32 %v1996_v52, 0.0 }
  0xe9   :  { %1089 = vst.msk [vmem:[%s2619_s3 + $0x100] sm:$0xff] %vm1056_vm2, %v1024_v44  ;;  %v995_v51 = vsel %vm675_vm7, %v1880_v20, %v1194_v42  ;;  %v1455_v53 = vpop.eup %1454  ;;  %v1193_v57 = vadd.f32 -1.0, %v1453_v14  ;;  %v2006_v20 = vpop.f32.mrf.mxu1  ;;  %v816_v7 = vmul.f32 1.442695, %v744_v60  ;;  %v2055_v12 = vadd.f32 %v1863_v5, %v1946_v24 }
  0xea   :  { %1060 = vst.msk [vmem:[%s2619_s3 + $0x18] sm:$0xff] %vm1056_vm2, %v995_v51  ;;  %v1027_v56 = vsel %vm707_vm8, %v1883_v21, %v1226_v45  ;;  %v1457_v58 = vpop.eup %1456  ;;  %v1225_v59 = vadd.f32 -1.0, %v1455_v53  ;;  %v776_v61 = vmin.f32 %v1993_v15, 0.0  ;;  %v2020_v1 = vpop.f32.mrf.mxu0  ;;  %v822_v16 = vmul.f32 1.442695, %v747_v0 }
  0xeb   :  { %1092 = vst.msk [vmem:[%s2619_s3 + $0x118] sm:$0xff] %vm1056_vm2, %v1027_v56  ;;  %v1459_v21 = vpop.eup %1458  ;;  %v994_v62 = vsel %vm674_vm9, %v1890_v33, %v1193_v57  ;;  %v1196_v63 = vadd.f32 -1.0, %v1457_v58  ;;  %v2044_v19 = vpop.f32.mrf.mxu1  ;;  %1476 = vpow2.f32 %v816_v7  ;;  %vm679_vm15 = vcmp.gt.f32.partialorder %v1912_v54, 0.0 }
  0xec   :  { %1059 = vst.msk [vmem:[%s2619_s3 + $0x10] sm:$0xff] %vm1056_vm2, %v994_v62  ;;  %v1026_v2 = vsel %vm706_vm10, %v1893_v34, %v1225_v59  ;;  %v1228_v6 = vadd.f32 -1.0, %v1459_v21  ;;  %v880_v11 = vmul.f32 1.442695, %v776_v61  ;;  %v1461_v33 = vpop.eup %1460  ;;  %v2042_v34 = vadd.f32 %v1863_v5, %v1944_v23  ;;  %v423_v28 = vpop.f32.mrf.mxu0 }
  0xed   :  { %1091 = vst.msk [vmem:[%s2619_s3 + $0x110] sm:$0xff] %vm1056_vm2, %v1026_v2  ;;  %v997_v13 = vsel %vm677_vm11, %v1896_v35, %v1196_v63  ;;  %v1463_v22 = vpop.eup %1462  ;;  %v1195_v25 = vadd.f32 -1.0, %v1461_v33  ;;  %v779_v27 = vmin.f32 %v2038_v17, 0.0  ;;  %vm711_vm0 = vcmp.gt.f32.partialorder %v1915_v55, 0.0  ;;  %v2075_v38 = vpop.f32.mrf.mxu1 }
  0xee   :  { %1062 = vst.msk [vmem:[%s2619_s3 + $0x28] sm:$0xff] %vm1056_vm2, %v997_v13  ;;  %v1029_v35 = vsel %vm709_vm12, %v1899_v37, %v1228_v6  ;;  %v1465_v23 = vpop.eup %1464  ;;  %v1227_v26 = vadd.f32 -1.0, %v1463_v22  ;;  %1478 = vpow2.f32 %v880_v11  ;;  %v746_v8 = vmin.f32 %v2042_v34, 0.0  ;;  %v2097_v44 = vpop.f32.mrf.mxu0 }
  0xef   :  { %1094 = vst.msk [vmem:[%s2619_s3 + $0x128] sm:$0xff] %vm1056_vm2, %v1029_v35  ;;  %v1467_v37 = vpop.eup %1466  ;;  %v996_v29 = vsel %vm676_vm13, %v1906_v49, %v1195_v25  ;;  %v1198_v24 = vadd.f32 -1.0, %v1465_v23  ;;  %1480 = vpow2.f32 %v822_v16  ;;  %v886_v32 = vmul.f32 1.442695, %v779_v27  ;;  %v1408_v56 = vpop.f32.mrf.mxu1 }
  0xf0   :  { %1061 = vst.msk [vmem:[%s2619_s3 + $0x20] sm:$0xff] %vm1056_vm2, %v996_v29  ;;  %v1028_v30 = vsel %vm708_vm14, %v1909_v50, %v1227_v26  ;;  %v1230_v31 = vadd.f32 -1.0, %v1467_v37  ;;  %v1469_v49 = vpop.eup %1468  ;;  %vm678_vm1 = vcmp.gt.f32.partialorder %v1927_v3, 0.0  ;;  %v778_v50 = vmin.f32 %v2055_v12, 0.0  ;;  %v2128_v60 = vpop.f32.mrf.mxu0 }
  0xf1   :  { %1093 = vst.msk [vmem:[%s2619_s3 + $0x120] sm:$0xff] %vm1056_vm2, %v1028_v30  ;;  %v999_v39 = vsel %vm679_vm15, %v1912_v54, %v1198_v24  ;;  %v2088_v9 = vadd.f32 %v1960_v36, %v1863_v5  ;;  %v1471_v41 = vpop.eup %1470  ;;  %v1197_v43 = vadd.f32 -1.0, %v1469_v49  ;;  %1482 = vpow2.f32 %v886_v32  ;;  %v593_v2 = vpop.f32.mrf.mxu1 }
  0xf2   :  { %1064 = vst.msk [vmem:[%s2619_s3 + $0x38] sm:$0xff] %vm1056_vm2, %v999_v39  ;;  %v1031_v42 = vsel %vm711_vm0, %v1915_v55, %v1230_v31  ;;  %v820_v54 = vmul.f32 1.442695, %v746_v8  ;;  %vm710_vm3 = vcmp.gt.f32.partialorder %v1930_v4, 0.0  ;;  %v1229_v36 = vadd.f32 -1.0, %v1471_v41  ;;  %v1473_v14 = vpop.eup %1472  ;;  %v2160_v11 = vpop.f32.mrf.mxu0 }
  0xf3   :  { %1096 = vst.msk [vmem:[%s2619_s3 + $0x138] sm:$0xff] %vm1056_vm2, %v1031_v42  ;;  %v884_v45 = vmul.f32 1.442695, %v778_v50  ;;  %v749_v46 = vmin.f32 %v2088_v9, 0.0  ;;  %v998_v55 = vsel %vm678_vm1, %v1927_v3, %v1197_v43  ;;  %v2110_v51 = vadd.f32 %v1968_v40, %v1863_v5  ;;  %v1475_v57 = vpop.eup %1474  ;;  %v1411_v26 = vpop.f32.mrf.mxu1 }
  0xf4   :  { %1484 = vpow2.f32 %v820_v54  ;;  %v2114_v53 = vadd.f32 %v1863_v5, %v1983_v48  ;;  %1063 = vst.msk [vmem:[%s2619_s3 + $0x30] sm:$0xff] %vm1056_vm2, %v998_v55  ;;  %v1030_v58 = vsel %vm710_vm3, %v1930_v4, %v1229_v36  ;;  %v1200_v59 = vadd.f32 -1.0, %v1473_v14  ;;  %v443_v31 = vpop.f32.mrf.mxu0 }
  0xf5   :  { %1486 = vpow2.f32 %v884_v45  ;;  %v826_v3 = vmul.f32 1.442695, %v749_v46  ;;  %1095 = vst.msk [vmem:[%s2619_s3 + $0x130] sm:$0xff] %vm1056_vm2, %v1030_v58  ;;  %vm681_vm4 = vcmp.gt.f32.partialorder %v1934_v10, 0.0  ;;  %vm713_vm5 = vcmp.gt.f32.partialorder %v1940_v18, 0.0 }
  0xf6   :  { %v1232_v40 = vadd.f32 -1.0, %v1475_v57  ;;  %v781_v48 = vmin.f32 %v2110_v51, 0.0  ;;  %v1001_v61 = vsel %vm681_vm4, %v1934_v10, %v1200_v59  ;;  %v748_v4 = vmin.f32 %v2114_v53, 0.0  ;;  %v1366_v45 = vpop.f32.mrf.mxu0 }
  0xf7   :  { %1488 = vpow2.f32 %v826_v3  ;;  %v2134_v21 = vadd.f32 %v1863_v5, %v2006_v20  ;;  %1066 = vst.msk [vmem:[%s2619_s3 + $0x48] sm:$0xff] %vm1056_vm2, %v1001_v61  ;;  %v2143_v0 = vadd.f32 %v2020_v1, %v1863_v5  ;;  %v2147_v10 = vadd.f32 %v2044_v19, %v1863_v5 }
  0xf8   :  { %v1033_v62 = vsel %vm713_vm5, %v1940_v18, %v1232_v40  ;;  %v890_v63 = vmul.f32 1.442695, %v781_v48  ;;  %v824_v20 = vmul.f32 1.442695, %v748_v4  ;;  %v2155_v18 = vadd.f32 %v1863_v5, %v423_v28  ;;  %v1477_v7 = vpop.eup %1476  ;;  %v453_v61 = vpop.f32.mrf.mxu0 }
  0xf9   :  { %1098 = vst.msk [vmem:[%s2619_s3 + $0x148] sm:$0xff] %vm1056_vm2, %v1033_v62  ;;  %v780_v6 = vmin.f32 %v2134_v21, 0.0  ;;  %vm680_vm6 = vcmp.gt.f32.partialorder %v1981_v47, 0.0  ;;  %vm712_vm7 = vcmp.gt.f32.partialorder %v1993_v15, 0.0  ;;  %v751_v1 = vmin.f32 %v2143_v0, 0.0 }
  0xfa   :  { %1490 = vpow2.f32 %v890_v63  ;;  %v1199_v13 = vadd.f32 -1.0, %v1477_v7  ;;  %v783_v19 = vmin.f32 %v2147_v10, 0.0  ;;  %vm683_vm8 = vcmp.gt.f32.partialorder %v1996_v52, 0.0 }
  0xfb   :  { %v1479_v33 = vpop.eup %1478  ;;  %1492 = vpow2.f32 %v824_v20  ;;  %v888_v16 = vmul.f32 1.442695, %v780_v6  ;;  %v830_v25 = vmul.f32 1.442695, %v751_v1  ;;  %v750_v23 = vmin.f32 %v2155_v18, 0.0 }
  0xfc   :  { %v1481_v22 = vpop.eup %1480  ;;  %v1231_v35 = vadd.f32 -1.0, %v1479_v33  ;;  %v1000_v27 = vsel %vm680_vm6, %v1981_v47, %v1199_v13  ;;  %v894_v37 = vmul.f32 1.442695, %v783_v19  ;;  %v2177_v30 = vadd.f32 %v1863_v5, %v2075_v38 }
  0xfd   :  { %v1202_v28 = vadd.f32 -1.0, %v1481_v22  ;;  %1494 = vpow2.f32 %v888_v16  ;;  %1065 = vst.msk [vmem:[%s2619_s3 + $0x40] sm:$0xff] %vm1056_vm2, %v1000_v27  ;;  %v828_v24 = vmul.f32 1.442695, %v750_v23  ;;  %v2191_v8 = vadd.f32 %v1408_v56, %v1863_v5  ;;  %v1369_v22 = vpop.f32.mrf.mxu0 }
  0xfe   :  { %v1032_v29 = vsel %vm712_vm7, %v1993_v15, %v1231_v35  ;;  %1496 = vpow2.f32 %v830_v25  ;;  %v1483_v47 = vpop.eup %1482  ;;  %v2188_v15 = vadd.f32 %v2097_v44, %v1863_v5  ;;  %vm715_vm9 = vcmp.gt.f32.partialorder %v2038_v17, 0.0 }
  0xff   :  { %1097 = vst.msk [vmem:[%s2619_s3 + $0x140] sm:$0xff] %vm1056_vm2, %v1032_v29  ;;  %v1003_v32 = vsel %vm683_vm8, %v1996_v52, %v1202_v28  ;;  %1498 = vpow2.f32 %v894_v37  ;;  %v1234_v38 = vadd.f32 -1.0, %v1483_v47  ;;  %v782_v49 = vmin.f32 %v2177_v30, 0.0  ;;  %v603_v52 = vpop.f32.mrf.mxu1 }
 0x100   :  { %1068 = vst.msk [vmem:[%s2619_s3 + $0x58] sm:$0xff] %vm1056_vm2, %v1003_v32  ;;  %1500 = vpow2.f32 %v828_v24  ;;  %vm682_vm10 = vcmp.gt.f32.partialorder %v2042_v34, 0.0  ;;  %vm714_vm11 = vcmp.gt.f32.partialorder %v2055_v12, 0.0  ;;  %v753_v50 = vmin.f32 %v2188_v15, 0.0 }
 0x101   :  { %v1485_v39 = vpop.eup %1484  ;;  %v785_v41 = vmin.f32 %v2191_v8, 0.0  ;;  %v1035_v43 = vsel %vm715_vm9, %v2038_v17, %v1234_v38  ;;  %v892_v44 = vmul.f32 1.442695, %v782_v49  ;;  %v2206_v36 = vadd.f32 %v1863_v5, %v2128_v60  ;;  %v2220_v59 = vpop.f32.mrf.mxu1 }
 0x102   :  { %v1487_v42 = vpop.eup %1486  ;;  %v1201_v54 = vadd.f32 -1.0, %v1485_v39  ;;  %1100 = vst.msk [vmem:[%s2619_s3 + $0x158] sm:$0xff] %vm1056_vm2, %v1035_v43  ;;  %v834_v14 = vmul.f32 1.442695, %v753_v50  ;;  %v2213_v56 = vadd.f32 %v1863_v5, %v593_v2  ;;  %vm685_vm12 = vcmp.gt.f32.partialorder %v2088_v9, 0.0  ;;  %v463_v39 = vpop.f32.mrf.mxu0 }
 0x103   :  { %v1233_v46 = vadd.f32 -1.0, %v1487_v42  ;;  %v898_v55 = vmul.f32 1.442695, %v785_v41  ;;  %1502 = vpow2.f32 %v892_v44  ;;  %v752_v58 = vmin.f32 %v2206_v36, 0.0 }
 0x104   :  { %v1489_v57 = vpop.eup %1488  ;;  %v1002_v17 = vsel %vm682_vm10, %v2042_v34, %v1201_v54  ;;  %vm717_vm13 = vcmp.gt.f32.partialorder %v2110_v51, 0.0  ;;  %1504 = vpow2.f32 %v834_v14  ;;  %v784_v48 = vmin.f32 %v2213_v56, 0.0 }
 0x105   :  { %1067 = vst.msk [vmem:[%s2619_s3 + $0x50] sm:$0xff] %vm1056_vm2, %v1002_v17  ;;  %v1034_v3 = vsel %vm714_vm11, %v2055_v12, %v1233_v46  ;;  %v1204_v40 = vadd.f32 -1.0, %v1489_v57  ;;  %1506 = vpow2.f32 %v898_v55  ;;  %v832_v34 = vmul.f32 1.442695, %v752_v58  ;;  %v1372_v55 = vpop.f32.mrf.mxu0 }
 0x106   :  { %1099 = vst.msk [vmem:[%s2619_s3 + $0x150] sm:$0xff] %vm1056_vm2, %v1034_v3  ;;  %v2237_v60 = vadd.f32 %v2160_v11, %v1863_v5  ;;  %vm684_vm14 = vcmp.gt.f32.partialorder %v2114_v53, 0.0  ;;  %v2244_v62 = vadd.f32 %v1411_v26, %v1863_v5  ;;  %v2247_v63 = vadd.f32 %v1863_v5, %v443_v31 }
 0x107   :  { %v1491_v4 = vpop.eup %1490  ;;  %v1005_v12 = vsel %vm685_vm12, %v2088_v9, %v1204_v40  ;;  %1508 = vpow2.f32 %v832_v34  ;;  %v896_v6 = vmul.f32 1.442695, %v784_v48  ;;  %v2254_v7 = vadd.f32 %v1863_v5, %v603_v52  ;;  %v613_v9 = vpop.f32.mrf.mxu1 }
 0x108   :  { %v1493_v2 = vpop.eup %1492  ;;  %1070 = vst.msk [vmem:[%s2619_s3 + $0x68] sm:$0xff] %vm1056_vm2, %v1005_v12  ;;  %v1236_v20 = vadd.f32 -1.0, %v1491_v4  ;;  %vm716_vm15 = vcmp.gt.f32.partialorder %v2134_v21, 0.0  ;;  %v755_v11 = vmin.f32 %v2237_v60, 0.0  ;;  %v787_v33 = vmin.f32 %v2244_v62, 0.0 }
 0x109   :  { %v1203_v1 = vadd.f32 -1.0, %v1493_v2  ;;  %vm687_vm0 = vcmp.gt.f32.partialorder %v2143_v0, 0.0  ;;  %1510 = vpow2.f32 %v896_v6  ;;  %v754_v19 = vmin.f32 %v2247_v63, 0.0  ;;  %v1417_v24 = vpop.f32.mrf.mxu1 }
 0x10a   :  { %v1495_v13 = vpop.eup %1494  ;;  %v1037_v16 = vsel %vm717_vm13, %v2110_v51, %v1236_v20  ;;  %v838_v26 = vmul.f32 1.442695, %v755_v11  ;;  %v902_v27 = vmul.f32 1.442695, %v787_v33  ;;  %vm719_vm1 = vcmp.gt.f32.partialorder %v2147_v10, 0.0 }
 0x10b   :  { %v1497_v35 = vpop.eup %1496  ;;  %1102 = vst.msk [vmem:[%s2619_s3 + $0x168] sm:$0xff] %vm1056_vm2, %v1037_v16  ;;  %v1004_v25 = vsel %vm684_vm14, %v2114_v53, %v1203_v1  ;;  %v1235_v23 = vadd.f32 -1.0, %v1495_v13  ;;  %v836_v37 = vmul.f32 1.442695, %v754_v19  ;;  %v786_v29 = vmin.f32 %v2254_v7, 0.0  ;;  %v473_v1 = vpop.f32.mrf.mxu0 }
 0x10c   :  { %v1499_v51 = vpop.eup %1498  ;;  %1069 = vst.msk [vmem:[%s2619_s3 + $0x60] sm:$0xff] %vm1056_vm2, %v1004_v25  ;;  %v1206_v28 = vadd.f32 -1.0, %v1497_v35  ;;  %1512 = vpow2.f32 %v838_v26  ;;  %v2281_v32 = vadd.f32 %v1366_v45, %v1863_v5  ;;  %vm686_vm3 = vcmp.gt.f32.partialorder %v2155_v18, 0.0 }
 0x10d   :  { %v1501_v31 = vpop.eup %1500  ;;  %v1036_v53 = vsel %vm716_vm15, %v2134_v21, %v1235_v23  ;;  %v1238_v47 = vadd.f32 -1.0, %v1499_v51  ;;  %1514 = vpow2.f32 %v902_v27  ;;  %v900_v52 = vmul.f32 1.442695, %v786_v29  ;;  %v1375_v27 = vpop.f32.mrf.mxu0 }
 0x10e   :  { %1101 = vst.msk [vmem:[%s2619_s3 + $0x160] sm:$0xff] %vm1056_vm2, %v1036_v53  ;;  %v1007_v38 = vsel %vm687_vm0, %v2143_v0, %v1206_v28  ;;  %v1205_v49 = vadd.f32 -1.0, %v1501_v31  ;;  %1516 = vpow2.f32 %v836_v37  ;;  %v757_v50 = vmin.f32 %v2281_v32, 0.0 }
 0x10f   :  { %1072 = vst.msk [vmem:[%s2619_s3 + $0x78] sm:$0xff] %vm1056_vm2, %v1007_v38  ;;  %v1039_v21 = vsel %vm719_vm1, %v2147_v10, %v1238_v47  ;;  %1518 = vpow2.f32 %v900_v52  ;;  %v2306_v41 = vadd.f32 %v2220_v59, %v1863_v5  ;;  %v2309_v42 = vadd.f32 %v1863_v5, %v453_v61  ;;  %v623_v10 = vpop.f32.mrf.mxu1 }
 0x110   :  { %1104 = vst.msk [vmem:[%s2619_s3 + $0x178] sm:$0xff] %vm1056_vm2, %v1039_v21  ;;  %v1006_v0 = vsel %vm686_vm3, %v2155_v18, %v1205_v49  ;;  %v1503_v43 = vpop.eup %1502  ;;  %vm718_vm4 = vcmp.gt.f32.partialorder %v2177_v30, 0.0  ;;  %v842_v54 = vmul.f32 1.442695, %v757_v50  ;;  %v2317_v18 = vadd.f32 %v1863_v5, %v613_v9 }
 0x111   :  { %1071 = vst.msk [vmem:[%s2619_s3 + $0x70] sm:$0xff] %vm1056_vm2, %v1006_v0  ;;  %v2320_v44 = vadd.f32 %v1369_v22, %v1863_v5  ;;  %v1505_v45 = vpop.eup %1504  ;;  %v1237_v46 = vadd.f32 -1.0, %v1503_v43  ;;  %vm689_vm5 = vcmp.gt.f32.partialorder %v2188_v15, 0.0  ;;  %vm721_vm6 = vcmp.gt.f32.partialorder %v2191_v8, 0.0  ;;  %v1420_v61 = vpop.f32.mrf.mxu1 }
 0x112   :  { %v789_v14 = vmin.f32 %v2306_v41, 0.0  ;;  %v1507_v57 = vpop.eup %1506  ;;  %v1208_v17 = vadd.f32 -1.0, %v1505_v45  ;;  %1520 = vpow2.f32 %v842_v54  ;;  %v756_v58 = vmin.f32 %v2309_v42, 0.0 }
 0x113   :  { %v2327_v59 = vadd.f32 %v1417_v24, %v1863_v5  ;;  %v1038_v3 = vsel %vm718_vm4, %v2177_v30, %v1237_v46  ;;  %v1240_v40 = vadd.f32 -1.0, %v1507_v57  ;;  %v788_v48 = vmin.f32 %v2317_v18, 0.0  ;;  %v633_v19 = vpop.f32.mrf.mxu1 }
 0x114   :  { %v906_v34 = vmul.f32 1.442695, %v789_v14  ;;  %v1509_v4 = vpop.eup %1508  ;;  %1103 = vst.msk [vmem:[%s2619_s3 + $0x170] sm:$0xff] %vm1056_vm2, %v1038_v3  ;;  %v1009_v12 = vsel %vm689_vm5, %v2188_v15, %v1208_v17  ;;  %vm688_vm7 = vcmp.gt.f32.partialorder %v2206_v36, 0.0  ;;  %v840_v2 = vmul.f32 1.442695, %v756_v58 }
 0x115   :  { %v759_v30 = vmin.f32 %v2320_v44, 0.0  ;;  %1074 = vst.msk [vmem:[%s2619_s3 + $0x88] sm:$0xff] %vm1056_vm2, %v1009_v12  ;;  %v1041_v20 = vsel %vm721_vm6, %v2191_v8, %v1240_v40  ;;  %v1207_v6 = vadd.f32 -1.0, %v1509_v4  ;;  %v904_v9 = vmul.f32 1.442695, %v788_v48  ;;  %v1423_v47 = vpop.f32.mrf.mxu1 }
 0x116   :  { %1522 = vpow2.f32 %v906_v34  ;;  %v1511_v11 = vpop.eup %1510  ;;  %1106 = vst.msk [vmem:[%s2619_s3 + $0x188] sm:$0xff] %vm1056_vm2, %v1041_v20  ;;  %vm720_vm8 = vcmp.gt.f32.partialorder %v2213_v56, 0.0  ;;  %v791_v33 = vmin.f32 %v2327_v59, 0.0  ;;  %v2355_v8 = vadd.f32 %v1863_v5, %v463_v39 }
 0x117   :  { %1524 = vpow2.f32 %v840_v2  ;;  %v846_v15 = vmul.f32 1.442695, %v759_v30  ;;  %v1008_v13 = vsel %vm688_vm7, %v2206_v36, %v1207_v6  ;;  %v1239_v16 = vadd.f32 -1.0, %v1511_v11  ;;  %v643_v14 = vpop.f32.mrf.mxu1 }
 0x118   :  { %1526 = vpow2.f32 %v904_v9  ;;  %1073 = vst.msk [vmem:[%s2619_s3 + $0x80] sm:$0xff] %vm1056_vm2, %v1008_v13  ;;  %v910_v22 = vmul.f32 1.442695, %v791_v33  ;;  %v2362_v35 = vadd.f32 %v1863_v5, %v623_v10  ;;  %v2365_v25 = vadd.f32 %v1372_v55, %v1863_v5  ;;  %v483_v10 = vpop.f32.mrf.mxu0 }
 0x119   :  { %1528 = vpow2.f32 %v846_v15  ;;  %v1513_v36 = vpop.eup %1512  ;;  %v1040_v23 = vsel %vm720_vm8, %v2213_v56, %v1239_v16  ;;  %vm691_vm9 = vcmp.gt.f32.partialorder %v2237_v60, 0.0  ;;  %vm723_vm10 = vcmp.gt.f32.partialorder %v2244_v62, 0.0  ;;  %v1426_v6 = vpop.f32.mrf.mxu1 }
 0x11a   :  { %v758_v26 = vmin.f32 %v2355_v8, 0.0  ;;  %v1515_v51 = vpop.eup %1514  ;;  %1105 = vst.msk [vmem:[%s2619_s3 + $0x180] sm:$0xff] %vm1056_vm2, %v1040_v23  ;;  %v1210_v28 = vadd.f32 -1.0, %v1513_v36  ;;  %1530 = vpow2.f32 %v910_v22  ;;  %v790_v37 = vmin.f32 %v2362_v35, 0.0  ;;  %v1378_v3 = vpop.f32.mrf.mxu0 }
 0x11b   :  { %v2377_v29 = vadd.f32 %v1420_v61, %v1863_v5  ;;  %v1517_v56 = vpop.eup %1516  ;;  %v1242_v24 = vadd.f32 -1.0, %v1515_v51  ;;  %vm690_vm11 = vcmp.gt.f32.partialorder %v2247_v63, 0.0  ;;  %v761_v53 = vmin.f32 %v2365_v25, 0.0 }
 0x11c   :  { %v844_v31 = vmul.f32 1.442695, %v758_v26  ;;  %v1519_v38 = vpop.eup %1518  ;;  %v1011_v49 = vsel %vm691_vm9, %v2237_v60, %v1210_v28  ;;  %v1209_v52 = vadd.f32 -1.0, %v1517_v56  ;;  %vm722_vm12 = vcmp.gt.f32.partialorder %v2254_v7, 0.0  ;;  %v493_v13 = vpop.f32.mrf.mxu0 }
 0x11d   :  { %v908_v39 = vmul.f32 1.442695, %v790_v37  ;;  %1076 = vst.msk [vmem:[%s2619_s3 + $0x98] sm:$0xff] %vm1056_vm2, %v1011_v49  ;;  %v1043_v21 = vsel %vm723_vm10, %v2244_v62, %v1242_v24  ;;  %v1241_v50 = vadd.f32 -1.0, %v1519_v38  ;;  %v850_v0 = vmul.f32 1.442695, %v761_v53 }
 0x11e   :  { %1532 = vpow2.f32 %v844_v31  ;;  %1108 = vst.msk [vmem:[%s2619_s3 + $0x198] sm:$0xff] %vm1056_vm2, %v1043_v21  ;;  %v1010_v60 = vsel %vm690_vm11, %v2247_v63, %v1209_v52  ;;  %v793_v43 = vmin.f32 %v2377_v29, 0.0  ;;  %v2401_v54 = vadd.f32 %v1863_v5, %v473_v1  ;;  %v1381_v24 = vpop.f32.mrf.mxu0  ;;  %v1568_v52 = vld [vmem:[%s2618_s2] ss:$0 sm:$0xff] }
 0x11f   :  { %1534 = vpow2.f32 %v908_v39  ;;  %v1521_v62 = vpop.eup %1520  ;;  %1075 = vst.msk [vmem:[%s2619_s3 + $0x90] sm:$0xff] %vm1056_vm2, %v1010_v60  ;;  %v1042_v45 = vsel %vm722_vm12, %v2254_v7, %v1241_v50  ;;  %v2409_v46 = vadd.f32 %v1863_v5, %v633_v19  ;;  %v2412_v63 = vadd.f32 %v1375_v27, %v1863_v5  ;;  %v653_v27 = vpop.f32.mrf.mxu1 }
 0x120   :  { %1536 = vpow2.f32 %v850_v0  ;;  %1107 = vst.msk [vmem:[%s2619_s3 + $0x190] sm:$0xff] %vm1056_vm2, %v1042_v45  ;;  %vm693_vm13 = vcmp.gt.f32.partialorder %v2281_v32, 0.0  ;;  %v1212_v55 = vadd.f32 -1.0, %v1521_v62  ;;  %v914_v57 = vmul.f32 1.442695, %v793_v43  ;;  %v503_v45 = vpop.f32.mrf.mxu0 }
 0x121   :  { %v760_v17 = vmin.f32 %v2401_v54, 0.0  ;;  %vm725_vm14 = vcmp.gt.f32.partialorder %v2306_v41, 0.0  ;;  %vm692_vm15 = vcmp.gt.f32.partialorder %v2309_v42, 0.0  ;;  %v792_v7 = vmin.f32 %v2409_v46, 0.0  ;;  %v1429_v39 = vpop.f32.mrf.mxu1 }
 0x122   :  { %v763_v58 = vmin.f32 %v2412_v63, 0.0  ;;  %v1013_v34 = vsel %vm693_vm13, %v2281_v32, %v1212_v55  ;;  %1538 = vpow2.f32 %v914_v57  ;;  %v2426_v61 = vadd.f32 %v1423_v47, %v1863_v5 }
 0x123   :  { %v1523_v40 = vpop.eup %1522  ;;  %v848_v48 = vmul.f32 1.442695, %v760_v17  ;;  %1078 = vst.msk [vmem:[%s2619_s3 + $0xa8] sm:$0xff] %vm1056_vm2, %v1013_v34  ;;  %v912_v2 = vmul.f32 1.442695, %v792_v7  ;;  %v2433_v20 = vadd.f32 %v1863_v5, %v483_v10  ;;  %vm724_vm0 = vcmp.gt.f32.partialorder %v2317_v18, 0.0 }
 0x124   :  { %v1525_v4 = vpop.eup %1524  ;;  %v1244_v12 = vadd.f32 -1.0, %v1523_v40  ;;  %v854_v30 = vmul.f32 1.442695, %v763_v58  ;;  %v795_v1 = vmin.f32 %v2426_v61, 0.0  ;;  %vm695_vm1 = vcmp.gt.f32.partialorder %v2320_v44, 0.0  ;;  %v663_v58 = vpop.f32.mrf.mxu1 }
 0x125   :  { %v1527_v9 = vpop.eup %1526  ;;  %v1211_v32 = vadd.f32 -1.0, %v1525_v4  ;;  %1540 = vpow2.f32 %v848_v48  ;;  %v762_v23 = vmin.f32 %v2433_v20, 0.0  ;;  %v2457_v26 = vadd.f32 %v1863_v5, %v643_v14 }
 0x126   :  { %v1529_v11 = vpop.eup %1528  ;;  %v1045_v15 = vsel %vm725_vm14, %v2306_v41, %v1244_v12  ;;  %v1243_v33 = vadd.f32 -1.0, %v1527_v9  ;;  %1542 = vpow2.f32 %v912_v2  ;;  %v918_v22 = vmul.f32 1.442695, %v795_v1 }
 0x127   :  { %1110 = vst.msk [vmem:[%s2619_s3 + $0x1a8] sm:$0xff] %vm1056_vm2, %v1045_v15  ;;  %v1012_v16 = vsel %vm692_vm15, %v2309_v42, %v1211_v32  ;;  %v1214_v19 = vadd.f32 -1.0, %v1529_v11  ;;  %1544 = vpow2.f32 %v854_v30  ;;  %v1531_v36 = vpop.eup %1530  ;;  %v2460_v42 = vadd.f32 %v1378_v3, %v1863_v5 }
 0x128   :  { %1077 = vst.msk [vmem:[%s2619_s3 + $0xa0] sm:$0xff] %vm1056_vm2, %v1012_v16  ;;  %v1044_v41 = vsel %vm724_vm0, %v2317_v18, %v1243_v33  ;;  %v1246_v28 = vadd.f32 -1.0, %v1531_v36  ;;  %1546 = vpow2.f32 %v918_v22  ;;  %v2470_v18 = vadd.f32 %v1426_v6, %v1863_v5 }
 0x129   :  { %1109 = vst.msk [vmem:[%s2619_s3 + $0x1a0] sm:$0xff] %vm1056_vm2, %v1044_v41  ;;  %v1015_v51 = vsel %vm695_vm1, %v2320_v44, %v1214_v19  ;;  %vm727_vm3 = vcmp.gt.f32.partialorder %v2327_v59, 0.0  ;;  %v852_v37 = vmul.f32 1.442695, %v762_v23  ;;  %v794_v56 = vmin.f32 %v2457_v26, 0.0 }
 0x12a   :  { %1080 = vst.msk [vmem:[%s2619_s3 + $0xb8] sm:$0xff] %vm1056_vm2, %v1015_v51  ;;  %v1047_v53 = vsel %vm727_vm3, %v2327_v59, %v1246_v28  ;;  %vm694_vm4 = vcmp.gt.f32.partialorder %v2355_v8, 0.0  ;;  %v765_v44 = vmin.f32 %v2460_v42, 0.0  ;;  %v797_v5 = vmin.f32 %v2470_v18, 0.0 }
 0x12b   :  { %v1533_v31 = vpop.eup %1532  ;;  %1112 = vst.msk [vmem:[%s2619_s3 + $0x1b8] sm:$0xff] %vm1056_vm2, %v1047_v53  ;;  %1548 = vpow2.f32 %v852_v37  ;;  %v916_v49 = vmul.f32 1.442695, %v794_v56  ;;  %v2489_v59 = vadd.f32 %v1568_v52, %v493_v13  ;;  %v2491_v60 = vadd.f32 %v1568_v52, %v653_v27 }
 0x12c   :  { %v1535_v47 = vpop.eup %1534  ;;  %v1213_v38 = vadd.f32 -1.0, %v1533_v31  ;;  %v858_v0 = vmul.f32 1.442695, %v765_v44  ;;  %v922_v10 = vmul.f32 1.442695, %v797_v5  ;;  %vm726_vm5 = vcmp.gt.f32.partialorder %v2362_v35, 0.0 }
 0x12d   :  { %v1537_v21 = vpop.eup %1536  ;;  %v1245_v50 = vadd.f32 -1.0, %v1535_v47  ;;  %1550 = vpow2.f32 %v916_v49  ;;  %vm697_vm6 = vcmp.gt.f32.partialorder %v2365_v25, 0.0  ;;  %v764_v55 = vmin.f32 %v2489_v59, 0.0 }
 0x12e   :  { %v1014_v43 = vsel %vm694_vm4, %v2355_v8, %v1213_v38  ;;  %v1216_v62 = vadd.f32 -1.0, %v1537_v21  ;;  %1552 = vpow2.f32 %v858_v0  ;;  %v796_v17 = vmin.f32 %v2491_v60, 0.0 }
 0x12f   :  { %1079 = vst.msk [vmem:[%s2619_s3 + $0xb0] sm:$0xff] %vm1056_vm2, %v1014_v43  ;;  %v1046_v14 = vsel %vm726_vm5, %v2362_v35, %v1245_v50  ;;  %v1539_v57 = vpop.eup %1538  ;;  %1554 = vpow2.f32 %v922_v10  ;;  %v2510_v7 = vadd.f32 %v1568_v52, %v1381_v24  ;;  %v856_v3 = vmul.f32 1.442695, %v764_v55 }
 0x130   :  { %1111 = vst.msk [vmem:[%s2619_s3 + $0x1b0] sm:$0xff] %vm1056_vm2, %v1046_v14  ;;  %v1017_v8 = vsel %vm697_vm6, %v2365_v25, %v1216_v62  ;;  %v1248_v35 = vadd.f32 -1.0, %v1539_v57  ;;  %v2516_v40 = vadd.f32 %v1568_v52, %v1429_v39  ;;  %v2518_v34 = vadd.f32 %v1568_v52, %v503_v45 }
 0x131   :  { %1082 = vst.msk [vmem:[%s2619_s3 + $0xc8] sm:$0xff] %vm1056_vm2, %v1017_v8  ;;  %vm729_vm7 = vcmp.gt.f32.partialorder %v2377_v29, 0.0  ;;  %vm696_vm8 = vcmp.gt.f32.partialorder %v2401_v54, 0.0  ;;  %v920_v25 = vmul.f32 1.442695, %v796_v17  ;;  %v767_v4 = vmin.f32 %v2510_v7, 0.0 }
 0x132   :  { %v1541_v48 = vpop.eup %1540  ;;  %v1049_v2 = vsel %vm729_vm7, %v2377_v29, %v1248_v35  ;;  %1556 = vpow2.f32 %v856_v3  ;;  %v2524_v6 = vadd.f32 %v1568_v52, %v663_v58  ;;  %v799_v11 = vmin.f32 %v2516_v40, 0.0 }
 0x133   :  { %v1543_v12 = vpop.eup %1542  ;;  %v1215_v30 = vadd.f32 -1.0, %v1541_v48  ;;  %1114 = vst.msk [vmem:[%s2619_s3 + $0x1c8] sm:$0xff] %vm1056_vm2, %v1049_v2  ;;  %1558 = vpow2.f32 %v920_v25  ;;  %v862_v1 = vmul.f32 1.442695, %v767_v4  ;;  %vm728_vm9 = vcmp.gt.f32.partialorder %v2409_v46, 0.0 }
 0x134   :  { %v1545_v9 = vpop.eup %1544  ;;  %v1247_v32 = vadd.f32 -1.0, %v1543_v12  ;;  %v766_v33 = vmin.f32 %v2518_v34, 0.0  ;;  %vm699_vm10 = vcmp.gt.f32.partialorder %v2412_v63, 0.0  ;;  %v926_v19 = vmul.f32 1.442695, %v799_v11 }
 0x135   :  { %v1016_v15 = vsel %vm696_vm8, %v2401_v54, %v1215_v30  ;;  %v1218_v29 = vadd.f32 -1.0, %v1545_v9  ;;  %v1547_v13 = vpop.eup %1546  ;;  %1560 = vpow2.f32 %v862_v1  ;;  %v798_v41 = vmin.f32 %v2524_v6, 0.0 }
 0x136   :  { %1081 = vst.msk [vmem:[%s2619_s3 + $0xc0] sm:$0xff] %vm1056_vm2, %v1016_v15  ;;  %v1048_v16 = vsel %vm728_vm9, %v2409_v46, %v1247_v32  ;;  %v1250_v22 = vadd.f32 -1.0, %v1547_v13  ;;  %v860_v36 = vmul.f32 1.442695, %v766_v33  ;;  %vm731_vm11 = vcmp.gt.f32.partialorder %v2426_v61, 0.0 }
 0x137   :  { %1113 = vst.msk [vmem:[%s2619_s3 + $0x1c0] sm:$0xff] %vm1056_vm2, %v1048_v16  ;;  %v1019_v54 = vsel %vm699_vm10, %v2412_v63, %v1218_v29  ;;  %1562 = vpow2.f32 %v926_v19  ;;  %v924_v27 = vmul.f32 1.442695, %v798_v41  ;;  %vm698_vm12 = vcmp.gt.f32.partialorder %v2433_v20, 0.0 }
 0x138   :  { %1084 = vst.msk [vmem:[%s2619_s3 + $0xd8] sm:$0xff] %vm1056_vm2, %v1019_v54  ;;  %v1549_v46 = vpop.eup %1548  ;;  %v1051_v23 = vsel %vm731_vm11, %v2426_v61, %v1250_v22  ;;  %1564 = vpow2.f32 %v860_v36  ;;  %vm730_vm13 = vcmp.gt.f32.partialorder %v2457_v26, 0.0  ;;  %vm701_vm14 = vcmp.gt.f32.partialorder %v2460_v42, 0.0 }
 0x139   :  { %1116 = vst.msk [vmem:[%s2619_s3 + $0x1d8] sm:$0xff] %vm1056_vm2, %v1051_v23  ;;  %v1217_v63 = vadd.f32 -1.0, %v1549_v46  ;;  %1566 = vpow2.f32 %v924_v27  ;;  %vm733_vm15 = vcmp.gt.f32.partialorder %v2470_v18, 0.0  ;;  %vm700_vm0 = vcmp.gt.f32.partialorder %v2489_v59, 0.0 }
 0x13a   :  { %v1551_v51 = vpop.eup %1550  ;;  %vm732_vm1 = vcmp.gt.f32.partialorder %v2491_v60, 0.0  ;;  %vm703_vm3 = vcmp.gt.f32.partialorder %v2510_v7, 0.0  ;;  %vm735_vm4 = vcmp.gt.f32.partialorder %v2516_v40, 0.0  ;;  %vm702_vm5 = vcmp.gt.f32.partialorder %v2518_v34, 0.0 }
 0x13b   :  { %v1553_v28 = vpop.eup %1552  ;;  %v1018_v37 = vsel %vm698_vm12, %v2433_v20, %v1217_v63  ;;  %v1249_v56 = vadd.f32 -1.0, %v1551_v51  ;;  %vm734_vm6 = vcmp.gt.f32.partialorder %v2524_v6, 0.0 }
 0x13c   :  { %v1555_v24 = vpop.eup %1554  ;;  %1083 = vst.msk [vmem:[%s2619_s3 + $0xd0] sm:$0xff] %vm1056_vm2, %v1018_v37  ;;  %v1220_v61 = vadd.f32 -1.0, %v1553_v28 }
 0x13d   :  { %v1050_v31 = vsel %vm730_vm13, %v2457_v26, %v1249_v56  ;;  %v1252_v53 = vadd.f32 -1.0, %v1555_v24 }
 0x13e   :  { %1115 = vst.msk [vmem:[%s2619_s3 + $0x1d0] sm:$0xff] %vm1056_vm2, %v1050_v31  ;;  %v1021_v20 = vsel %vm701_vm14, %v2460_v42, %v1220_v61 }
 0x13f   :  { %v1557_v44 = vpop.eup %1556  ;;  %1086 = vst.msk [vmem:[%s2619_s3 + $0xe8] sm:$0xff] %vm1056_vm2, %v1021_v20  ;;  %v1053_v26 = vsel %vm733_vm15, %v2470_v18, %v1252_v53 }
 0x140   :  { %v1559_v5 = vpop.eup %1558  ;;  %1118 = vst.msk [vmem:[%s2619_s3 + $0x1e8] sm:$0xff] %vm1056_vm2, %v1053_v26  ;;  %v1219_v47 = vadd.f32 -1.0, %v1557_v44 }
 0x141   :  { %v1251_v42 = vadd.f32 -1.0, %v1559_v5 }
 0x142   :  { %v1561_v38 = vpop.eup %1560  ;;  %v1020_v49 = vsel %vm700_vm0, %v2489_v59, %v1219_v47 }
 0x143   :  { %1085 = vst.msk [vmem:[%s2619_s3 + $0xe0] sm:$0xff] %vm1056_vm2, %v1020_v49  ;;  %v1052_v18 = vsel %vm732_vm1, %v2491_v60, %v1251_v42  ;;  %v1222_v52 = vadd.f32 -1.0, %v1561_v38 }
 0x144   :  { %v1563_v39 = vpop.eup %1562  ;;  %1117 = vst.msk [vmem:[%s2619_s3 + $0x1e0] sm:$0xff] %vm1056_vm2, %v1052_v18 }
 0x145   :  { %v1565_v21 = vpop.eup %1564  ;;  %v1023_v59 = vsel %vm703_vm3, %v2510_v7, %v1222_v52  ;;  %v1254_v50 = vadd.f32 -1.0, %v1563_v39 }
 0x146   :  { %1088 = vst.msk [vmem:[%s2619_s3 + $0xf8] sm:$0xff] %vm1056_vm2, %v1023_v59  ;;  %v1221_v0 = vadd.f32 -1.0, %v1565_v21  ;;  %v1567_v10 = vpop.eup %1566 }
 0x147   :  { %v1055_v60 = vsel %vm735_vm4, %v2516_v40, %v1254_v50  ;;  %v1253_v62 = vadd.f32 -1.0, %v1567_v10 }
 0x148   :  { %1120 = vst.msk [vmem:[%s2619_s3 + $0x1f8] sm:$0xff] %vm1056_vm2, %v1055_v60  ;;  %v1022_v43 = vsel %vm702_vm5, %v2518_v34, %v1221_v0 }
 0x149   :  { %1087 = vst.msk [vmem:[%s2619_s3 + $0xf0] sm:$0xff] %vm1056_vm2, %v1022_v43  ;;  %v1054_v45 = vsel %vm734_vm6, %v2524_v6, %v1253_v62 }
 0x14a   :  { %1119 = vst.msk [vmem:[%s2619_s3 + $0x1f0] sm:$0xff] %vm1056_vm2, %v1054_v45 }

// kernel: policy_net_forward.6
= control target key start
LH: loop header
LB: loop body
LE: loop exit
PB: predicated region body
PF: predicated region fallthrough
CT: control target
= control target key end

     0   :  { %vm105_vm0 = vcmask 261120   ;;  %s1261_s1 = inlined_call_operand.vmem [shape: f32[288,32], index: 1, kind: input, shape index: {}]   ;;  %s1262_s0 = inlined_call_operand.vmem [shape: f32[128,288], index: 0, kind: input, shape index: {}]   ;;  %s1263_s2 = inlined_call_operand.vmem [shape: f32[1,32], index: 2, kind: input, shape index: {}]   ;;  %s1264_s3 = inlined_call_operand.vmem [shape: f32[128,32], index: 3, kind: output, shape index: {}]  }
   0x1   :  { %v93_v0 = vld [vmem:[%s1261_s1 + $0xf8] sm:$0xff]  ;;  %v92_v2 = vld [vmem:[%s1261_s1 + $0xf0] sm:$0xff]  ;;  %v91_v4 = vld [vmem:[%s1261_s1 + $0xe8] sm:$0xff] }
   0x2   :  { %v77_v1 = vld [vmem:[%s1261_s1 + $0x78] sm:$0xff]  ;;  %593 = vmatprep.subr.mxu0 %v93_v0  ;;  %725 = vmatprep.subr.mxu1 %v93_v0  ;;  %v76_v3 = vld [vmem:[%s1261_s1 + $0x70] sm:$0xff]  ;;  %v75_v5 = vld [vmem:[%s1261_s1 + $0x68] sm:$0xff] }
   0x3   :  { %594 = vmatpush3.msra.mxu0 %v77_v1  ;;  %741 = vmatpush3.msra.mxu1 %v77_v1  ;;  %v90_v6 = vld [vmem:[%s1261_s1 + $0xe0] sm:$0xff]  ;;  %v89_v8 = vld [vmem:[%s1261_s1 + $0xd8] sm:$0xff]  ;;  %v88_v10 = vld [vmem:[%s1261_s1 + $0xd0] sm:$0xff] }
   0x4   :  { %595 = vmatprep.subr.mxu0 %v92_v2  ;;  %726 = vmatprep.subr.mxu1 %v92_v2  ;;  %v74_v7 = vld [vmem:[%s1261_s1 + $0x60] sm:$0xff]  ;;  %v73_v9 = vld [vmem:[%s1261_s1 + $0x58] sm:$0xff]  ;;  %v72_v11 = vld [vmem:[%s1261_s1 + $0x50] sm:$0xff] }
   0x5   :  { %596 = vmatpush3.msra.mxu0 %v76_v3  ;;  %742 = vmatpush3.msra.mxu1 %v76_v3  ;;  %v87_v12 = vld [vmem:[%s1261_s1 + $0xc8] sm:$0xff]  ;;  %v86_v14 = vld [vmem:[%s1261_s1 + $0xc0] sm:$0xff]  ;;  %v85_v16 = vld [vmem:[%s1261_s1 + $0xb8] sm:$0xff] }
   0x6   :  { %597 = vmatprep.subr.mxu0 %v91_v4  ;;  %727 = vmatprep.subr.mxu1 %v91_v4  ;;  %v71_v13 = vld [vmem:[%s1261_s1 + $0x48] sm:$0xff]  ;;  %v70_v15 = vld [vmem:[%s1261_s1 + $0x40] sm:$0xff]  ;;  %v69_v17 = vld [vmem:[%s1261_s1 + $0x38] sm:$0xff] }
   0x7   :  { %598 = vmatpush3.msra.mxu0 %v75_v5  ;;  %743 = vmatpush3.msra.mxu1 %v75_v5  ;;  %v84_v18 = vld [vmem:[%s1261_s1 + $0xb0] sm:$0xff]  ;;  %v83_v20 = vld [vmem:[%s1261_s1 + $0xa8] sm:$0xff]  ;;  %v82_v22 = vld [vmem:[%s1261_s1 + $0xa0] sm:$0xff] }
   0x8   :  { %599 = vmatprep.subr.mxu0 %v90_v6  ;;  %728 = vmatprep.subr.mxu1 %v90_v6  ;;  %v68_v19 = vld [vmem:[%s1261_s1 + $0x30] sm:$0xff]  ;;  %v67_v21 = vld [vmem:[%s1261_s1 + $0x28] sm:$0xff]  ;;  %v66_v23 = vld [vmem:[%s1261_s1 + $0x20] sm:$0xff] }
   0x9   :  { %600 = vmatpush3.msra.mxu0 %v74_v7  ;;  %744 = vmatpush3.msra.mxu1 %v74_v7  ;;  %v81_v24 = vld [vmem:[%s1261_s1 + $0x98] sm:$0xff]  ;;  %v80_v26 = vld [vmem:[%s1261_s1 + $0x90] sm:$0xff]  ;;  %v79_v28 = vld [vmem:[%s1261_s1 + $0x88] sm:$0xff] }
   0xa   :  { %601 = vmatprep.subr.mxu0 %v89_v8  ;;  %729 = vmatprep.subr.mxu1 %v89_v8  ;;  %v65_v25 = vld [vmem:[%s1261_s1 + $0x18] sm:$0xff]  ;;  %v64_v27 = vld [vmem:[%s1261_s1 + $0x10] sm:$0xff]  ;;  %v63_v29 = vld [vmem:[%s1261_s1 + $0x8] sm:$0xff] }
   0xb   :  { %602 = vmatpush3.msra.mxu0 %v73_v9  ;;  %745 = vmatpush3.msra.mxu1 %v73_v9  ;;  %v78_v30 = vld [vmem:[%s1261_s1 + $0x80] sm:$0xff]  ;;  %v15_v32 = vld [vmem:[%s1262_s0 + $0x8] sm:$0xff]  ;;  %v97_v38 = vld [vmem:[%s1261_s1 + $0x118] sm:$0xff] }
   0xc   :  { %603 = vmatprep.subr.mxu0 %v88_v10  ;;  %730 = vmatprep.subr.mxu1 %v88_v10  ;;  %v62_v31 = vld [vmem:[%s1261_s1] sm:$0xff]  ;;  %v51_v33 = vld [vmem:[%s1262_s0 + $0x128] sm:$0xff]  ;;  %v17_v39 = vld [vmem:[%s1262_s0 + $0x18] sm:$0xff] }
   0xd   :  { %604 = vmatpush3.msra.mxu0 %v72_v11  ;;  %746 = vmatpush3.msra.mxu1 %v72_v11  ;;  %v14_v34 = vld [vmem:[%s1262_s0] sm:$0xff]  ;;  %v53_v40 = vld [vmem:[%s1262_s0 + $0x138] sm:$0xff]  ;;  %v96_v43 = vld [vmem:[%s1261_s1 + $0x110] sm:$0xff] }
   0xe   :  { %605 = vmatprep.subr.mxu0 %v87_v12  ;;  %731 = vmatprep.subr.mxu1 %v87_v12  ;;  %v50_v35 = vld [vmem:[%s1262_s0 + $0x120] sm:$0xff]  ;;  %v21_v41 = vld [vmem:[%s1262_s0 + $0x38] sm:$0xff]  ;;  %v20_v44 = vld [vmem:[%s1262_s0 + $0x30] sm:$0xff] }
   0xf   :  { %606 = vmatpush3.msra.mxu0 %v71_v13  ;;  %747 = vmatpush3.msra.mxu1 %v71_v13  ;;  %v18_v36 = vld [vmem:[%s1262_s0 + $0x20] sm:$0xff]  ;;  %v57_v42 = vld [vmem:[%s1262_s0 + $0x158] sm:$0xff]  ;;  %v56_v45 = vld [vmem:[%s1262_s0 + $0x150] sm:$0xff] }
  0x10   :  { %607 = vmatprep.subr.mxu0 %v86_v14  ;;  %732 = vmatprep.subr.mxu1 %v86_v14  ;;  %v54_v37 = vld [vmem:[%s1262_s0 + $0x140] sm:$0xff]  ;;  %v24_v46 = vld [vmem:[%s1262_s0 + $0x50] sm:$0xff]  ;;  %v95_v48 = vld [vmem:[%s1261_s1 + $0x108] sm:$0xff] }
  0x11   :  { %608 = vmatpush3.msra.mxu0 %v70_v15  ;;  %748 = vmatpush3.msra.mxu1 %v70_v15  ;;  %v60_v47 = vld [vmem:[%s1262_s0 + $0x170] sm:$0xff]  ;;  %v23_v49 = vld [vmem:[%s1262_s0 + $0x48] sm:$0xff]  ;;  %v94_v51 = vld [vmem:[%s1261_s1 + $0x100] sm:$0xff] }
  0x12   :  { %609 = vmatprep.subr.mxu0 %v85_v16  ;;  %733 = vmatprep.subr.mxu1 %v85_v16  ;;  %v59_v50 = vld [vmem:[%s1262_s0 + $0x168] sm:$0xff]  ;;  %v16_v53 = vld [vmem:[%s1262_s0 + $0x10] sm:$0xff]  ;;  %v26_v54 = vld [vmem:[%s1262_s0 + $0x60] sm:$0xff] }
  0x13   :  { %610 = vmatpush3.msra.mxu0 %v69_v17  ;;  %749 = vmatpush3.msra.mxu1 %v69_v17  ;;  %v27_v52 = vld [vmem:[%s1262_s0 + $0x68] sm:$0xff]  ;;  %v30_v56 = vld [vmem:[%s1262_s0 + $0x80] sm:$0xff]  ;;  %v29_v58 = vld [vmem:[%s1262_s0 + $0x78] sm:$0xff] }
  0x14   :  { %611 = vmatprep.subr.mxu0 %v84_v18  ;;  %734 = vmatprep.subr.mxu1 %v84_v18  ;;  %v19_v55 = vld [vmem:[%s1262_s0 + $0x28] sm:$0xff]  ;;  %v22_v57 = vld [vmem:[%s1262_s0 + $0x40] sm:$0xff]  ;;  %v25_v59 = vld [vmem:[%s1262_s0 + $0x58] sm:$0xff] }
  0x15   :  { %612 = vmatpush3.msra.mxu0 %v68_v19  ;;  %750 = vmatpush3.msra.mxu1 %v68_v19  ;;  %v33_v60 = vld [vmem:[%s1262_s0 + $0x98] sm:$0xff]  ;;  %v28_v61 = vld [vmem:[%s1262_s0 + $0x70] sm:$0xff]  ;;  %v31_v63 = vld [vmem:[%s1262_s0 + $0x88] sm:$0xff] }
  0x16   :  { %613 = vmatprep.subr.mxu0 %v83_v20  ;;  %735 = vmatprep.subr.mxu1 %v83_v20  ;;  %v32_v62 = vld [vmem:[%s1262_s0 + $0x90] sm:$0xff]  ;;  %v34_v1 = vld [vmem:[%s1262_s0 + $0xa0] sm:$0xff]  ;;  %v35_v2 = vld [vmem:[%s1262_s0 + $0xa8] sm:$0xff] }
  0x17   :  { %614 = vmatpush3.msra.mxu0 %v67_v21  ;;  %751 = vmatpush3.msra.mxu1 %v67_v21  ;;  %v36_v0 = vld [vmem:[%s1262_s0 + $0xb0] sm:$0xff]  ;;  %v37_v3 = vld [vmem:[%s1262_s0 + $0xb8] sm:$0xff]  ;;  %v39_v4 = vld [vmem:[%s1262_s0 + $0xc8] sm:$0xff] }
  0x18   :  { %615 = vmatprep.subr.mxu0 %v82_v22  ;;  %736 = vmatprep.subr.mxu1 %v82_v22  ;;  %v40_v5 = vld [vmem:[%s1262_s0 + $0xd0] sm:$0xff]  ;;  %v38_v6 = vld [vmem:[%s1262_s0 + $0xc0] sm:$0xff]  ;;  %v43_v7 = vld [vmem:[%s1262_s0 + $0xe8] sm:$0xff] }
  0x19   :  { %616 = vmatpush3.msra.mxu0 %v66_v23  ;;  %752 = vmatpush3.msra.mxu1 %v66_v23  ;;  %v42_v8 = vld [vmem:[%s1262_s0 + $0xe0] sm:$0xff]  ;;  %v41_v10 = vld [vmem:[%s1262_s0 + $0xd8] sm:$0xff]  ;;  %v52_v13 = vld [vmem:[%s1262_s0 + $0x130] sm:$0xff] }
  0x1a   :  { %617 = vmatprep.subr.mxu0 %v81_v24  ;;  %737 = vmatprep.subr.mxu1 %v81_v24  ;;  %v46_v9 = vld [vmem:[%s1262_s0 + $0x100] sm:$0xff]  ;;  %v49_v11 = vld [vmem:[%s1262_s0 + $0x118] sm:$0xff]  ;;  %v44_v14 = vld [vmem:[%s1262_s0 + $0xf0] sm:$0xff] }
  0x1b   :  { %618 = vmatpush3.msra.mxu0 %v65_v25  ;;  %753 = vmatpush3.msra.mxu1 %v65_v25  ;;  %v45_v12 = vld [vmem:[%s1262_s0 + $0xf8] sm:$0xff]  ;;  %v55_v15 = vld [vmem:[%s1262_s0 + $0x148] sm:$0xff]  ;;  %v48_v16 = vld [vmem:[%s1262_s0 + $0x110] sm:$0xff] }
  0x1c   :  { %619 = vmatprep.subr.mxu0 %v80_v26  ;;  %738 = vmatprep.subr.mxu1 %v80_v26  ;;  %v58_v17 = vld [vmem:[%s1262_s0 + $0x160] sm:$0xff]  ;;  %v47_v18 = vld [vmem:[%s1262_s0 + $0x108] sm:$0xff]  ;;  %v61_v19 = vld [vmem:[%s1262_s0 + $0x178] sm:$0xff] }
  0x1d   :  { %620 = vmatpush3.msra.mxu0 %v64_v27  ;;  %754 = vmatpush3.msra.mxu1 %v64_v27 }
  0x1e   :  { %621 = vmatprep.subr.mxu0 %v79_v28  ;;  %739 = vmatprep.subr.mxu1 %v79_v28 }
  0x1f   :  { %622 = vmatpush3.msra.mxu0 %v63_v29  ;;  %755 = vmatpush3.msra.mxu1 %v63_v29 }
  0x20   :  { %623 = vmatprep.subr.mxu0 %v78_v30  ;;  %740 = vmatprep.subr.mxu1 %v78_v30 }
  0x21   :  { %624 = vmatpush3.msra.mxu0 %v62_v31  ;;  %756 = vmatpush3.msra.mxu1 %v62_v31 }
  0x22   :  { %218 = vmatprep.mubr.f32.mxu0 %v15_v32  ;;  %278 = vmatprep.mubr.f32.mxu1 %v51_v33 }
  0x23   :  { %219 = vmatmul.mubr.f32.vlgmr.msra.gmra.mxu0 %v14_v34  ;;  %279 = vmatmul.mubr.f32.vlgmr.msra.gmra.mxu1 %v50_v35 }
  0x24   :  { %223 = vmatprep.mubr.f32.mxu0 %v18_v36  ;;  %283 = vmatprep.mubr.f32.mxu1 %v54_v37 }
  0x25   :  { %693 = vmatprep.subr.mxu1 %v97_v38 }
  0x26   :  { %694 = vmatpush3.msra.mxu1 %v97_v38  ;;  %v1096_v38 = vld [vmem:[%s1263_s2] ss:$0 sm:$0xff] }
  0x27   :  { %224 = vmatmul.mubr.f32.gmra.mxu0 %v17_v39  ;;  %284 = vmatmul.mubr.f32.gmra.mxu1 %v53_v40 }
  0x28   :  { %228 = vmatprep.mubr.f32.mxu0 %v21_v41  ;;  %288 = vmatprep.mubr.f32.mxu1 %v57_v42 }
  0x29   :  { %695 = vmatprep.subr.mxu1 %v96_v43 }
  0x2a   :  { %696 = vmatpush3.msra.mxu1 %v96_v43 }
  0x2b   :  { %229 = vmatmul.mubr.f32.gmra.mxu0 %v20_v44  ;;  %289 = vmatmul.mubr.f32.gmra.mxu1 %v56_v45 }
  0x2c   :  { %233 = vmatprep.mubr.f32.mxu0 %v24_v46  ;;  %293 = vmatprep.mubr.f32.mxu1 %v60_v47 }
  0x2d   :  { %697 = vmatprep.subr.mxu1 %v95_v48 }
  0x2e   :  { %698 = vmatpush3.msra.mxu1 %v95_v48 }
  0x2f   :  { %234 = vmatmul.mubr.f32.gmra.mxu0 %v23_v49  ;;  %294 = vmatmul.mubr.f32.gmra.mxu1 %v59_v50 }
  0x30   :  { %699 = vmatprep.subr.mxu1 %v94_v51  ;;  %238 = vmatprep.mubr.f32.mxu0 %v27_v52 }
  0x31   :  { %700 = vmatpush3.msra.mxu1 %v94_v51  ;;  %701 = vmatprep.mubr.msk.f32.mxu1 %vm105_vm0, %v16_v53 }
  0x33   :  { %239 = vmatmul.mubr.f32.gmra.mxu0 %v26_v54  ;;  %702 = vmatmul.mubr.msk.f32.vlgmr.msra.gmra.mxu1 %vm105_vm0, %v19_v55 }
  0x34   :  { %243 = vmatprep.mubr.f32.mxu0 %v30_v56  ;;  %704 = vmatprep.mubr.msk.f32.mxu1 %vm105_vm0, %v22_v57 }
  0x37   :  { %244 = vmatmul.mubr.f32.gmra.mxu0 %v29_v58  ;;  %705 = vmatmul.mubr.msk.f32.gmra.mxu1 %vm105_vm0, %v25_v59 }
  0x38   :  { %248 = vmatprep.mubr.f32.mxu0 %v33_v60  ;;  %707 = vmatprep.mubr.msk.f32.mxu1 %vm105_vm0, %v28_v61 }
  0x3b   :  { %249 = vmatmul.mubr.f32.gmra.mxu0 %v32_v62  ;;  %708 = vmatmul.mubr.msk.f32.gmra.mxu1 %vm105_vm0, %v31_v63 }
  0x3c   :  { %253 = vmatprep.mubr.f32.mxu0 %v36_v0  ;;  %710 = vmatprep.mubr.msk.f32.mxu1 %vm105_vm0, %v34_v1 }
  0x3f   :  { %254 = vmatmul.mubr.f32.gmra.mxu0 %v35_v2  ;;  %711 = vmatmul.mubr.msk.f32.gmra.mxu1 %vm105_vm0, %v37_v3 }
  0x40   :  { %258 = vmatprep.mubr.f32.mxu0 %v39_v4  ;;  %713 = vmatprep.mubr.msk.f32.mxu1 %vm105_vm0, %v40_v5 }
  0x43   :  { %259 = vmatmul.mubr.f32.gmra.mxu0 %v38_v6  ;;  %714 = vmatmul.mubr.msk.f32.gmra.mxu1 %vm105_vm0, %v43_v7 }
  0x44   :  { %263 = vmatprep.mubr.f32.mxu0 %v42_v8  ;;  %716 = vmatprep.mubr.msk.f32.mxu1 %vm105_vm0, %v46_v9 }
  0x47   :  { %264 = vmatmul.mubr.f32.gmra.mxu0 %v41_v10  ;;  %717 = vmatmul.mubr.msk.f32.gmra.mxu1 %vm105_vm0, %v49_v11 }
  0x48   :  { %268 = vmatprep.mubr.f32.mxu0 %v45_v12  ;;  %719 = vmatprep.mubr.msk.f32.mxu1 %vm105_vm0, %v52_v13 }
  0x4b   :  { %269 = vmatmul.mubr.f32.gmra.mxu0 %v44_v14  ;;  %720 = vmatmul.mubr.msk.f32.gmra.mxu1 %vm105_vm0, %v55_v15 }
  0x4c   :  { %273 = vmatprep.mubr.f32.mxu0 %v48_v16  ;;  %722 = vmatprep.mubr.msk.f32.mxu1 %vm105_vm0, %v58_v17 }
  0x4f   :  { %274 = vmatmul.mubr.f32.gmra.mxu0 %v47_v18  ;;  %723 = vmatmul.mubr.msk.f32.gmra.mxu1 %vm105_vm0, %v61_v19 }
  0xe3   :  { %v625_v20 = vpop.f32.mrf.mxu0  ;;  %v1077_v21 = vpop.f32.mrf.mxu1 }
  0xe5   :  { %v626_v22 = vpop.f32.mrf.mxu0  ;;  %v1079_v23 = vpop.f32.mrf.mxu1 }
  0xe6   :  { %v627_v35 = vadd.f32 %v626_v22, %v625_v20 }
  0xe7   :  { %v628_v24 = vpop.f32.mrf.mxu0  ;;  %v1081_v25 = vpop.f32.mrf.mxu1 }
  0xe8   :  { %v221_v44 = vadd.f32 %v627_v35, %v1096_v38 }
  0xe9   :  { %v629_v26 = vpop.f32.mrf.mxu0  ;;  %v1083_v27 = vpop.f32.mrf.mxu1 }
  0xea   :  { %v630_v32 = vadd.f32 %v629_v26, %v628_v24 }
  0xeb   :  { %v631_v28 = vpop.f32.mrf.mxu0  ;;  %v1085_v29 = vpop.f32.mrf.mxu1 }
  0xec   :  { %v226_v40 = vadd.f32 %v630_v32, %v1096_v38 }
  0xed   :  { %v632_v30 = vpop.f32.mrf.mxu0  ;;  %v1087_v31 = vpop.f32.mrf.mxu1 }
  0xee   :  { %v633_v45 = vadd.f32 %v632_v30, %v631_v28 }
  0xef   :  { %v634_v33 = vpop.f32.mrf.mxu0  ;;  %v1089_v34 = vpop.f32.mrf.mxu1 }
  0xf0   :  { %v231_v58 = vadd.f32 %v633_v45, %v1096_v38 }
  0xf1   :  { %v635_v36 = vpop.f32.mrf.mxu0  ;;  %v1091_v37 = vpop.f32.mrf.mxu1 }
  0xf2   :  { %v636_v39 = vadd.f32 %v635_v36, %v634_v33  ;;  %v663_v33 = vadd.f32 %v1079_v23, %v1077_v21  ;;  %v669_v21 = vadd.f32 %v1087_v31, %v1085_v29 }
  0xf3   :  { %v637_v41 = vpop.f32.mrf.mxu0  ;;  %v703_v42 = vpop.f32.mrf.mxu1 }
  0xf4   :  { %v1099_v43 = vadd.f32 %v703_v42, %v226_v40  ;;  %v236_v50 = vadd.f32 %v636_v39, %v1096_v38 }
  0xf5   :  { %v638_v46 = vpop.f32.mrf.mxu0  ;;  %v365_v47 = vpop.f32.mrf.mxu1 }
  0xf6   :  { %v461_v48 = vmin.f32 %v1099_v43, 0.0  ;;  %v1103_v49 = vadd.f32 %v365_v47, %v221_v44  ;;  %v639_v54 = vadd.f32 %v638_v46, %v637_v41  ;;  %v666_v44 = vadd.f32 %v1083_v27, %v1081_v25 }
  0xf7   :  { %v640_v51 = vpop.f32.mrf.mxu0  ;;  %v706_v52 = vpop.f32.mrf.mxu1  ;;  %vm445_vm1 = vcmp.gt.f32.partialorder %v1099_v43, 0.0 }
  0xf8   :  { %v478_v53 = vmul.f32 1.442695, %v461_v48  ;;  %v460_v55 = vmin.f32 %v1103_v49, 0.0  ;;  %v1107_v56 = vadd.f32 %v706_v52, %v236_v50  ;;  %v241_v3 = vadd.f32 %v639_v54, %v1096_v38 }
  0xf9   :  { %v641_v57 = vpop.f32.mrf.mxu0  ;;  %v375_v59 = vpop.f32.mrf.mxu1  ;;  %vm444_vm2 = vcmp.gt.f32.partialorder %v1103_v49, 0.0 }
  0xfa   :  { %757 = vpow2.f32 %v478_v53  ;;  %v476_v60 = vmul.f32 1.442695, %v460_v55  ;;  %v463_v61 = vmin.f32 %v1107_v56, 0.0  ;;  %v642_v62 = vadd.f32 %v641_v57, %v640_v51 }
  0xfb   :  { %v1111_v63 = vadd.f32 %v375_v59, %v231_v58  ;;  %v643_v0 = vpop.f32.mrf.mxu0  ;;  %v709_v1 = vpop.f32.mrf.mxu1  ;;  %v281_v53 = vadd.f32 %v663_v33, %v1096_v38  ;;  %v672_v58 = vadd.f32 %v1091_v37, %v1089_v34  ;;  %v286_v59 = vadd.f32 %v666_v44, %v1096_v38 }
  0xfc   :  { %759 = vpow2.f32 %v476_v60  ;;  %v482_v2 = vmul.f32 1.442695, %v463_v61  ;;  %v246_v5 = vadd.f32 %v642_v62, %v1096_v38  ;;  %vm447_vm3 = vcmp.gt.f32.partialorder %v1107_v56, 0.0 }
  0xfd   :  { %v462_v4 = vmin.f32 %v1111_v63, 0.0  ;;  %v644_v6 = vpop.f32.mrf.mxu0  ;;  %v385_v7 = vpop.f32.mrf.mxu1  ;;  %vm446_vm4 = vcmp.gt.f32.partialorder %v1111_v63, 0.0 }
  0xfe   :  { %761 = vpow2.f32 %v482_v2  ;;  %v645_v8 = vadd.f32 %v644_v6, %v643_v0  ;;  %v1116_v9 = vadd.f32 %v385_v7, %v241_v3  ;;  %v1118_v11 = vadd.f32 %v709_v1, %v246_v5 }
  0xff   :  { %v480_v10 = vmul.f32 1.442695, %v462_v4  ;;  %v646_v12 = vpop.f32.mrf.mxu0  ;;  %v712_v13 = vpop.f32.mrf.mxu1  ;;  %v291_v2 = vadd.f32 %v669_v21, %v1096_v38 }
 0x100   :  { %v464_v14 = vmin.f32 %v1116_v9, 0.0  ;;  %v251_v15 = vadd.f32 %v645_v8, %v1096_v38  ;;  %v465_v16 = vmin.f32 %v1118_v11, 0.0  ;;  %vm448_vm5 = vcmp.gt.f32.partialorder %v1116_v9, 0.0 }
 0x101   :  { %763 = vpow2.f32 %v480_v10  ;;  %v647_v17 = vpop.f32.mrf.mxu0  ;;  %v395_v18 = vpop.f32.mrf.mxu1  ;;  %vm449_vm6 = vcmp.gt.f32.partialorder %v1118_v11, 0.0 }
 0x102   :  { %v484_v19 = vmul.f32 1.442695, %v464_v14  ;;  %v648_v20 = vadd.f32 %v647_v17, %v646_v12  ;;  %v1123_v22 = vadd.f32 %v395_v18, %v251_v15  ;;  %v486_v24 = vmul.f32 1.442695, %v465_v16 }
 0x103   :  { %v649_v26 = vpop.f32.mrf.mxu0  ;;  %v715_v28 = vpop.f32.mrf.mxu1 }
 0x104   :  { %765 = vpow2.f32 %v484_v19  ;;  %v256_v30 = vadd.f32 %v648_v20, %v1096_v38  ;;  %v466_v32 = vmin.f32 %v1123_v22, 0.0  ;;  %vm450_vm7 = vcmp.gt.f32.partialorder %v1123_v22, 0.0 }
 0x105   :  { %767 = vpow2.f32 %v486_v24  ;;  %v650_v35 = vpop.f32.mrf.mxu0  ;;  %v405_v36 = vpop.f32.mrf.mxu1 }
 0x106   :  { %v1129_v39 = vadd.f32 %v712_v13, %v256_v30  ;;  %v488_v40 = vmul.f32 1.442695, %v466_v32  ;;  %v651_v41 = vadd.f32 %v650_v35, %v649_v26  ;;  %v296_v13 = vadd.f32 %v672_v58, %v1096_v38 }
 0x107   :  { %v758_v42 = vpop.eup %757  ;;  %v652_v45 = vpop.f32.mrf.mxu0 }
 0x108   :  { %v1133_v46 = vpop.f32.mrf.mxu1  ;;  %v578_v47 = vadd.f32 -1.0, %v758_v42  ;;  %v467_v48 = vmin.f32 %v1129_v39, 0.0  ;;  %769 = vpow2.f32 %v488_v40  ;;  %v261_v23 = vadd.f32 %v651_v41, %v1096_v38 }
 0x109   :  { %v760_v50 = vpop.eup %759  ;;  %v653_v51 = vpop.f32.mrf.mxu0  ;;  %vm451_vm8 = vcmp.gt.f32.partialorder %v1129_v39, 0.0 }
 0x10a   :  { %v415_v52 = vpop.f32.mrf.mxu1  ;;  %v525_v25 = vsel %vm445_vm1, %v1099_v43, %v578_v47  ;;  %v577_v27 = vadd.f32 -1.0, %v760_v50  ;;  %v490_v54 = vmul.f32 1.442695, %v467_v48  ;;  %v654_v55 = vadd.f32 %v653_v51, %v652_v45 }
 0x10b   :  { %v762_v57 = vpop.eup %761  ;;  %541 = vst.msk [vmem:[%s1264_s3 + $0x8] sm:$0xff] %vm105_vm0, %v525_v25  ;;  %v1149_v29 = vadd.f32 %v405_v36, %v261_v23  ;;  %v655_v31 = vpop.f32.mrf.mxu0 }
 0x10c   :  { %v721_v43 = vpop.f32.mrf.mxu1  ;;  %v524_v60 = vsel %vm444_vm2, %v1103_v49, %v577_v27  ;;  %v580_v61 = vadd.f32 -1.0, %v762_v57  ;;  %771 = vpow2.f32 %v490_v54  ;;  %v266_v62 = vadd.f32 %v654_v55, %v1096_v38 }
 0x10d   :  { %540 = vst.msk [vmem:[%s1264_s3] sm:$0xff] %vm105_vm0, %v524_v60  ;;  %v468_v34 = vmin.f32 %v1149_v29, 0.0  ;;  %v1160_v37 = vadd.f32 %v721_v43, %v286_v59  ;;  %v656_v0 = vpop.f32.mrf.mxu0  ;;  %vm452_vm9 = vcmp.gt.f32.partialorder %v1149_v29, 0.0 }
 0x10e   :  { %v425_v1 = vpop.f32.mrf.mxu1  ;;  %v764_v49 = vpop.eup %763  ;;  %v527_v3 = vsel %vm447_vm3, %v1107_v56, %v580_v61  ;;  %v1164_v4 = vadd.f32 %v715_v28, %v266_v62  ;;  %v657_v5 = vadd.f32 %v656_v0, %v655_v31 }
 0x10f   :  { %v1166_v6 = vadd.f32 %v425_v1, %v281_v53  ;;  %543 = vst.msk [vmem:[%s1264_s3 + $0x18] sm:$0xff] %vm105_vm0, %v527_v3  ;;  %v579_v7 = vadd.f32 -1.0, %v764_v49  ;;  %v492_v8 = vmul.f32 1.442695, %v468_v34  ;;  %v473_v10 = vmin.f32 %v1160_v37, 0.0  ;;  %v658_v12 = vpop.f32.mrf.mxu0 }
 0x110   :  { %v724_v14 = vpop.f32.mrf.mxu1  ;;  %v469_v56 = vmin.f32 %v1164_v4, 0.0  ;;  %v271_v15 = vadd.f32 %v657_v5, %v1096_v38  ;;  %vm457_vm10 = vcmp.gt.f32.partialorder %v1160_v37, 0.0  ;;  %vm453_vm11 = vcmp.gt.f32.partialorder %v1164_v4, 0.0 }
 0x111   :  { %v766_v16 = vpop.eup %765  ;;  %v526_v17 = vsel %vm446_vm4, %v1111_v63, %v579_v7  ;;  %773 = vpow2.f32 %v492_v8  ;;  %v502_v18 = vmul.f32 1.442695, %v473_v10  ;;  %v472_v19 = vmin.f32 %v1166_v6, 0.0  ;;  %v659_v20 = vpop.f32.mrf.mxu0 }
 0x112   :  { %v768_v24 = vpop.eup %767  ;;  %542 = vst.msk [vmem:[%s1264_s3 + $0x10] sm:$0xff] %vm105_vm0, %v526_v17  ;;  %v581_v26 = vadd.f32 -1.0, %v766_v16  ;;  %v494_v28 = vmul.f32 1.442695, %v469_v56  ;;  %v1184_v30 = vadd.f32 %v415_v52, %v271_v15  ;;  %v1186_v32 = vadd.f32 %v724_v14, %v296_v13  ;;  %v435_v36 = vpop.f32.mrf.mxu1 }
 0x113   :  { %v582_v33 = vadd.f32 -1.0, %v768_v24  ;;  %775 = vpow2.f32 %v502_v18  ;;  %v500_v63 = vmul.f32 1.442695, %v472_v19  ;;  %v660_v35 = vadd.f32 %v659_v20, %v658_v12 }
 0x114   :  { %v528_v40 = vsel %vm448_vm5, %v1116_v9, %v581_v26  ;;  %777 = vpow2.f32 %v494_v28  ;;  %v470_v41 = vmin.f32 %v1184_v30, 0.0  ;;  %v475_v45 = vmin.f32 %v1186_v32, 0.0 }
 0x115   :  { %v770_v42 = vpop.eup %769  ;;  %v529_v44 = vsel %vm449_vm6, %v1118_v11, %v582_v33  ;;  %544 = vst.msk [vmem:[%s1264_s3 + $0x20] sm:$0xff] %vm105_vm0, %v528_v40  ;;  %779 = vpow2.f32 %v500_v63  ;;  %v276_v48 = vadd.f32 %v660_v35, %v1096_v38  ;;  %v436_v50 = vadd.f32 %v435_v36, %v291_v2 }
 0x116   :  { %545 = vst.msk [vmem:[%s1264_s3 + $0x28] sm:$0xff] %vm105_vm0, %v529_v44  ;;  %v583_v9 = vadd.f32 -1.0, %v770_v42  ;;  %v496_v47 = vmul.f32 1.442695, %v470_v41  ;;  %v506_v11 = vmul.f32 1.442695, %v475_v45 }
 0x117   :  { %v421_v23 = vadd.f32 %v1133_v46, %v276_v48  ;;  %v474_v52 = vmin.f32 %v436_v50, 0.0  ;;  %vm456_vm12 = vcmp.gt.f32.partialorder %v1166_v6, 0.0  ;;  %vm454_vm13 = vcmp.gt.f32.partialorder %v1184_v30, 0.0 }
 0x118   :  { %v530_v21 = vsel %vm450_vm7, %v1123_v22, %v583_v9  ;;  %781 = vpow2.f32 %v496_v47  ;;  %vm459_vm14 = vcmp.gt.f32.partialorder %v1186_v32, 0.0  ;;  %vm458_vm15 = vcmp.gt.f32.partialorder %v436_v50, 0.0 }
 0x119   :  { %v772_v51 = vpop.eup %771  ;;  %546 = vst.msk [vmem:[%s1264_s3 + $0x30] sm:$0xff] %vm105_vm0, %v530_v21  ;;  %783 = vpow2.f32 %v506_v11  ;;  %v471_v25 = vmin.f32 %v421_v23, 0.0  ;;  %v504_v38 = vmul.f32 1.442695, %v474_v52  ;;  %vm455_vm1 = vcmp.gt.f32.partialorder %v421_v23, 0.0 }
 0x11a   :  { %v584_v53 = vadd.f32 -1.0, %v772_v51 }
 0x11b   :  { %v498_v54 = vmul.f32 1.442695, %v471_v25  ;;  %785 = vpow2.f32 %v504_v38 }
 0x11c   :  { %v531_v27 = vsel %vm451_vm8, %v1129_v39, %v584_v53 }
 0x11d   :  { %547 = vst.msk [vmem:[%s1264_s3 + $0x38] sm:$0xff] %vm105_vm0, %v531_v27  ;;  %787 = vpow2.f32 %v498_v54 }
 0x11e   :  { %v774_v22 = vpop.eup %773 }
 0x11f   :  { %v585_v46 = vadd.f32 -1.0, %v774_v22 }
 0x120   :  { %v776_v55 = vpop.eup %775 }
 0x121   :  { %v778_v57 = vpop.eup %777  ;;  %v532_v58 = vsel %vm452_vm9, %v1149_v29, %v585_v46  ;;  %v590_v31 = vadd.f32 -1.0, %v776_v55 }
 0x122   :  { %v780_v59 = vpop.eup %779  ;;  %548 = vst.msk [vmem:[%s1264_s3 + $0x40] sm:$0xff] %vm105_vm0, %v532_v58  ;;  %v586_v39 = vadd.f32 -1.0, %v778_v57 }
 0x123   :  { %v537_v43 = vsel %vm457_vm10, %v1160_v37, %v590_v31  ;;  %v589_v60 = vadd.f32 -1.0, %v780_v59 }
 0x124   :  { %v533_v61 = vsel %vm453_vm11, %v1164_v4, %v586_v39  ;;  %553 = vst.msk [vmem:[%s1264_s3 + $0x68] sm:$0xff] %vm105_vm0, %v537_v43 }
 0x125   :  { %v782_v29 = vpop.eup %781  ;;  %549 = vst.msk [vmem:[%s1264_s3 + $0x48] sm:$0xff] %vm105_vm0, %v533_v61  ;;  %v536_v62 = vsel %vm456_vm12, %v1166_v6, %v589_v60 }
 0x126   :  { %v784_v34 = vpop.eup %783  ;;  %v587_v37 = vadd.f32 -1.0, %v782_v29  ;;  %552 = vst.msk [vmem:[%s1264_s3 + $0x60] sm:$0xff] %vm105_vm0, %v536_v62 }
 0x127   :  { %v592_v0 = vadd.f32 -1.0, %v784_v34 }
 0x128   :  { %v534_v1 = vsel %vm454_vm13, %v1184_v30, %v587_v37  ;;  %v786_v49 = vpop.eup %785 }
 0x129   :  { %550 = vst.msk [vmem:[%s1264_s3 + $0x50] sm:$0xff] %vm105_vm0, %v534_v1  ;;  %v539_v2 = vsel %vm459_vm14, %v1186_v32, %v592_v0  ;;  %v591_v4 = vadd.f32 -1.0, %v786_v49 }
 0x12a   :  { %555 = vst.msk [vmem:[%s1264_s3 + $0x78] sm:$0xff] %vm105_vm0, %v539_v2  ;;  %v788_v3 = vpop.eup %787 }
 0x12b   :  { %v588_v5 = vadd.f32 -1.0, %v788_v3  ;;  %v538_v6 = vsel %vm458_vm15, %v436_v50, %v591_v4 }
 0x12c   :  { %554 = vst.msk [vmem:[%s1264_s3 + $0x70] sm:$0xff] %vm105_vm0, %v538_v6 }
 0x12d   :  { %v535_v7 = vsel %vm455_vm1, %v421_v23, %v588_v5 }
 0x12e   :  { %551 = vst.msk [vmem:[%s1264_s3 + $0x58] sm:$0xff] %vm105_vm0, %v535_v7 }

// kernel: policy_net_forward.7
= control target key start
LH: loop header
LB: loop body
LE: loop exit
PB: predicated region body
PF: predicated region fallthrough
CT: control target
= control target key end

     0   :  { %vm69_vm0 = vcmask 261120   ;;  %s554_s1 = inlined_call_operand.vmem [shape: f32[288,32], index: 1, kind: input, shape index: {}]   ;;  %s555_s0 = inlined_call_operand.vmem [shape: f32[32,288], index: 0, kind: input, shape index: {}]   ;;  %s556_s2 = inlined_call_operand.vmem [shape: f32[1,32], index: 2, kind: input, shape index: {}]   ;;  %s557_s3 = inlined_call_operand.vmem [shape: f32[32,32], index: 3, kind: output, shape index: {}]  }
   0x1   :  { %v57_v0 = vld [vmem:[%s554_s1 + $0xf8] sm:$0xff]  ;;  %v56_v2 = vld [vmem:[%s554_s1 + $0xf0] sm:$0xff]  ;;  %v55_v4 = vld [vmem:[%s554_s1 + $0xe8] sm:$0xff] }
   0x2   :  { %v41_v1 = vld [vmem:[%s554_s1 + $0x78] sm:$0xff]  ;;  %293 = vmatprep.subr.mxu0 %v57_v0  ;;  %v40_v3 = vld [vmem:[%s554_s1 + $0x70] sm:$0xff]  ;;  %v39_v5 = vld [vmem:[%s554_s1 + $0x68] sm:$0xff] }
   0x3   :  { %294 = vmatpush3.msra.mxu0 %v41_v1  ;;  %v54_v6 = vld [vmem:[%s554_s1 + $0xe0] sm:$0xff]  ;;  %v53_v8 = vld [vmem:[%s554_s1 + $0xd8] sm:$0xff]  ;;  %v52_v10 = vld [vmem:[%s554_s1 + $0xd0] sm:$0xff] }
   0x4   :  { %295 = vmatprep.subr.mxu0 %v56_v2  ;;  %v38_v7 = vld [vmem:[%s554_s1 + $0x60] sm:$0xff]  ;;  %v37_v9 = vld [vmem:[%s554_s1 + $0x58] sm:$0xff]  ;;  %v36_v11 = vld [vmem:[%s554_s1 + $0x50] sm:$0xff] }
   0x5   :  { %296 = vmatpush3.msra.mxu0 %v40_v3  ;;  %v61_v12 = vld [vmem:[%s554_s1 + $0x118] sm:$0xff]  ;;  %v51_v13 = vld [vmem:[%s554_s1 + $0xc8] sm:$0xff]  ;;  %v60_v14 = vld [vmem:[%s554_s1 + $0x110] sm:$0xff] }
   0x6   :  { %297 = vmatprep.subr.mxu0 %v55_v4  ;;  %345 = vmatprep.subr.mxu1 %v61_v12  ;;  %v35_v15 = vld [vmem:[%s554_s1 + $0x48] sm:$0xff]  ;;  %v50_v17 = vld [vmem:[%s554_s1 + $0xc0] sm:$0xff]  ;;  %v49_v20 = vld [vmem:[%s554_s1 + $0xb8] sm:$0xff] }
   0x7   :  { %298 = vmatpush3.msra.mxu0 %v39_v5  ;;  %346 = vmatpush3.msra.mxu1 %v61_v12  ;;  %v15_v16 = vld [vmem:[%s555_s0 + $0x8] sm:$0xff]  ;;  %v34_v19 = vld [vmem:[%s554_s1 + $0x40] sm:$0xff]  ;;  %v33_v22 = vld [vmem:[%s554_s1 + $0x38] sm:$0xff] }
   0x8   :  { %299 = vmatprep.subr.mxu0 %v54_v6  ;;  %347 = vmatprep.subr.mxu1 %v60_v14  ;;  %v59_v18 = vld [vmem:[%s554_s1 + $0x108] sm:$0xff]  ;;  %v58_v21 = vld [vmem:[%s554_s1 + $0x100] sm:$0xff]  ;;  %v48_v23 = vld [vmem:[%s554_s1 + $0xb0] sm:$0xff] }
   0x9   :  { %300 = vmatpush3.msra.mxu0 %v38_v7  ;;  %146 = vmatprep.mubr.f32.mxu0 %v15_v16  ;;  %v16_v24 = vld [vmem:[%s555_s0 + $0x10] sm:$0xff]  ;;  %v19_v26 = vld [vmem:[%s555_s0 + $0x28] sm:$0xff]  ;;  %v22_v28 = vld [vmem:[%s555_s0 + $0x40] sm:$0xff] }
   0xa   :  { %301 = vmatprep.subr.mxu0 %v53_v8  ;;  %348 = vmatpush3.msra.mxu1 %v60_v14  ;;  %v32_v25 = vld [vmem:[%s554_s1 + $0x30] sm:$0xff]  ;;  %v47_v27 = vld [vmem:[%s554_s1 + $0xa8] sm:$0xff]  ;;  %v46_v30 = vld [vmem:[%s554_s1 + $0xa0] sm:$0xff] }
   0xb   :  { %302 = vmatpush3.msra.mxu0 %v37_v9  ;;  %349 = vmatprep.subr.mxu1 %v59_v18  ;;  %v31_v29 = vld [vmem:[%s554_s1 + $0x28] sm:$0xff]  ;;  %v30_v31 = vld [vmem:[%s554_s1 + $0x20] sm:$0xff]  ;;  %v25_v32 = vld [vmem:[%s555_s0 + $0x58] sm:$0xff] }
   0xc   :  { %303 = vmatprep.subr.mxu0 %v52_v10  ;;  %350 = vmatpush3.msra.mxu1 %v59_v18  ;;  %v45_v33 = vld [vmem:[%s554_s1 + $0x98] sm:$0xff]  ;;  %v44_v35 = vld [vmem:[%s554_s1 + $0x90] sm:$0xff]  ;;  %v43_v37 = vld [vmem:[%s554_s1 + $0x88] sm:$0xff] }
   0xd   :  { %304 = vmatpush3.msra.mxu0 %v36_v11  ;;  %351 = vmatprep.subr.mxu1 %v58_v21  ;;  %v29_v34 = vld [vmem:[%s554_s1 + $0x18] sm:$0xff]  ;;  %v28_v36 = vld [vmem:[%s554_s1 + $0x10] sm:$0xff]  ;;  %v27_v38 = vld [vmem:[%s554_s1 + $0x8] sm:$0xff] }
   0xe   :  { %305 = vmatprep.subr.mxu0 %v51_v13  ;;  %352 = vmatpush3.msra.mxu1 %v58_v21  ;;  %v42_v39 = vld [vmem:[%s554_s1 + $0x80] sm:$0xff]  ;;  %v17_v43 = vld [vmem:[%s555_s0 + $0x18] sm:$0xff]  ;;  %v20_v45 = vld [vmem:[%s555_s0 + $0x30] sm:$0xff] }
   0xf   :  { %306 = vmatpush3.msra.mxu0 %v35_v15  ;;  %353 = vmatprep.mubr.msk.f32.mxu1 %vm69_vm0, %v16_v24  ;;  %v26_v40 = vld [vmem:[%s554_s1] sm:$0xff]  ;;  %v21_v44 = vld [vmem:[%s555_s0 + $0x38] sm:$0xff]  ;;  %v24_v46 = vld [vmem:[%s555_s0 + $0x50] sm:$0xff] }
  0x10   :  { %307 = vmatprep.subr.mxu0 %v50_v17  ;;  %354 = vmatmul.mubr.msk.f32.vlgmr.msra.gmra.mxu1 %vm69_vm0, %v19_v26  ;;  %v14_v41 = vld [vmem:[%s555_s0] sm:$0xff]  ;;  %v23_v47 = vld [vmem:[%s555_s0 + $0x48] sm:$0xff] }
  0x11   :  { %308 = vmatpush3.msra.mxu0 %v34_v19  ;;  %356 = vmatprep.mubr.msk.f32.mxu1 %vm69_vm0, %v22_v28  ;;  %v18_v42 = vld [vmem:[%s555_s0 + $0x20] sm:$0xff] }
  0x12   :  { %309 = vmatprep.subr.mxu0 %v49_v20  ;;  %v284_v51 = vld [vmem:[%s556_s2] ss:$0 sm:$0xff] }
  0x13   :  { %310 = vmatpush3.msra.mxu0 %v33_v22 }
  0x14   :  { %311 = vmatprep.subr.mxu0 %v48_v23  ;;  %357 = vmatmul.mubr.msk.f32.gmra.mxu1 %vm69_vm0, %v25_v32 }
  0x15   :  { %312 = vmatpush3.msra.mxu0 %v32_v25 }
  0x16   :  { %313 = vmatprep.subr.mxu0 %v47_v27 }
  0x17   :  { %314 = vmatpush3.msra.mxu0 %v31_v29 }
  0x18   :  { %315 = vmatprep.subr.mxu0 %v46_v30 }
  0x19   :  { %316 = vmatpush3.msra.mxu0 %v30_v31 }
  0x1a   :  { %317 = vmatprep.subr.mxu0 %v45_v33 }
  0x1b   :  { %318 = vmatpush3.msra.mxu0 %v29_v34 }
  0x1c   :  { %319 = vmatprep.subr.mxu0 %v44_v35 }
  0x1d   :  { %320 = vmatpush3.msra.mxu0 %v28_v36 }
  0x1e   :  { %321 = vmatprep.subr.mxu0 %v43_v37 }
  0x1f   :  { %322 = vmatpush3.msra.mxu0 %v27_v38 }
  0x20   :  { %323 = vmatprep.subr.mxu0 %v42_v39 }
  0x21   :  { %324 = vmatpush3.msra.mxu0 %v26_v40 }
  0x22   :  { %147 = vmatmul.mubr.f32.vlgmr.msra.gmra.mxu0 %v14_v41 }
  0x23   :  { %151 = vmatprep.mubr.f32.mxu0 %v18_v42 }
  0x26   :  { %152 = vmatmul.mubr.f32.gmra.mxu0 %v17_v43 }
  0x27   :  { %156 = vmatprep.mubr.f32.mxu0 %v21_v44 }
  0x2a   :  { %157 = vmatmul.mubr.f32.gmra.mxu0 %v20_v45 }
  0x2b   :  { %161 = vmatprep.mubr.f32.mxu0 %v24_v46 }
  0x2e   :  { %162 = vmatmul.mubr.f32.gmra.mxu0 %v23_v47 }
  0xd0   :  { %v355_v49 = vpop.f32.mrf.mxu1 }
  0xd2   :  { %v233_v54 = vpop.f32.mrf.mxu1 }
  0xd4   :  { %v358_v60 = vpop.f32.mrf.mxu1 }
  0xd6   :  { %v243_v4 = vpop.f32.mrf.mxu1 }
  0xe2   :  { %v325_v48 = vpop.f32.mrf.mxu0 }
  0xe4   :  { %v326_v50 = vpop.f32.mrf.mxu0 }
  0xe5   :  { %v327_v52 = vadd.f32 %v326_v50, %v325_v48 }
  0xe6   :  { %v328_v53 = vpop.f32.mrf.mxu0 }
  0xe7   :  { %v149_v55 = vadd.f32 %v327_v52, %v284_v51 }
  0xe8   :  { %v329_v56 = vpop.f32.mrf.mxu0 }
  0xe9   :  { %v330_v57 = vadd.f32 %v329_v56, %v328_v53  ;;  %v234_v58 = vadd.f32 %v233_v54, %v149_v55 }
  0xea   :  { %v331_v59 = vpop.f32.mrf.mxu0 }
  0xeb   :  { %v154_v61 = vadd.f32 %v330_v57, %v284_v51  ;;  %v256_v62 = vmin.f32 %v234_v58, 0.0  ;;  %vm252_vm1 = vcmp.gt.f32.partialorder %v234_v58, 0.0 }
  0xec   :  { %v332_v63 = vpop.f32.mrf.mxu0 }
  0xed   :  { %v239_v0 = vadd.f32 %v355_v49, %v154_v61  ;;  %v260_v1 = vmul.f32 1.442695, %v256_v62  ;;  %v333_v2 = vadd.f32 %v332_v63, %v331_v59 }
  0xee   :  { %v334_v3 = vpop.f32.mrf.mxu0 }
  0xef   :  { %v257_v5 = vmin.f32 %v239_v0, 0.0  ;;  %359 = vpow2.f32 %v260_v1  ;;  %v159_v6 = vadd.f32 %v333_v2, %v284_v51  ;;  %vm253_vm2 = vcmp.gt.f32.partialorder %v239_v0, 0.0 }
  0xf0   :  { %v335_v7 = vpop.f32.mrf.mxu0 }
  0xf1   :  { %v262_v8 = vmul.f32 1.442695, %v257_v5  ;;  %v336_v9 = vadd.f32 %v335_v7, %v334_v3  ;;  %v244_v10 = vadd.f32 %v243_v4, %v159_v6 }
  0xf3   :  { %361 = vpow2.f32 %v262_v8  ;;  %v164_v11 = vadd.f32 %v336_v9, %v284_v51  ;;  %v258_v12 = vmin.f32 %v244_v10, 0.0  ;;  %vm254_vm3 = vcmp.gt.f32.partialorder %v244_v10, 0.0 }
  0xf5   :  { %v249_v13 = vadd.f32 %v358_v60, %v164_v11  ;;  %v264_v14 = vmul.f32 1.442695, %v258_v12 }
  0xf7   :  { %v259_v15 = vmin.f32 %v249_v13, 0.0  ;;  %363 = vpow2.f32 %v264_v14  ;;  %vm255_vm4 = vcmp.gt.f32.partialorder %v249_v13, 0.0 }
  0xf9   :  { %v266_v16 = vmul.f32 1.442695, %v259_v15 }
  0xfb   :  { %365 = vpow2.f32 %v266_v16 }
  0xfc   :  { %v360_v17 = vpop.eup %359 }
  0xfd   :  { %v289_v18 = vadd.f32 -1.0, %v360_v17 }
  0xff   :  { %v272_v19 = vsel %vm252_vm1, %v234_v58, %v289_v18 }
 0x100   :  { %v362_v20 = vpop.eup %361  ;;  %276 = vst.msk [vmem:[%s557_s3] sm:$0xff] %vm69_vm0, %v272_v19 }
 0x101   :  { %v290_v21 = vadd.f32 -1.0, %v362_v20 }
 0x103   :  { %v273_v22 = vsel %vm253_vm2, %v239_v0, %v290_v21 }
 0x104   :  { %v364_v23 = vpop.eup %363  ;;  %277 = vst.msk [vmem:[%s557_s3 + $0x8] sm:$0xff] %vm69_vm0, %v273_v22 }
 0x105   :  { %v291_v24 = vadd.f32 -1.0, %v364_v23 }
 0x107   :  { %v274_v25 = vsel %vm254_vm3, %v244_v10, %v291_v24 }
 0x108   :  { %v366_v26 = vpop.eup %365  ;;  %278 = vst.msk [vmem:[%s557_s3 + $0x10] sm:$0xff] %vm69_vm0, %v274_v25 }
 0x109   :  { %v292_v27 = vadd.f32 -1.0, %v366_v26 }
 0x10b   :  { %v275_v28 = vsel %vm255_vm4, %v249_v13, %v292_v27 }
 0x10c   :  { %279 = vst.msk [vmem:[%s557_s3 + $0x18] sm:$0xff] %vm69_vm0, %v275_v28 }

// kernel: squeeze.1
= control target key start
LH: loop header
LB: loop body
LE: loop exit
PB: predicated region body
PF: predicated region fallthrough
CT: control target
= control target key end

     0   :  { %s40_s8 = smov 122   ;;  %vm8_vm0 = vcmask 15360   ;;  %s41_s9 = smov 124   ;;  %s58_s0 = inlined_call_operand.vmem [shape: f32[8], index: 0, kind: input, shape index: {}]   ;;  %s59_s1 = inlined_call_operand.vmem [shape: f32[4,2], index: 1, kind: output, shape index: {}]  }
   0x1   :  { %v5_v0 = vld [vmem:[%s58_s0] sm:$0x1]  ;;  %s39_s0 = smov 126  }
   0x2   :  { %6 = vst [vmem:[#allocation1] sm:$0x1] %v5_v0 }
   0x9   :  { %v10_v1 = vld [vmem:[#allocation1] sm:$0x1]  }
   0xa   :  { %v22_v2 = vld [vmem:[#allocation1] sm:$0x1]   ;;  %11 = vrot.lane.b32.xlu0 %v10_v1, %s39_s0 }
   0xb   :  { %23 = vrot.lane.b32.xlu1 %v22_v2, %s40_s8  ;;  %v7_v3 = vld [vmem:[#allocation1] sm:$0x1]  }
   0xc   :  { %v16_v4 = vld [vmem:[#allocation1] sm:$0x1]   ;;  %9 = vst.msk [vmem:[#allocation0] sm:$0x1] %vm8_vm0, %v7_v3  }
   0xe   :  { %17 = vrot.lane.b32.xlu0 %v16_v4, %s41_s9 }
  0x7c   :  { %v12_v5 = vpop.permute.xlu0 %11  }
  0x7d   :  { %v24_v6 = vpop.permute.xlu1 %23   ;;  %15 = vst.msk [vmem:[#allocation0 + $0x1] sm:$0x1] %vm8_vm0, %v12_v5  }
  0x7e   :  { %27 = vst.msk [vmem:[#allocation0 + $0x3] sm:$0x1] %vm8_vm0, %v24_v6  }
  0x80   :  { %v18_v7 = vpop.permute.xlu0 %17  }
  0x81   :  { %21 = vst.msk [vmem:[#allocation0 + $0x2] sm:$0x1] %vm8_vm0, %v18_v7  }
  0x88   :  { %v32_v8 = vld [vmem:[#allocation0] sm:$0xf] }
  0x89   :  { %35 = vst [vmem:[%s59_s1] sm:$0xf] %v32_v8 }

// kernel: policy_net_forward.8
= control target key start
LH: loop header
LB: loop body
LE: loop exit
PB: predicated region body
PF: predicated region fallthrough
CT: control target
= control target key end

     0   :  { %v930_v4 = vmov 0.0   ;;  %s2099_s0 = inlined_call_operand.vmem [shape: f32[8,128], index: 0, kind: input, shape index: {}]   ;;  %s2100_s1 = inlined_call_operand.vmem [shape: f32[128,256], index: 1, kind: input, shape index: {}]   ;;  %s2101_s2 = inlined_call_operand.vmem [shape: f32[1,256], index: 2, kind: input, shape index: {}]   ;;  %s2102_s3 = inlined_call_operand.vmem [shape: f32[256,256], index: 3, kind: input, shape index: {}]   ;;  %s2103_s4 = inlined_call_operand.vmem [shape: f32[1,256], index: 4, kind: input, shape index: {}]   ;;  %s2104_s5 = inlined_call_operand.vmem [shape: f32[256,1024], index: 5, kind: input, shape index: {}]   ;;  %s2105_s6 = inlined_call_operand.vmem [shape: f32[1,1024], index: 6, kind: input, shape index: {}]   ;;  %s2106_s7 = inlined_call_operand.hbm [shape: f32[8,256], index: 7, kind: output, shape index: {0}]   ;;  %s2107_s8 = inlined_call_operand.vmem [shape: f32[8,1024], index: 8, kind: output, shape index: {1}]  }
   0x1   :  { %v61_v0 = vld [vmem:[%s2100_s1 + $0xf8] sm:$0xff]  ;;  %v60_v1 = vld [vmem:[%s2100_s1 + $0xf0] sm:$0xff]  ;;  %v59_v2 = vld [vmem:[%s2100_s1 + $0xe8] sm:$0xff]  ;;  %138 = vmatprep.mubr.f32.mxu0 %v930_v4 }
   0x2   :  { %74 = vmatprep.subr.mxu0 %v61_v0  ;;  %v58_v3 = vld [vmem:[%s2100_s1 + $0xe0] sm:$0xff]  ;;  %v57_v5 = vld [vmem:[%s2100_s1 + $0xd8] sm:$0xff]  ;;  %v56_v6 = vld [vmem:[%s2100_s1 + $0xd0] sm:$0xff] }
   0x3   :  { %75 = vmatpush1.msra.mxu0 %v60_v1  ;;  %v55_v7 = vld [vmem:[%s2100_s1 + $0xc8] sm:$0xff]  ;;  %v54_v8 = vld [vmem:[%s2100_s1 + $0xc0] sm:$0xff]  ;;  %v53_v9 = vld [vmem:[%s2100_s1 + $0xb8] sm:$0xff] }
   0x4   :  { %76 = vmatprep.subr.mxu0 %v59_v2  ;;  %v52_v10 = vld [vmem:[%s2100_s1 + $0xb0] sm:$0xff]  ;;  %v51_v11 = vld [vmem:[%s2100_s1 + $0xa8] sm:$0xff]  ;;  %v50_v12 = vld [vmem:[%s2100_s1 + $0xa0] sm:$0xff] }
   0x5   :  { %77 = vmatpush1.msra.mxu0 %v58_v3  ;;  %v49_v13 = vld [vmem:[%s2100_s1 + $0x98] sm:$0xff]  ;;  %v48_v14 = vld [vmem:[%s2100_s1 + $0x90] sm:$0xff]  ;;  %v176_v17 = vld [vmem:[%s2102_s3 + $0xe8] sm:$0xff] }
   0x6   :  { %78 = vmatprep.subr.mxu0 %v57_v5  ;;  %v178_v15 = vld [vmem:[%s2102_s3 + $0xf8] sm:$0xff]  ;;  %v177_v16 = vld [vmem:[%s2102_s3 + $0xf0] sm:$0xff]  ;;  %v47_v18 = vld [vmem:[%s2100_s1 + $0x88] sm:$0xff] }
   0x7   :  { %79 = vmatpush1.msra.mxu0 %v56_v6  ;;  %223 = vmatprep.subr.mxu1 %v178_v15  ;;  %v175_v19 = vld [vmem:[%s2102_s3 + $0xe0] sm:$0xff]  ;;  %v174_v21 = vld [vmem:[%s2102_s3 + $0xd8] sm:$0xff]  ;;  %v173_v23 = vld [vmem:[%s2102_s3 + $0xd0] sm:$0xff] }
   0x8   :  { %80 = vmatprep.subr.mxu0 %v55_v7  ;;  %v46_v20 = vld [vmem:[%s2100_s1 + $0x80] sm:$0xff]  ;;  %224 = vmatpush1.msra.mxu1 %v177_v16  ;;  %v45_v22 = vld [vmem:[%s2100_s1 + $0x78] sm:$0xff]  ;;  %v44_v24 = vld [vmem:[%s2100_s1 + $0x70] sm:$0xff] }
   0x9   :  { %81 = vmatpush1.msra.mxu0 %v54_v8  ;;  %225 = vmatprep.subr.mxu1 %v176_v17  ;;  %v172_v25 = vld [vmem:[%s2102_s3 + $0xc8] sm:$0xff]  ;;  %v171_v27 = vld [vmem:[%s2102_s3 + $0xc0] sm:$0xff]  ;;  %v170_v29 = vld [vmem:[%s2102_s3 + $0xb8] sm:$0xff] }
   0xa   :  { %82 = vmatprep.subr.mxu0 %v53_v9  ;;  %226 = vmatpush1.msra.mxu1 %v175_v19  ;;  %v43_v26 = vld [vmem:[%s2100_s1 + $0x68] sm:$0xff]  ;;  %v42_v28 = vld [vmem:[%s2100_s1 + $0x60] sm:$0xff]  ;;  %v41_v30 = vld [vmem:[%s2100_s1 + $0x58] sm:$0xff] }
   0xb   :  { %83 = vmatpush1.msra.mxu0 %v52_v10  ;;  %227 = vmatprep.subr.mxu1 %v174_v21  ;;  %v169_v31 = vld [vmem:[%s2102_s3 + $0xb0] sm:$0xff]  ;;  %v168_v33 = vld [vmem:[%s2102_s3 + $0xa8] sm:$0xff]  ;;  %v167_v35 = vld [vmem:[%s2102_s3 + $0xa0] sm:$0xff] }
   0xc   :  { %84 = vmatprep.subr.mxu0 %v51_v11  ;;  %228 = vmatpush1.msra.mxu1 %v173_v23  ;;  %v40_v32 = vld [vmem:[%s2100_s1 + $0x50] sm:$0xff]  ;;  %v39_v34 = vld [vmem:[%s2100_s1 + $0x48] sm:$0xff]  ;;  %v38_v36 = vld [vmem:[%s2100_s1 + $0x40] sm:$0xff] }
   0xd   :  { %85 = vmatpush1.msra.mxu0 %v50_v12  ;;  %229 = vmatprep.subr.mxu1 %v172_v25  ;;  %v166_v37 = vld [vmem:[%s2102_s3 + $0x98] sm:$0xff]  ;;  %v165_v39 = vld [vmem:[%s2102_s3 + $0x90] sm:$0xff]  ;;  %v164_v41 = vld [vmem:[%s2102_s3 + $0x88] sm:$0xff] }
   0xe   :  { %86 = vmatprep.subr.mxu0 %v49_v13  ;;  %230 = vmatpush1.msra.mxu1 %v171_v27  ;;  %v37_v38 = vld [vmem:[%s2100_s1 + $0x38] sm:$0xff]  ;;  %v36_v40 = vld [vmem:[%s2100_s1 + $0x30] sm:$0xff]  ;;  %v35_v42 = vld [vmem:[%s2100_s1 + $0x28] sm:$0xff] }
   0xf   :  { %87 = vmatpush1.msra.mxu0 %v48_v14  ;;  %231 = vmatprep.subr.mxu1 %v170_v29  ;;  %v163_v43 = vld [vmem:[%s2102_s3 + $0x80] sm:$0xff]  ;;  %v162_v45 = vld [vmem:[%s2102_s3 + $0x78] sm:$0xff]  ;;  %v161_v47 = vld [vmem:[%s2102_s3 + $0x70] sm:$0xff] }
  0x10   :  { %88 = vmatprep.subr.mxu0 %v47_v18  ;;  %232 = vmatpush1.msra.mxu1 %v169_v31  ;;  %v34_v44 = vld [vmem:[%s2100_s1 + $0x20] sm:$0xff]  ;;  %v33_v46 = vld [vmem:[%s2100_s1 + $0x18] sm:$0xff]  ;;  %v32_v48 = vld [vmem:[%s2100_s1 + $0x10] sm:$0xff] }
  0x11   :  { %89 = vmatpush1.msra.mxu0 %v46_v20  ;;  %233 = vmatprep.subr.mxu1 %v168_v33  ;;  %v160_v49 = vld [vmem:[%s2102_s3 + $0x68] sm:$0xff]  ;;  %v159_v51 = vld [vmem:[%s2102_s3 + $0x60] sm:$0xff]  ;;  %v158_v53 = vld [vmem:[%s2102_s3 + $0x58] sm:$0xff] }
  0x12   :  { %90 = vmatprep.subr.mxu0 %v45_v22  ;;  %234 = vmatpush1.msra.mxu1 %v167_v35  ;;  %v31_v50 = vld [vmem:[%s2100_s1 + $0x8] sm:$0xff]  ;;  %v30_v52 = vld [vmem:[%s2100_s1] sm:$0xff]  ;;  %v157_v55 = vld [vmem:[%s2102_s3 + $0x50] sm:$0xff] }
  0x13   :  { %91 = vmatpush1.msra.mxu0 %v44_v24  ;;  %235 = vmatprep.subr.mxu1 %v166_v37  ;;  %v29_v54 = vld [vmem:[%s2099_s0] sm:$0xff] }
  0x14   :  { %92 = vmatprep.subr.mxu0 %v43_v26  ;;  %236 = vmatpush1.msra.mxu1 %v165_v39 }
  0x15   :  { %93 = vmatpush1.msra.mxu0 %v42_v28  ;;  %237 = vmatprep.subr.mxu1 %v164_v41 }
  0x16   :  { %94 = vmatprep.subr.mxu0 %v41_v30  ;;  %238 = vmatpush1.msra.mxu1 %v163_v43 }
  0x17   :  { %95 = vmatpush1.msra.mxu0 %v40_v32  ;;  %239 = vmatprep.subr.mxu1 %v162_v45 }
  0x18   :  { %96 = vmatprep.subr.mxu0 %v39_v34  ;;  %240 = vmatpush1.msra.mxu1 %v161_v47 }
  0x19   :  { %97 = vmatpush1.msra.mxu0 %v38_v36  ;;  %241 = vmatprep.subr.mxu1 %v160_v49 }
  0x1a   :  { %98 = vmatprep.subr.mxu0 %v37_v38 }
  0x1b   :  { %99 = vmatpush1.msra.mxu0 %v36_v40 }
  0x1c   :  { %100 = vmatprep.subr.mxu0 %v35_v42 }
  0x1d   :  { %101 = vmatpush1.msra.mxu0 %v34_v44 }
  0x1e   :  { %102 = vmatprep.subr.mxu0 %v33_v46 }
  0x1f   :  { %103 = vmatpush1.msra.mxu0 %v32_v48 }
  0x20   :  { %14 = vsyncpa [#allocation3], 0  ;;  %104 = vmatprep.subr.mxu0 %v31_v50  ;;  %242 = vmatpush1.msra.mxu1 %v159_v51  ;;  %v156_v56 = vld [vmem:[%s2102_s3 + $0x48] sm:$0xff]  ;;  %v155_v57 = vld [vmem:[%s2102_s3 + $0x40] sm:$0xff]  ;;  %s931_s29 = smov [#allocation2]  }
  0x21   :  { %105 = vmatpush1.msra.mxu0 %v30_v52  ;;  %243 = vmatprep.subr.mxu1 %v158_v53  ;;  %v154_v58 = vld [vmem:[%s2102_s3 + $0x38] sm:$0xff]  ;;  %v153_v59 = vld [vmem:[%s2102_s3 + $0x30] sm:$0xff]  ;;  %v152_v60 = vld [vmem:[%s2102_s3 + $0x28] sm:$0xff]  ;;  %s894_s0 = sshll.u32 %s931_s29, 4  ;;  %s895_s0 = int_to_ptr.vmem [resolvable:$true] %s894_s0 }
  0x22   :  { %139 = vmatmul.mubr.f32.vlgmr.msra.gmra.mxu0 %v29_v54  ;;  %244 = vmatpush1.msra.mxu1 %v157_v55  ;;  %v151_v61 = vld [vmem:[%s2102_s3 + $0x20] sm:$0xff]  ;;  %v150_v62 = vld [vmem:[%s2102_s3 + $0x18] sm:$0xff]  ;;  %v149_v63 = vld [vmem:[%s2102_s3 + $0x10] sm:$0xff]  ;;  %s908_s30 = scalar_lea.vmem %s895_s0, 256  ;;  %p913_p1 = scmp.lt.s32.totalorder %s895_s0, %s895_s0 }
  0x23   :  { %245 = vmatprep.subr.mxu1 %v156_v56  ;;  %v148_v0 = vld [vmem:[%s2102_s3 + $0x8] sm:$0xff]  ;;  %v147_v1 = vld [vmem:[%s2102_s3] sm:$0xff]  ;;  %v210_v2 = vld [vmem:[%s2102_s3 + $0x1f8] sm:$0xff]  ;;  %p909_p0 = scmp.ne.s32.totalorder %s895_s0, %s908_s30  ;;  %p914_p2 = scmp.lt.s32.totalorder %s908_s30, %s908_s30 }
  0x24   :  { %246 = vmatpush1.msra.mxu1 %v155_v57  ;;  %v209_v3 = vld [vmem:[%s2102_s3 + $0x1f0] sm:$0xff]  ;;  %v208_v4 = vld [vmem:[%s2102_s3 + $0x1e8] sm:$0xff]  ;;  %v207_v5 = vld [vmem:[%s2102_s3 + $0x1e0] sm:$0xff] }
  0x25   :  { %247 = vmatprep.subr.mxu1 %v154_v58  ;;  %v206_v6 = vld [vmem:[%s2102_s3 + $0x1d8] sm:$0xff]  ;;  %v205_v7 = vld [vmem:[%s2102_s3 + $0x1d0] sm:$0xff]  ;;  %v204_v8 = vld [vmem:[%s2102_s3 + $0x1c8] sm:$0xff]  ;;  %p915_p3 = por %p914_p2, %p913_p1 }
  0x26   :  { %248 = vmatpush1.msra.mxu1 %v153_v59  ;;  %v203_v9 = vld [vmem:[%s2102_s3 + $0x1c0] sm:$0xff]  ;;  %v202_v10 = vld [vmem:[%s2102_s3 + $0x1b8] sm:$0xff]  ;;  %v201_v11 = vld [vmem:[%s2102_s3 + $0x1b0] sm:$0xff] }
  0x27   :  { %249 = vmatprep.subr.mxu1 %v152_v60  ;;  %v200_v12 = vld [vmem:[%s2102_s3 + $0x1a8] sm:$0xff]  ;;  %v199_v13 = vld [vmem:[%s2102_s3 + $0x1a0] sm:$0xff]  ;;  %v198_v14 = vld [vmem:[%s2102_s3 + $0x198] sm:$0xff]  ;;  %p916_p4 = pnand %p915_p3, %p909_p0 }
  0x28   :  { %250 = vmatpush1.msra.mxu1 %v151_v61  ;;  %v197_v15 = vld [vmem:[%s2102_s3 + $0x190] sm:$0xff]  ;;  %v196_v16 = vld [vmem:[%s2102_s3 + $0x188] sm:$0xff]  ;;  %v195_v17 = vld [vmem:[%s2102_s3 + $0x180] sm:$0xff] }
  0x29   :  { %251 = vmatprep.subr.mxu1 %v150_v62  ;;  %v194_v18 = vld [vmem:[%s2102_s3 + $0x178] sm:$0xff]  ;;  %v193_v19 = vld [vmem:[%s2102_s3 + $0x170] sm:$0xff]  ;;  %v192_v20 = vld [vmem:[%s2102_s3 + $0x168] sm:$0xff] }
  0x2a   :  { %252 = vmatpush1.msra.mxu1 %v149_v63  ;;  %v191_v21 = vld [vmem:[%s2102_s3 + $0x160] sm:$0xff]  ;;  %v190_v22 = vld [vmem:[%s2102_s3 + $0x158] sm:$0xff]  ;;  %v189_v23 = vld [vmem:[%s2102_s3 + $0x150] sm:$0xff] }
  0x2b   :  { %253 = vmatprep.subr.mxu1 %v148_v0  ;;  %v188_v24 = vld [vmem:[%s2102_s3 + $0x148] sm:$0xff]  ;;  %v187_v25 = vld [vmem:[%s2102_s3 + $0x140] sm:$0xff]  ;;  %v186_v26 = vld [vmem:[%s2102_s3 + $0x138] sm:$0xff] }
  0x2c   :  { %254 = vmatpush1.msra.mxu1 %v147_v1  ;;  %v185_v27 = vld [vmem:[%s2102_s3 + $0x130] sm:$0xff]  ;;  %v184_v28 = vld [vmem:[%s2102_s3 + $0x128] sm:$0xff]  ;;  %v183_v29 = vld [vmem:[%s2102_s3 + $0x120] sm:$0xff] }
  0x2d   :  { %255 = vmatprep.subr.mxu1 %v210_v2  ;;  %v182_v30 = vld [vmem:[%s2102_s3 + $0x118] sm:$0xff]  ;;  %v181_v31 = vld [vmem:[%s2102_s3 + $0x110] sm:$0xff]  ;;  %v180_v32 = vld [vmem:[%s2102_s3 + $0x108] sm:$0xff] }
  0x2e   :  { %256 = vmatpush2.msra.mxu1 %v209_v3  ;;  %v179_v33 = vld [vmem:[%s2102_s3 + $0x100] sm:$0xff]  ;;  %v419_v34 = vld [vmem:[%s2104_s5 + $0x3c8] sm:$0xff]  ;;  %v421_v35 = vld [vmem:[%s2104_s5 + $0x3d8] sm:$0xff] }
  0x2f   :  { %257 = vmatprep.subr.mxu1 %v208_v4  ;;  %v418_v36 = vld [vmem:[%s2104_s5 + $0x3c0] sm:$0xff]  ;;  %596 = vmatprep.subr.mxu0 %v419_v34  ;;  %v411_v37 = vld [vmem:[%s2104_s5 + $0x388] sm:$0xff] }
  0x30   :  { %258 = vmatpush2.msra.mxu1 %v207_v5  ;;  %597 = vmatpush1.msra.mxu0 %v418_v36  ;;  %v410_v38 = vld [vmem:[%s2104_s5 + $0x380] sm:$0xff]  ;;  %v403_v39 = vld [vmem:[%s2104_s5 + $0x348] sm:$0xff] }
  0x31   :  { %259 = vmatprep.subr.mxu1 %v206_v6  ;;  %598 = vmatprep.subr.mxu0 %v411_v37  ;;  %v402_v40 = vld [vmem:[%s2104_s5 + $0x340] sm:$0xff]  ;;  %v395_v41 = vld [vmem:[%s2104_s5 + $0x308] sm:$0xff] }
  0x32   :  { %260 = vmatpush2.msra.mxu1 %v205_v7  ;;  %599 = vmatpush1.msra.mxu0 %v410_v38  ;;  %v394_v42 = vld [vmem:[%s2104_s5 + $0x300] sm:$0xff]  ;;  %v387_v43 = vld [vmem:[%s2104_s5 + $0x2c8] sm:$0xff] }
  0x33   :  { %261 = vmatprep.subr.mxu1 %v204_v8  ;;  %600 = vmatprep.subr.mxu0 %v403_v39  ;;  %v386_v44 = vld [vmem:[%s2104_s5 + $0x2c0] sm:$0xff]  ;;  %v379_v45 = vld [vmem:[%s2104_s5 + $0x288] sm:$0xff] }
  0x34   :  { %262 = vmatpush2.msra.mxu1 %v203_v9  ;;  %601 = vmatpush1.msra.mxu0 %v402_v40  ;;  %v378_v46 = vld [vmem:[%s2104_s5 + $0x280] sm:$0xff]  ;;  %v371_v47 = vld [vmem:[%s2104_s5 + $0x248] sm:$0xff] }
  0x35   :  { %263 = vmatprep.subr.mxu1 %v202_v10  ;;  %602 = vmatprep.subr.mxu0 %v395_v41  ;;  %v370_v48 = vld [vmem:[%s2104_s5 + $0x240] sm:$0xff]  ;;  %v363_v49 = vld [vmem:[%s2104_s5 + $0x208] sm:$0xff]  ;;  %v420_v41 = vld [vmem:[%s2104_s5 + $0x3d0] sm:$0xff] }
  0x36   :  { %264 = vmatpush2.msra.mxu1 %v201_v11  ;;  %603 = vmatpush1.msra.mxu0 %v394_v42  ;;  %v362_v50 = vld [vmem:[%s2104_s5 + $0x200] sm:$0xff]  ;;  %v355_v51 = vld [vmem:[%s2104_s5 + $0x1c8] sm:$0xff]  ;;  %v413_v42 = vld [vmem:[%s2104_s5 + $0x398] sm:$0xff] }
  0x37   :  { %265 = vmatprep.subr.mxu1 %v200_v12  ;;  %604 = vmatprep.subr.mxu0 %v387_v43  ;;  %v354_v52 = vld [vmem:[%s2104_s5 + $0x1c0] sm:$0xff]  ;;  %v347_v53 = vld [vmem:[%s2104_s5 + $0x188] sm:$0xff]  ;;  %v412_v43 = vld [vmem:[%s2104_s5 + $0x390] sm:$0xff] }
  0x38   :  { %266 = vmatpush2.msra.mxu1 %v199_v13  ;;  %605 = vmatpush1.msra.mxu0 %v386_v44  ;;  %v346_v54 = vld [vmem:[%s2104_s5 + $0x180] sm:$0xff]  ;;  %v339_v55 = vld [vmem:[%s2104_s5 + $0x148] sm:$0xff]  ;;  %v405_v44 = vld [vmem:[%s2104_s5 + $0x358] sm:$0xff] }
  0x39   :  { %267 = vmatprep.subr.mxu1 %v198_v14  ;;  %606 = vmatprep.subr.mxu0 %v379_v45  ;;  %v338_v56 = vld [vmem:[%s2104_s5 + $0x140] sm:$0xff]  ;;  %v331_v57 = vld [vmem:[%s2104_s5 + $0x108] sm:$0xff]  ;;  %v404_v45 = vld [vmem:[%s2104_s5 + $0x350] sm:$0xff] }
  0x3a   :  { %268 = vmatpush2.msra.mxu1 %v197_v15  ;;  %607 = vmatpush1.msra.mxu0 %v378_v46  ;;  %v330_v58 = vld [vmem:[%s2104_s5 + $0x100] sm:$0xff]  ;;  %v323_v59 = vld [vmem:[%s2104_s5 + $0xc8] sm:$0xff]  ;;  %v397_v46 = vld [vmem:[%s2104_s5 + $0x318] sm:$0xff] }
  0x3b   :  { %269 = vmatprep.subr.mxu1 %v196_v16  ;;  %608 = vmatprep.subr.mxu0 %v371_v47  ;;  %v322_v60 = vld [vmem:[%s2104_s5 + $0xc0] sm:$0xff]  ;;  %v315_v61 = vld [vmem:[%s2104_s5 + $0x88] sm:$0xff]  ;;  %v396_v47 = vld [vmem:[%s2104_s5 + $0x310] sm:$0xff] }
  0x3c   :  { %270 = vmatpush2.msra.mxu1 %v195_v17  ;;  %609 = vmatpush1.msra.mxu0 %v370_v48  ;;  %v314_v62 = vld [vmem:[%s2104_s5 + $0x80] sm:$0xff]  ;;  %v307_v63 = vld [vmem:[%s2104_s5 + $0x48] sm:$0xff]  ;;  %v389_v48 = vld [vmem:[%s2104_s5 + $0x2d8] sm:$0xff] }
  0x3d   :  { %271 = vmatprep.subr.mxu1 %v194_v18  ;;  %610 = vmatprep.subr.mxu0 %v363_v49  ;;  %v306_v0 = vld [vmem:[%s2104_s5 + $0x40] sm:$0xff]  ;;  %v299_v1 = vld [vmem:[%s2104_s5 + $0x8] sm:$0xff]  ;;  %v388_v49 = vld [vmem:[%s2104_s5 + $0x2d0] sm:$0xff] }
  0x3e   :  { %272 = vmatpush2.msra.mxu1 %v193_v19  ;;  %611 = vmatpush1.msra.mxu0 %v362_v50  ;;  %v298_v2 = vld [vmem:[%s2104_s5] sm:$0xff]  ;;  %v547_v3 = vld [vmem:[%s2104_s5 + $0x7c8] sm:$0xff]  ;;  %v381_v50 = vld [vmem:[%s2104_s5 + $0x298] sm:$0xff] }
  0x3f   :  { %273 = vmatprep.subr.mxu1 %v192_v20  ;;  %612 = vmatprep.subr.mxu0 %v355_v51  ;;  %v546_v4 = vld [vmem:[%s2104_s5 + $0x7c0] sm:$0xff]  ;;  %v539_v5 = vld [vmem:[%s2104_s5 + $0x788] sm:$0xff]  ;;  %v380_v51 = vld [vmem:[%s2104_s5 + $0x290] sm:$0xff] }
  0x40   :  { %274 = vmatpush2.msra.mxu1 %v191_v21  ;;  %613 = vmatpush1.msra.mxu0 %v354_v52  ;;  %v538_v6 = vld [vmem:[%s2104_s5 + $0x780] sm:$0xff]  ;;  %v531_v7 = vld [vmem:[%s2104_s5 + $0x748] sm:$0xff]  ;;  %v373_v52 = vld [vmem:[%s2104_s5 + $0x258] sm:$0xff] }
  0x41   :  { %275 = vmatprep.subr.mxu1 %v190_v22  ;;  %614 = vmatprep.subr.mxu0 %v347_v53  ;;  %v530_v8 = vld [vmem:[%s2104_s5 + $0x740] sm:$0xff]  ;;  %v523_v9 = vld [vmem:[%s2104_s5 + $0x708] sm:$0xff]  ;;  %v372_v53 = vld [vmem:[%s2104_s5 + $0x250] sm:$0xff] }
  0x42   :  { %276 = vmatpush2.msra.mxu1 %v189_v23  ;;  %615 = vmatpush1.msra.mxu0 %v346_v54  ;;  %v522_v10 = vld [vmem:[%s2104_s5 + $0x700] sm:$0xff]  ;;  %v515_v11 = vld [vmem:[%s2104_s5 + $0x6c8] sm:$0xff]  ;;  %v365_v54 = vld [vmem:[%s2104_s5 + $0x218] sm:$0xff] }
  0x43   :  { %277 = vmatprep.subr.mxu1 %v188_v24  ;;  %616 = vmatprep.subr.mxu0 %v339_v55  ;;  %v514_v12 = vld [vmem:[%s2104_s5 + $0x6c0] sm:$0xff]  ;;  %v507_v13 = vld [vmem:[%s2104_s5 + $0x688] sm:$0xff]  ;;  %v364_v55 = vld [vmem:[%s2104_s5 + $0x210] sm:$0xff] }
  0x44   :  { %278 = vmatpush2.msra.mxu1 %v187_v25  ;;  %617 = vmatpush1.msra.mxu0 %v338_v56  ;;  %v506_v14 = vld [vmem:[%s2104_s5 + $0x680] sm:$0xff]  ;;  %v499_v15 = vld [vmem:[%s2104_s5 + $0x648] sm:$0xff]  ;;  %v357_v56 = vld [vmem:[%s2104_s5 + $0x1d8] sm:$0xff] }
  0x45   :  { %279 = vmatprep.subr.mxu1 %v186_v26  ;;  %618 = vmatprep.subr.mxu0 %v331_v57  ;;  %v498_v16 = vld [vmem:[%s2104_s5 + $0x640] sm:$0xff]  ;;  %v491_v17 = vld [vmem:[%s2104_s5 + $0x608] sm:$0xff]  ;;  %v356_v57 = vld [vmem:[%s2104_s5 + $0x1d0] sm:$0xff] }
  0x46   :  { %280 = vmatpush2.msra.mxu1 %v185_v27  ;;  %619 = vmatpush1.msra.mxu0 %v330_v58  ;;  %v490_v18 = vld [vmem:[%s2104_s5 + $0x600] sm:$0xff]  ;;  %v483_v19 = vld [vmem:[%s2104_s5 + $0x5c8] sm:$0xff]  ;;  %v349_v58 = vld [vmem:[%s2104_s5 + $0x198] sm:$0xff] }
  0x47   :  { %281 = vmatprep.subr.mxu1 %v184_v28  ;;  %620 = vmatprep.subr.mxu0 %v323_v59  ;;  %v482_v20 = vld [vmem:[%s2104_s5 + $0x5c0] sm:$0xff]  ;;  %v475_v21 = vld [vmem:[%s2104_s5 + $0x588] sm:$0xff]  ;;  %v64_v28 = vlaneseq  ;;  %v348_v59 = vld [vmem:[%s2104_s5 + $0x190] sm:$0xff] }
  0x48   :  { %282 = vmatpush2.msra.mxu1 %v183_v29  ;;  %621 = vmatpush1.msra.mxu0 %v322_v60  ;;  %v474_v22 = vld [vmem:[%s2104_s5 + $0x580] sm:$0xff]  ;;  %v467_v23 = vld [vmem:[%s2104_s5 + $0x548] sm:$0xff]  ;;  %v341_v60 = vld [vmem:[%s2104_s5 + $0x158] sm:$0xff] }
  0x49   :  { %283 = vmatprep.subr.mxu1 %v182_v30  ;;  %622 = vmatprep.subr.mxu0 %v315_v61  ;;  %v466_v24 = vld [vmem:[%s2104_s5 + $0x540] sm:$0xff]  ;;  %v459_v25 = vld [vmem:[%s2104_s5 + $0x508] sm:$0xff]  ;;  %v1442_v29 = vshrl.u32 %v64_v28, 7  ;;  %v340_v61 = vld [vmem:[%s2104_s5 + $0x150] sm:$0xff] }
  0x4a   :  { %284 = vmatpush2.msra.mxu1 %v181_v31  ;;  %623 = vmatpush1.msra.mxu0 %v314_v62  ;;  %v458_v26 = vld [vmem:[%s2104_s5 + $0x500] sm:$0xff]  ;;  %v451_v27 = vld [vmem:[%s2104_s5 + $0x4c8] sm:$0xff]  ;;  %v333_v62 = vld [vmem:[%s2104_s5 + $0x118] sm:$0xff] }
  0x4b   :  { %285 = vmatprep.subr.mxu1 %v180_v32  ;;  %624 = vmatprep.subr.mxu0 %v307_v63  ;;  %v1445_v30 = vsub.s32 0, %v1442_v29  ;;  %v62_v31 = vld [vmem:[%s2101_s2] sm:$0x3]  ;;  %v1451_v32 = vsub.s32 1, %v1442_v29  ;;  %v332_v63 = vld [vmem:[%s2104_s5 + $0x110] sm:$0xff]  ;;  %v469_v28 = vld [vmem:[%s2104_s5 + $0x558] sm:$0xff] }
  0x4c   :  { %286 = vmatpush2.msra.mxu1 %v179_v33  ;;  %625 = vmatpush1.msra.mxu0 %v306_v0  ;;  %v325_v0 = vld [vmem:[%s2104_s5 + $0xd8] sm:$0xff] }
  0x4d   :  { %667 = vmatprep.subr.mxu1 %v421_v35  ;;  %626 = vmatprep.subr.mxu0 %v299_v1  ;;  %v67_v33 = vrot.slane %v62_v31, %v1445_v30  ;;  %v71_v34 = vrot.slane %v62_v31, %v1451_v32  ;;  %v324_v1 = vld [vmem:[%s2104_s5 + $0xd0] sm:$0xff] }
  0x4e   :  { %627 = vmatpush1.msra.mxu0 %v298_v2  ;;  %v317_v2 = vld [vmem:[%s2104_s5 + $0x98] sm:$0xff]  ;;  %v468_v31 = vld [vmem:[%s2104_s5 + $0x550] sm:$0xff] }
  0x4f   :  { %628 = vmatprep.subr.mxu0 %v547_v3  ;;  %v316_v3 = vld [vmem:[%s2104_s5 + $0x90] sm:$0xff] }
  0x50   :  { %629 = vmatpush2.msra.mxu0 %v546_v4  ;;  %v309_v4 = vld [vmem:[%s2104_s5 + $0x58] sm:$0xff] }
  0x51   :  { %630 = vmatprep.subr.mxu0 %v539_v5  ;;  %v308_v5 = vld [vmem:[%s2104_s5 + $0x50] sm:$0xff] }
  0x52   :  { %631 = vmatpush2.msra.mxu0 %v538_v6  ;;  %v301_v6 = vld [vmem:[%s2104_s5 + $0x18] sm:$0xff] }
  0x53   :  { %632 = vmatprep.subr.mxu0 %v531_v7  ;;  %v300_v7 = vld [vmem:[%s2104_s5 + $0x10] sm:$0xff] }
  0x54   :  { %633 = vmatpush2.msra.mxu0 %v530_v8  ;;  %v549_v8 = vld [vmem:[%s2104_s5 + $0x7d8] sm:$0xff] }
  0x55   :  { %634 = vmatprep.subr.mxu0 %v523_v9  ;;  %v548_v9 = vld [vmem:[%s2104_s5 + $0x7d0] sm:$0xff] }
  0x56   :  { %635 = vmatpush2.msra.mxu0 %v522_v10  ;;  %v541_v10 = vld [vmem:[%s2104_s5 + $0x798] sm:$0xff] }
  0x57   :  { %636 = vmatprep.subr.mxu0 %v515_v11  ;;  %v540_v11 = vld [vmem:[%s2104_s5 + $0x790] sm:$0xff] }
  0x58   :  { %637 = vmatpush2.msra.mxu0 %v514_v12  ;;  %v533_v12 = vld [vmem:[%s2104_s5 + $0x758] sm:$0xff] }
  0x59   :  { %638 = vmatprep.subr.mxu0 %v507_v13  ;;  %v532_v13 = vld [vmem:[%s2104_s5 + $0x750] sm:$0xff] }
  0x5a   :  { %639 = vmatpush2.msra.mxu0 %v506_v14  ;;  %v525_v14 = vld [vmem:[%s2104_s5 + $0x718] sm:$0xff] }
  0x5b   :  { %640 = vmatprep.subr.mxu0 %v499_v15  ;;  %v524_v15 = vld [vmem:[%s2104_s5 + $0x710] sm:$0xff] }
  0x5c   :  { %641 = vmatpush2.msra.mxu0 %v498_v16  ;;  %v517_v16 = vld [vmem:[%s2104_s5 + $0x6d8] sm:$0xff] }
  0x5d   :  { %642 = vmatprep.subr.mxu0 %v491_v17  ;;  %v516_v17 = vld [vmem:[%s2104_s5 + $0x6d0] sm:$0xff] }
  0x5e   :  { %643 = vmatpush2.msra.mxu0 %v490_v18  ;;  %v509_v18 = vld [vmem:[%s2104_s5 + $0x698] sm:$0xff] }
  0x5f   :  { %644 = vmatprep.subr.mxu0 %v483_v19  ;;  %v508_v19 = vld [vmem:[%s2104_s5 + $0x690] sm:$0xff] }
  0x60   :  { %645 = vmatpush2.msra.mxu0 %v482_v20  ;;  %v501_v20 = vld [vmem:[%s2104_s5 + $0x658] sm:$0xff] }
  0x61   :  { %646 = vmatprep.subr.mxu0 %v475_v21  ;;  %v500_v21 = vld [vmem:[%s2104_s5 + $0x650] sm:$0xff] }
  0x62   :  { %647 = vmatpush2.msra.mxu0 %v474_v22  ;;  %v493_v22 = vld [vmem:[%s2104_s5 + $0x618] sm:$0xff] }
  0x63   :  { %648 = vmatprep.subr.mxu0 %v467_v23  ;;  %v492_v23 = vld [vmem:[%s2104_s5 + $0x610] sm:$0xff] }
  0x64   :  { %649 = vmatpush2.msra.mxu0 %v466_v24  ;;  %v485_v24 = vld [vmem:[%s2104_s5 + $0x5d8] sm:$0xff] }
  0x65   :  { %650 = vmatprep.subr.mxu0 %v459_v25  ;;  %v484_v25 = vld [vmem:[%s2104_s5 + $0x5d0] sm:$0xff] }
  0x66   :  { %651 = vmatpush2.msra.mxu0 %v458_v26  ;;  %v477_v26 = vld [vmem:[%s2104_s5 + $0x598] sm:$0xff] }
  0x67   :  { %652 = vmatprep.subr.mxu0 %v451_v27  ;;  %v476_v27 = vld [vmem:[%s2104_s5 + $0x590] sm:$0xff] }
  0xe2   :  { %v140_v35 = vpop.f32.mrf.mxu0 }
  0xe3   :  { %v141_v36 = vadd.f32 %v140_v35, %v67_v33  ;;  %v461_v33 = vld [vmem:[%s2104_s5 + $0x518] sm:$0xff] }
  0xe4   :  { %v142_v37 = vpop.f32.mrf.mxu0  ;;  %v453_v35 = vld [vmem:[%s2104_s5 + $0x4d8] sm:$0xff] }
  0xe5   :  { %v143_v38 = vadd.f32 %v142_v37, %v71_v34  ;;  %v145_v40 = vmax.f32 %v141_v36, 0.0  ;;  %v460_v34 = vld [vmem:[%s2104_s5 + $0x510] sm:$0xff]  ;;  %v450_v36 = vld [vmem:[%s2104_s5 + $0x4c0] sm:$0xff] }
  0xe6   :  { %v452_v37 = vld [vmem:[%s2104_s5 + $0x4d0] sm:$0xff]  ;;  %653 = vmatpush2.msra.mxu0 %v450_v36  ;;  %v350_v36 = vld [vmem:[%s2104_s5 + $0x1a0] sm:$0xff] }
  0xe7   :  { %v146_v39 = vmax.f32 %v143_v38, 0.0  ;;  %v443_v38 = vld [vmem:[%s2104_s5 + $0x488] sm:$0xff] }
  0xe8   :  { %654 = vmatprep.subr.mxu0 %v443_v38  ;;  %v343_v38 = vld [vmem:[%s2104_s5 + $0x168] sm:$0xff] }
  0xe9   :  { %287 = vmatprep.mubr.f32.mxu1 %v146_v39  ;;  %v445_v39 = vld [vmem:[%s2104_s5 + $0x498] sm:$0xff] }
  0xea   :  { %288 = vmatmul.mubr.f32.vlgmr.msra.gmra.mxu1 %v145_v40  ;;  %v442_v40 = vld [vmem:[%s2104_s5 + $0x480] sm:$0xff] }
  0xeb   :  { %668 = vmatpush1.msra.mxu1 %v420_v41  ;;  %v444_v41 = vld [vmem:[%s2104_s5 + $0x490] sm:$0xff]  ;;  %655 = vmatpush2.msra.mxu0 %v442_v40  ;;  %v342_v40 = vld [vmem:[%s2104_s5 + $0x160] sm:$0xff] }
  0xec   :  { %669 = vmatprep.subr.mxu1 %v413_v42  ;;  %v435_v42 = vld [vmem:[%s2104_s5 + $0x448] sm:$0xff] }
  0xed   :  { %670 = vmatpush1.msra.mxu1 %v412_v43  ;;  %v437_v43 = vld [vmem:[%s2104_s5 + $0x458] sm:$0xff]  ;;  %656 = vmatprep.subr.mxu0 %v435_v42  ;;  %v335_v42 = vld [vmem:[%s2104_s5 + $0x128] sm:$0xff] }
  0xee   :  { %671 = vmatprep.subr.mxu1 %v405_v44  ;;  %v434_v44 = vld [vmem:[%s2104_s5 + $0x440] sm:$0xff] }
  0xef   :  { %672 = vmatpush1.msra.mxu1 %v404_v45  ;;  %v436_v45 = vld [vmem:[%s2104_s5 + $0x450] sm:$0xff]  ;;  %657 = vmatpush2.msra.mxu0 %v434_v44  ;;  %v334_v44 = vld [vmem:[%s2104_s5 + $0x120] sm:$0xff] }
  0xf0   :  { %673 = vmatprep.subr.mxu1 %v397_v46  ;;  %v427_v46 = vld [vmem:[%s2104_s5 + $0x408] sm:$0xff] }
  0xf1   :  { %674 = vmatpush1.msra.mxu1 %v396_v47  ;;  %v429_v47 = vld [vmem:[%s2104_s5 + $0x418] sm:$0xff]  ;;  %658 = vmatprep.subr.mxu0 %v427_v46  ;;  %v327_v46 = vld [vmem:[%s2104_s5 + $0xe8] sm:$0xff] }
  0xf2   :  { %675 = vmatprep.subr.mxu1 %v389_v48  ;;  %v426_v48 = vld [vmem:[%s2104_s5 + $0x400] sm:$0xff] }
  0xf3   :  { %676 = vmatpush1.msra.mxu1 %v388_v49  ;;  %v428_v49 = vld [vmem:[%s2104_s5 + $0x410] sm:$0xff]  ;;  %659 = vmatpush2.msra.mxu0 %v426_v48  ;;  %v326_v48 = vld [vmem:[%s2104_s5 + $0xe0] sm:$0xff] }
  0xf4   :  { %677 = vmatprep.subr.mxu1 %v381_v50  ;;  %v423_v50 = vld [vmem:[%s2104_s5 + $0x3e8] sm:$0xff] }
  0xf5   :  { %678 = vmatpush1.msra.mxu1 %v380_v51  ;;  %v425_v51 = vld [vmem:[%s2104_s5 + $0x3f8] sm:$0xff]  ;;  %738 = vmatprep.subr.mxu0 %v423_v50  ;;  %v319_v50 = vld [vmem:[%s2104_s5 + $0xa8] sm:$0xff] }
  0xf6   :  { %679 = vmatprep.subr.mxu1 %v373_v52  ;;  %v211_v52 = vld [vmem:[%s2103_s4] sm:$0x3] }
  0xf7   :  { %680 = vmatpush1.msra.mxu1 %v372_v53  ;;  %v216_v53 = vrot.slane %v211_v52, %v1445_v30 }
  0xf8   :  { %681 = vmatprep.subr.mxu1 %v365_v54  ;;  %v220_v54 = vrot.slane %v211_v52, %v1451_v32  ;;  %v318_v52 = vld [vmem:[%s2104_s5 + $0xa0] sm:$0xff] }
  0xf9   :  { %682 = vmatpush1.msra.mxu1 %v364_v55 }
  0xfa   :  { %683 = vmatprep.subr.mxu1 %v357_v56 }
  0xfb   :  { %684 = vmatpush1.msra.mxu1 %v356_v57 }
  0xfc   :  { %685 = vmatprep.subr.mxu1 %v349_v58 }
  0xfd   :  { %686 = vmatpush1.msra.mxu1 %v348_v59 }
  0xfe   :  { %687 = vmatprep.subr.mxu1 %v341_v60 }
  0xff   :  { %688 = vmatpush1.msra.mxu1 %v340_v61  ;;  %v422_v61 = vld [vmem:[%s2104_s5 + $0x3e0] sm:$0xff] }
 0x100   :  { %689 = vmatprep.subr.mxu1 %v333_v62  ;;  %v424_v62 = vld [vmem:[%s2104_s5 + $0x3f0] sm:$0xff] }
 0x101   :  { %690 = vmatpush1.msra.mxu1 %v332_v63  ;;  %v415_v63 = vld [vmem:[%s2104_s5 + $0x3a8] sm:$0xff] }
 0x102   :  { %691 = vmatprep.subr.mxu1 %v325_v0  ;;  %v417_v0 = vld [vmem:[%s2104_s5 + $0x3b8] sm:$0xff] }
 0x103   :  { %692 = vmatpush1.msra.mxu1 %v324_v1  ;;  %v414_v1 = vld [vmem:[%s2104_s5 + $0x3a0] sm:$0xff] }
 0x104   :  { %693 = vmatprep.subr.mxu1 %v317_v2  ;;  %v416_v2 = vld [vmem:[%s2104_s5 + $0x3b0] sm:$0xff] }
 0x105   :  { %694 = vmatpush1.msra.mxu1 %v316_v3  ;;  %v407_v3 = vld [vmem:[%s2104_s5 + $0x368] sm:$0xff] }
 0x106   :  { %695 = vmatprep.subr.mxu1 %v309_v4  ;;  %v409_v4 = vld [vmem:[%s2104_s5 + $0x378] sm:$0xff] }
 0x107   :  { %696 = vmatpush1.msra.mxu1 %v308_v5  ;;  %v406_v5 = vld [vmem:[%s2104_s5 + $0x360] sm:$0xff] }
 0x108   :  { %697 = vmatprep.subr.mxu1 %v301_v6  ;;  %v408_v6 = vld [vmem:[%s2104_s5 + $0x370] sm:$0xff] }
 0x109   :  { %698 = vmatpush1.msra.mxu1 %v300_v7  ;;  %v399_v7 = vld [vmem:[%s2104_s5 + $0x328] sm:$0xff] }
 0x10a   :  { %699 = vmatprep.subr.mxu1 %v549_v8  ;;  %v401_v8 = vld [vmem:[%s2104_s5 + $0x338] sm:$0xff] }
 0x10b   :  { %700 = vmatpush2.msra.mxu1 %v548_v9  ;;  %v398_v9 = vld [vmem:[%s2104_s5 + $0x320] sm:$0xff] }
 0x10c   :  { %701 = vmatprep.subr.mxu1 %v541_v10  ;;  %v400_v10 = vld [vmem:[%s2104_s5 + $0x330] sm:$0xff] }
 0x10d   :  { %702 = vmatpush2.msra.mxu1 %v540_v11  ;;  %v391_v11 = vld [vmem:[%s2104_s5 + $0x2e8] sm:$0xff] }
 0x10e   :  { %703 = vmatprep.subr.mxu1 %v533_v12  ;;  %v393_v12 = vld [vmem:[%s2104_s5 + $0x2f8] sm:$0xff] }
 0x10f   :  { %704 = vmatpush2.msra.mxu1 %v532_v13  ;;  %v390_v13 = vld [vmem:[%s2104_s5 + $0x2e0] sm:$0xff] }
 0x110   :  { %705 = vmatprep.subr.mxu1 %v525_v14  ;;  %v392_v14 = vld [vmem:[%s2104_s5 + $0x2f0] sm:$0xff] }
 0x111   :  { %706 = vmatpush2.msra.mxu1 %v524_v15  ;;  %v383_v15 = vld [vmem:[%s2104_s5 + $0x2a8] sm:$0xff] }
 0x112   :  { %707 = vmatprep.subr.mxu1 %v517_v16  ;;  %v385_v16 = vld [vmem:[%s2104_s5 + $0x2b8] sm:$0xff] }
 0x113   :  { %708 = vmatpush2.msra.mxu1 %v516_v17  ;;  %v382_v17 = vld [vmem:[%s2104_s5 + $0x2a0] sm:$0xff] }
 0x114   :  { %709 = vmatprep.subr.mxu1 %v509_v18  ;;  %v384_v18 = vld [vmem:[%s2104_s5 + $0x2b0] sm:$0xff] }
 0x115   :  { %710 = vmatpush2.msra.mxu1 %v508_v19  ;;  %v375_v19 = vld [vmem:[%s2104_s5 + $0x268] sm:$0xff] }
 0x116   :  { %711 = vmatprep.subr.mxu1 %v501_v20  ;;  %v377_v20 = vld [vmem:[%s2104_s5 + $0x278] sm:$0xff] }
 0x117   :  { %712 = vmatpush2.msra.mxu1 %v500_v21  ;;  %v374_v21 = vld [vmem:[%s2104_s5 + $0x260] sm:$0xff] }
 0x118   :  { %713 = vmatprep.subr.mxu1 %v493_v22  ;;  %v376_v22 = vld [vmem:[%s2104_s5 + $0x270] sm:$0xff] }
 0x119   :  { %714 = vmatpush2.msra.mxu1 %v492_v23  ;;  %v367_v23 = vld [vmem:[%s2104_s5 + $0x228] sm:$0xff] }
 0x11a   :  { %715 = vmatprep.subr.mxu1 %v485_v24  ;;  %v369_v24 = vld [vmem:[%s2104_s5 + $0x238] sm:$0xff] }
 0x11b   :  { %716 = vmatpush2.msra.mxu1 %v484_v25  ;;  %v366_v25 = vld [vmem:[%s2104_s5 + $0x220] sm:$0xff] }
 0x11c   :  { %717 = vmatprep.subr.mxu1 %v477_v26  ;;  %v368_v26 = vld [vmem:[%s2104_s5 + $0x230] sm:$0xff] }
 0x11d   :  { %718 = vmatpush2.msra.mxu1 %v476_v27  ;;  %v359_v27 = vld [vmem:[%s2104_s5 + $0x1e8] sm:$0xff] }
 0x11e   :  { %719 = vmatprep.subr.mxu1 %v469_v28  ;;  %v361_v28 = vld [vmem:[%s2104_s5 + $0x1f8] sm:$0xff] }
 0x11f   :  { %720 = vmatpush2.msra.mxu1 %v468_v31  ;;  %v358_v31 = vld [vmem:[%s2104_s5 + $0x1e0] sm:$0xff] }
 0x120   :  { %721 = vmatprep.subr.mxu1 %v461_v33  ;;  %v360_v33 = vld [vmem:[%s2104_s5 + $0x1f0] sm:$0xff] }
 0x121   :  { %722 = vmatpush2.msra.mxu1 %v460_v34  ;;  %v351_v34 = vld [vmem:[%s2104_s5 + $0x1a8] sm:$0xff] }
 0x122   :  { %723 = vmatprep.subr.mxu1 %v453_v35  ;;  %v353_v35 = vld [vmem:[%s2104_s5 + $0x1b8] sm:$0xff] }
 0x123   :  { %724 = vmatpush2.msra.mxu1 %v452_v37  ;;  %v352_v37 = vld [vmem:[%s2104_s5 + $0x1b0] sm:$0xff] }
 0x124   :  { %725 = vmatprep.subr.mxu1 %v445_v39  ;;  %v345_v39 = vld [vmem:[%s2104_s5 + $0x178] sm:$0xff] }
 0x125   :  { %726 = vmatpush2.msra.mxu1 %v444_v41  ;;  %v344_v41 = vld [vmem:[%s2104_s5 + $0x170] sm:$0xff] }
 0x126   :  { %727 = vmatprep.subr.mxu1 %v437_v43  ;;  %v337_v43 = vld [vmem:[%s2104_s5 + $0x138] sm:$0xff] }
 0x127   :  { %728 = vmatpush2.msra.mxu1 %v436_v45  ;;  %v336_v45 = vld [vmem:[%s2104_s5 + $0x130] sm:$0xff] }
 0x128   :  { %729 = vmatprep.subr.mxu1 %v429_v47  ;;  %v329_v47 = vld [vmem:[%s2104_s5 + $0xf8] sm:$0xff] }
 0x129   :  { %730 = vmatpush2.msra.mxu1 %v428_v49  ;;  %v328_v49 = vld [vmem:[%s2104_s5 + $0xf0] sm:$0xff] }
 0x12a   :  { %809 = vmatprep.subr.mxu1 %v425_v51  ;;  %v321_v51 = vld [vmem:[%s2104_s5 + $0xb8] sm:$0xff] }
 0x1aa   :  { %v289_v55 = vpop.f32.mrf.mxu1 }
 0x1ab   :  { %v290_v56 = vadd.f32 %v289_v55, %v216_v53  ;;  %v320_v53 = vld [vmem:[%s2104_s5 + $0xb0] sm:$0xff]  ;;  %v313_v55 = vld [vmem:[%s2104_s5 + $0x78] sm:$0xff] }
 0x1ac   :  { %v291_v57 = vpop.f32.mrf.mxu1 }
 0x1ad   :  { %v1676_v58 = vmax.f32 %v290_v56, 0.0  ;;  %v292_v59 = vadd.f32 %v291_v57, %v220_v54  ;;  %v311_v54 = vld [vmem:[%s2104_s5 + $0x68] sm:$0xff]  ;;  %v310_v56 = vld [vmem:[%s2104_s5 + $0x60] sm:$0xff]  ;;  %v312_v57 = vld [vmem:[%s2104_s5 + $0x70] sm:$0xff] }
 0x1af   :  { %296 = vst [vmem:[#allocation2] sm:$0xff] %v1676_v58  ;;  %v295_v60 = vmax.f32 %v292_v59, 0.0  ;;  %v303_v59 = vld [vmem:[%s2104_s5 + $0x28] sm:$0xff] }
 0x1b1   :  { %297 = vst [vmem:[#allocation2 + $0x8] sm:$0xff] %v295_v60  ;;  %660 = vmatprep.mubr.f32.mxu0 %v295_v60  ;;  %731 = vmatprep.mubr.f32.mxu1 %v295_v60 }
 0x1b2   :  { %661 = vmatmul.mubr.f32.vlgmr.msra.gmra.mxu0 %v1676_v58  ;;  %732 = vmatmul.mubr.f32.vlgmr.msra.gmra.mxu1 %v1676_v58 }
 0x1b3   :  { %739 = vmatpush1.msra.mxu0 %v422_v61  ;;  %810 = vmatpush1.msra.mxu1 %v424_v62  ;;  %v302_v61 = vld [vmem:[%s2104_s5 + $0x20] sm:$0xff]  ;;  %v304_v62 = vld [vmem:[%s2104_s5 + $0x30] sm:$0xff] }
 0x1b4   :  { %740 = vmatprep.subr.mxu0 %v415_v63  ;;  %802 = vmatprep.mubr.f32.mxu0 %v295_v60  ;;  %v551_v63 = vld [vmem:[%s2104_s5 + $0x7e8] sm:$0xff] }
 0x1b5   :  { %811 = vmatprep.subr.mxu1 %v417_v0  ;;  %873 = vmatprep.mubr.f32.mxu1 %v295_v60  ;;  %v305_v60 = vld [vmem:[%s2104_s5 + $0x38] sm:$0xff] }
 0x1b6   :  { %741 = vmatpush1.msra.mxu0 %v414_v1  ;;  %812 = vmatpush1.msra.mxu1 %v416_v2  ;;  %v553_v0 = vld [vmem:[%s2104_s5 + $0x7f8] sm:$0xff]  ;;  %v550_v1 = vld [vmem:[%s2104_s5 + $0x7e0] sm:$0xff]  ;;  %v552_v2 = vld [vmem:[%s2104_s5 + $0x7f0] sm:$0xff] }
 0x1b7   :  { %742 = vmatprep.subr.mxu0 %v407_v3  ;;  %813 = vmatprep.subr.mxu1 %v409_v4  ;;  %v543_v3 = vld [vmem:[%s2104_s5 + $0x7a8] sm:$0xff]  ;;  %v545_v4 = vld [vmem:[%s2104_s5 + $0x7b8] sm:$0xff] }
 0x1b8   :  { %743 = vmatpush1.msra.mxu0 %v406_v5  ;;  %814 = vmatpush1.msra.mxu1 %v408_v6  ;;  %v542_v5 = vld [vmem:[%s2104_s5 + $0x7a0] sm:$0xff]  ;;  %v544_v6 = vld [vmem:[%s2104_s5 + $0x7b0] sm:$0xff] }
 0x1b9   :  { %744 = vmatprep.subr.mxu0 %v399_v7  ;;  %815 = vmatprep.subr.mxu1 %v401_v8  ;;  %v535_v7 = vld [vmem:[%s2104_s5 + $0x768] sm:$0xff]  ;;  %v537_v8 = vld [vmem:[%s2104_s5 + $0x778] sm:$0xff] }
 0x1ba   :  { %745 = vmatpush1.msra.mxu0 %v398_v9  ;;  %816 = vmatpush1.msra.mxu1 %v400_v10  ;;  %v534_v9 = vld [vmem:[%s2104_s5 + $0x760] sm:$0xff]  ;;  %v536_v10 = vld [vmem:[%s2104_s5 + $0x770] sm:$0xff] }
 0x1bb   :  { %746 = vmatprep.subr.mxu0 %v391_v11  ;;  %817 = vmatprep.subr.mxu1 %v393_v12  ;;  %v527_v11 = vld [vmem:[%s2104_s5 + $0x728] sm:$0xff]  ;;  %v529_v12 = vld [vmem:[%s2104_s5 + $0x738] sm:$0xff] }
 0x1bc   :  { %747 = vmatpush1.msra.mxu0 %v390_v13  ;;  %818 = vmatpush1.msra.mxu1 %v392_v14  ;;  %v526_v13 = vld [vmem:[%s2104_s5 + $0x720] sm:$0xff]  ;;  %v528_v14 = vld [vmem:[%s2104_s5 + $0x730] sm:$0xff] }
 0x1bd   :  { %748 = vmatprep.subr.mxu0 %v383_v15  ;;  %819 = vmatprep.subr.mxu1 %v385_v16  ;;  %v519_v15 = vld [vmem:[%s2104_s5 + $0x6e8] sm:$0xff]  ;;  %v521_v16 = vld [vmem:[%s2104_s5 + $0x6f8] sm:$0xff] }
 0x1be   :  { %749 = vmatpush1.msra.mxu0 %v382_v17  ;;  %820 = vmatpush1.msra.mxu1 %v384_v18  ;;  %v518_v17 = vld [vmem:[%s2104_s5 + $0x6e0] sm:$0xff]  ;;  %v520_v18 = vld [vmem:[%s2104_s5 + $0x6f0] sm:$0xff] }
 0x1bf   :  { %750 = vmatprep.subr.mxu0 %v375_v19  ;;  %821 = vmatprep.subr.mxu1 %v377_v20  ;;  %v511_v19 = vld [vmem:[%s2104_s5 + $0x6a8] sm:$0xff]  ;;  %v513_v20 = vld [vmem:[%s2104_s5 + $0x6b8] sm:$0xff] }
 0x1c0   :  { %751 = vmatpush1.msra.mxu0 %v374_v21  ;;  %822 = vmatpush1.msra.mxu1 %v376_v22  ;;  %v510_v21 = vld [vmem:[%s2104_s5 + $0x6a0] sm:$0xff]  ;;  %v512_v22 = vld [vmem:[%s2104_s5 + $0x6b0] sm:$0xff] }
 0x1c1   :  { %752 = vmatprep.subr.mxu0 %v367_v23  ;;  %823 = vmatprep.subr.mxu1 %v369_v24  ;;  %v503_v23 = vld [vmem:[%s2104_s5 + $0x668] sm:$0xff]  ;;  %v505_v24 = vld [vmem:[%s2104_s5 + $0x678] sm:$0xff] }
 0x1c2   :  { %753 = vmatpush1.msra.mxu0 %v366_v25  ;;  %824 = vmatpush1.msra.mxu1 %v368_v26  ;;  %v502_v25 = vld [vmem:[%s2104_s5 + $0x660] sm:$0xff]  ;;  %v504_v26 = vld [vmem:[%s2104_s5 + $0x670] sm:$0xff] }
 0x1c3   :  { %754 = vmatprep.subr.mxu0 %v359_v27  ;;  %825 = vmatprep.subr.mxu1 %v361_v28  ;;  %v495_v27 = vld [vmem:[%s2104_s5 + $0x628] sm:$0xff]  ;;  %v497_v28 = vld [vmem:[%s2104_s5 + $0x638] sm:$0xff] }
 0x1c4   :  { %755 = vmatpush1.msra.mxu0 %v358_v31  ;;  %826 = vmatpush1.msra.mxu1 %v360_v33  ;;  %v494_v31 = vld [vmem:[%s2104_s5 + $0x620] sm:$0xff]  ;;  %v496_v33 = vld [vmem:[%s2104_s5 + $0x630] sm:$0xff] }
 0x1c5   :  { %756 = vmatprep.subr.mxu0 %v351_v34  ;;  %827 = vmatprep.subr.mxu1 %v353_v35  ;;  %v487_v34 = vld [vmem:[%s2104_s5 + $0x5e8] sm:$0xff]  ;;  %v489_v35 = vld [vmem:[%s2104_s5 + $0x5f8] sm:$0xff] }
 0x1c6   :  { %757 = vmatpush1.msra.mxu0 %v350_v36  ;;  %828 = vmatpush1.msra.mxu1 %v352_v37  ;;  %v486_v36 = vld [vmem:[%s2104_s5 + $0x5e0] sm:$0xff]  ;;  %v488_v37 = vld [vmem:[%s2104_s5 + $0x5f0] sm:$0xff] }
 0x1c7   :  { %758 = vmatprep.subr.mxu0 %v343_v38  ;;  %829 = vmatprep.subr.mxu1 %v345_v39  ;;  %v479_v38 = vld [vmem:[%s2104_s5 + $0x5a8] sm:$0xff]  ;;  %v481_v39 = vld [vmem:[%s2104_s5 + $0x5b8] sm:$0xff] }
 0x1c8   :  { %759 = vmatpush1.msra.mxu0 %v342_v40  ;;  %830 = vmatpush1.msra.mxu1 %v344_v41  ;;  %v478_v40 = vld [vmem:[%s2104_s5 + $0x5a0] sm:$0xff]  ;;  %v480_v41 = vld [vmem:[%s2104_s5 + $0x5b0] sm:$0xff] }
 0x1c9   :  { %760 = vmatprep.subr.mxu0 %v335_v42  ;;  %831 = vmatprep.subr.mxu1 %v337_v43  ;;  %v471_v42 = vld [vmem:[%s2104_s5 + $0x568] sm:$0xff]  ;;  %v473_v43 = vld [vmem:[%s2104_s5 + $0x578] sm:$0xff] }
 0x1ca   :  { %761 = vmatpush1.msra.mxu0 %v334_v44  ;;  %832 = vmatpush1.msra.mxu1 %v336_v45  ;;  %v470_v44 = vld [vmem:[%s2104_s5 + $0x560] sm:$0xff]  ;;  %v472_v45 = vld [vmem:[%s2104_s5 + $0x570] sm:$0xff] }
 0x1cb   :  { %762 = vmatprep.subr.mxu0 %v327_v46  ;;  %833 = vmatprep.subr.mxu1 %v329_v47  ;;  %v463_v46 = vld [vmem:[%s2104_s5 + $0x528] sm:$0xff]  ;;  %v465_v47 = vld [vmem:[%s2104_s5 + $0x538] sm:$0xff] }
 0x1cc   :  { %763 = vmatpush1.msra.mxu0 %v326_v48  ;;  %834 = vmatpush1.msra.mxu1 %v328_v49  ;;  %v462_v48 = vld [vmem:[%s2104_s5 + $0x520] sm:$0xff]  ;;  %v464_v49 = vld [vmem:[%s2104_s5 + $0x530] sm:$0xff] }
 0x1cd   :  { %764 = vmatprep.subr.mxu0 %v319_v50  ;;  %835 = vmatprep.subr.mxu1 %v321_v51  ;;  %v455_v50 = vld [vmem:[%s2104_s5 + $0x4e8] sm:$0xff]  ;;  %v457_v51 = vld [vmem:[%s2104_s5 + $0x4f8] sm:$0xff] }
 0x1ce   :  { %765 = vmatpush1.msra.mxu0 %v318_v52  ;;  %836 = vmatpush1.msra.mxu1 %v320_v53  ;;  %v454_v52 = vld [vmem:[%s2104_s5 + $0x4e0] sm:$0xff]  ;;  %v456_v53 = vld [vmem:[%s2104_s5 + $0x4f0] sm:$0xff] }
 0x1cf   :  { %766 = vmatprep.subr.mxu0 %v311_v54  ;;  %837 = vmatprep.subr.mxu1 %v313_v55  ;;  %v447_v54 = vld [vmem:[%s2104_s5 + $0x4a8] sm:$0xff]  ;;  %v449_v55 = vld [vmem:[%s2104_s5 + $0x4b8] sm:$0xff] }
 0x1d0   :  { %767 = vmatpush1.msra.mxu0 %v310_v56  ;;  %838 = vmatpush1.msra.mxu1 %v312_v57  ;;  %v446_v56 = vld [vmem:[%s2104_s5 + $0x4a0] sm:$0xff]  ;;  %v448_v57 = vld [vmem:[%s2104_s5 + $0x4b0] sm:$0xff] }
 0x1d1   :  { %768 = vmatprep.subr.mxu0 %v303_v59  ;;  %839 = vmatprep.subr.mxu1 %v305_v60  ;;  %v439_v59 = vld [vmem:[%s2104_s5 + $0x468] sm:$0xff]  ;;  %v441_v60 = vld [vmem:[%s2104_s5 + $0x478] sm:$0xff] }
 0x1d2   :  { %769 = vmatpush1.msra.mxu0 %v302_v61  ;;  %840 = vmatpush1.msra.mxu1 %v304_v62  ;;  %v438_v61 = vld [vmem:[%s2104_s5 + $0x460] sm:$0xff]  ;;  %v440_v62 = vld [vmem:[%s2104_s5 + $0x470] sm:$0xff] }
 0x1d3   :  { %770 = vmatprep.subr.mxu0 %v551_v63  ;;  %841 = vmatprep.subr.mxu1 %v553_v0  ;;  %v431_v63 = vld [vmem:[%s2104_s5 + $0x428] sm:$0xff]  ;;  %v433_v0 = vld [vmem:[%s2104_s5 + $0x438] sm:$0xff] }
 0x1d4   :  { %771 = vmatpush2.msra.mxu0 %v550_v1  ;;  %842 = vmatpush2.msra.mxu1 %v552_v2  ;;  %v430_v1 = vld [vmem:[%s2104_s5 + $0x420] sm:$0xff]  ;;  %v432_v2 = vld [vmem:[%s2104_s5 + $0x430] sm:$0xff] }
 0x1d5   :  { %772 = vmatprep.subr.mxu0 %v543_v3  ;;  %843 = vmatprep.subr.mxu1 %v545_v4 }
 0x1d6   :  { %773 = vmatpush2.msra.mxu0 %v542_v5  ;;  %844 = vmatpush2.msra.mxu1 %v544_v6 }
 0x1d7   :  { %774 = vmatprep.subr.mxu0 %v535_v7  ;;  %845 = vmatprep.subr.mxu1 %v537_v8 }
 0x1d8   :  { %775 = vmatpush2.msra.mxu0 %v534_v9  ;;  %846 = vmatpush2.msra.mxu1 %v536_v10 }
 0x1d9   :  { %776 = vmatprep.subr.mxu0 %v527_v11  ;;  %847 = vmatprep.subr.mxu1 %v529_v12 }
 0x1da   :  { %777 = vmatpush2.msra.mxu0 %v526_v13  ;;  %848 = vmatpush2.msra.mxu1 %v528_v14 }
 0x1db   :  { %778 = vmatprep.subr.mxu0 %v519_v15  ;;  %849 = vmatprep.subr.mxu1 %v521_v16 }
 0x1dc   :  { %779 = vmatpush2.msra.mxu0 %v518_v17  ;;  %850 = vmatpush2.msra.mxu1 %v520_v18 }
 0x1dd   :  { %780 = vmatprep.subr.mxu0 %v511_v19  ;;  %851 = vmatprep.subr.mxu1 %v513_v20 }
 0x1de   :  { %781 = vmatpush2.msra.mxu0 %v510_v21  ;;  %852 = vmatpush2.msra.mxu1 %v512_v22 }
 0x1df   :  { %782 = vmatprep.subr.mxu0 %v503_v23  ;;  %853 = vmatprep.subr.mxu1 %v505_v24 }
 0x1e0   :  { %783 = vmatpush2.msra.mxu0 %v502_v25  ;;  %854 = vmatpush2.msra.mxu1 %v504_v26 }
 0x1e1   :  { %784 = vmatprep.subr.mxu0 %v495_v27  ;;  %855 = vmatprep.subr.mxu1 %v497_v28 }
 0x1e2   :  { %785 = vmatpush2.msra.mxu0 %v494_v31  ;;  %856 = vmatpush2.msra.mxu1 %v496_v33 }
 0x1e3   :  { %786 = vmatprep.subr.mxu0 %v487_v34  ;;  %857 = vmatprep.subr.mxu1 %v489_v35 }
 0x1e4   :  { %787 = vmatpush2.msra.mxu0 %v486_v36  ;;  %858 = vmatpush2.msra.mxu1 %v488_v37 }
 0x1e5   :  { %788 = vmatprep.subr.mxu0 %v479_v38  ;;  %859 = vmatprep.subr.mxu1 %v481_v39 }
 0x1e6   :  { %789 = vmatpush2.msra.mxu0 %v478_v40  ;;  %860 = vmatpush2.msra.mxu1 %v480_v41 }
 0x1e7   :  { %790 = vmatprep.subr.mxu0 %v471_v42  ;;  %861 = vmatprep.subr.mxu1 %v473_v43 }
 0x1e8   :  { %791 = vmatpush2.msra.mxu0 %v470_v44  ;;  %862 = vmatpush2.msra.mxu1 %v472_v45 }
 0x1e9   :  { %792 = vmatprep.subr.mxu0 %v463_v46  ;;  %863 = vmatprep.subr.mxu1 %v465_v47 }
 0x1ea   :  { %793 = vmatpush2.msra.mxu0 %v462_v48  ;;  %864 = vmatpush2.msra.mxu1 %v464_v49 }
 0x1eb   :  { %794 = vmatprep.subr.mxu0 %v455_v50  ;;  %865 = vmatprep.subr.mxu1 %v457_v51 }
 0x1ec   :  { %795 = vmatpush2.msra.mxu0 %v454_v52  ;;  %866 = vmatpush2.msra.mxu1 %v456_v53 }
 0x1ed   :  { %796 = vmatprep.subr.mxu0 %v447_v54  ;;  %867 = vmatprep.subr.mxu1 %v449_v55 }
 0x1ee   :  { %797 = vmatpush2.msra.mxu0 %v446_v56  ;;  %868 = vmatpush2.msra.mxu1 %v448_v57 }
 0x1ef   :  { %798 = vmatprep.subr.mxu0 %v439_v59  ;;  %869 = vmatprep.subr.mxu1 %v441_v60 }
 0x1f0   :  { %799 = vmatpush2.msra.mxu0 %v438_v61  ;;  %870 = vmatpush2.msra.mxu1 %v440_v62 }
 0x1f1   :  { %800 = vmatprep.subr.mxu0 %v431_v63  ;;  %871 = vmatprep.subr.mxu1 %v433_v0 }
 0x1f2   :  { %801 = vmatpush2.msra.mxu0 %v430_v1  ;;  %872 = vmatpush2.msra.mxu1 %v432_v2 }
 0x1f3   :  { %803 = vmatmul.mubr.f32.vlgmr.msra.gmra.mxu0 %v1676_v58  ;;  %874 = vmatmul.mubr.f32.vlgmr.msra.gmra.mxu1 %v1676_v58 }
 0x1f4   :  { %919 = shalt.err (!%p916_p4)
}
 0x1f5   :  { %897 = dma.vmem_to_hbm [thread:$0]  %s895_s0, 256, %s2106_s7, [#allocation3]   ;;  %v566_v3 = vsub.s32 2, %v1442_v29  ;;  %v554_v58 = vld [vmem:[%s2105_s6] sm:$0xff]  ;;  %v570_v4 = vsub.s32 3, %v1442_v29  ;;  %v582_v16 = vsub.s32 6, %v1442_v29 }
 0x1f6   :  { %v559_v5 = vrot.slane %v554_v58, %v1445_v30  ;;  %v563_v7 = vrot.slane %v554_v58, %v1451_v32  ;;  %v574_v32 = vsub.s32 4, %v1442_v29  ;;  %v578_v17 = vsub.s32 5, %v1442_v29 }
 0x1f7   :  { %v567_v6 = vrot.slane %v554_v58, %v566_v3  ;;  %v571_v8 = vrot.slane %v554_v58, %v570_v4  ;;  %v586_v18 = vsub.s32 7, %v1442_v29  ;;  %v583_v20 = vrot.slane %v554_v58, %v582_v16 }
 0x1f8   :  { %v575_v19 = vrot.slane %v554_v58, %v574_v32  ;;  %v579_v21 = vrot.slane %v554_v58, %v578_v17 }
 0x1f9   :  { %v587_v22 = vrot.slane %v554_v58, %v586_v18 }
 0x272   :  { %v662_v9 = vpop.f32.mrf.mxu0  ;;  %v733_v10 = vpop.f32.mrf.mxu1 }
 0x273   :  { %v663_v11 = vadd.f32 %v662_v9, %v559_v5  ;;  %v734_v12 = vadd.f32 %v733_v10, %v567_v6 }
 0x274   :  { %v664_v13 = vpop.f32.mrf.mxu0  ;;  %v735_v14 = vpop.f32.mrf.mxu1 }
 0x275   :  { %880 = vst [vmem:[%s2107_s8] sm:$0xff] %v663_v11  ;;  %882 = vst [vmem:[%s2107_s8 + $0x10] sm:$0xff] %v734_v12  ;;  %v665_v15 = vadd.f32 %v664_v13, %v563_v7  ;;  %v736_v30 = vadd.f32 %v735_v14, %v571_v8 }
 0x277   :  { %881 = vst [vmem:[%s2107_s8 + $0x8] sm:$0xff] %v665_v15  ;;  %883 = vst [vmem:[%s2107_s8 + $0x18] sm:$0xff] %v736_v30 }
 0x2b3   :  { %v804_v23 = vpop.f32.mrf.mxu0  ;;  %v875_v24 = vpop.f32.mrf.mxu1 }
 0x2b4   :  { %v805_v25 = vadd.f32 %v804_v23, %v575_v19  ;;  %v876_v26 = vadd.f32 %v875_v24, %v583_v20 }
 0x2b5   :  { %v806_v27 = vpop.f32.mrf.mxu0  ;;  %v877_v28 = vpop.f32.mrf.mxu1 }
 0x2b6   :  { %884 = vst [vmem:[%s2107_s8 + $0x20] sm:$0xff] %v805_v25  ;;  %886 = vst [vmem:[%s2107_s8 + $0x30] sm:$0xff] %v876_v26  ;;  %v807_v31 = vadd.f32 %v806_v27, %v579_v21  ;;  %v878_v29 = vadd.f32 %v877_v28, %v587_v22 }
 0x2b8   :  { %885 = vst [vmem:[%s2107_s8 + $0x28] sm:$0xff] %v807_v31  ;;  %887 = vst [vmem:[%s2107_s8 + $0x38] sm:$0xff] %v878_v29 }
 0x2b9   :  { %928 = dma.done.wait [#allocation3], 256  }
 0x2ba   :  { %929 = vsyncadd [#allocation3], 4294967040 }
 0x2bb   :  { %905 = vsyncpa [#allocation3], 1 }

// kernel: policy_net_forward.9
= control target key start
LH: loop header
LB: loop body
LE: loop exit
PB: predicated region body
PF: predicated region fallthrough
CT: control target
= control target key end

     0   :  { %18 = vsyncpa [#allocation3], 0  ;;  %s5354_s0 = inlined_call_operand.vmem [shape: f32[4,2,1024], index: 0, kind: input, shape index: {}]   ;;  %s5355_s1 = inlined_call_operand.vmem [shape: f32[4,2,1], index: 1, kind: input, shape index: {}]   ;;  %s5356_s2 = inlined_call_operand.vmem [shape: f32[256,1024], index: 2, kind: input, shape index: {}]   ;;  %s5357_s3 = inlined_call_operand.vmem [shape: f32[256,1024], index: 3, kind: input, shape index: {}]   ;;  %s5358_s4 = inlined_call_operand.vmem [shape: f32[256,1024], index: 4, kind: input, shape index: {}]   ;;  %s5359_s5 = inlined_call_operand.vmem [shape: f32[1,1024], index: 5, kind: input, shape index: {}]   ;;  %s5360_s6 = inlined_call_operand.vmem [shape: f32[256,7], index: 6, kind: input, shape index: {}]   ;;  %s5361_s7 = inlined_call_operand.vmem [shape: f32[1,7], index: 7, kind: input, shape index: {}]   ;;  %s5362_s8 = inlined_call_operand.vmem [shape: f32[2,2,256], index: 8, kind: input, shape index: {}]   ;;  %s5363_s9 = inlined_call_operand.vmem [shape: f32[2,2,256], index: 9, kind: input, shape index: {}]   ;;  %s5364_s10 = inlined_call_operand.vmem [shape: f32[4,2,7], index: 10, kind: output, shape index: {0}]   ;;  %s5365_s11 = inlined_call_operand.hbm [shape: f32[2,2,256], index: 11, kind: output, shape index: {1}]   ;;  %s5366_s12 = inlined_call_operand.hbm [shape: f32[2,2,256], index: 12, kind: output, shape index: {2}]  }
   0x1   :  { %19 = vsyncpa [#allocation5], 0  ;;  %s2829_s21 = smov 0  }
   0x2 LB: > { %s2835_s22 = sadd.s32 4294967295, %s2755_s21   ;;  %p2557_p0 = scmp.ge.s32.totalorder %s2755_s21, 1  ;;  %s2755_s21 = sphi %s2829_s21, %s25_s21  }
   0x3   : > { %p368_p1 = scmp.lt.s32.totalorder %s2755_s21, 5 }
   0x5   : > { %p369_p2 = pnand %p2557_p0, %p368_p1 }
   0x6   : > { %p413_p3 = scmp.lt.s32.totalorder (!%p369_p2), %s2835_s22, 3  ;;  %p2562_p4 = scmp.ne.s32.totalorder (!%p369_p2), %s2835_s22, 0 }
   0x7   : > { %372 = sbr.rel (%p369_p2) target bundleno = 969 (0x3c9), region = 60 }
   0xc   : > { %s414_s23 = scalar_select %p413_p3, %s2835_s22, 3 }
   0xd   : > { %429 = sbr.rel (%p2562_p4) target bundleno = 21 (0x15), region = 64 }
   0xe   : > { %s2581_s24 = sshll.u32 %s414_s23, 4  ;;  %s2560_s25 = sshll.u32 %s414_s23, 1 }
   0xf   : > { %s2844_s28 = scalar_lea.vmem %s5354_s0, %s2581_s24  ;;  %s421_s13 = scalar_lea.vmem %s5355_s1, %s2560_s25 }
  0x10   : > { %s2852_s16 = scalar_lea.vmem %s5364_s10, %s2560_s25 }
  0x12   : > { %v430_v0 = vld [vmem:[%s5362_s8] sm:$0xff]  }
  0x13   : > { %v434_v1 = vld [vmem:[%s5363_s9] sm:$0xff]   ;;  %432 = vst [vmem:[#allocation2] sm:$0xff] %v430_v0  }
  0x14   : > { %436 = vst [vmem:[#allocation4] sm:$0xff] %v434_v1  }
  0x15 PF: > { %v438_v2 = vld [vmem:[%s421_s13] sm:$0x3]  ;;  %v582_v3 = vld [vmem:[%s5356_s2 + $0x3c8] sm:$0xff]  ;;  %v584_v4 = vld [vmem:[%s5356_s2 + $0x3d8] sm:$0xff]  ;;  %v2757_v5 = vmov 0   ;;  %p2625_p5 = scmp.eq.s32.totalorder %s2835_s22, 3 }
  0x16   : > { %2644 = vset.pattern.permute.xlu0 %v2757_v5  ;;  %728 = vmatprep.subr.mxu0 %v582_v3  ;;  %v581_v6 = vld [vmem:[%s5356_s2 + $0x3c0] sm:$0xff]  ;;  %v583_v7 = vld [vmem:[%s5356_s2 + $0x3d0] sm:$0xff]  ;;  %v574_v8 = vld [vmem:[%s5356_s2 + $0x388] sm:$0xff]  ;;  %s2760_s19 = smov [#allocation2]   ;;  %s2761_s23 = smov [#allocation4]  }
  0x17   : > { %443 = vperm.xlu0 %2644, %v438_v2   ;;  %799 = vmatprep.subr.mxu1 %v584_v4  ;;  %v576_v9 = vld [vmem:[%s5356_s2 + $0x398] sm:$0xff]  ;;  %v573_v10 = vld [vmem:[%s5356_s2 + $0x380] sm:$0xff]  ;;  %v575_v11 = vld [vmem:[%s5356_s2 + $0x390] sm:$0xff]  ;;  %s2451_s20 = sshll.u32 %s2760_s19, 4  ;;  %s2464_s24 = sshll.u32 %s2761_s23, 4  ;;  %s2452_s20 = int_to_ptr.vmem [resolvable:$true] %s2451_s20  ;;  %s2465_s24 = int_to_ptr.vmem [resolvable:$true] %s2464_s24 }
  0x18   : > { %729 = vmatpush1.msra.mxu0 %v581_v6  ;;  %800 = vmatpush1.msra.mxu1 %v583_v7  ;;  %v566_v12 = vld [vmem:[%s5356_s2 + $0x348] sm:$0xff]  ;;  %v568_v13 = vld [vmem:[%s5356_s2 + $0x358] sm:$0xff]  ;;  %v565_v14 = vld [vmem:[%s5356_s2 + $0x340] sm:$0xff]  ;;  %s2693_s25 = scalar_lea.vmem %s2452_s20, 128  ;;  %p2700_p9 = scmp.lt.s32.totalorder %s2452_s20, %s2452_s20 }
  0x19   : > { %730 = vmatprep.subr.mxu0 %v574_v8  ;;  %801 = vmatprep.subr.mxu1 %v576_v9  ;;  %v567_v15 = vld [vmem:[%s5356_s2 + $0x350] sm:$0xff]  ;;  %v558_v16 = vld [vmem:[%s5356_s2 + $0x308] sm:$0xff]  ;;  %v560_v17 = vld [vmem:[%s5356_s2 + $0x318] sm:$0xff]  ;;  %p2694_p6 = scmp.ne.s32.totalorder %s2452_s20, %s2693_s25  ;;  %p2701_p10 = scmp.lt.s32.totalorder %s2693_s25, %s2693_s25 }
  0x1a   : > { %731 = vmatpush1.msra.mxu0 %v573_v10  ;;  %802 = vmatpush1.msra.mxu1 %v575_v11  ;;  %v557_v18 = vld [vmem:[%s5356_s2 + $0x300] sm:$0xff]  ;;  %v559_v19 = vld [vmem:[%s5356_s2 + $0x310] sm:$0xff]  ;;  %v550_v20 = vld [vmem:[%s5356_s2 + $0x2c8] sm:$0xff] }
  0x1b   : > { %732 = vmatprep.subr.mxu0 %v566_v12  ;;  %803 = vmatprep.subr.mxu1 %v568_v13  ;;  %v552_v21 = vld [vmem:[%s5356_s2 + $0x2d8] sm:$0xff]  ;;  %v549_v22 = vld [vmem:[%s5356_s2 + $0x2c0] sm:$0xff]  ;;  %v551_v23 = vld [vmem:[%s5356_s2 + $0x2d0] sm:$0xff]  ;;  %p2695_p7 = pnand %p2694_p6, %p2625_p5  ;;  %p2702_p11 = por %p2701_p10, %p2700_p9 }
  0x1c   : > { %733 = vmatpush1.msra.mxu0 %v565_v14  ;;  %804 = vmatpush1.msra.mxu1 %v567_v15  ;;  %v542_v24 = vld [vmem:[%s5356_s2 + $0x288] sm:$0xff]  ;;  %v544_v25 = vld [vmem:[%s5356_s2 + $0x298] sm:$0xff]  ;;  %v541_v26 = vld [vmem:[%s5356_s2 + $0x280] sm:$0xff] }
  0x1d   : > { %734 = vmatprep.subr.mxu0 %v558_v16  ;;  %805 = vmatprep.subr.mxu1 %v560_v17  ;;  %v543_v27 = vld [vmem:[%s5356_s2 + $0x290] sm:$0xff]  ;;  %v534_v28 = vld [vmem:[%s5356_s2 + $0x248] sm:$0xff]  ;;  %v536_v29 = vld [vmem:[%s5356_s2 + $0x258] sm:$0xff]  ;;  %p2696_p8 = pneg %p2695_p7 }
  0x1e   : > { %735 = vmatpush1.msra.mxu0 %v557_v18  ;;  %806 = vmatpush1.msra.mxu1 %v559_v19  ;;  %v533_v30 = vld [vmem:[%s5356_s2 + $0x240] sm:$0xff]  ;;  %v535_v31 = vld [vmem:[%s5356_s2 + $0x250] sm:$0xff]  ;;  %v526_v32 = vld [vmem:[%s5356_s2 + $0x208] sm:$0xff] }
  0x1f   : > { %736 = vmatprep.subr.mxu0 %v550_v20  ;;  %807 = vmatprep.subr.mxu1 %v552_v21  ;;  %v528_v33 = vld [vmem:[%s5356_s2 + $0x218] sm:$0xff]  ;;  %v525_v34 = vld [vmem:[%s5356_s2 + $0x200] sm:$0xff]  ;;  %v527_v35 = vld [vmem:[%s5356_s2 + $0x210] sm:$0xff]  ;;  %p2703_p12 = pnand %p2702_p11, %p2696_p8 }
  0x20   : > { %737 = vmatpush1.msra.mxu0 %v549_v22  ;;  %808 = vmatpush1.msra.mxu1 %v551_v23  ;;  %v518_v36 = vld [vmem:[%s5356_s2 + $0x1c8] sm:$0xff]  ;;  %v520_v37 = vld [vmem:[%s5356_s2 + $0x1d8] sm:$0xff]  ;;  %v517_v38 = vld [vmem:[%s5356_s2 + $0x1c0] sm:$0xff] }
  0x21   : > { %738 = vmatprep.subr.mxu0 %v542_v24  ;;  %809 = vmatprep.subr.mxu1 %v544_v25  ;;  %v519_v39 = vld [vmem:[%s5356_s2 + $0x1d0] sm:$0xff]  ;;  %v510_v40 = vld [vmem:[%s5356_s2 + $0x188] sm:$0xff]  ;;  %v512_v41 = vld [vmem:[%s5356_s2 + $0x198] sm:$0xff] }
  0x22   : > { %739 = vmatpush1.msra.mxu0 %v541_v26  ;;  %810 = vmatpush1.msra.mxu1 %v543_v27  ;;  %v509_v42 = vld [vmem:[%s5356_s2 + $0x180] sm:$0xff]  ;;  %v511_v43 = vld [vmem:[%s5356_s2 + $0x190] sm:$0xff]  ;;  %v502_v44 = vld [vmem:[%s5356_s2 + $0x148] sm:$0xff] }
  0x23   : > { %740 = vmatprep.subr.mxu0 %v534_v28  ;;  %811 = vmatprep.subr.mxu1 %v536_v29  ;;  %v504_v45 = vld [vmem:[%s5356_s2 + $0x158] sm:$0xff]  ;;  %v501_v46 = vld [vmem:[%s5356_s2 + $0x140] sm:$0xff]  ;;  %v503_v47 = vld [vmem:[%s5356_s2 + $0x150] sm:$0xff] }
  0x24   : > { %741 = vmatpush1.msra.mxu0 %v533_v30  ;;  %812 = vmatpush1.msra.mxu1 %v535_v31  ;;  %v494_v48 = vld [vmem:[%s5356_s2 + $0x108] sm:$0xff]  ;;  %v496_v49 = vld [vmem:[%s5356_s2 + $0x118] sm:$0xff]  ;;  %v493_v50 = vld [vmem:[%s5356_s2 + $0x100] sm:$0xff] }
  0x25   : > { %742 = vmatprep.subr.mxu0 %v526_v32  ;;  %813 = vmatprep.subr.mxu1 %v528_v33  ;;  %v495_v51 = vld [vmem:[%s5356_s2 + $0x110] sm:$0xff]  ;;  %v486_v52 = vld [vmem:[%s5356_s2 + $0xc8] sm:$0xff]  ;;  %v488_v53 = vld [vmem:[%s5356_s2 + $0xd8] sm:$0xff] }
  0x26   : > { %743 = vmatpush1.msra.mxu0 %v525_v34  ;;  %814 = vmatpush1.msra.mxu1 %v527_v35  ;;  %v485_v54 = vld [vmem:[%s5356_s2 + $0xc0] sm:$0xff]  ;;  %v487_v55 = vld [vmem:[%s5356_s2 + $0xd0] sm:$0xff]  ;;  %v478_v56 = vld [vmem:[%s5356_s2 + $0x88] sm:$0xff] }
  0x27   : > { %744 = vmatprep.subr.mxu0 %v518_v36  ;;  %815 = vmatprep.subr.mxu1 %v520_v37  ;;  %v480_v57 = vld [vmem:[%s5356_s2 + $0x98] sm:$0xff]  ;;  %v477_v58 = vld [vmem:[%s5356_s2 + $0x80] sm:$0xff]  ;;  %v479_v59 = vld [vmem:[%s5356_s2 + $0x90] sm:$0xff] }
  0x28   : > { %745 = vmatpush1.msra.mxu0 %v517_v38  ;;  %816 = vmatpush1.msra.mxu1 %v519_v39  ;;  %v470_v60 = vld [vmem:[%s5356_s2 + $0x48] sm:$0xff]  ;;  %v472_v61 = vld [vmem:[%s5356_s2 + $0x58] sm:$0xff]  ;;  %v469_v62 = vld [vmem:[%s5356_s2 + $0x40] sm:$0xff] }
  0x29   : > { %746 = vmatprep.subr.mxu0 %v510_v40  ;;  %817 = vmatprep.subr.mxu1 %v512_v41  ;;  %v471_v63 = vld [vmem:[%s5356_s2 + $0x50] sm:$0xff]  ;;  %v462_v0 = vld [vmem:[%s5356_s2 + $0x8] sm:$0xff]  ;;  %v464_v1 = vld [vmem:[%s5356_s2 + $0x18] sm:$0xff] }
  0x2a   : > { %747 = vmatpush1.msra.mxu0 %v509_v42  ;;  %818 = vmatpush1.msra.mxu1 %v511_v43  ;;  %v461_v2 = vld [vmem:[%s5356_s2] sm:$0xff]  ;;  %v463_v3 = vld [vmem:[%s5356_s2 + $0x10] sm:$0xff]  ;;  %v710_v4 = vld [vmem:[%s5356_s2 + $0x7c8] sm:$0xff] }
  0x2b   : > { %748 = vmatprep.subr.mxu0 %v502_v44  ;;  %819 = vmatprep.subr.mxu1 %v504_v45  ;;  %v712_v5 = vld [vmem:[%s5356_s2 + $0x7d8] sm:$0xff]  ;;  %v709_v6 = vld [vmem:[%s5356_s2 + $0x7c0] sm:$0xff]  ;;  %v711_v7 = vld [vmem:[%s5356_s2 + $0x7d0] sm:$0xff] }
  0x2c   : > { %749 = vmatpush1.msra.mxu0 %v501_v46  ;;  %820 = vmatpush1.msra.mxu1 %v503_v47  ;;  %v702_v8 = vld [vmem:[%s5356_s2 + $0x788] sm:$0xff]  ;;  %v704_v9 = vld [vmem:[%s5356_s2 + $0x798] sm:$0xff]  ;;  %v701_v10 = vld [vmem:[%s5356_s2 + $0x780] sm:$0xff] }
  0x2d   : > { %750 = vmatprep.subr.mxu0 %v494_v48  ;;  %821 = vmatprep.subr.mxu1 %v496_v49  ;;  %v703_v11 = vld [vmem:[%s5356_s2 + $0x790] sm:$0xff]  ;;  %v694_v12 = vld [vmem:[%s5356_s2 + $0x748] sm:$0xff]  ;;  %v696_v13 = vld [vmem:[%s5356_s2 + $0x758] sm:$0xff] }
  0x2e   : > { %751 = vmatpush1.msra.mxu0 %v493_v50  ;;  %822 = vmatpush1.msra.mxu1 %v495_v51  ;;  %v693_v14 = vld [vmem:[%s5356_s2 + $0x740] sm:$0xff]  ;;  %v695_v15 = vld [vmem:[%s5356_s2 + $0x750] sm:$0xff]  ;;  %v686_v16 = vld [vmem:[%s5356_s2 + $0x708] sm:$0xff] }
  0x2f   : > { %752 = vmatprep.subr.mxu0 %v486_v52  ;;  %823 = vmatprep.subr.mxu1 %v488_v53  ;;  %v688_v17 = vld [vmem:[%s5356_s2 + $0x718] sm:$0xff]  ;;  %v685_v18 = vld [vmem:[%s5356_s2 + $0x700] sm:$0xff]  ;;  %v687_v19 = vld [vmem:[%s5356_s2 + $0x710] sm:$0xff] }
  0x30   : > { %753 = vmatpush1.msra.mxu0 %v485_v54  ;;  %824 = vmatpush1.msra.mxu1 %v487_v55  ;;  %v678_v20 = vld [vmem:[%s5356_s2 + $0x6c8] sm:$0xff]  ;;  %v680_v21 = vld [vmem:[%s5356_s2 + $0x6d8] sm:$0xff]  ;;  %v677_v22 = vld [vmem:[%s5356_s2 + $0x6c0] sm:$0xff] }
  0x31   : > { %754 = vmatprep.subr.mxu0 %v478_v56  ;;  %825 = vmatprep.subr.mxu1 %v480_v57  ;;  %v679_v23 = vld [vmem:[%s5356_s2 + $0x6d0] sm:$0xff]  ;;  %v670_v24 = vld [vmem:[%s5356_s2 + $0x688] sm:$0xff]  ;;  %v672_v25 = vld [vmem:[%s5356_s2 + $0x698] sm:$0xff] }
  0x32   : > { %755 = vmatpush1.msra.mxu0 %v477_v58  ;;  %826 = vmatpush1.msra.mxu1 %v479_v59  ;;  %v669_v26 = vld [vmem:[%s5356_s2 + $0x680] sm:$0xff]  ;;  %v671_v27 = vld [vmem:[%s5356_s2 + $0x690] sm:$0xff]  ;;  %v662_v28 = vld [vmem:[%s5356_s2 + $0x648] sm:$0xff] }
  0x33   : > { %756 = vmatprep.subr.mxu0 %v470_v60  ;;  %827 = vmatprep.subr.mxu1 %v472_v61  ;;  %v664_v29 = vld [vmem:[%s5356_s2 + $0x658] sm:$0xff]  ;;  %v661_v30 = vld [vmem:[%s5356_s2 + $0x640] sm:$0xff]  ;;  %v663_v31 = vld [vmem:[%s5356_s2 + $0x650] sm:$0xff] }
  0x34   : > { %757 = vmatpush1.msra.mxu0 %v469_v62  ;;  %828 = vmatpush1.msra.mxu1 %v471_v63  ;;  %v654_v32 = vld [vmem:[%s5356_s2 + $0x608] sm:$0xff]  ;;  %v656_v33 = vld [vmem:[%s5356_s2 + $0x618] sm:$0xff]  ;;  %v653_v34 = vld [vmem:[%s5356_s2 + $0x600] sm:$0xff] }
  0x35   : > { %758 = vmatprep.subr.mxu0 %v462_v0  ;;  %829 = vmatprep.subr.mxu1 %v464_v1  ;;  %v655_v35 = vld [vmem:[%s5356_s2 + $0x610] sm:$0xff]  ;;  %v646_v36 = vld [vmem:[%s5356_s2 + $0x5c8] sm:$0xff]  ;;  %v648_v37 = vld [vmem:[%s5356_s2 + $0x5d8] sm:$0xff] }
  0x36   : > { %759 = vmatpush1.msra.mxu0 %v461_v2  ;;  %830 = vmatpush1.msra.mxu1 %v463_v3  ;;  %v645_v38 = vld [vmem:[%s5356_s2 + $0x5c0] sm:$0xff]  ;;  %v647_v39 = vld [vmem:[%s5356_s2 + $0x5d0] sm:$0xff]  ;;  %v638_v40 = vld [vmem:[%s5356_s2 + $0x588] sm:$0xff] }
  0x37   : > { %760 = vmatprep.subr.mxu0 %v710_v4  ;;  %831 = vmatprep.subr.mxu1 %v712_v5  ;;  %v640_v41 = vld [vmem:[%s5356_s2 + $0x598] sm:$0xff]  ;;  %v637_v42 = vld [vmem:[%s5356_s2 + $0x580] sm:$0xff]  ;;  %v639_v43 = vld [vmem:[%s5356_s2 + $0x590] sm:$0xff] }
  0x38   : > { %761 = vmatpush2.msra.mxu0 %v709_v6  ;;  %832 = vmatpush2.msra.mxu1 %v711_v7  ;;  %v630_v44 = vld [vmem:[%s5356_s2 + $0x548] sm:$0xff]  ;;  %v632_v45 = vld [vmem:[%s5356_s2 + $0x558] sm:$0xff]  ;;  %v629_v46 = vld [vmem:[%s5356_s2 + $0x540] sm:$0xff]  ;;  %v2758_v6 = vmov 269488144  }
  0x39   : > { %762 = vmatprep.subr.mxu0 %v702_v8  ;;  %833 = vmatprep.subr.mxu1 %v704_v9  ;;  %v631_v47 = vld [vmem:[%s5356_s2 + $0x550] sm:$0xff]  ;;  %v622_v48 = vld [vmem:[%s5356_s2 + $0x508] sm:$0xff]  ;;  %v624_v49 = vld [vmem:[%s5356_s2 + $0x518] sm:$0xff]  ;;  %v446_v7 = vunpack.c.l.s4 %v2758_v6  ;;  %v448_v8 = vlaneseq }
  0x3a   : > { %763 = vmatpush2.msra.mxu0 %v701_v10  ;;  %834 = vmatpush2.msra.mxu1 %v703_v11  ;;  %v621_v50 = vld [vmem:[%s5356_s2 + $0x500] sm:$0xff]  ;;  %v623_v51 = vld [vmem:[%s5356_s2 + $0x510] sm:$0xff]  ;;  %v614_v52 = vld [vmem:[%s5356_s2 + $0x4c8] sm:$0xff]  ;;  %v2759_v11 = vmov 1983009808  }
  0x3b   : > { %764 = vmatprep.subr.mxu0 %v694_v12  ;;  %835 = vmatprep.subr.mxu1 %v696_v13  ;;  %v616_v53 = vld [vmem:[%s5356_s2 + $0x4d8] sm:$0xff]  ;;  %v613_v54 = vld [vmem:[%s5356_s2 + $0x4c0] sm:$0xff]  ;;  %v615_v55 = vld [vmem:[%s5356_s2 + $0x4d0] sm:$0xff]  ;;  %v447_v9 = vunpack.c.0.s8 %v446_v7  ;;  %v3251_v10 = vshrl.u32 %v448_v8, 7  ;;  %v719_v12 = vunpack.c.l.s4 %v2759_v11 }
  0x3c   : > { %765 = vmatpush2.msra.mxu0 %v693_v14  ;;  %836 = vmatpush2.msra.mxu1 %v695_v15  ;;  %v606_v56 = vld [vmem:[%s5356_s2 + $0x488] sm:$0xff]  ;;  %v608_v57 = vld [vmem:[%s5356_s2 + $0x498] sm:$0xff]  ;;  %v605_v58 = vld [vmem:[%s5356_s2 + $0x480] sm:$0xff] }
  0x3d   : > { %766 = vmatprep.subr.mxu0 %v686_v16  ;;  %837 = vmatprep.subr.mxu1 %v688_v17  ;;  %v607_v59 = vld [vmem:[%s5356_s2 + $0x490] sm:$0xff]  ;;  %v598_v60 = vld [vmem:[%s5356_s2 + $0x448] sm:$0xff]  ;;  %v600_v61 = vld [vmem:[%s5356_s2 + $0x458] sm:$0xff]  ;;  %v450_v13 = vsub.s32 %v447_v9, %v3251_v10  ;;  %v720_v14 = vunpack.c.0.s8 %v719_v12 }
  0x3e   : > { %767 = vmatpush2.msra.mxu0 %v685_v18  ;;  %838 = vmatpush2.msra.mxu1 %v687_v19  ;;  %v597_v62 = vld [vmem:[%s5356_s2 + $0x440] sm:$0xff]  ;;  %v599_v63 = vld [vmem:[%s5356_s2 + $0x450] sm:$0xff]  ;;  %v590_v0 = vld [vmem:[%s5356_s2 + $0x408] sm:$0xff] }
  0x3f   : > { %768 = vmatprep.subr.mxu0 %v678_v20  ;;  %839 = vmatprep.subr.mxu1 %v680_v21  ;;  %v592_v1 = vld [vmem:[%s5356_s2 + $0x418] sm:$0xff]  ;;  %v589_v2 = vld [vmem:[%s5356_s2 + $0x400] sm:$0xff]  ;;  %v591_v3 = vld [vmem:[%s5356_s2 + $0x410] sm:$0xff]  ;;  %v3255_v17 = vsub.s32 %v720_v14, %v3251_v10 }
  0x40   : > { %769 = vmatpush2.msra.mxu0 %v677_v22  ;;  %840 = vmatpush2.msra.mxu1 %v679_v23  ;;  %v586_v4 = vld [vmem:[%s5356_s2 + $0x3e8] sm:$0xff]  ;;  %v588_v5 = vld [vmem:[%s5356_s2 + $0x3f8] sm:$0xff]  ;;  %v439_v15 = vld [vmem:[#allocation2] sm:$0xf] }
  0x41   : > { %770 = vmatprep.subr.mxu0 %v670_v24  ;;  %841 = vmatprep.subr.mxu1 %v672_v25  ;;  %v585_v22 = vld [vmem:[%s5356_s2 + $0x3e0] sm:$0xff]  ;;  %v587_v23 = vld [vmem:[%s5356_s2 + $0x3f0] sm:$0xff]  ;;  %v578_v24 = vld [vmem:[%s5356_s2 + $0x3a8] sm:$0xff] }
  0x42   : > { %771 = vmatpush2.msra.mxu0 %v669_v26  ;;  %842 = vmatpush2.msra.mxu1 %v671_v27  ;;  %v580_v25 = vld [vmem:[%s5356_s2 + $0x3b8] sm:$0xff]  ;;  %v577_v26 = vld [vmem:[%s5356_s2 + $0x3a0] sm:$0xff]  ;;  %v579_v27 = vld [vmem:[%s5356_s2 + $0x3b0] sm:$0xff] }
  0x43   : > { %772 = vmatprep.subr.mxu0 %v662_v28  ;;  %843 = vmatprep.subr.mxu1 %v664_v29  ;;  %v570_v28 = vld [vmem:[%s5356_s2 + $0x368] sm:$0xff]  ;;  %v572_v29 = vld [vmem:[%s5356_s2 + $0x378] sm:$0xff]  ;;  %v489_v6 = vld [vmem:[%s5356_s2 + $0xe0] sm:$0xff] }
  0x44   : > { %773 = vmatpush2.msra.mxu0 %v661_v30  ;;  %844 = vmatpush2.msra.mxu1 %v663_v31  ;;  %v569_v30 = vld [vmem:[%s5356_s2 + $0x360] sm:$0xff]  ;;  %v571_v31 = vld [vmem:[%s5356_s2 + $0x370] sm:$0xff]  ;;  %v482_v8 = vld [vmem:[%s5356_s2 + $0xa8] sm:$0xff] }
  0x45   : > { %774 = vmatprep.subr.mxu0 %v654_v32  ;;  %845 = vmatprep.subr.mxu1 %v656_v33  ;;  %v562_v32 = vld [vmem:[%s5356_s2 + $0x328] sm:$0xff]  ;;  %v564_v33 = vld [vmem:[%s5356_s2 + $0x338] sm:$0xff]  ;;  %v491_v7 = vld [vmem:[%s5356_s2 + $0xf0] sm:$0xff] }
  0x46   : > { %775 = vmatpush2.msra.mxu0 %v653_v34  ;;  %846 = vmatpush2.msra.mxu1 %v655_v35  ;;  %v561_v34 = vld [vmem:[%s5356_s2 + $0x320] sm:$0xff]  ;;  %v563_v35 = vld [vmem:[%s5356_s2 + $0x330] sm:$0xff]  ;;  %v484_v9 = vld [vmem:[%s5356_s2 + $0xb8] sm:$0xff] }
  0x47   : > { %776 = vmatprep.subr.mxu0 %v646_v36  ;;  %847 = vmatprep.subr.mxu1 %v648_v37  ;;  %v554_v36 = vld [vmem:[%s5356_s2 + $0x2e8] sm:$0xff]  ;;  %v556_v37 = vld [vmem:[%s5356_s2 + $0x2f8] sm:$0xff]  ;;  %v481_v11 = vld [vmem:[%s5356_s2 + $0xa0] sm:$0xff] }
  0x48   : > { %777 = vmatpush2.msra.mxu0 %v645_v38  ;;  %848 = vmatpush2.msra.mxu1 %v647_v39  ;;  %v553_v38 = vld [vmem:[%s5356_s2 + $0x2e0] sm:$0xff]  ;;  %v555_v39 = vld [vmem:[%s5356_s2 + $0x2f0] sm:$0xff]  ;;  %v476_v14 = vld [vmem:[%s5356_s2 + $0x78] sm:$0xff] }
  0x49   : > { %778 = vmatprep.subr.mxu0 %v638_v40  ;;  %849 = vmatprep.subr.mxu1 %v640_v41  ;;  %v546_v40 = vld [vmem:[%s5356_s2 + $0x2a8] sm:$0xff]  ;;  %v548_v41 = vld [vmem:[%s5356_s2 + $0x2b8] sm:$0xff]  ;;  %v483_v12 = vld [vmem:[%s5356_s2 + $0xb0] sm:$0xff] }
  0x4a   : > { %779 = vmatpush2.msra.mxu0 %v637_v42  ;;  %850 = vmatpush2.msra.mxu1 %v639_v43  ;;  %v545_v42 = vld [vmem:[%s5356_s2 + $0x2a0] sm:$0xff]  ;;  %v547_v43 = vld [vmem:[%s5356_s2 + $0x2b0] sm:$0xff] }
  0x4b   : > { %780 = vmatprep.subr.mxu0 %v630_v44  ;;  %851 = vmatprep.subr.mxu1 %v632_v45  ;;  %v538_v44 = vld [vmem:[%s5356_s2 + $0x268] sm:$0xff]  ;;  %v540_v45 = vld [vmem:[%s5356_s2 + $0x278] sm:$0xff] }
  0x4c   : > { %781 = vmatpush2.msra.mxu0 %v629_v46  ;;  %852 = vmatpush2.msra.mxu1 %v631_v47  ;;  %v537_v46 = vld [vmem:[%s5356_s2 + $0x260] sm:$0xff]  ;;  %v539_v47 = vld [vmem:[%s5356_s2 + $0x270] sm:$0xff] }
  0x4d   : > { %782 = vmatprep.subr.mxu0 %v622_v48  ;;  %853 = vmatprep.subr.mxu1 %v624_v49  ;;  %v530_v48 = vld [vmem:[%s5356_s2 + $0x228] sm:$0xff]  ;;  %v532_v49 = vld [vmem:[%s5356_s2 + $0x238] sm:$0xff] }
  0x4e   : > { %783 = vmatpush2.msra.mxu0 %v621_v50  ;;  %854 = vmatpush2.msra.mxu1 %v623_v51  ;;  %v529_v50 = vld [vmem:[%s5356_s2 + $0x220] sm:$0xff]  ;;  %v531_v51 = vld [vmem:[%s5356_s2 + $0x230] sm:$0xff] }
  0x4f   : > { %784 = vmatprep.subr.mxu0 %v614_v52  ;;  %855 = vmatprep.subr.mxu1 %v616_v53  ;;  %v522_v52 = vld [vmem:[%s5356_s2 + $0x1e8] sm:$0xff]  ;;  %v524_v53 = vld [vmem:[%s5356_s2 + $0x1f8] sm:$0xff] }
  0x50   : > { %785 = vmatpush2.msra.mxu0 %v613_v54  ;;  %856 = vmatpush2.msra.mxu1 %v615_v55  ;;  %v521_v54 = vld [vmem:[%s5356_s2 + $0x1e0] sm:$0xff]  ;;  %v523_v55 = vld [vmem:[%s5356_s2 + $0x1f0] sm:$0xff] }
  0x51   : > { %786 = vmatprep.subr.mxu0 %v606_v56  ;;  %857 = vmatprep.subr.mxu1 %v608_v57  ;;  %v514_v56 = vld [vmem:[%s5356_s2 + $0x1a8] sm:$0xff]  ;;  %v516_v57 = vld [vmem:[%s5356_s2 + $0x1b8] sm:$0xff] }
  0x52   : > { %787 = vmatpush2.msra.mxu0 %v605_v58  ;;  %858 = vmatpush2.msra.mxu1 %v607_v59  ;;  %v513_v58 = vld [vmem:[%s5356_s2 + $0x1a0] sm:$0xff]  ;;  %v515_v59 = vld [vmem:[%s5356_s2 + $0x1b0] sm:$0xff] }
  0x53   : > { %788 = vmatprep.subr.mxu0 %v598_v60  ;;  %859 = vmatprep.subr.mxu1 %v600_v61  ;;  %v506_v60 = vld [vmem:[%s5356_s2 + $0x168] sm:$0xff]  ;;  %v508_v61 = vld [vmem:[%s5356_s2 + $0x178] sm:$0xff] }
  0x54   : > { %789 = vmatpush2.msra.mxu0 %v597_v62  ;;  %860 = vmatpush2.msra.mxu1 %v599_v63  ;;  %v505_v62 = vld [vmem:[%s5356_s2 + $0x160] sm:$0xff]  ;;  %v507_v63 = vld [vmem:[%s5356_s2 + $0x170] sm:$0xff] }
  0x55   : > { %790 = vmatprep.subr.mxu0 %v590_v0  ;;  %861 = vmatprep.subr.mxu1 %v592_v1  ;;  %v498_v0 = vld [vmem:[%s5356_s2 + $0x128] sm:$0xff]  ;;  %v500_v1 = vld [vmem:[%s5356_s2 + $0x138] sm:$0xff] }
  0x56   : > { %791 = vmatpush2.msra.mxu0 %v589_v2  ;;  %862 = vmatpush2.msra.mxu1 %v591_v3  ;;  %v497_v2 = vld [vmem:[%s5356_s2 + $0x120] sm:$0xff]  ;;  %v499_v3 = vld [vmem:[%s5356_s2 + $0x130] sm:$0xff] }
  0x57   : > { %870 = vmatprep.subr.mxu0 %v586_v4  ;;  %941 = vmatprep.subr.mxu1 %v588_v5  ;;  %v490_v4 = vld [vmem:[%s5356_s2 + $0xe8] sm:$0xff]  ;;  %v492_v5 = vld [vmem:[%s5356_s2 + $0xf8] sm:$0xff] }
  0x92   : > { %v444_v16 = vpop.permute.xlu0 %443 }
  0x93   : > { %v3257_v18 = vrot.slane %v444_v16, %v450_v13  ;;  %v474_v13 = vld [vmem:[%s5356_s2 + $0x68] sm:$0xff]  ;;  %v475_v16 = vld [vmem:[%s5356_s2 + $0x70] sm:$0xff] }
  0x95   : > { %v453_v19 = vmul.f32 %v3257_v18, %v439_v15  ;;  %v473_v15 = vld [vmem:[%s5356_s2 + $0x60] sm:$0xff] }
  0x97   : > { %v3261_v20 = vrot.slane %v453_v19, %v3255_v17  ;;  %v466_v19 = vld [vmem:[%s5356_s2 + $0x28] sm:$0xff] }
  0x99   : > { %v725_v21 = vcombine.high %v3261_v20, %v3261_v20 }
  0x9b   : > { %792 = vmatprep.mubr.f32.mxu0 %v725_v21  ;;  %863 = vmatprep.mubr.f32.mxu1 %v725_v21 }
  0x9c   : > { %793 = vmatmul.mubr.f32.vlgmr.msra.gmra.mxu0 %v3261_v20  ;;  %864 = vmatmul.mubr.f32.vlgmr.msra.gmra.mxu1 %v3261_v20 }
  0x9d   : > { %871 = vmatpush1.msra.mxu0 %v585_v22  ;;  %942 = vmatpush1.msra.mxu1 %v587_v23  ;;  %v465_v22 = vld [vmem:[%s5356_s2 + $0x20] sm:$0xff]  ;;  %v467_v23 = vld [vmem:[%s5356_s2 + $0x30] sm:$0xff] }
  0x9e   : > { %872 = vmatprep.subr.mxu0 %v578_v24  ;;  %934 = vmatprep.mubr.f32.mxu0 %v725_v21  ;;  %v714_v24 = vld [vmem:[%s5356_s2 + $0x7e8] sm:$0xff] }
  0x9f   : > { %943 = vmatprep.subr.mxu1 %v580_v25  ;;  %1005 = vmatprep.mubr.f32.mxu1 %v725_v21  ;;  %v468_v21 = vld [vmem:[%s5356_s2 + $0x38] sm:$0xff] }
  0xa0   : > { %873 = vmatpush1.msra.mxu0 %v577_v26  ;;  %944 = vmatpush1.msra.mxu1 %v579_v27  ;;  %v716_v25 = vld [vmem:[%s5356_s2 + $0x7f8] sm:$0xff]  ;;  %v713_v26 = vld [vmem:[%s5356_s2 + $0x7e0] sm:$0xff]  ;;  %v715_v27 = vld [vmem:[%s5356_s2 + $0x7f0] sm:$0xff] }
  0xa1   : > { %874 = vmatprep.subr.mxu0 %v570_v28  ;;  %945 = vmatprep.subr.mxu1 %v572_v29  ;;  %v706_v28 = vld [vmem:[%s5356_s2 + $0x7a8] sm:$0xff]  ;;  %v708_v29 = vld [vmem:[%s5356_s2 + $0x7b8] sm:$0xff] }
  0xa2   : > { %875 = vmatpush1.msra.mxu0 %v569_v30  ;;  %946 = vmatpush1.msra.mxu1 %v571_v31  ;;  %v705_v30 = vld [vmem:[%s5356_s2 + $0x7a0] sm:$0xff]  ;;  %v707_v31 = vld [vmem:[%s5356_s2 + $0x7b0] sm:$0xff] }
  0xa3   : > { %876 = vmatprep.subr.mxu0 %v562_v32  ;;  %947 = vmatprep.subr.mxu1 %v564_v33  ;;  %v698_v32 = vld [vmem:[%s5356_s2 + $0x768] sm:$0xff]  ;;  %v700_v33 = vld [vmem:[%s5356_s2 + $0x778] sm:$0xff] }
  0xa4   : > { %877 = vmatpush1.msra.mxu0 %v561_v34  ;;  %948 = vmatpush1.msra.mxu1 %v563_v35  ;;  %v697_v34 = vld [vmem:[%s5356_s2 + $0x760] sm:$0xff]  ;;  %v699_v35 = vld [vmem:[%s5356_s2 + $0x770] sm:$0xff] }
  0xa5   : > { %878 = vmatprep.subr.mxu0 %v554_v36  ;;  %949 = vmatprep.subr.mxu1 %v556_v37  ;;  %v690_v36 = vld [vmem:[%s5356_s2 + $0x728] sm:$0xff]  ;;  %v692_v37 = vld [vmem:[%s5356_s2 + $0x738] sm:$0xff] }
  0xa6   : > { %879 = vmatpush1.msra.mxu0 %v553_v38  ;;  %950 = vmatpush1.msra.mxu1 %v555_v39  ;;  %v689_v38 = vld [vmem:[%s5356_s2 + $0x720] sm:$0xff]  ;;  %v691_v39 = vld [vmem:[%s5356_s2 + $0x730] sm:$0xff] }
  0xa7   : > { %880 = vmatprep.subr.mxu0 %v546_v40  ;;  %951 = vmatprep.subr.mxu1 %v548_v41  ;;  %v682_v40 = vld [vmem:[%s5356_s2 + $0x6e8] sm:$0xff]  ;;  %v684_v41 = vld [vmem:[%s5356_s2 + $0x6f8] sm:$0xff] }
  0xa8   : > { %881 = vmatpush1.msra.mxu0 %v545_v42  ;;  %952 = vmatpush1.msra.mxu1 %v547_v43  ;;  %v681_v42 = vld [vmem:[%s5356_s2 + $0x6e0] sm:$0xff]  ;;  %v683_v43 = vld [vmem:[%s5356_s2 + $0x6f0] sm:$0xff] }
  0xa9   : > { %882 = vmatprep.subr.mxu0 %v538_v44  ;;  %953 = vmatprep.subr.mxu1 %v540_v45  ;;  %v674_v44 = vld [vmem:[%s5356_s2 + $0x6a8] sm:$0xff]  ;;  %v676_v45 = vld [vmem:[%s5356_s2 + $0x6b8] sm:$0xff] }
  0xaa   : > { %883 = vmatpush1.msra.mxu0 %v537_v46  ;;  %954 = vmatpush1.msra.mxu1 %v539_v47  ;;  %v673_v46 = vld [vmem:[%s5356_s2 + $0x6a0] sm:$0xff]  ;;  %v675_v47 = vld [vmem:[%s5356_s2 + $0x6b0] sm:$0xff] }
  0xab   : > { %884 = vmatprep.subr.mxu0 %v530_v48  ;;  %955 = vmatprep.subr.mxu1 %v532_v49  ;;  %v666_v48 = vld [vmem:[%s5356_s2 + $0x668] sm:$0xff]  ;;  %v668_v49 = vld [vmem:[%s5356_s2 + $0x678] sm:$0xff] }
  0xac   : > { %885 = vmatpush1.msra.mxu0 %v529_v50  ;;  %956 = vmatpush1.msra.mxu1 %v531_v51  ;;  %v665_v50 = vld [vmem:[%s5356_s2 + $0x660] sm:$0xff]  ;;  %v667_v51 = vld [vmem:[%s5356_s2 + $0x670] sm:$0xff] }
  0xad   : > { %886 = vmatprep.subr.mxu0 %v522_v52  ;;  %957 = vmatprep.subr.mxu1 %v524_v53  ;;  %v658_v52 = vld [vmem:[%s5356_s2 + $0x628] sm:$0xff]  ;;  %v660_v53 = vld [vmem:[%s5356_s2 + $0x638] sm:$0xff] }
  0xae   : > { %887 = vmatpush1.msra.mxu0 %v521_v54  ;;  %958 = vmatpush1.msra.mxu1 %v523_v55  ;;  %v657_v54 = vld [vmem:[%s5356_s2 + $0x620] sm:$0xff]  ;;  %v659_v55 = vld [vmem:[%s5356_s2 + $0x630] sm:$0xff] }
  0xaf   : > { %888 = vmatprep.subr.mxu0 %v514_v56  ;;  %959 = vmatprep.subr.mxu1 %v516_v57  ;;  %v650_v56 = vld [vmem:[%s5356_s2 + $0x5e8] sm:$0xff]  ;;  %v652_v57 = vld [vmem:[%s5356_s2 + $0x5f8] sm:$0xff] }
  0xb0   : > { %889 = vmatpush1.msra.mxu0 %v513_v58  ;;  %960 = vmatpush1.msra.mxu1 %v515_v59  ;;  %v649_v58 = vld [vmem:[%s5356_s2 + $0x5e0] sm:$0xff]  ;;  %v651_v59 = vld [vmem:[%s5356_s2 + $0x5f0] sm:$0xff] }
  0xb1   : > { %890 = vmatprep.subr.mxu0 %v506_v60  ;;  %961 = vmatprep.subr.mxu1 %v508_v61  ;;  %v642_v60 = vld [vmem:[%s5356_s2 + $0x5a8] sm:$0xff]  ;;  %v644_v61 = vld [vmem:[%s5356_s2 + $0x5b8] sm:$0xff] }
  0xb2   : > { %891 = vmatpush1.msra.mxu0 %v505_v62  ;;  %962 = vmatpush1.msra.mxu1 %v507_v63  ;;  %v641_v62 = vld [vmem:[%s5356_s2 + $0x5a0] sm:$0xff]  ;;  %v643_v63 = vld [vmem:[%s5356_s2 + $0x5b0] sm:$0xff] }
  0xb3   : > { %892 = vmatprep.subr.mxu0 %v498_v0  ;;  %963 = vmatprep.subr.mxu1 %v500_v1  ;;  %v634_v0 = vld [vmem:[%s5356_s2 + $0x568] sm:$0xff]  ;;  %v636_v1 = vld [vmem:[%s5356_s2 + $0x578] sm:$0xff] }
  0xb4   : > { %893 = vmatpush1.msra.mxu0 %v497_v2  ;;  %964 = vmatpush1.msra.mxu1 %v499_v3  ;;  %v633_v2 = vld [vmem:[%s5356_s2 + $0x560] sm:$0xff]  ;;  %v635_v3 = vld [vmem:[%s5356_s2 + $0x570] sm:$0xff] }
  0xb5   : > { %894 = vmatprep.subr.mxu0 %v490_v4  ;;  %965 = vmatprep.subr.mxu1 %v492_v5  ;;  %v626_v4 = vld [vmem:[%s5356_s2 + $0x528] sm:$0xff]  ;;  %v628_v5 = vld [vmem:[%s5356_s2 + $0x538] sm:$0xff] }
  0xb6   : > { %895 = vmatpush1.msra.mxu0 %v489_v6  ;;  %966 = vmatpush1.msra.mxu1 %v491_v7  ;;  %v625_v6 = vld [vmem:[%s5356_s2 + $0x520] sm:$0xff]  ;;  %v627_v7 = vld [vmem:[%s5356_s2 + $0x530] sm:$0xff] }
  0xb7   : > { %896 = vmatprep.subr.mxu0 %v482_v8  ;;  %967 = vmatprep.subr.mxu1 %v484_v9  ;;  %v440_v8 = vld [vmem:[#allocation2 + $0x4] sm:$0xf]  ;;  %v618_v9 = vld [vmem:[%s5356_s2 + $0x4e8] sm:$0xff] }
  0xb8   : > { %897 = vmatpush1.msra.mxu0 %v481_v11  ;;  %968 = vmatpush1.msra.mxu1 %v483_v12  ;;  %v620_v11 = vld [vmem:[%s5356_s2 + $0x4f8] sm:$0xff]  ;;  %v617_v12 = vld [vmem:[%s5356_s2 + $0x4e0] sm:$0xff] }
  0xb9   : > { %898 = vmatprep.subr.mxu0 %v474_v13  ;;  %969 = vmatprep.subr.mxu1 %v476_v14  ;;  %v619_v13 = vld [vmem:[%s5356_s2 + $0x4f0] sm:$0xff]  ;;  %v610_v14 = vld [vmem:[%s5356_s2 + $0x4a8] sm:$0xff] }
  0xba   : > { %899 = vmatpush1.msra.mxu0 %v473_v15  ;;  %970 = vmatpush1.msra.mxu1 %v475_v16  ;;  %v612_v15 = vld [vmem:[%s5356_s2 + $0x4b8] sm:$0xff]  ;;  %v454_v16 = vmul.f32 %v3257_v18, %v440_v8 }
  0xbb   : > { %900 = vmatprep.subr.mxu0 %v466_v19  ;;  %971 = vmatprep.subr.mxu1 %v468_v21  ;;  %v609_v19 = vld [vmem:[%s5356_s2 + $0x4a0] sm:$0xff]  ;;  %v611_v21 = vld [vmem:[%s5356_s2 + $0x4b0] sm:$0xff]  ;;  %v1387_v8 = vld [vmem:[%s5358_s4 + $0x158] sm:$0xff] }
  0xbc   : > { %901 = vmatpush1.msra.mxu0 %v465_v22  ;;  %972 = vmatpush1.msra.mxu1 %v467_v23  ;;  %v602_v22 = vld [vmem:[%s5356_s2 + $0x468] sm:$0xff]  ;;  %v604_v23 = vld [vmem:[%s5356_s2 + $0x478] sm:$0xff] }
  0xbd   : > { %902 = vmatprep.subr.mxu0 %v714_v24  ;;  %973 = vmatprep.subr.mxu1 %v716_v25  ;;  %v601_v24 = vld [vmem:[%s5356_s2 + $0x460] sm:$0xff]  ;;  %v603_v25 = vld [vmem:[%s5356_s2 + $0x470] sm:$0xff] }
  0xbe   : > { %903 = vmatpush2.msra.mxu0 %v713_v26  ;;  %974 = vmatpush2.msra.mxu1 %v715_v27  ;;  %v594_v26 = vld [vmem:[%s5356_s2 + $0x428] sm:$0xff]  ;;  %v596_v27 = vld [vmem:[%s5356_s2 + $0x438] sm:$0xff] }
  0xbf   : > { %904 = vmatprep.subr.mxu0 %v706_v28  ;;  %975 = vmatprep.subr.mxu1 %v708_v29  ;;  %v3641_v28 = vrot.slane %v454_v16, %v3255_v17  ;;  %v593_v29 = vld [vmem:[%s5356_s2 + $0x420] sm:$0xff]  ;;  %v1369_v16 = vld [vmem:[%s5358_s4 + $0xc8] sm:$0xff] }
  0xc0   : > { %905 = vmatpush2.msra.mxu0 %v705_v30  ;;  %976 = vmatpush2.msra.mxu1 %v707_v31  ;;  %v595_v30 = vld [vmem:[%s5356_s2 + $0x430] sm:$0xff]  ;;  %v1465_v31 = vld [vmem:[%s5358_s4 + $0x3c8] sm:$0xff] }
  0xc1   : > { %906 = vmatprep.subr.mxu0 %v698_v32  ;;  %977 = vmatprep.subr.mxu1 %v700_v33  ;;  %v1467_v32 = vld [vmem:[%s5358_s4 + $0x3d8] sm:$0xff]  ;;  %v1464_v33 = vld [vmem:[%s5358_s4 + $0x3c0] sm:$0xff] }
  0xc2   : > { %907 = vmatpush2.msra.mxu0 %v697_v34  ;;  %978 = vmatpush2.msra.mxu1 %v699_v35  ;;  %v3662_v34 = vcombine.high %v3641_v28, %v3641_v28  ;;  %v1466_v35 = vld [vmem:[%s5358_s4 + $0x3d0] sm:$0xff] }
  0xc3   : > { %908 = vmatprep.subr.mxu0 %v690_v36  ;;  %979 = vmatprep.subr.mxu1 %v692_v37  ;;  %v1457_v36 = vld [vmem:[%s5358_s4 + $0x388] sm:$0xff]  ;;  %v1459_v37 = vld [vmem:[%s5358_s4 + $0x398] sm:$0xff] }
  0xc4   : > { %909 = vmatpush2.msra.mxu0 %v689_v38  ;;  %980 = vmatpush2.msra.mxu1 %v691_v39  ;;  %v1458_v38 = vld [vmem:[%s5358_s4 + $0x390] sm:$0xff]  ;;  %v1449_v39 = vld [vmem:[%s5358_s4 + $0x348] sm:$0xff] }
  0xc5   : > { %910 = vmatprep.subr.mxu0 %v682_v40  ;;  %981 = vmatprep.subr.mxu1 %v684_v41  ;;  %v1451_v40 = vld [vmem:[%s5358_s4 + $0x358] sm:$0xff]  ;;  %v1448_v41 = vld [vmem:[%s5358_s4 + $0x340] sm:$0xff] }
  0xc6   : > { %911 = vmatpush2.msra.mxu0 %v681_v42  ;;  %982 = vmatpush2.msra.mxu1 %v683_v43  ;;  %v1450_v42 = vld [vmem:[%s5358_s4 + $0x350] sm:$0xff]  ;;  %v1441_v43 = vld [vmem:[%s5358_s4 + $0x308] sm:$0xff] }
  0xc7   : > { %912 = vmatprep.subr.mxu0 %v674_v44  ;;  %983 = vmatprep.subr.mxu1 %v676_v45  ;;  %v1443_v44 = vld [vmem:[%s5358_s4 + $0x318] sm:$0xff]  ;;  %v1440_v45 = vld [vmem:[%s5358_s4 + $0x300] sm:$0xff] }
  0xc8   : > { %913 = vmatpush2.msra.mxu0 %v673_v46  ;;  %984 = vmatpush2.msra.mxu1 %v675_v47  ;;  %v1442_v46 = vld [vmem:[%s5358_s4 + $0x310] sm:$0xff]  ;;  %v1433_v47 = vld [vmem:[%s5358_s4 + $0x2c8] sm:$0xff] }
  0xc9   : > { %914 = vmatprep.subr.mxu0 %v666_v48  ;;  %985 = vmatprep.subr.mxu1 %v668_v49  ;;  %v1435_v48 = vld [vmem:[%s5358_s4 + $0x2d8] sm:$0xff]  ;;  %v1432_v49 = vld [vmem:[%s5358_s4 + $0x2c0] sm:$0xff] }
  0xca   : > { %915 = vmatpush2.msra.mxu0 %v665_v50  ;;  %986 = vmatpush2.msra.mxu1 %v667_v51  ;;  %v1434_v50 = vld [vmem:[%s5358_s4 + $0x2d0] sm:$0xff]  ;;  %v1425_v51 = vld [vmem:[%s5358_s4 + $0x288] sm:$0xff] }
  0xcb   : > { %916 = vmatprep.subr.mxu0 %v658_v52  ;;  %987 = vmatprep.subr.mxu1 %v660_v53  ;;  %v1427_v52 = vld [vmem:[%s5358_s4 + $0x298] sm:$0xff]  ;;  %v1424_v53 = vld [vmem:[%s5358_s4 + $0x280] sm:$0xff] }
  0xcc   : > { %917 = vmatpush2.msra.mxu0 %v657_v54  ;;  %988 = vmatpush2.msra.mxu1 %v659_v55  ;;  %v1426_v54 = vld [vmem:[%s5358_s4 + $0x290] sm:$0xff]  ;;  %v1417_v55 = vld [vmem:[%s5358_s4 + $0x248] sm:$0xff] }
  0xcd   : > { %918 = vmatprep.subr.mxu0 %v650_v56  ;;  %989 = vmatprep.subr.mxu1 %v652_v57  ;;  %v1419_v56 = vld [vmem:[%s5358_s4 + $0x258] sm:$0xff]  ;;  %v1416_v57 = vld [vmem:[%s5358_s4 + $0x240] sm:$0xff] }
  0xce   : > { %919 = vmatpush2.msra.mxu0 %v649_v58  ;;  %990 = vmatpush2.msra.mxu1 %v651_v59  ;;  %v1418_v58 = vld [vmem:[%s5358_s4 + $0x250] sm:$0xff]  ;;  %v1409_v59 = vld [vmem:[%s5358_s4 + $0x208] sm:$0xff] }
  0xcf   : > { %920 = vmatprep.subr.mxu0 %v642_v60  ;;  %991 = vmatprep.subr.mxu1 %v644_v61  ;;  %v1411_v60 = vld [vmem:[%s5358_s4 + $0x218] sm:$0xff]  ;;  %v1408_v61 = vld [vmem:[%s5358_s4 + $0x200] sm:$0xff] }
  0xd0   : > { %921 = vmatpush2.msra.mxu0 %v641_v62  ;;  %992 = vmatpush2.msra.mxu1 %v643_v63  ;;  %v1410_v62 = vld [vmem:[%s5358_s4 + $0x210] sm:$0xff]  ;;  %v1401_v63 = vld [vmem:[%s5358_s4 + $0x1c8] sm:$0xff] }
  0xd1   : > { %922 = vmatprep.subr.mxu0 %v634_v0  ;;  %993 = vmatprep.subr.mxu1 %v636_v1  ;;  %v1403_v0 = vld [vmem:[%s5358_s4 + $0x1d8] sm:$0xff]  ;;  %v1400_v1 = vld [vmem:[%s5358_s4 + $0x1c0] sm:$0xff] }
  0xd2   : > { %923 = vmatpush2.msra.mxu0 %v633_v2  ;;  %994 = vmatpush2.msra.mxu1 %v635_v3  ;;  %v1402_v2 = vld [vmem:[%s5358_s4 + $0x1d0] sm:$0xff]  ;;  %v1393_v3 = vld [vmem:[%s5358_s4 + $0x188] sm:$0xff] }
  0xd3   : > { %924 = vmatprep.subr.mxu0 %v626_v4  ;;  %995 = vmatprep.subr.mxu1 %v628_v5  ;;  %v1395_v4 = vld [vmem:[%s5358_s4 + $0x198] sm:$0xff]  ;;  %v1392_v5 = vld [vmem:[%s5358_s4 + $0x180] sm:$0xff] }
  0xd4   : > { %925 = vmatpush2.msra.mxu0 %v625_v6  ;;  %996 = vmatpush2.msra.mxu1 %v627_v7  ;;  %v1394_v6 = vld [vmem:[%s5358_s4 + $0x190] sm:$0xff]  ;;  %v1385_v7 = vld [vmem:[%s5358_s4 + $0x148] sm:$0xff] }
  0xd5   : > { %926 = vmatprep.subr.mxu0 %v618_v9  ;;  %997 = vmatprep.subr.mxu1 %v620_v11  ;;  %v1384_v9 = vld [vmem:[%s5358_s4 + $0x140] sm:$0xff]  ;;  %v1386_v11 = vld [vmem:[%s5358_s4 + $0x150] sm:$0xff] }
  0xd6   : > { %927 = vmatpush2.msra.mxu0 %v617_v12  ;;  %998 = vmatpush2.msra.mxu1 %v619_v13  ;;  %v1377_v12 = vld [vmem:[%s5358_s4 + $0x108] sm:$0xff]  ;;  %v1379_v13 = vld [vmem:[%s5358_s4 + $0x118] sm:$0xff] }
  0xd7   : > { %928 = vmatprep.subr.mxu0 %v610_v14  ;;  %999 = vmatprep.subr.mxu1 %v612_v15  ;;  %v1376_v14 = vld [vmem:[%s5358_s4 + $0x100] sm:$0xff]  ;;  %v1378_v15 = vld [vmem:[%s5358_s4 + $0x110] sm:$0xff] }
  0xd8   : > { %929 = vmatpush2.msra.mxu0 %v609_v19  ;;  %1000 = vmatpush2.msra.mxu1 %v611_v21  ;;  %v1371_v19 = vld [vmem:[%s5358_s4 + $0xd8] sm:$0xff]  ;;  %v1368_v21 = vld [vmem:[%s5358_s4 + $0xc0] sm:$0xff] }
  0xd9   : > { %930 = vmatprep.subr.mxu0 %v602_v22  ;;  %1001 = vmatprep.subr.mxu1 %v604_v23  ;;  %v1370_v22 = vld [vmem:[%s5358_s4 + $0xd0] sm:$0xff]  ;;  %v1361_v23 = vld [vmem:[%s5358_s4 + $0x88] sm:$0xff] }
  0xda   : > { %931 = vmatpush2.msra.mxu0 %v601_v24  ;;  %1002 = vmatpush2.msra.mxu1 %v603_v25  ;;  %v1363_v24 = vld [vmem:[%s5358_s4 + $0x98] sm:$0xff]  ;;  %v1360_v25 = vld [vmem:[%s5358_s4 + $0x80] sm:$0xff] }
  0xdb   : > { %932 = vmatprep.subr.mxu0 %v594_v26  ;;  %1003 = vmatprep.subr.mxu1 %v596_v27  ;;  %v1362_v26 = vld [vmem:[%s5358_s4 + $0x90] sm:$0xff]  ;;  %v1353_v27 = vld [vmem:[%s5358_s4 + $0x48] sm:$0xff] }
  0xdc   : > { %933 = vmatpush2.msra.mxu0 %v593_v29  ;;  %1004 = vmatpush2.msra.mxu1 %v595_v30  ;;  %v1355_v29 = vld [vmem:[%s5358_s4 + $0x58] sm:$0xff]  ;;  %v1352_v30 = vld [vmem:[%s5358_s4 + $0x40] sm:$0xff] }
  0xdd   : > { %935 = vmatmul.mubr.f32.vlgmr.msra.gmra.mxu0 %v3261_v20  ;;  %1006 = vmatmul.mubr.f32.vlgmr.msra.gmra.mxu1 %v3261_v20  ;;  %v1456_v20 = vld [vmem:[%s5358_s4 + $0x380] sm:$0xff] }
  0xde   : > { %1611 = vmatprep.subr.mxu0 %v1465_v31  ;;  %1682 = vmatprep.subr.mxu1 %v1467_v32  ;;  %v1354_v31 = vld [vmem:[%s5358_s4 + $0x50] sm:$0xff]  ;;  %v1345_v32 = vld [vmem:[%s5358_s4 + $0x8] sm:$0xff] }
  0xdf   : > { %1612 = vmatpush1.msra.mxu0 %v1464_v33  ;;  %1675 = vmatprep.mubr.f32.mxu0 %v3662_v34  ;;  %v1347_v33 = vld [vmem:[%s5358_s4 + $0x18] sm:$0xff] }
  0xe0   : > { %1683 = vmatpush1.msra.mxu1 %v1466_v35  ;;  %1746 = vmatprep.mubr.f32.mxu1 %v3662_v34  ;;  %v1344_v35 = vld [vmem:[%s5358_s4] sm:$0xff] }
  0xe1   : > { %1613 = vmatprep.subr.mxu0 %v1457_v36  ;;  %1684 = vmatprep.subr.mxu1 %v1459_v37  ;;  %v1346_v36 = vld [vmem:[%s5358_s4 + $0x10] sm:$0xff]  ;;  %v1593_v37 = vld [vmem:[%s5358_s4 + $0x7c8] sm:$0xff] }
  0xe2   : > { %1614 = vmatpush1.msra.mxu0 %v1456_v20  ;;  %1685 = vmatpush1.msra.mxu1 %v1458_v38  ;;  %v1595_v20 = vld [vmem:[%s5358_s4 + $0x7d8] sm:$0xff]  ;;  %v1592_v38 = vld [vmem:[%s5358_s4 + $0x7c0] sm:$0xff] }
  0xe3   : > { %1615 = vmatprep.subr.mxu0 %v1449_v39  ;;  %1686 = vmatprep.subr.mxu1 %v1451_v40  ;;  %v1594_v39 = vld [vmem:[%s5358_s4 + $0x7d0] sm:$0xff]  ;;  %v1585_v40 = vld [vmem:[%s5358_s4 + $0x788] sm:$0xff] }
  0xe4   : > { %1616 = vmatpush1.msra.mxu0 %v1448_v41  ;;  %1687 = vmatpush1.msra.mxu1 %v1450_v42  ;;  %v1587_v41 = vld [vmem:[%s5358_s4 + $0x798] sm:$0xff]  ;;  %v1584_v42 = vld [vmem:[%s5358_s4 + $0x780] sm:$0xff] }
  0xe5   : > { %1617 = vmatprep.subr.mxu0 %v1441_v43  ;;  %1688 = vmatprep.subr.mxu1 %v1443_v44  ;;  %v1586_v43 = vld [vmem:[%s5358_s4 + $0x790] sm:$0xff]  ;;  %v1577_v44 = vld [vmem:[%s5358_s4 + $0x748] sm:$0xff] }
  0xe6   : > { %1618 = vmatpush1.msra.mxu0 %v1440_v45  ;;  %1689 = vmatpush1.msra.mxu1 %v1442_v46  ;;  %v1579_v45 = vld [vmem:[%s5358_s4 + $0x758] sm:$0xff]  ;;  %v1576_v46 = vld [vmem:[%s5358_s4 + $0x740] sm:$0xff] }
  0xe7   : > { %1619 = vmatprep.subr.mxu0 %v1433_v47  ;;  %1690 = vmatprep.subr.mxu1 %v1435_v48  ;;  %v1578_v47 = vld [vmem:[%s5358_s4 + $0x750] sm:$0xff]  ;;  %v1569_v48 = vld [vmem:[%s5358_s4 + $0x708] sm:$0xff] }
  0xe8   : > { %1620 = vmatpush1.msra.mxu0 %v1432_v49  ;;  %1691 = vmatpush1.msra.mxu1 %v1434_v50  ;;  %v1571_v49 = vld [vmem:[%s5358_s4 + $0x718] sm:$0xff]  ;;  %v1568_v50 = vld [vmem:[%s5358_s4 + $0x700] sm:$0xff] }
  0xe9   : > { %1621 = vmatprep.subr.mxu0 %v1425_v51  ;;  %1692 = vmatprep.subr.mxu1 %v1427_v52  ;;  %v1570_v51 = vld [vmem:[%s5358_s4 + $0x710] sm:$0xff]  ;;  %v1561_v52 = vld [vmem:[%s5358_s4 + $0x6c8] sm:$0xff] }
  0xea   : > { %1622 = vmatpush1.msra.mxu0 %v1424_v53  ;;  %1693 = vmatpush1.msra.mxu1 %v1426_v54  ;;  %v1563_v53 = vld [vmem:[%s5358_s4 + $0x6d8] sm:$0xff]  ;;  %v1560_v54 = vld [vmem:[%s5358_s4 + $0x6c0] sm:$0xff] }
  0xeb   : > { %1623 = vmatprep.subr.mxu0 %v1417_v55  ;;  %1694 = vmatprep.subr.mxu1 %v1419_v56  ;;  %v1562_v55 = vld [vmem:[%s5358_s4 + $0x6d0] sm:$0xff]  ;;  %v1553_v56 = vld [vmem:[%s5358_s4 + $0x688] sm:$0xff] }
  0xec   : > { %1624 = vmatpush1.msra.mxu0 %v1416_v57  ;;  %1695 = vmatpush1.msra.mxu1 %v1418_v58  ;;  %v1555_v57 = vld [vmem:[%s5358_s4 + $0x698] sm:$0xff]  ;;  %v1552_v58 = vld [vmem:[%s5358_s4 + $0x680] sm:$0xff] }
  0xed   : > { %1625 = vmatprep.subr.mxu0 %v1409_v59  ;;  %1696 = vmatprep.subr.mxu1 %v1411_v60  ;;  %v1554_v59 = vld [vmem:[%s5358_s4 + $0x690] sm:$0xff]  ;;  %v1545_v60 = vld [vmem:[%s5358_s4 + $0x648] sm:$0xff] }
  0xee   : > { %1626 = vmatpush1.msra.mxu0 %v1408_v61  ;;  %1697 = vmatpush1.msra.mxu1 %v1410_v62  ;;  %v1547_v61 = vld [vmem:[%s5358_s4 + $0x658] sm:$0xff]  ;;  %v1544_v62 = vld [vmem:[%s5358_s4 + $0x640] sm:$0xff] }
  0xef   : > { %1627 = vmatprep.subr.mxu0 %v1401_v63  ;;  %1698 = vmatprep.subr.mxu1 %v1403_v0  ;;  %v1546_v63 = vld [vmem:[%s5358_s4 + $0x650] sm:$0xff]  ;;  %v1537_v0 = vld [vmem:[%s5358_s4 + $0x608] sm:$0xff] }
  0xf0   : > { %1628 = vmatpush1.msra.mxu0 %v1400_v1  ;;  %1699 = vmatpush1.msra.mxu1 %v1402_v2  ;;  %v1539_v1 = vld [vmem:[%s5358_s4 + $0x618] sm:$0xff]  ;;  %v1536_v2 = vld [vmem:[%s5358_s4 + $0x600] sm:$0xff] }
  0xf1   : > { %1629 = vmatprep.subr.mxu0 %v1393_v3  ;;  %1700 = vmatprep.subr.mxu1 %v1395_v4  ;;  %v1538_v3 = vld [vmem:[%s5358_s4 + $0x610] sm:$0xff]  ;;  %v1529_v4 = vld [vmem:[%s5358_s4 + $0x5c8] sm:$0xff] }
  0xf2   : > { %1630 = vmatpush1.msra.mxu0 %v1392_v5  ;;  %1701 = vmatpush1.msra.mxu1 %v1394_v6  ;;  %v1531_v5 = vld [vmem:[%s5358_s4 + $0x5d8] sm:$0xff]  ;;  %v1528_v6 = vld [vmem:[%s5358_s4 + $0x5c0] sm:$0xff] }
  0xf3   : > { %1631 = vmatprep.subr.mxu0 %v1385_v7  ;;  %1702 = vmatprep.subr.mxu1 %v1387_v8  ;;  %v1530_v7 = vld [vmem:[%s5358_s4 + $0x5d0] sm:$0xff]  ;;  %v1521_v8 = vld [vmem:[%s5358_s4 + $0x588] sm:$0xff] }
  0xf4   : > { %1632 = vmatpush1.msra.mxu0 %v1384_v9  ;;  %1703 = vmatpush1.msra.mxu1 %v1386_v11  ;;  %v1523_v9 = vld [vmem:[%s5358_s4 + $0x598] sm:$0xff]  ;;  %v1520_v11 = vld [vmem:[%s5358_s4 + $0x580] sm:$0xff] }
  0xf5   : > { %1633 = vmatprep.subr.mxu0 %v1377_v12  ;;  %1704 = vmatprep.subr.mxu1 %v1379_v13  ;;  %v1522_v12 = vld [vmem:[%s5358_s4 + $0x590] sm:$0xff]  ;;  %v1513_v13 = vld [vmem:[%s5358_s4 + $0x548] sm:$0xff] }
  0xf6   : > { %1634 = vmatpush1.msra.mxu0 %v1376_v14  ;;  %1705 = vmatpush1.msra.mxu1 %v1378_v15  ;;  %v1515_v14 = vld [vmem:[%s5358_s4 + $0x558] sm:$0xff]  ;;  %v1512_v15 = vld [vmem:[%s5358_s4 + $0x540] sm:$0xff] }
  0xf7   : > { %1635 = vmatprep.subr.mxu0 %v1369_v16  ;;  %1706 = vmatprep.subr.mxu1 %v1371_v19  ;;  %v1514_v16 = vld [vmem:[%s5358_s4 + $0x550] sm:$0xff]  ;;  %v1505_v19 = vld [vmem:[%s5358_s4 + $0x508] sm:$0xff] }
  0xf8   : > { %1636 = vmatpush1.msra.mxu0 %v1368_v21  ;;  %1707 = vmatpush1.msra.mxu1 %v1370_v22  ;;  %v1507_v21 = vld [vmem:[%s5358_s4 + $0x518] sm:$0xff]  ;;  %v1504_v22 = vld [vmem:[%s5358_s4 + $0x500] sm:$0xff] }
  0xf9   : > { %1637 = vmatprep.subr.mxu0 %v1361_v23  ;;  %1708 = vmatprep.subr.mxu1 %v1363_v24  ;;  %v1506_v23 = vld [vmem:[%s5358_s4 + $0x510] sm:$0xff]  ;;  %v1497_v24 = vld [vmem:[%s5358_s4 + $0x4c8] sm:$0xff] }
  0xfa   : > { %1638 = vmatpush1.msra.mxu0 %v1360_v25  ;;  %1709 = vmatpush1.msra.mxu1 %v1362_v26  ;;  %v1499_v25 = vld [vmem:[%s5358_s4 + $0x4d8] sm:$0xff]  ;;  %v1496_v26 = vld [vmem:[%s5358_s4 + $0x4c0] sm:$0xff] }
  0xfb   : > { %1639 = vmatprep.subr.mxu0 %v1353_v27  ;;  %1710 = vmatprep.subr.mxu1 %v1355_v29  ;;  %v1498_v27 = vld [vmem:[%s5358_s4 + $0x4d0] sm:$0xff]  ;;  %v1489_v29 = vld [vmem:[%s5358_s4 + $0x488] sm:$0xff] }
  0xfc   : > { %1640 = vmatpush1.msra.mxu0 %v1352_v30  ;;  %1711 = vmatpush1.msra.mxu1 %v1354_v31  ;;  %v1491_v30 = vld [vmem:[%s5358_s4 + $0x498] sm:$0xff]  ;;  %v1488_v31 = vld [vmem:[%s5358_s4 + $0x480] sm:$0xff] }
  0xfd   : > { %1641 = vmatprep.subr.mxu0 %v1345_v32  ;;  %1712 = vmatprep.subr.mxu1 %v1347_v33  ;;  %v1490_v32 = vld [vmem:[%s5358_s4 + $0x490] sm:$0xff]  ;;  %v1481_v33 = vld [vmem:[%s5358_s4 + $0x448] sm:$0xff] }
  0xfe   : > { %1642 = vmatpush1.msra.mxu0 %v1344_v35  ;;  %1713 = vmatpush1.msra.mxu1 %v1346_v36  ;;  %v1483_v35 = vld [vmem:[%s5358_s4 + $0x458] sm:$0xff]  ;;  %v1480_v36 = vld [vmem:[%s5358_s4 + $0x440] sm:$0xff] }
  0xff   : > { %1643 = vmatprep.subr.mxu0 %v1593_v37  ;;  %1714 = vmatprep.subr.mxu1 %v1595_v20  ;;  %v1482_v37 = vld [vmem:[%s5358_s4 + $0x450] sm:$0xff]  ;;  %v1473_v20 = vld [vmem:[%s5358_s4 + $0x408] sm:$0xff] }
 0x100   : > { %1644 = vmatpush2.msra.mxu0 %v1592_v38  ;;  %1715 = vmatpush2.msra.mxu1 %v1594_v39  ;;  %v1475_v38 = vld [vmem:[%s5358_s4 + $0x418] sm:$0xff]  ;;  %v1472_v39 = vld [vmem:[%s5358_s4 + $0x400] sm:$0xff] }
 0x101   : > { %1645 = vmatprep.subr.mxu0 %v1585_v40  ;;  %1716 = vmatprep.subr.mxu1 %v1587_v41  ;;  %v1474_v40 = vld [vmem:[%s5358_s4 + $0x410] sm:$0xff]  ;;  %v1469_v41 = vld [vmem:[%s5358_s4 + $0x3e8] sm:$0xff] }
 0x102   : > { %1646 = vmatpush2.msra.mxu0 %v1584_v42  ;;  %1717 = vmatpush2.msra.mxu1 %v1586_v43  ;;  %v1471_v42 = vld [vmem:[%s5358_s4 + $0x3f8] sm:$0xff]  ;;  %v1468_v43 = vld [vmem:[%s5358_s4 + $0x3e0] sm:$0xff] }
 0x103   : > { %1647 = vmatprep.subr.mxu0 %v1577_v44  ;;  %1718 = vmatprep.subr.mxu1 %v1579_v45  ;;  %v1470_v44 = vld [vmem:[%s5358_s4 + $0x3f0] sm:$0xff]  ;;  %v1461_v45 = vld [vmem:[%s5358_s4 + $0x3a8] sm:$0xff] }
 0x104   : > { %1648 = vmatpush2.msra.mxu0 %v1576_v46  ;;  %1719 = vmatpush2.msra.mxu1 %v1578_v47  ;;  %v1463_v46 = vld [vmem:[%s5358_s4 + $0x3b8] sm:$0xff]  ;;  %v1460_v47 = vld [vmem:[%s5358_s4 + $0x3a0] sm:$0xff] }
 0x105   : > { %1649 = vmatprep.subr.mxu0 %v1569_v48  ;;  %1720 = vmatprep.subr.mxu1 %v1571_v49  ;;  %v1462_v48 = vld [vmem:[%s5358_s4 + $0x3b0] sm:$0xff]  ;;  %v1453_v49 = vld [vmem:[%s5358_s4 + $0x368] sm:$0xff] }
 0x106   : > { %1650 = vmatpush2.msra.mxu0 %v1568_v50  ;;  %1721 = vmatpush2.msra.mxu1 %v1570_v51  ;;  %v1455_v50 = vld [vmem:[%s5358_s4 + $0x378] sm:$0xff]  ;;  %v1452_v51 = vld [vmem:[%s5358_s4 + $0x360] sm:$0xff] }
 0x107   : > { %1651 = vmatprep.subr.mxu0 %v1561_v52  ;;  %1722 = vmatprep.subr.mxu1 %v1563_v53  ;;  %v1454_v52 = vld [vmem:[%s5358_s4 + $0x370] sm:$0xff]  ;;  %v1447_v53 = vld [vmem:[%s5358_s4 + $0x338] sm:$0xff] }
 0x108   : > { %1652 = vmatpush2.msra.mxu0 %v1560_v54  ;;  %1723 = vmatpush2.msra.mxu1 %v1562_v55  ;;  %v1444_v54 = vld [vmem:[%s5358_s4 + $0x320] sm:$0xff]  ;;  %v1446_v55 = vld [vmem:[%s5358_s4 + $0x330] sm:$0xff] }
 0x109   : > { %1653 = vmatprep.subr.mxu0 %v1553_v56  ;;  %1724 = vmatprep.subr.mxu1 %v1555_v57  ;;  %v1437_v56 = vld [vmem:[%s5358_s4 + $0x2e8] sm:$0xff]  ;;  %v1439_v57 = vld [vmem:[%s5358_s4 + $0x2f8] sm:$0xff] }
 0x10a   : > { %1654 = vmatpush2.msra.mxu0 %v1552_v58  ;;  %1725 = vmatpush2.msra.mxu1 %v1554_v59  ;;  %v1436_v58 = vld [vmem:[%s5358_s4 + $0x2e0] sm:$0xff]  ;;  %v1438_v59 = vld [vmem:[%s5358_s4 + $0x2f0] sm:$0xff] }
 0x10b   : > { %1655 = vmatprep.subr.mxu0 %v1545_v60  ;;  %1726 = vmatprep.subr.mxu1 %v1547_v61  ;;  %v1429_v60 = vld [vmem:[%s5358_s4 + $0x2a8] sm:$0xff]  ;;  %v1431_v61 = vld [vmem:[%s5358_s4 + $0x2b8] sm:$0xff] }
 0x10c   : > { %1656 = vmatpush2.msra.mxu0 %v1544_v62  ;;  %1727 = vmatpush2.msra.mxu1 %v1546_v63  ;;  %v1428_v62 = vld [vmem:[%s5358_s4 + $0x2a0] sm:$0xff]  ;;  %v1430_v63 = vld [vmem:[%s5358_s4 + $0x2b0] sm:$0xff] }
 0x10d   : > { %1657 = vmatprep.subr.mxu0 %v1537_v0  ;;  %1728 = vmatprep.subr.mxu1 %v1539_v1  ;;  %v1421_v0 = vld [vmem:[%s5358_s4 + $0x268] sm:$0xff]  ;;  %v1423_v1 = vld [vmem:[%s5358_s4 + $0x278] sm:$0xff] }
 0x10e   : > { %1658 = vmatpush2.msra.mxu0 %v1536_v2  ;;  %1729 = vmatpush2.msra.mxu1 %v1538_v3  ;;  %v1420_v2 = vld [vmem:[%s5358_s4 + $0x260] sm:$0xff]  ;;  %v1422_v3 = vld [vmem:[%s5358_s4 + $0x270] sm:$0xff] }
 0x10f   : > { %1659 = vmatprep.subr.mxu0 %v1529_v4  ;;  %1730 = vmatprep.subr.mxu1 %v1531_v5  ;;  %v1413_v4 = vld [vmem:[%s5358_s4 + $0x228] sm:$0xff]  ;;  %v1415_v5 = vld [vmem:[%s5358_s4 + $0x238] sm:$0xff] }
 0x110   : > { %1660 = vmatpush2.msra.mxu0 %v1528_v6  ;;  %1731 = vmatpush2.msra.mxu1 %v1530_v7  ;;  %v1412_v6 = vld [vmem:[%s5358_s4 + $0x220] sm:$0xff]  ;;  %v1414_v7 = vld [vmem:[%s5358_s4 + $0x230] sm:$0xff] }
 0x111   : > { %1661 = vmatprep.subr.mxu0 %v1521_v8  ;;  %1732 = vmatprep.subr.mxu1 %v1523_v9  ;;  %v1405_v8 = vld [vmem:[%s5358_s4 + $0x1e8] sm:$0xff]  ;;  %v1407_v9 = vld [vmem:[%s5358_s4 + $0x1f8] sm:$0xff] }
 0x112   : > { %1662 = vmatpush2.msra.mxu0 %v1520_v11  ;;  %1733 = vmatpush2.msra.mxu1 %v1522_v12  ;;  %v1404_v11 = vld [vmem:[%s5358_s4 + $0x1e0] sm:$0xff]  ;;  %v1406_v12 = vld [vmem:[%s5358_s4 + $0x1f0] sm:$0xff] }
 0x113   : > { %1663 = vmatprep.subr.mxu0 %v1513_v13  ;;  %1734 = vmatprep.subr.mxu1 %v1515_v14  ;;  %v1397_v13 = vld [vmem:[%s5358_s4 + $0x1a8] sm:$0xff]  ;;  %v1399_v14 = vld [vmem:[%s5358_s4 + $0x1b8] sm:$0xff] }
 0x114   : > { %1664 = vmatpush2.msra.mxu0 %v1512_v15  ;;  %1735 = vmatpush2.msra.mxu1 %v1514_v16  ;;  %v1396_v15 = vld [vmem:[%s5358_s4 + $0x1a0] sm:$0xff]  ;;  %v1398_v16 = vld [vmem:[%s5358_s4 + $0x1b0] sm:$0xff] }
 0x115   : > { %1665 = vmatprep.subr.mxu0 %v1505_v19  ;;  %1736 = vmatprep.subr.mxu1 %v1507_v21  ;;  %v1389_v19 = vld [vmem:[%s5358_s4 + $0x168] sm:$0xff]  ;;  %v1391_v21 = vld [vmem:[%s5358_s4 + $0x178] sm:$0xff] }
 0x116   : > { %1666 = vmatpush2.msra.mxu0 %v1504_v22  ;;  %1737 = vmatpush2.msra.mxu1 %v1506_v23  ;;  %v1388_v22 = vld [vmem:[%s5358_s4 + $0x160] sm:$0xff]  ;;  %v1390_v23 = vld [vmem:[%s5358_s4 + $0x170] sm:$0xff] }
 0x117   : > { %1667 = vmatprep.subr.mxu0 %v1497_v24  ;;  %1738 = vmatprep.subr.mxu1 %v1499_v25  ;;  %v1381_v24 = vld [vmem:[%s5358_s4 + $0x128] sm:$0xff]  ;;  %v1383_v25 = vld [vmem:[%s5358_s4 + $0x138] sm:$0xff] }
 0x118   : > { %1668 = vmatpush2.msra.mxu0 %v1496_v26  ;;  %1739 = vmatpush2.msra.mxu1 %v1498_v27  ;;  %v1380_v26 = vld [vmem:[%s5358_s4 + $0x120] sm:$0xff]  ;;  %v1382_v27 = vld [vmem:[%s5358_s4 + $0x130] sm:$0xff] }
 0x119   : > { %1669 = vmatprep.subr.mxu0 %v1489_v29  ;;  %1740 = vmatprep.subr.mxu1 %v1491_v30  ;;  %v1373_v29 = vld [vmem:[%s5358_s4 + $0xe8] sm:$0xff]  ;;  %v1375_v30 = vld [vmem:[%s5358_s4 + $0xf8] sm:$0xff] }
 0x11a   : > { %1670 = vmatpush2.msra.mxu0 %v1488_v31  ;;  %1741 = vmatpush2.msra.mxu1 %v1490_v32  ;;  %v1372_v31 = vld [vmem:[%s5358_s4 + $0xe0] sm:$0xff]  ;;  %v1374_v32 = vld [vmem:[%s5358_s4 + $0xf0] sm:$0xff] }
 0x11b   : > { %1671 = vmatprep.subr.mxu0 %v1481_v33  ;;  %1742 = vmatprep.subr.mxu1 %v1483_v35  ;;  %v1365_v33 = vld [vmem:[%s5358_s4 + $0xa8] sm:$0xff]  ;;  %v1367_v35 = vld [vmem:[%s5358_s4 + $0xb8] sm:$0xff] }
 0x11c   : > { %1672 = vmatpush2.msra.mxu0 %v1480_v36  ;;  %1743 = vmatpush2.msra.mxu1 %v1482_v37  ;;  %v1364_v36 = vld [vmem:[%s5358_s4 + $0xa0] sm:$0xff]  ;;  %v1366_v37 = vld [vmem:[%s5358_s4 + $0xb0] sm:$0xff] }
 0x11d   : > { %1673 = vmatprep.subr.mxu0 %v1473_v20  ;;  %1744 = vmatprep.subr.mxu1 %v1475_v38  ;;  %v1357_v20 = vld [vmem:[%s5358_s4 + $0x68] sm:$0xff]  ;;  %v1359_v38 = vld [vmem:[%s5358_s4 + $0x78] sm:$0xff] }
 0x11e   : > { %1674 = vmatpush2.msra.mxu0 %v1472_v39  ;;  %1745 = vmatpush2.msra.mxu1 %v1474_v40  ;;  %v1356_v39 = vld [vmem:[%s5358_s4 + $0x60] sm:$0xff]  ;;  %v1358_v40 = vld [vmem:[%s5358_s4 + $0x70] sm:$0xff] }
 0x11f   : > { %1676 = vmatmul.mubr.f32.vlgmr.msra.gmra.mxu0 %v3641_v28  ;;  %1747 = vmatmul.mubr.f32.vlgmr.msra.gmra.mxu1 %v3641_v28 }
 0x120   : > { %1753 = vmatprep.subr.mxu0 %v1469_v41  ;;  %1824 = vmatprep.subr.mxu1 %v1471_v42  ;;  %v1349_v41 = vld [vmem:[%s5358_s4 + $0x28] sm:$0xff]  ;;  %v1351_v42 = vld [vmem:[%s5358_s4 + $0x38] sm:$0xff] }
 0x121   : > { %1754 = vmatpush1.msra.mxu0 %v1468_v43  ;;  %1817 = vmatprep.mubr.f32.mxu0 %v3662_v34  ;;  %v1348_v43 = vld [vmem:[%s5358_s4 + $0x20] sm:$0xff] }
 0x122   : > { %1825 = vmatpush1.msra.mxu1 %v1470_v44  ;;  %1888 = vmatprep.mubr.f32.mxu1 %v3662_v34  ;;  %v1445_v34 = vld [vmem:[%s5358_s4 + $0x328] sm:$0xff]  ;;  %v1350_v44 = vld [vmem:[%s5358_s4 + $0x30] sm:$0xff] }
 0x123   : > { %1755 = vmatprep.subr.mxu0 %v1461_v45  ;;  %1826 = vmatprep.subr.mxu1 %v1463_v46  ;;  %v1597_v45 = vld [vmem:[%s5358_s4 + $0x7e8] sm:$0xff]  ;;  %v1599_v46 = vld [vmem:[%s5358_s4 + $0x7f8] sm:$0xff] }
 0x124   : > { %1756 = vmatpush1.msra.mxu0 %v1460_v47  ;;  %1827 = vmatpush1.msra.mxu1 %v1462_v48  ;;  %v1596_v47 = vld [vmem:[%s5358_s4 + $0x7e0] sm:$0xff]  ;;  %v1598_v48 = vld [vmem:[%s5358_s4 + $0x7f0] sm:$0xff] }
 0x125   : > { %1757 = vmatprep.subr.mxu0 %v1453_v49  ;;  %1828 = vmatprep.subr.mxu1 %v1455_v50  ;;  %v1589_v49 = vld [vmem:[%s5358_s4 + $0x7a8] sm:$0xff]  ;;  %v1591_v50 = vld [vmem:[%s5358_s4 + $0x7b8] sm:$0xff] }
 0x126   : > { %1758 = vmatpush1.msra.mxu0 %v1452_v51  ;;  %1829 = vmatpush1.msra.mxu1 %v1454_v52  ;;  %v1588_v51 = vld [vmem:[%s5358_s4 + $0x7a0] sm:$0xff]  ;;  %v1590_v52 = vld [vmem:[%s5358_s4 + $0x7b0] sm:$0xff] }
 0x127   : > { %1759 = vmatprep.subr.mxu0 %v1445_v34  ;;  %1830 = vmatprep.subr.mxu1 %v1447_v53  ;;  %v1581_v34 = vld [vmem:[%s5358_s4 + $0x768] sm:$0xff]  ;;  %v1583_v53 = vld [vmem:[%s5358_s4 + $0x778] sm:$0xff] }
 0x128   : > { %1760 = vmatpush1.msra.mxu0 %v1444_v54  ;;  %1831 = vmatpush1.msra.mxu1 %v1446_v55  ;;  %v1580_v54 = vld [vmem:[%s5358_s4 + $0x760] sm:$0xff]  ;;  %v1582_v55 = vld [vmem:[%s5358_s4 + $0x770] sm:$0xff] }
 0x129   : > { %1761 = vmatprep.subr.mxu0 %v1437_v56  ;;  %1832 = vmatprep.subr.mxu1 %v1439_v57  ;;  %v1573_v56 = vld [vmem:[%s5358_s4 + $0x728] sm:$0xff]  ;;  %v1575_v57 = vld [vmem:[%s5358_s4 + $0x738] sm:$0xff] }
 0x12a   : > { %1762 = vmatpush1.msra.mxu0 %v1436_v58  ;;  %1833 = vmatpush1.msra.mxu1 %v1438_v59  ;;  %v1572_v58 = vld [vmem:[%s5358_s4 + $0x720] sm:$0xff]  ;;  %v1574_v59 = vld [vmem:[%s5358_s4 + $0x730] sm:$0xff] }
 0x12b   : > { %1763 = vmatprep.subr.mxu0 %v1429_v60  ;;  %1834 = vmatprep.subr.mxu1 %v1431_v61  ;;  %v1565_v60 = vld [vmem:[%s5358_s4 + $0x6e8] sm:$0xff]  ;;  %v1567_v61 = vld [vmem:[%s5358_s4 + $0x6f8] sm:$0xff] }
 0x12c   : > { %1764 = vmatpush1.msra.mxu0 %v1428_v62  ;;  %1835 = vmatpush1.msra.mxu1 %v1430_v63  ;;  %v1564_v62 = vld [vmem:[%s5358_s4 + $0x6e0] sm:$0xff]  ;;  %v1566_v63 = vld [vmem:[%s5358_s4 + $0x6f0] sm:$0xff] }
 0x12d   : > { %1765 = vmatprep.subr.mxu0 %v1421_v0  ;;  %1836 = vmatprep.subr.mxu1 %v1423_v1  ;;  %v1557_v0 = vld [vmem:[%s5358_s4 + $0x6a8] sm:$0xff]  ;;  %v1559_v1 = vld [vmem:[%s5358_s4 + $0x6b8] sm:$0xff] }
 0x12e   : > { %1766 = vmatpush1.msra.mxu0 %v1420_v2  ;;  %1837 = vmatpush1.msra.mxu1 %v1422_v3  ;;  %v1556_v2 = vld [vmem:[%s5358_s4 + $0x6a0] sm:$0xff]  ;;  %v1558_v3 = vld [vmem:[%s5358_s4 + $0x6b0] sm:$0xff] }
 0x12f   : > { %1767 = vmatprep.subr.mxu0 %v1413_v4  ;;  %1838 = vmatprep.subr.mxu1 %v1415_v5  ;;  %v1549_v4 = vld [vmem:[%s5358_s4 + $0x668] sm:$0xff]  ;;  %v1551_v5 = vld [vmem:[%s5358_s4 + $0x678] sm:$0xff] }
 0x130   : > { %1768 = vmatpush1.msra.mxu0 %v1412_v6  ;;  %1839 = vmatpush1.msra.mxu1 %v1414_v7  ;;  %v1548_v6 = vld [vmem:[%s5358_s4 + $0x660] sm:$0xff]  ;;  %v1550_v7 = vld [vmem:[%s5358_s4 + $0x670] sm:$0xff] }
 0x131   : > { %1769 = vmatprep.subr.mxu0 %v1405_v8  ;;  %1840 = vmatprep.subr.mxu1 %v1407_v9  ;;  %v1541_v8 = vld [vmem:[%s5358_s4 + $0x628] sm:$0xff]  ;;  %v1543_v9 = vld [vmem:[%s5358_s4 + $0x638] sm:$0xff] }
 0x132   : > { %1770 = vmatpush1.msra.mxu0 %v1404_v11  ;;  %1841 = vmatpush1.msra.mxu1 %v1406_v12  ;;  %v1540_v11 = vld [vmem:[%s5358_s4 + $0x620] sm:$0xff]  ;;  %v1542_v12 = vld [vmem:[%s5358_s4 + $0x630] sm:$0xff] }
 0x133   : > { %1771 = vmatprep.subr.mxu0 %v1397_v13  ;;  %1842 = vmatprep.subr.mxu1 %v1399_v14  ;;  %v1533_v13 = vld [vmem:[%s5358_s4 + $0x5e8] sm:$0xff]  ;;  %v1535_v14 = vld [vmem:[%s5358_s4 + $0x5f8] sm:$0xff] }
 0x134   : > { %1772 = vmatpush1.msra.mxu0 %v1396_v15  ;;  %1843 = vmatpush1.msra.mxu1 %v1398_v16  ;;  %v1532_v15 = vld [vmem:[%s5358_s4 + $0x5e0] sm:$0xff]  ;;  %v1534_v16 = vld [vmem:[%s5358_s4 + $0x5f0] sm:$0xff] }
 0x135   : > { %1773 = vmatprep.subr.mxu0 %v1389_v19  ;;  %1844 = vmatprep.subr.mxu1 %v1391_v21  ;;  %v1525_v19 = vld [vmem:[%s5358_s4 + $0x5a8] sm:$0xff]  ;;  %v1527_v21 = vld [vmem:[%s5358_s4 + $0x5b8] sm:$0xff] }
 0x136   : > { %1774 = vmatpush1.msra.mxu0 %v1388_v22  ;;  %1845 = vmatpush1.msra.mxu1 %v1390_v23  ;;  %v1524_v22 = vld [vmem:[%s5358_s4 + $0x5a0] sm:$0xff]  ;;  %v1526_v23 = vld [vmem:[%s5358_s4 + $0x5b0] sm:$0xff] }
 0x137   : > { %1775 = vmatprep.subr.mxu0 %v1381_v24  ;;  %1846 = vmatprep.subr.mxu1 %v1383_v25  ;;  %v1517_v24 = vld [vmem:[%s5358_s4 + $0x568] sm:$0xff]  ;;  %v1519_v25 = vld [vmem:[%s5358_s4 + $0x578] sm:$0xff] }
 0x138   : > { %1776 = vmatpush1.msra.mxu0 %v1380_v26  ;;  %1847 = vmatpush1.msra.mxu1 %v1382_v27  ;;  %v1516_v26 = vld [vmem:[%s5358_s4 + $0x560] sm:$0xff]  ;;  %v1518_v27 = vld [vmem:[%s5358_s4 + $0x570] sm:$0xff] }
 0x139   : > { %1777 = vmatprep.subr.mxu0 %v1373_v29  ;;  %1848 = vmatprep.subr.mxu1 %v1375_v30  ;;  %v1509_v29 = vld [vmem:[%s5358_s4 + $0x528] sm:$0xff]  ;;  %v1511_v30 = vld [vmem:[%s5358_s4 + $0x538] sm:$0xff] }
 0x13a   : > { %1778 = vmatpush1.msra.mxu0 %v1372_v31  ;;  %1849 = vmatpush1.msra.mxu1 %v1374_v32  ;;  %v1508_v31 = vld [vmem:[%s5358_s4 + $0x520] sm:$0xff]  ;;  %v1510_v32 = vld [vmem:[%s5358_s4 + $0x530] sm:$0xff] }
 0x13b   : > { %1779 = vmatprep.subr.mxu0 %v1365_v33  ;;  %1850 = vmatprep.subr.mxu1 %v1367_v35  ;;  %v1501_v33 = vld [vmem:[%s5358_s4 + $0x4e8] sm:$0xff]  ;;  %v1503_v35 = vld [vmem:[%s5358_s4 + $0x4f8] sm:$0xff] }
 0x13c   : > { %1780 = vmatpush1.msra.mxu0 %v1364_v36  ;;  %1851 = vmatpush1.msra.mxu1 %v1366_v37  ;;  %v1500_v36 = vld [vmem:[%s5358_s4 + $0x4e0] sm:$0xff]  ;;  %v1502_v37 = vld [vmem:[%s5358_s4 + $0x4f0] sm:$0xff] }
 0x13d   : > { %1781 = vmatprep.subr.mxu0 %v1357_v20  ;;  %1852 = vmatprep.subr.mxu1 %v1359_v38  ;;  %v1493_v20 = vld [vmem:[%s5358_s4 + $0x4a8] sm:$0xff]  ;;  %v1495_v38 = vld [vmem:[%s5358_s4 + $0x4b8] sm:$0xff] }
 0x13e   : > { %1782 = vmatpush1.msra.mxu0 %v1356_v39  ;;  %1853 = vmatpush1.msra.mxu1 %v1358_v40  ;;  %v1492_v39 = vld [vmem:[%s5358_s4 + $0x4a0] sm:$0xff]  ;;  %v1494_v40 = vld [vmem:[%s5358_s4 + $0x4b0] sm:$0xff] }
 0x13f   : > { %1783 = vmatprep.subr.mxu0 %v1349_v41  ;;  %1854 = vmatprep.subr.mxu1 %v1351_v42  ;;  %v1485_v41 = vld [vmem:[%s5358_s4 + $0x468] sm:$0xff]  ;;  %v1487_v42 = vld [vmem:[%s5358_s4 + $0x478] sm:$0xff] }
 0x140   : > { %1784 = vmatpush1.msra.mxu0 %v1348_v43  ;;  %1855 = vmatpush1.msra.mxu1 %v1350_v44  ;;  %v1484_v43 = vld [vmem:[%s5358_s4 + $0x460] sm:$0xff]  ;;  %v1486_v44 = vld [vmem:[%s5358_s4 + $0x470] sm:$0xff] }
 0x141   : > { %1785 = vmatprep.subr.mxu0 %v1597_v45  ;;  %1856 = vmatprep.subr.mxu1 %v1599_v46  ;;  %v1477_v45 = vld [vmem:[%s5358_s4 + $0x428] sm:$0xff]  ;;  %v1479_v46 = vld [vmem:[%s5358_s4 + $0x438] sm:$0xff] }
 0x142   : > { %1786 = vmatpush2.msra.mxu0 %v1596_v47  ;;  %1857 = vmatpush2.msra.mxu1 %v1598_v48  ;;  %v1476_v47 = vld [vmem:[%s5358_s4 + $0x420] sm:$0xff]  ;;  %v1478_v48 = vld [vmem:[%s5358_s4 + $0x430] sm:$0xff] }
 0x143   : > { %1787 = vmatprep.subr.mxu0 %v1589_v49  ;;  %1858 = vmatprep.subr.mxu1 %v1591_v50  ;;  %v1209_v49 = vld [vmem:[%s5357_s3 + $0x3c8] sm:$0xff]  ;;  %v1211_v50 = vld [vmem:[%s5357_s3 + $0x3d8] sm:$0xff] }
 0x144   : > { %1788 = vmatpush2.msra.mxu0 %v1588_v51  ;;  %1859 = vmatpush2.msra.mxu1 %v1590_v52  ;;  %v1208_v51 = vld [vmem:[%s5357_s3 + $0x3c0] sm:$0xff]  ;;  %v1210_v52 = vld [vmem:[%s5357_s3 + $0x3d0] sm:$0xff] }
 0x145   : > { %1789 = vmatprep.subr.mxu0 %v1581_v34  ;;  %1860 = vmatprep.subr.mxu1 %v1583_v53  ;;  %v1201_v34 = vld [vmem:[%s5357_s3 + $0x388] sm:$0xff]  ;;  %v1203_v53 = vld [vmem:[%s5357_s3 + $0x398] sm:$0xff] }
 0x146   : > { %1790 = vmatpush2.msra.mxu0 %v1580_v54  ;;  %1861 = vmatpush2.msra.mxu1 %v1582_v55  ;;  %v1200_v54 = vld [vmem:[%s5357_s3 + $0x380] sm:$0xff]  ;;  %v1202_v55 = vld [vmem:[%s5357_s3 + $0x390] sm:$0xff] }
 0x147   : > { %1791 = vmatprep.subr.mxu0 %v1573_v56  ;;  %1862 = vmatprep.subr.mxu1 %v1575_v57  ;;  %v1195_v56 = vld [vmem:[%s5357_s3 + $0x358] sm:$0xff]  ;;  %v1192_v57 = vld [vmem:[%s5357_s3 + $0x340] sm:$0xff] }
 0x148   : > { %1792 = vmatpush2.msra.mxu0 %v1572_v58  ;;  %1863 = vmatpush2.msra.mxu1 %v1574_v59  ;;  %v1194_v58 = vld [vmem:[%s5357_s3 + $0x350] sm:$0xff]  ;;  %v1185_v59 = vld [vmem:[%s5357_s3 + $0x308] sm:$0xff] }
 0x149   : > { %1793 = vmatprep.subr.mxu0 %v1565_v60  ;;  %1864 = vmatprep.subr.mxu1 %v1567_v61  ;;  %v1187_v60 = vld [vmem:[%s5357_s3 + $0x318] sm:$0xff]  ;;  %v1184_v61 = vld [vmem:[%s5357_s3 + $0x300] sm:$0xff] }
 0x14a   : > { %1794 = vmatpush2.msra.mxu0 %v1564_v62  ;;  %1865 = vmatpush2.msra.mxu1 %v1566_v63  ;;  %v1186_v62 = vld [vmem:[%s5357_s3 + $0x310] sm:$0xff]  ;;  %v1177_v63 = vld [vmem:[%s5357_s3 + $0x2c8] sm:$0xff] }
 0x14b   : > { %1795 = vmatprep.subr.mxu0 %v1557_v0  ;;  %1866 = vmatprep.subr.mxu1 %v1559_v1  ;;  %v1179_v0 = vld [vmem:[%s5357_s3 + $0x2d8] sm:$0xff]  ;;  %v1176_v1 = vld [vmem:[%s5357_s3 + $0x2c0] sm:$0xff] }
 0x14c   : > { %1796 = vmatpush2.msra.mxu0 %v1556_v2  ;;  %1867 = vmatpush2.msra.mxu1 %v1558_v3  ;;  %v1178_v2 = vld [vmem:[%s5357_s3 + $0x2d0] sm:$0xff]  ;;  %v1169_v3 = vld [vmem:[%s5357_s3 + $0x288] sm:$0xff] }
 0x14d   : > { %1797 = vmatprep.subr.mxu0 %v1549_v4  ;;  %1868 = vmatprep.subr.mxu1 %v1551_v5  ;;  %v1171_v4 = vld [vmem:[%s5357_s3 + $0x298] sm:$0xff]  ;;  %v1168_v5 = vld [vmem:[%s5357_s3 + $0x280] sm:$0xff] }
 0x14e   : > { %1798 = vmatpush2.msra.mxu0 %v1548_v6  ;;  %1869 = vmatpush2.msra.mxu1 %v1550_v7  ;;  %v1170_v6 = vld [vmem:[%s5357_s3 + $0x290] sm:$0xff]  ;;  %v1161_v7 = vld [vmem:[%s5357_s3 + $0x248] sm:$0xff] }
 0x14f   : > { %1799 = vmatprep.subr.mxu0 %v1541_v8  ;;  %1870 = vmatprep.subr.mxu1 %v1543_v9  ;;  %v1163_v8 = vld [vmem:[%s5357_s3 + $0x258] sm:$0xff]  ;;  %v1160_v9 = vld [vmem:[%s5357_s3 + $0x240] sm:$0xff] }
 0x150   : > { %1800 = vmatpush2.msra.mxu0 %v1540_v11  ;;  %1871 = vmatpush2.msra.mxu1 %v1542_v12  ;;  %v1162_v11 = vld [vmem:[%s5357_s3 + $0x250] sm:$0xff]  ;;  %v1153_v12 = vld [vmem:[%s5357_s3 + $0x208] sm:$0xff] }
 0x151   : > { %1801 = vmatprep.subr.mxu0 %v1533_v13  ;;  %1872 = vmatprep.subr.mxu1 %v1535_v14  ;;  %v1155_v13 = vld [vmem:[%s5357_s3 + $0x218] sm:$0xff]  ;;  %v1152_v14 = vld [vmem:[%s5357_s3 + $0x200] sm:$0xff] }
 0x152   : > { %1802 = vmatpush2.msra.mxu0 %v1532_v15  ;;  %1873 = vmatpush2.msra.mxu1 %v1534_v16  ;;  %v1154_v15 = vld [vmem:[%s5357_s3 + $0x210] sm:$0xff]  ;;  %v1145_v16 = vld [vmem:[%s5357_s3 + $0x1c8] sm:$0xff] }
 0x153   : > { %1803 = vmatprep.subr.mxu0 %v1525_v19  ;;  %1874 = vmatprep.subr.mxu1 %v1527_v21  ;;  %v1147_v19 = vld [vmem:[%s5357_s3 + $0x1d8] sm:$0xff]  ;;  %v1144_v21 = vld [vmem:[%s5357_s3 + $0x1c0] sm:$0xff] }
 0x154   : > { %1804 = vmatpush2.msra.mxu0 %v1524_v22  ;;  %1875 = vmatpush2.msra.mxu1 %v1526_v23  ;;  %v1146_v22 = vld [vmem:[%s5357_s3 + $0x1d0] sm:$0xff]  ;;  %v1137_v23 = vld [vmem:[%s5357_s3 + $0x188] sm:$0xff] }
 0x155   : > { %1805 = vmatprep.subr.mxu0 %v1517_v24  ;;  %1876 = vmatprep.subr.mxu1 %v1519_v25  ;;  %v1139_v24 = vld [vmem:[%s5357_s3 + $0x198] sm:$0xff]  ;;  %v1136_v25 = vld [vmem:[%s5357_s3 + $0x180] sm:$0xff] }
 0x156   : > { %1806 = vmatpush2.msra.mxu0 %v1516_v26  ;;  %1877 = vmatpush2.msra.mxu1 %v1518_v27  ;;  %v1138_v26 = vld [vmem:[%s5357_s3 + $0x190] sm:$0xff] }
 0x157   : > { %1807 = vmatprep.subr.mxu0 %v1509_v29  ;;  %1878 = vmatprep.subr.mxu1 %v1511_v30  ;;  %v1129_v30 = vld [vmem:[%s5357_s3 + $0x148] sm:$0xff] }
 0x158   : > { %1808 = vmatpush2.msra.mxu0 %v1508_v31  ;;  %1879 = vmatpush2.msra.mxu1 %v1510_v32  ;;  %v1131_v31 = vld [vmem:[%s5357_s3 + $0x158] sm:$0xff]  ;;  %v1128_v32 = vld [vmem:[%s5357_s3 + $0x140] sm:$0xff] }
 0x159   : > { %1809 = vmatprep.subr.mxu0 %v1501_v33  ;;  %1880 = vmatprep.subr.mxu1 %v1503_v35  ;;  %v1130_v33 = vld [vmem:[%s5357_s3 + $0x150] sm:$0xff]  ;;  %v1121_v35 = vld [vmem:[%s5357_s3 + $0x108] sm:$0xff] }
 0x15a   : > { %1810 = vmatpush2.msra.mxu0 %v1500_v36  ;;  %1881 = vmatpush2.msra.mxu1 %v1502_v37  ;;  %v1123_v36 = vld [vmem:[%s5357_s3 + $0x118] sm:$0xff]  ;;  %v1120_v37 = vld [vmem:[%s5357_s3 + $0x100] sm:$0xff] }
 0x15b   : > { %1811 = vmatprep.subr.mxu0 %v1493_v20  ;;  %1882 = vmatprep.subr.mxu1 %v1495_v38  ;;  %v1122_v20 = vld [vmem:[%s5357_s3 + $0x110] sm:$0xff] }
 0x15c   : > { %1812 = vmatpush2.msra.mxu0 %v1492_v39  ;;  %1883 = vmatpush2.msra.mxu1 %v1494_v40  ;;  %v794_v27 = vpop.f32.mrf.mxu0  ;;  %v865_v29 = vpop.f32.mrf.mxu1  ;;  %v1113_v40 = vld [vmem:[%s5357_s3 + $0xc8] sm:$0xff] }
 0x15d   : > { %1813 = vmatprep.subr.mxu0 %v1485_v41  ;;  %1884 = vmatprep.subr.mxu1 %v1487_v42  ;;  %v1115_v41 = vld [vmem:[%s5357_s3 + $0xd8] sm:$0xff]  ;;  %v1112_v42 = vld [vmem:[%s5357_s3 + $0xc0] sm:$0xff] }
 0x15e   : > { %1814 = vmatpush2.msra.mxu0 %v1484_v43  ;;  %1885 = vmatpush2.msra.mxu1 %v1486_v44  ;;  %v796_v38 = vpop.f32.mrf.mxu0  ;;  %v867_v39 = vpop.f32.mrf.mxu1  ;;  %v1114_v43 = vld [vmem:[%s5357_s3 + $0xd0] sm:$0xff]  ;;  %v1105_v44 = vld [vmem:[%s5357_s3 + $0x88] sm:$0xff] }
 0x15f   : > { %1815 = vmatprep.subr.mxu0 %v1477_v45  ;;  %1886 = vmatprep.subr.mxu1 %v1479_v46  ;;  %v1107_v45 = vld [vmem:[%s5357_s3 + $0x98] sm:$0xff]  ;;  %v1020_v46 = vcombine.low %v794_v27, %v796_v38 }
 0x160   : > { %1816 = vmatpush2.msra.mxu0 %v1476_v47  ;;  %1887 = vmatpush2.msra.mxu1 %v1478_v48  ;;  %v1021_v47 = vcombine.low %v865_v29, %v867_v39  ;;  %v1104_v48 = vld [vmem:[%s5357_s3 + $0x80] sm:$0xff]  ;;  %v1291_v27 = vld [vmem:[%s5357_s3 + $0x658] sm:$0xff] }
 0x161   : > { %1818 = vmatmul.mubr.f32.vlgmr.msra.gmra.mxu0 %v3641_v28  ;;  %1889 = vmatmul.mubr.f32.vlgmr.msra.gmra.mxu1 %v3641_v28  ;;  %v1193_v28 = vld [vmem:[%s5357_s3 + $0x348] sm:$0xff]  ;;  %v1288_v29 = vld [vmem:[%s5357_s3 + $0x640] sm:$0xff]  ;;  %v1275_v38 = vld [vmem:[%s5357_s3 + $0x5d8] sm:$0xff] }
 0x162   : > { %1906 = vmatprep.subr.mxu0 %v1209_v49  ;;  %1977 = vmatprep.subr.mxu1 %v1211_v50  ;;  %v1106_v49 = vld [vmem:[%s5357_s3 + $0x90] sm:$0xff]  ;;  %v1097_v50 = vld [vmem:[%s5357_s3 + $0x48] sm:$0xff]  ;;  %v1272_v39 = vld [vmem:[%s5357_s3 + $0x5c0] sm:$0xff] }
 0x163   : > { %1907 = vmatpush1.msra.mxu0 %v1208_v51  ;;  %1978 = vmatpush1.msra.mxu1 %v1210_v52  ;;  %v1099_v51 = vld [vmem:[%s5357_s3 + $0x58] sm:$0xff]  ;;  %v1096_v52 = vld [vmem:[%s5357_s3 + $0x40] sm:$0xff] }
 0x164   : > { %1908 = vmatprep.subr.mxu0 %v1201_v34  ;;  %1979 = vmatprep.subr.mxu1 %v1203_v53  ;;  %v1098_v34 = vld [vmem:[%s5357_s3 + $0x50] sm:$0xff]  ;;  %v1089_v53 = vld [vmem:[%s5357_s3 + $0x8] sm:$0xff] }
 0x165   : > { %1909 = vmatpush1.msra.mxu0 %v1200_v54  ;;  %1980 = vmatpush1.msra.mxu1 %v1202_v55  ;;  %v1091_v54 = vld [vmem:[%s5357_s3 + $0x18] sm:$0xff]  ;;  %v1028_v55 = vrot.slane %v1020_v46, %v3255_v17 }
 0x166   : > { %1910 = vmatprep.subr.mxu0 %v1193_v28  ;;  %1981 = vmatprep.subr.mxu1 %v1195_v56  ;;  %v1035_v28 = vrot.slane %v1021_v47, %v3255_v17  ;;  %v1088_v56 = vld [vmem:[%s5357_s3] sm:$0xff]  ;;  %v1259_v46 = vld [vmem:[%s5357_s3 + $0x558] sm:$0xff] }
 0x167   : > { %1911 = vmatpush1.msra.mxu0 %v1192_v57  ;;  %1982 = vmatpush1.msra.mxu1 %v1194_v58  ;;  %v1090_v57 = vld [vmem:[%s5357_s3 + $0x10] sm:$0xff]  ;;  %v1337_v58 = vld [vmem:[%s5357_s3 + $0x7c8] sm:$0xff]  ;;  %v1256_v47 = vld [vmem:[%s5357_s3 + $0x540] sm:$0xff] }
 0x168   : > { %1912 = vmatprep.subr.mxu0 %v1185_v59  ;;  %1983 = vmatprep.subr.mxu1 %v1187_v60  ;;  %v1339_v59 = vld [vmem:[%s5357_s3 + $0x7d8] sm:$0xff]  ;;  %v1336_v60 = vld [vmem:[%s5357_s3 + $0x7c0] sm:$0xff] }
 0x169   : > { %1913 = vmatpush1.msra.mxu0 %v1184_v61  ;;  %1984 = vmatpush1.msra.mxu1 %v1186_v62  ;;  %v1338_v61 = vld [vmem:[%s5357_s3 + $0x7d0] sm:$0xff]  ;;  %v1329_v62 = vld [vmem:[%s5357_s3 + $0x788] sm:$0xff] }
 0x16a   : > { %1914 = vmatprep.subr.mxu0 %v1177_v63  ;;  %1985 = vmatprep.subr.mxu1 %v1179_v0  ;;  %v1331_v63 = vld [vmem:[%s5357_s3 + $0x798] sm:$0xff]  ;;  %v1036_v0 = vcombine.low %v1028_v55, %v1035_v28  ;;  %v1242_v55 = vld [vmem:[%s5357_s3 + $0x4d0] sm:$0xff]  ;;  %v1233_v28 = vld [vmem:[%s5357_s3 + $0x488] sm:$0xff] }
 0x16b   : > { %1915 = vmatpush1.msra.mxu0 %v1176_v1  ;;  %1986 = vmatpush1.msra.mxu1 %v1178_v2  ;;  %v1328_v1 = vld [vmem:[%s5357_s3 + $0x780] sm:$0xff]  ;;  %v1330_v2 = vld [vmem:[%s5357_s3 + $0x790] sm:$0xff] }
 0x16c   : > { %1916 = vmatprep.subr.mxu0 %v1169_v3  ;;  %1987 = vmatprep.subr.mxu1 %v1171_v4  ;;  %v459_v3 = vld [vmem:[%s2844_s28] sm:$0xff]  ;;  %v1321_v4 = vld [vmem:[%s5357_s3 + $0x748] sm:$0xff] }
 0x16d   : > { %1917 = vmatpush1.msra.mxu0 %v1168_v5  ;;  %1988 = vmatpush1.msra.mxu1 %v1170_v6  ;;  %v1323_v5 = vld [vmem:[%s5357_s3 + $0x758] sm:$0xff]  ;;  %v1320_v6 = vld [vmem:[%s5357_s3 + $0x740] sm:$0xff] }
 0x16e   : > { %1918 = vmatprep.subr.mxu0 %v1161_v7  ;;  %1989 = vmatprep.subr.mxu1 %v1163_v8  ;;  %v1322_v7 = vld [vmem:[%s5357_s3 + $0x750] sm:$0xff]  ;;  %v1313_v8 = vld [vmem:[%s5357_s3 + $0x708] sm:$0xff] }
 0x16f   : > { %1919 = vmatpush1.msra.mxu0 %v1160_v9  ;;  %1990 = vmatpush1.msra.mxu1 %v1162_v11  ;;  %v1315_v9 = vld [vmem:[%s5357_s3 + $0x718] sm:$0xff]  ;;  %v1056_v11 = vadd.f32 %v1036_v0, %v459_v3  ;;  %v1216_v3 = vld [vmem:[%s5357_s3 + $0x400] sm:$0xff] }
 0x170   : > { %1920 = vmatprep.subr.mxu0 %v1153_v12  ;;  %1991 = vmatprep.subr.mxu1 %v1155_v13  ;;  %v1312_v12 = vld [vmem:[%s5357_s3 + $0x700] sm:$0xff]  ;;  %v1314_v13 = vld [vmem:[%s5357_s3 + $0x710] sm:$0xff] }
 0x171   : > { %1921 = vmatpush1.msra.mxu0 %v1152_v14  ;;  %1992 = vmatpush1.msra.mxu1 %v1154_v15  ;;  %v1305_v14 = vld [vmem:[%s5357_s3 + $0x6c8] sm:$0xff]  ;;  %v1307_v15 = vld [vmem:[%s5357_s3 + $0x6d8] sm:$0xff] }
 0x172   : > { %1922 = vmatprep.subr.mxu0 %v1145_v16  ;;  %1993 = vmatprep.subr.mxu1 %v1147_v19  ;;  %v1304_v16 = vld [vmem:[%s5357_s3 + $0x6c0] sm:$0xff]  ;;  %v1306_v19 = vld [vmem:[%s5357_s3 + $0x6d0] sm:$0xff] }
 0x173   : > { %1923 = vmatpush1.msra.mxu0 %v1144_v21  ;;  %1994 = vmatpush1.msra.mxu1 %v1146_v22  ;;  %v1297_v21 = vld [vmem:[%s5357_s3 + $0x688] sm:$0xff]  ;;  %v1299_v22 = vld [vmem:[%s5357_s3 + $0x698] sm:$0xff] }
 0x174   : > { %1924 = vmatprep.subr.mxu0 %v1137_v23  ;;  %1995 = vmatprep.subr.mxu1 %v1139_v24  ;;  %v1065_v23 = vrot.slane %v1056_v11, 4  ;;  %v1296_v24 = vld [vmem:[%s5357_s3 + $0x680] sm:$0xff] }
 0x175   : > { %1925 = vmatpush1.msra.mxu0 %v1136_v25  ;;  %1996 = vmatpush1.msra.mxu1 %v1138_v26  ;;  %v1298_v25 = vld [vmem:[%s5357_s3 + $0x690] sm:$0xff]  ;;  %v1289_v26 = vld [vmem:[%s5357_s3 + $0x648] sm:$0xff] }
 0x176   : > { %1926 = vmatprep.subr.mxu0 %v1129_v30  ;;  %1997 = vmatprep.subr.mxu1 %v1131_v31  ;;  %v1290_v30 = vld [vmem:[%s5357_s3 + $0x650] sm:$0xff]  ;;  %v1281_v31 = vld [vmem:[%s5357_s3 + $0x608] sm:$0xff] }
 0x177   : > { %1927 = vmatpush1.msra.mxu0 %v1128_v32  ;;  %1998 = vmatpush1.msra.mxu1 %v1130_v33  ;;  %v1283_v32 = vld [vmem:[%s5357_s3 + $0x618] sm:$0xff]  ;;  %v2564_v33 = vmul.f32 -1.442695, %v1065_v23 }
 0x178   : > { %1928 = vmatprep.subr.mxu0 %v1121_v35  ;;  %1999 = vmatprep.subr.mxu1 %v1123_v36  ;;  %v1280_v35 = vld [vmem:[%s5357_s3 + $0x600] sm:$0xff]  ;;  %v1282_v36 = vld [vmem:[%s5357_s3 + $0x610] sm:$0xff] }
 0x179   : > { %1929 = vmatpush1.msra.mxu0 %v1120_v37  ;;  %2000 = vmatpush1.msra.mxu1 %v1122_v20  ;;  %v2563_v37 = vmul.f32 -1.442695, %v1056_v11  ;;  %v1273_v20 = vld [vmem:[%s5357_s3 + $0x5c8] sm:$0xff]  ;;  %2645 = vpow2.f32 %v2564_v33 }
 0x17a   : > { %1930 = vmatprep.subr.mxu0 %v1113_v40  ;;  %2001 = vmatprep.subr.mxu1 %v1115_v41  ;;  %v1274_v40 = vld [vmem:[%s5357_s3 + $0x5d0] sm:$0xff]  ;;  %v1265_v41 = vld [vmem:[%s5357_s3 + $0x588] sm:$0xff] }
 0x17b   : > { %1931 = vmatpush1.msra.mxu0 %v1112_v42  ;;  %2002 = vmatpush1.msra.mxu1 %v1114_v43  ;;  %v1267_v42 = vld [vmem:[%s5357_s3 + $0x598] sm:$0xff]  ;;  %v1264_v43 = vld [vmem:[%s5357_s3 + $0x580] sm:$0xff]  ;;  %2647 = vpow2.f32 %v2563_v37 }
 0x17c   : > { %1932 = vmatprep.subr.mxu0 %v1105_v44  ;;  %2003 = vmatprep.subr.mxu1 %v1107_v45  ;;  %v1266_v44 = vld [vmem:[%s5357_s3 + $0x590] sm:$0xff]  ;;  %v1257_v45 = vld [vmem:[%s5357_s3 + $0x548] sm:$0xff] }
 0x17d   : > { %1933 = vmatpush1.msra.mxu0 %v1104_v48  ;;  %2004 = vmatpush1.msra.mxu1 %v1106_v49  ;;  %v1258_v48 = vld [vmem:[%s5357_s3 + $0x550] sm:$0xff]  ;;  %v1249_v49 = vld [vmem:[%s5357_s3 + $0x508] sm:$0xff] }
 0x17e   : > { %1934 = vmatprep.subr.mxu0 %v1097_v50  ;;  %2005 = vmatprep.subr.mxu1 %v1099_v51  ;;  %v1251_v50 = vld [vmem:[%s5357_s3 + $0x518] sm:$0xff]  ;;  %v1248_v51 = vld [vmem:[%s5357_s3 + $0x500] sm:$0xff] }
 0x17f   : > { %1935 = vmatpush1.msra.mxu0 %v1096_v52  ;;  %2006 = vmatpush1.msra.mxu1 %v1098_v34  ;;  %v1250_v52 = vld [vmem:[%s5357_s3 + $0x510] sm:$0xff]  ;;  %v1241_v34 = vld [vmem:[%s5357_s3 + $0x4c8] sm:$0xff] }
 0x180   : > { %1936 = vmatprep.subr.mxu0 %v1089_v53  ;;  %2007 = vmatprep.subr.mxu1 %v1091_v54  ;;  %v1243_v53 = vld [vmem:[%s5357_s3 + $0x4d8] sm:$0xff]  ;;  %v1240_v54 = vld [vmem:[%s5357_s3 + $0x4c0] sm:$0xff] }
 0x181   : > { %1937 = vmatpush1.msra.mxu0 %v1088_v56  ;;  %2008 = vmatpush1.msra.mxu1 %v1090_v57  ;;  %v1235_v56 = vld [vmem:[%s5357_s3 + $0x498] sm:$0xff]  ;;  %v1232_v57 = vld [vmem:[%s5357_s3 + $0x480] sm:$0xff] }
 0x182   : > { %1938 = vmatprep.subr.mxu0 %v1337_v58  ;;  %2009 = vmatprep.subr.mxu1 %v1339_v59  ;;  %v1234_v58 = vld [vmem:[%s5357_s3 + $0x490] sm:$0xff]  ;;  %v1225_v59 = vld [vmem:[%s5357_s3 + $0x448] sm:$0xff] }
 0x183   : > { %1939 = vmatpush2.msra.mxu0 %v1336_v60  ;;  %2010 = vmatpush2.msra.mxu1 %v1338_v61  ;;  %v1227_v60 = vld [vmem:[%s5357_s3 + $0x458] sm:$0xff]  ;;  %v1224_v61 = vld [vmem:[%s5357_s3 + $0x440] sm:$0xff] }
 0x184   : > { %1940 = vmatprep.subr.mxu0 %v1329_v62  ;;  %2011 = vmatprep.subr.mxu1 %v1331_v63  ;;  %v1226_v62 = vld [vmem:[%s5357_s3 + $0x450] sm:$0xff] }
 0x185   : > { %1941 = vmatpush2.msra.mxu0 %v1328_v1  ;;  %2012 = vmatpush2.msra.mxu1 %v1330_v2  ;;  %v1217_v1 = vld [vmem:[%s5357_s3 + $0x408] sm:$0xff]  ;;  %v1219_v2 = vld [vmem:[%s5357_s3 + $0x418] sm:$0xff] }
 0x186   : > { %1942 = vmatprep.subr.mxu0 %v1321_v4  ;;  %2013 = vmatprep.subr.mxu1 %v1323_v5  ;;  %v1218_v4 = vld [vmem:[%s5357_s3 + $0x410] sm:$0xff]  ;;  %v2646_v5 = vpop.eup %2645 }
 0x187   : > { %1943 = vmatpush2.msra.mxu0 %v1320_v6  ;;  %2014 = vmatpush2.msra.mxu1 %v1322_v7 }
 0x188   : > { %1944 = vmatprep.subr.mxu0 %v1313_v8  ;;  %2015 = vmatprep.subr.mxu1 %v1315_v9  ;;  %v1213_v8 = vld [vmem:[%s5357_s3 + $0x3e8] sm:$0xff]  ;;  %v1215_v9 = vld [vmem:[%s5357_s3 + $0x3f8] sm:$0xff]  ;;  %v2648_v11 = vpop.eup %2647 }
 0x189   : > { %1945 = vmatpush2.msra.mxu0 %v1312_v12  ;;  %2016 = vmatpush2.msra.mxu1 %v1314_v13 }
 0x18a   : > { %1946 = vmatprep.subr.mxu0 %v1305_v14  ;;  %2017 = vmatprep.subr.mxu1 %v1307_v15  ;;  %v1070_v14 = vadd.f32 1.0, %v2646_v5  ;;  %v1158_v5 = vld [vmem:[%s5357_s3 + $0x230] sm:$0xff] }
 0x18b   : > { %1947 = vmatpush2.msra.mxu0 %v1304_v16  ;;  %2018 = vmatpush2.msra.mxu1 %v1306_v19  ;;  %v1061_v19 = vadd.f32 1.0, %v2648_v11  ;;  %v1141_v11 = vld [vmem:[%s5357_s3 + $0x1a8] sm:$0xff] }
 0x18c   : > { %1948 = vmatprep.subr.mxu0 %v1297_v21  ;;  %2019 = vmatprep.subr.mxu1 %v1299_v22  ;;  %v460_v21 = vld [vmem:[%s2844_s28 + $0x8] sm:$0xff]  ;;  %2649 = vrcp.f32 %v1070_v14  ;;  %v1142_v14 = vld [vmem:[%s5357_s3 + $0x1b0] sm:$0xff] }
 0x18d   : > { %1949 = vmatpush2.msra.mxu0 %v1296_v24  ;;  %2020 = vmatpush2.msra.mxu1 %v1298_v25  ;;  %2651 = vrcp.f32 %v1061_v19  ;;  %v1132_v19 = vld [vmem:[%s5357_s3 + $0x160] sm:$0xff] }
 0x18e   : > { %1950 = vmatprep.subr.mxu0 %v1289_v26  ;;  %2021 = vmatprep.subr.mxu1 %v1291_v27  ;;  %v455_v26 = vld [vmem:[#allocation4] sm:$0xf] }
 0x18f   : > { %1951 = vmatpush2.msra.mxu0 %v1288_v29  ;;  %2022 = vmatpush2.msra.mxu1 %v1290_v30  ;;  %v457_v30 = vmul.f32 %v455_v26, %v3257_v18  ;;  %v1117_v26 = vld [vmem:[%s5357_s3 + $0xe8] sm:$0xff] }
 0x190   : > { %1952 = vmatprep.subr.mxu0 %v1281_v31  ;;  %2023 = vmatprep.subr.mxu1 %v1283_v32 }
 0x191   : > { %1953 = vmatpush2.msra.mxu0 %v1280_v35  ;;  %2024 = vmatpush2.msra.mxu1 %v1282_v36 }
 0x192   : > { %1954 = vmatprep.subr.mxu0 %v1273_v20  ;;  %2025 = vmatprep.subr.mxu1 %v1275_v38 }
 0x193   : > { %1955 = vmatpush2.msra.mxu0 %v1272_v39  ;;  %2026 = vmatpush2.msra.mxu1 %v1274_v40 }
 0x194   : > { %1956 = vmatprep.subr.mxu0 %v1265_v41  ;;  %2027 = vmatprep.subr.mxu1 %v1267_v42  ;;  %v1212_v42 = vld [vmem:[%s5357_s3 + $0x3e0] sm:$0xff] }
 0x195   : > { %1957 = vmatpush2.msra.mxu0 %v1264_v43  ;;  %2028 = vmatpush2.msra.mxu1 %v1266_v44  ;;  %v1214_v43 = vld [vmem:[%s5357_s3 + $0x3f0] sm:$0xff]  ;;  %v1205_v44 = vld [vmem:[%s5357_s3 + $0x3a8] sm:$0xff] }
 0x196   : > { %1958 = vmatprep.subr.mxu0 %v1257_v45  ;;  %2029 = vmatprep.subr.mxu1 %v1259_v46  ;;  %v1207_v45 = vld [vmem:[%s5357_s3 + $0x3b8] sm:$0xff]  ;;  %v1204_v46 = vld [vmem:[%s5357_s3 + $0x3a0] sm:$0xff] }
 0x197   : > { %1959 = vmatpush2.msra.mxu0 %v1256_v47  ;;  %2030 = vmatpush2.msra.mxu1 %v1258_v48  ;;  %v1206_v47 = vld [vmem:[%s5357_s3 + $0x3b0] sm:$0xff]  ;;  %v1197_v48 = vld [vmem:[%s5357_s3 + $0x368] sm:$0xff] }
 0x198   : > { %1960 = vmatprep.subr.mxu0 %v1249_v49  ;;  %2031 = vmatprep.subr.mxu1 %v1251_v50  ;;  %v1199_v49 = vld [vmem:[%s5357_s3 + $0x378] sm:$0xff]  ;;  %v1196_v50 = vld [vmem:[%s5357_s3 + $0x360] sm:$0xff] }
 0x199   : > { %1961 = vmatpush2.msra.mxu0 %v1248_v51  ;;  %2032 = vmatpush2.msra.mxu1 %v1250_v52  ;;  %v2650_v27 = vpop.eup %2649  ;;  %v1198_v51 = vld [vmem:[%s5357_s3 + $0x370] sm:$0xff]  ;;  %v1189_v52 = vld [vmem:[%s5357_s3 + $0x328] sm:$0xff] }
 0x19a   : > { %1962 = vmatprep.subr.mxu0 %v1241_v34  ;;  %2033 = vmatprep.subr.mxu1 %v1243_v53  ;;  %v2652_v29 = vpop.eup %2651  ;;  %v1083_v32 = vmul.f32 %v2650_v27, %v457_v30  ;;  %v1191_v34 = vld [vmem:[%s5357_s3 + $0x338] sm:$0xff]  ;;  %v1188_v53 = vld [vmem:[%s5357_s3 + $0x320] sm:$0xff]  ;;  %v1118_v30 = vld [vmem:[%s5357_s3 + $0xf0] sm:$0xff] }
 0x19b   : > { %1963 = vmatpush2.msra.mxu0 %v1240_v54  ;;  %2034 = vmatpush2.msra.mxu1 %v1242_v55  ;;  %v1190_v54 = vld [vmem:[%s5357_s3 + $0x330] sm:$0xff]  ;;  %v1181_v55 = vld [vmem:[%s5357_s3 + $0x2e8] sm:$0xff]  ;;  %v1119_v27 = vld [vmem:[%s5357_s3 + $0xf8] sm:$0xff] }
 0x19c   : > { %1964 = vmatprep.subr.mxu0 %v1233_v28  ;;  %2035 = vmatprep.subr.mxu1 %v1235_v56  ;;  %v1183_v28 = vld [vmem:[%s5357_s3 + $0x2f8] sm:$0xff]  ;;  %v1180_v56 = vld [vmem:[%s5357_s3 + $0x2e0] sm:$0xff] }
 0x19d   : > { %v936_v63 = vpop.f32.mrf.mxu0  ;;  %v1007_v0 = vpop.f32.mrf.mxu1  ;;  %1965 = vmatpush2.msra.mxu0 %v1232_v57  ;;  %2036 = vmatpush2.msra.mxu1 %v1234_v58  ;;  %v1182_v57 = vld [vmem:[%s5357_s3 + $0x2f0] sm:$0xff]  ;;  %v1173_v58 = vld [vmem:[%s5357_s3 + $0x2a8] sm:$0xff] }
 0x19e   : > { %1966 = vmatprep.subr.mxu0 %v1225_v59  ;;  %2037 = vmatprep.subr.mxu1 %v1227_v60  ;;  %v1175_v59 = vld [vmem:[%s5357_s3 + $0x2b8] sm:$0xff]  ;;  %v1172_v60 = vld [vmem:[%s5357_s3 + $0x2a0] sm:$0xff] }
 0x19f   : > { %v938_v6 = vpop.f32.mrf.mxu0  ;;  %v1009_v7 = vpop.f32.mrf.mxu1  ;;  %1967 = vmatpush2.msra.mxu0 %v1224_v61  ;;  %2038 = vmatpush2.msra.mxu1 %v1226_v62  ;;  %v1174_v61 = vld [vmem:[%s5357_s3 + $0x2b0] sm:$0xff]  ;;  %v1165_v62 = vld [vmem:[%s5357_s3 + $0x268] sm:$0xff] }
 0x1a0   : > { %v1037_v12 = vcombine.low %v936_v63, %v938_v6  ;;  %v1038_v13 = vcombine.low %v1007_v0, %v1009_v7  ;;  %1968 = vmatprep.subr.mxu0 %v1217_v1  ;;  %2039 = vmatprep.subr.mxu1 %v1219_v2  ;;  %v1167_v63 = vld [vmem:[%s5357_s3 + $0x278] sm:$0xff]  ;;  %v1164_v0 = vld [vmem:[%s5357_s3 + $0x260] sm:$0xff]  ;;  %v1166_v1 = vld [vmem:[%s5357_s3 + $0x270] sm:$0xff] }
 0x1a1   : > { %1969 = vmatpush2.msra.mxu0 %v1216_v3  ;;  %2040 = vmatpush2.msra.mxu1 %v1218_v4  ;;  %v1157_v2 = vld [vmem:[%s5357_s3 + $0x228] sm:$0xff]  ;;  %v1159_v3 = vld [vmem:[%s5357_s3 + $0x238] sm:$0xff]  ;;  %v1156_v4 = vld [vmem:[%s5357_s3 + $0x220] sm:$0xff] }
 0x1a2   : > { %v1045_v15 = vrot.slane %v1037_v12, %v3255_v17  ;;  %v1052_v16 = vrot.slane %v1038_v13, %v3255_v17  ;;  %2048 = vmatprep.subr.mxu0 %v1213_v8  ;;  %2119 = vmatprep.subr.mxu1 %v1215_v9  ;;  %v1149_v6 = vld [vmem:[%s5357_s3 + $0x1e8] sm:$0xff]  ;;  %v1151_v7 = vld [vmem:[%s5357_s3 + $0x1f8] sm:$0xff]  ;;  %v1148_v8 = vld [vmem:[%s5357_s3 + $0x1e0] sm:$0xff] }
 0x1a3   : > { %v1150_v9 = vld [vmem:[%s5357_s3 + $0x1f0] sm:$0xff]  ;;  %v1143_v12 = vld [vmem:[%s5357_s3 + $0x1b8] sm:$0xff]  ;;  %v1140_v13 = vld [vmem:[%s5357_s3 + $0x1a0] sm:$0xff] }
 0x1a4   : > { %v1053_v22 = vcombine.low %v1045_v15, %v1052_v16  ;;  %v1133_v15 = vld [vmem:[%s5357_s3 + $0x168] sm:$0xff]  ;;  %v1135_v16 = vld [vmem:[%s5357_s3 + $0x178] sm:$0xff] }
 0x1a6   : > { %v1057_v23 = vadd.f32 %v1053_v22, %v460_v21  ;;  %v1134_v21 = vld [vmem:[%s5357_s3 + $0x170] sm:$0xff]  ;;  %v1125_v22 = vld [vmem:[%s5357_s3 + $0x128] sm:$0xff] }
 0x1a8   : > { %2653 = vtanh.f32 %v1057_v23  ;;  %v1075_v24 = vrot.slane %v1057_v23, 4  ;;  %v1127_v23 = vld [vmem:[%s5357_s3 + $0x138] sm:$0xff] }
 0x1aa   : > { %v2565_v25 = vmul.f32 -1.442695, %v1075_v24  ;;  %v1124_v24 = vld [vmem:[%s5357_s3 + $0x120] sm:$0xff] }
 0x1ac   : > { %2655 = vpow2.f32 %v2565_v25  ;;  %v1126_v25 = vld [vmem:[%s5357_s3 + $0x130] sm:$0xff] }
 0x1b5   : > { %v2654_v31 = vpop.eup %2653 }
 0x1b6   : > { %v1084_v33 = vmul.f32 %v2654_v31, %v2652_v29  ;;  %v1116_v29 = vld [vmem:[%s5357_s3 + $0xe0] sm:$0xff]  ;;  %v1109_v31 = vld [vmem:[%s5357_s3 + $0xa8] sm:$0xff] }
 0x1b8   : > { %v1085_v35 = vadd.f32 %v1084_v33, %v1083_v32  ;;  %v1111_v32 = vld [vmem:[%s5357_s3 + $0xb8] sm:$0xff]  ;;  %v1108_v33 = vld [vmem:[%s5357_s3 + $0xa0] sm:$0xff] }
 0x1b9   : > { %v2656_v36 = vpop.eup %2655 }
 0x1ba   : > { %v1080_v37 = vadd.f32 1.0, %v2656_v36  ;;  %2424 = vst [vmem:[#allocation4] sm:$0xf] %v1085_v35  ;;  %2657 = vtanh.f32 %v1085_v35  ;;  %v1110_v35 = vld [vmem:[%s5357_s3 + $0xb0] sm:$0xff]  ;;  %v1101_v36 = vld [vmem:[%s5357_s3 + $0x68] sm:$0xff] }
 0x1bc   : > { %2659 = vrcp.f32 %v1080_v37  ;;  %v1103_v37 = vld [vmem:[%s5357_s3 + $0x78] sm:$0xff] }
 0x1c7   : > { %v2658_v20 = vpop.eup %2657 }
 0x1c9   : > { %v2660_v38 = vpop.eup %2659 }
 0x1ca   : > { %v1087_v39 = vmul.f32 %v2660_v38, %v2658_v20  ;;  %v1100_v20 = vld [vmem:[%s5357_s3 + $0x60] sm:$0xff]  ;;  %v1102_v38 = vld [vmem:[%s5357_s3 + $0x70] sm:$0xff] }
 0x1cc   : > { %v4829_v40 = vrot.slane %v1087_v39, %v3255_v17  ;;  %2410 = vst [vmem:[#allocation2] sm:$0xf] %v1087_v39  ;;  %v1093_v39 = vld [vmem:[%s5357_s3 + $0x28] sm:$0xff] }
 0x1ce   : > { %v1903_v41 = vcombine.high %v4829_v40, %v4829_v40 }
 0x1d0   : > { %1970 = vmatprep.mubr.f32.mxu0 %v1903_v41  ;;  %2041 = vmatprep.mubr.f32.mxu1 %v1903_v41 }
 0x1d1   : > { %1971 = vmatmul.mubr.f32.vlgmr.msra.gmra.mxu0 %v4829_v40  ;;  %2042 = vmatmul.mubr.f32.vlgmr.msra.gmra.mxu1 %v4829_v40 }
 0x1d2   : > { %2049 = vmatpush1.msra.mxu0 %v1212_v42  ;;  %2120 = vmatpush1.msra.mxu1 %v1214_v43  ;;  %v1092_v42 = vld [vmem:[%s5357_s3 + $0x20] sm:$0xff]  ;;  %v1094_v43 = vld [vmem:[%s5357_s3 + $0x30] sm:$0xff] }
 0x1d3   : > { %2050 = vmatprep.subr.mxu0 %v1205_v44  ;;  %2112 = vmatprep.mubr.f32.mxu0 %v1903_v41  ;;  %v1341_v44 = vld [vmem:[%s5357_s3 + $0x7e8] sm:$0xff] }
 0x1d4   : > { %2121 = vmatprep.subr.mxu1 %v1207_v45  ;;  %2183 = vmatprep.mubr.f32.mxu1 %v1903_v41  ;;  %v1095_v41 = vld [vmem:[%s5357_s3 + $0x38] sm:$0xff] }
 0x1d5   : > { %2051 = vmatpush1.msra.mxu0 %v1204_v46  ;;  %2122 = vmatpush1.msra.mxu1 %v1206_v47  ;;  %v1343_v45 = vld [vmem:[%s5357_s3 + $0x7f8] sm:$0xff]  ;;  %v1340_v46 = vld [vmem:[%s5357_s3 + $0x7e0] sm:$0xff]  ;;  %v1342_v47 = vld [vmem:[%s5357_s3 + $0x7f0] sm:$0xff] }
 0x1d6   : > { %2052 = vmatprep.subr.mxu0 %v1197_v48  ;;  %2123 = vmatprep.subr.mxu1 %v1199_v49  ;;  %v1333_v48 = vld [vmem:[%s5357_s3 + $0x7a8] sm:$0xff]  ;;  %v1335_v49 = vld [vmem:[%s5357_s3 + $0x7b8] sm:$0xff] }
 0x1d7   : > { %2053 = vmatpush1.msra.mxu0 %v1196_v50  ;;  %2124 = vmatpush1.msra.mxu1 %v1198_v51  ;;  %v1332_v50 = vld [vmem:[%s5357_s3 + $0x7a0] sm:$0xff]  ;;  %v1334_v51 = vld [vmem:[%s5357_s3 + $0x7b0] sm:$0xff] }
 0x1d8   : > { %2054 = vmatprep.subr.mxu0 %v1189_v52  ;;  %2125 = vmatprep.subr.mxu1 %v1191_v34  ;;  %v1325_v52 = vld [vmem:[%s5357_s3 + $0x768] sm:$0xff]  ;;  %v1327_v34 = vld [vmem:[%s5357_s3 + $0x778] sm:$0xff] }
 0x1d9   : > { %2055 = vmatpush1.msra.mxu0 %v1188_v53  ;;  %2126 = vmatpush1.msra.mxu1 %v1190_v54  ;;  %v1324_v53 = vld [vmem:[%s5357_s3 + $0x760] sm:$0xff]  ;;  %v1326_v54 = vld [vmem:[%s5357_s3 + $0x770] sm:$0xff] }
 0x1da   : > { %2056 = vmatprep.subr.mxu0 %v1181_v55  ;;  %2127 = vmatprep.subr.mxu1 %v1183_v28  ;;  %v1317_v55 = vld [vmem:[%s5357_s3 + $0x728] sm:$0xff]  ;;  %v1319_v28 = vld [vmem:[%s5357_s3 + $0x738] sm:$0xff] }
 0x1db   : > { %2057 = vmatpush1.msra.mxu0 %v1180_v56  ;;  %2128 = vmatpush1.msra.mxu1 %v1182_v57  ;;  %v1316_v56 = vld [vmem:[%s5357_s3 + $0x720] sm:$0xff]  ;;  %v1318_v57 = vld [vmem:[%s5357_s3 + $0x730] sm:$0xff] }
 0x1dc   : > { %2058 = vmatprep.subr.mxu0 %v1173_v58  ;;  %2129 = vmatprep.subr.mxu1 %v1175_v59  ;;  %v1309_v58 = vld [vmem:[%s5357_s3 + $0x6e8] sm:$0xff]  ;;  %v1311_v59 = vld [vmem:[%s5357_s3 + $0x6f8] sm:$0xff] }
 0x1dd   : > { %2059 = vmatpush1.msra.mxu0 %v1172_v60  ;;  %2130 = vmatpush1.msra.mxu1 %v1174_v61  ;;  %v1308_v60 = vld [vmem:[%s5357_s3 + $0x6e0] sm:$0xff]  ;;  %v1310_v61 = vld [vmem:[%s5357_s3 + $0x6f0] sm:$0xff] }
 0x1de   : > { %2060 = vmatprep.subr.mxu0 %v1165_v62  ;;  %2131 = vmatprep.subr.mxu1 %v1167_v63  ;;  %v1301_v62 = vld [vmem:[%s5357_s3 + $0x6a8] sm:$0xff]  ;;  %v1303_v63 = vld [vmem:[%s5357_s3 + $0x6b8] sm:$0xff] }
 0x1df   : > { %2061 = vmatpush1.msra.mxu0 %v1164_v0  ;;  %2132 = vmatpush1.msra.mxu1 %v1166_v1  ;;  %v1300_v0 = vld [vmem:[%s5357_s3 + $0x6a0] sm:$0xff]  ;;  %v1302_v1 = vld [vmem:[%s5357_s3 + $0x6b0] sm:$0xff] }
 0x1e0   : > { %2062 = vmatprep.subr.mxu0 %v1157_v2  ;;  %2133 = vmatprep.subr.mxu1 %v1159_v3  ;;  %v1293_v2 = vld [vmem:[%s5357_s3 + $0x668] sm:$0xff]  ;;  %v1295_v3 = vld [vmem:[%s5357_s3 + $0x678] sm:$0xff] }
 0x1e1   : > { %2063 = vmatpush1.msra.mxu0 %v1156_v4  ;;  %2134 = vmatpush1.msra.mxu1 %v1158_v5  ;;  %v1292_v4 = vld [vmem:[%s5357_s3 + $0x660] sm:$0xff]  ;;  %v1294_v5 = vld [vmem:[%s5357_s3 + $0x670] sm:$0xff] }
 0x1e2   : > { %2064 = vmatprep.subr.mxu0 %v1149_v6  ;;  %2135 = vmatprep.subr.mxu1 %v1151_v7  ;;  %v1285_v6 = vld [vmem:[%s5357_s3 + $0x628] sm:$0xff]  ;;  %v1287_v7 = vld [vmem:[%s5357_s3 + $0x638] sm:$0xff] }
 0x1e3   : > { %2065 = vmatpush1.msra.mxu0 %v1148_v8  ;;  %2136 = vmatpush1.msra.mxu1 %v1150_v9  ;;  %v1284_v8 = vld [vmem:[%s5357_s3 + $0x620] sm:$0xff]  ;;  %v1286_v9 = vld [vmem:[%s5357_s3 + $0x630] sm:$0xff] }
 0x1e4   : > { %2066 = vmatprep.subr.mxu0 %v1141_v11  ;;  %2137 = vmatprep.subr.mxu1 %v1143_v12  ;;  %v1277_v11 = vld [vmem:[%s5357_s3 + $0x5e8] sm:$0xff]  ;;  %v1279_v12 = vld [vmem:[%s5357_s3 + $0x5f8] sm:$0xff] }
 0x1e5   : > { %2067 = vmatpush1.msra.mxu0 %v1140_v13  ;;  %2138 = vmatpush1.msra.mxu1 %v1142_v14  ;;  %v1276_v13 = vld [vmem:[%s5357_s3 + $0x5e0] sm:$0xff]  ;;  %v1278_v14 = vld [vmem:[%s5357_s3 + $0x5f0] sm:$0xff] }
 0x1e6   : > { %2068 = vmatprep.subr.mxu0 %v1133_v15  ;;  %2139 = vmatprep.subr.mxu1 %v1135_v16  ;;  %v1269_v15 = vld [vmem:[%s5357_s3 + $0x5a8] sm:$0xff]  ;;  %v1271_v16 = vld [vmem:[%s5357_s3 + $0x5b8] sm:$0xff] }
 0x1e7   : > { %2069 = vmatpush1.msra.mxu0 %v1132_v19  ;;  %2140 = vmatpush1.msra.mxu1 %v1134_v21  ;;  %v1268_v19 = vld [vmem:[%s5357_s3 + $0x5a0] sm:$0xff]  ;;  %v1270_v21 = vld [vmem:[%s5357_s3 + $0x5b0] sm:$0xff] }
 0x1e8   : > { %2070 = vmatprep.subr.mxu0 %v1125_v22  ;;  %2141 = vmatprep.subr.mxu1 %v1127_v23  ;;  %v1261_v22 = vld [vmem:[%s5357_s3 + $0x568] sm:$0xff]  ;;  %v1263_v23 = vld [vmem:[%s5357_s3 + $0x578] sm:$0xff] }
 0x1e9   : > { %2071 = vmatpush1.msra.mxu0 %v1124_v24  ;;  %2142 = vmatpush1.msra.mxu1 %v1126_v25  ;;  %v1260_v24 = vld [vmem:[%s5357_s3 + $0x560] sm:$0xff]  ;;  %v1262_v25 = vld [vmem:[%s5357_s3 + $0x570] sm:$0xff] }
 0x1ea   : > { %2072 = vmatprep.subr.mxu0 %v1117_v26  ;;  %2143 = vmatprep.subr.mxu1 %v1119_v27  ;;  %v1253_v26 = vld [vmem:[%s5357_s3 + $0x528] sm:$0xff]  ;;  %v1255_v27 = vld [vmem:[%s5357_s3 + $0x538] sm:$0xff] }
 0x1eb   : > { %2073 = vmatpush1.msra.mxu0 %v1116_v29  ;;  %2144 = vmatpush1.msra.mxu1 %v1118_v30  ;;  %v1252_v29 = vld [vmem:[%s5357_s3 + $0x520] sm:$0xff]  ;;  %v1254_v30 = vld [vmem:[%s5357_s3 + $0x530] sm:$0xff] }
 0x1ec   : > { %2074 = vmatprep.subr.mxu0 %v1109_v31  ;;  %2145 = vmatprep.subr.mxu1 %v1111_v32  ;;  %v1245_v31 = vld [vmem:[%s5357_s3 + $0x4e8] sm:$0xff]  ;;  %v1247_v32 = vld [vmem:[%s5357_s3 + $0x4f8] sm:$0xff] }
 0x1ed   : > { %2075 = vmatpush1.msra.mxu0 %v1108_v33  ;;  %2146 = vmatpush1.msra.mxu1 %v1110_v35  ;;  %v1244_v33 = vld [vmem:[%s5357_s3 + $0x4e0] sm:$0xff]  ;;  %v1246_v35 = vld [vmem:[%s5357_s3 + $0x4f0] sm:$0xff] }
 0x1ee   : > { %2076 = vmatprep.subr.mxu0 %v1101_v36  ;;  %2147 = vmatprep.subr.mxu1 %v1103_v37  ;;  %v1237_v36 = vld [vmem:[%s5357_s3 + $0x4a8] sm:$0xff]  ;;  %v1239_v37 = vld [vmem:[%s5357_s3 + $0x4b8] sm:$0xff] }
 0x1ef   : > { %2077 = vmatpush1.msra.mxu0 %v1100_v20  ;;  %2148 = vmatpush1.msra.mxu1 %v1102_v38  ;;  %v1236_v20 = vld [vmem:[%s5357_s3 + $0x4a0] sm:$0xff]  ;;  %v1238_v38 = vld [vmem:[%s5357_s3 + $0x4b0] sm:$0xff] }
 0x1f0   : > { %2078 = vmatprep.subr.mxu0 %v1093_v39  ;;  %2149 = vmatprep.subr.mxu1 %v1095_v41  ;;  %v1229_v39 = vld [vmem:[%s5357_s3 + $0x468] sm:$0xff]  ;;  %v1231_v41 = vld [vmem:[%s5357_s3 + $0x478] sm:$0xff] }
 0x1f1   : > { %2079 = vmatpush1.msra.mxu0 %v1092_v42  ;;  %2150 = vmatpush1.msra.mxu1 %v1094_v43  ;;  %v1228_v42 = vld [vmem:[%s5357_s3 + $0x460] sm:$0xff]  ;;  %v1230_v43 = vld [vmem:[%s5357_s3 + $0x470] sm:$0xff] }
 0x1f2   : > { %2080 = vmatprep.subr.mxu0 %v1341_v44  ;;  %2151 = vmatprep.subr.mxu1 %v1343_v45  ;;  %v1221_v44 = vld [vmem:[%s5357_s3 + $0x428] sm:$0xff]  ;;  %v1223_v45 = vld [vmem:[%s5357_s3 + $0x438] sm:$0xff] }
 0x1f3   : > { %2081 = vmatpush2.msra.mxu0 %v1340_v46  ;;  %2152 = vmatpush2.msra.mxu1 %v1342_v47  ;;  %v1220_v46 = vld [vmem:[%s5357_s3 + $0x420] sm:$0xff]  ;;  %v1222_v47 = vld [vmem:[%s5357_s3 + $0x430] sm:$0xff] }
 0x1f4   : > { %2082 = vmatprep.subr.mxu0 %v1333_v48  ;;  %2153 = vmatprep.subr.mxu1 %v1335_v49  ;;  %v2330_v48 = vld [vmem:[%s5360_s6 + $0xf8] sm:$0xff] }
 0x1f5   : > { %2083 = vmatpush2.msra.mxu0 %v1332_v50  ;;  %2154 = vmatpush2.msra.mxu1 %v1334_v51  ;;  %v2314_v49 = vld [vmem:[%s5360_s6 + $0x78] sm:$0xff]  ;;  %v2329_v50 = vld [vmem:[%s5360_s6 + $0xf0] sm:$0xff] }
 0x1f6   : > { %2084 = vmatprep.subr.mxu0 %v1325_v52  ;;  %2155 = vmatprep.subr.mxu1 %v1327_v34  ;;  %v2313_v51 = vld [vmem:[%s5360_s6 + $0x70] sm:$0xff]  ;;  %v2312_v52 = vld [vmem:[%s5360_s6 + $0x68] sm:$0xff]  ;;  %v2327_v34 = vld [vmem:[%s5360_s6 + $0xe0] sm:$0xff] }
 0x1f7   : > { %2085 = vmatpush2.msra.mxu0 %v1324_v53  ;;  %2156 = vmatpush2.msra.mxu1 %v1326_v54  ;;  %v2311_v53 = vld [vmem:[%s5360_s6 + $0x60] sm:$0xff]  ;;  %v2326_v54 = vld [vmem:[%s5360_s6 + $0xd8] sm:$0xff] }
 0x1f8   : > { %2086 = vmatprep.subr.mxu0 %v1317_v55  ;;  %2157 = vmatprep.subr.mxu1 %v1319_v28  ;;  %v2310_v55 = vld [vmem:[%s5360_s6 + $0x58] sm:$0xff]  ;;  %v2325_v28 = vld [vmem:[%s5360_s6 + $0xd0] sm:$0xff] }
 0x1f9   : > { %2087 = vmatpush2.msra.mxu0 %v1316_v56  ;;  %2158 = vmatpush2.msra.mxu1 %v1318_v57  ;;  %v2309_v56 = vld [vmem:[%s5360_s6 + $0x50] sm:$0xff]  ;;  %v2324_v57 = vld [vmem:[%s5360_s6 + $0xc8] sm:$0xff] }
 0x1fa   : > { %2088 = vmatprep.subr.mxu0 %v1309_v58  ;;  %2159 = vmatprep.subr.mxu1 %v1311_v59  ;;  %v2308_v58 = vld [vmem:[%s5360_s6 + $0x48] sm:$0xff]  ;;  %v2323_v59 = vld [vmem:[%s5360_s6 + $0xc0] sm:$0xff] }
 0x1fb   : > { %2089 = vmatpush2.msra.mxu0 %v1308_v60  ;;  %2160 = vmatpush2.msra.mxu1 %v1310_v61  ;;  %v2307_v60 = vld [vmem:[%s5360_s6 + $0x40] sm:$0xff]  ;;  %v2322_v61 = vld [vmem:[%s5360_s6 + $0xb8] sm:$0xff] }
 0x1fc   : > { %2090 = vmatprep.subr.mxu0 %v1301_v62  ;;  %2161 = vmatprep.subr.mxu1 %v1303_v63  ;;  %v2306_v62 = vld [vmem:[%s5360_s6 + $0x38] sm:$0xff]  ;;  %v2321_v63 = vld [vmem:[%s5360_s6 + $0xb0] sm:$0xff] }
 0x1fd   : > { %2091 = vmatpush2.msra.mxu0 %v1300_v0  ;;  %2162 = vmatpush2.msra.mxu1 %v1302_v1  ;;  %v2305_v0 = vld [vmem:[%s5360_s6 + $0x30] sm:$0xff]  ;;  %v2320_v1 = vld [vmem:[%s5360_s6 + $0xa8] sm:$0xff] }
 0x1fe   : > { %2092 = vmatprep.subr.mxu0 %v1293_v2  ;;  %2163 = vmatprep.subr.mxu1 %v1295_v3  ;;  %v2304_v2 = vld [vmem:[%s5360_s6 + $0x28] sm:$0xff]  ;;  %v2319_v3 = vld [vmem:[%s5360_s6 + $0xa0] sm:$0xff] }
 0x1ff   : > { %2093 = vmatpush2.msra.mxu0 %v1292_v4  ;;  %2164 = vmatpush2.msra.mxu1 %v1294_v5  ;;  %v2303_v4 = vld [vmem:[%s5360_s6 + $0x20] sm:$0xff]  ;;  %v2318_v5 = vld [vmem:[%s5360_s6 + $0x98] sm:$0xff] }
 0x200   : > { %2094 = vmatprep.subr.mxu0 %v1285_v6  ;;  %2165 = vmatprep.subr.mxu1 %v1287_v7  ;;  %v2302_v6 = vld [vmem:[%s5360_s6 + $0x18] sm:$0xff]  ;;  %v2317_v7 = vld [vmem:[%s5360_s6 + $0x90] sm:$0xff] }
 0x201   : > { %2095 = vmatpush2.msra.mxu0 %v1284_v8  ;;  %2166 = vmatpush2.msra.mxu1 %v1286_v9  ;;  %v2301_v8 = vld [vmem:[%s5360_s6 + $0x10] sm:$0xff]  ;;  %v2316_v9 = vld [vmem:[%s5360_s6 + $0x88] sm:$0xff] }
 0x202   : > { %2096 = vmatprep.subr.mxu0 %v1277_v11  ;;  %2167 = vmatprep.subr.mxu1 %v1279_v12  ;;  %v2300_v11 = vld [vmem:[%s5360_s6 + $0x8] sm:$0xff]  ;;  %v2315_v12 = vld [vmem:[%s5360_s6 + $0x80] sm:$0xff] }
 0x203   : > { %2097 = vmatpush2.msra.mxu0 %v1276_v13  ;;  %2168 = vmatpush2.msra.mxu1 %v1278_v14  ;;  %v2299_v13 = vld [vmem:[%s5360_s6] sm:$0xff]  ;;  %v1677_v14 = vpop.f32.mrf.mxu0 }
 0x204   : > { %2098 = vmatprep.subr.mxu0 %v1269_v15  ;;  %2169 = vmatprep.subr.mxu1 %v1271_v16  ;;  %v1748_v15 = vpop.f32.mrf.mxu1 }
 0x205   : > { %2099 = vmatpush2.msra.mxu0 %v1268_v19  ;;  %2170 = vmatpush2.msra.mxu1 %v1270_v21  ;;  %v1679_v16 = vpop.f32.mrf.mxu0 }
 0x206   : > { %2100 = vmatprep.subr.mxu0 %v1261_v22  ;;  %2171 = vmatprep.subr.mxu1 %v1263_v23  ;;  %v1750_v19 = vpop.f32.mrf.mxu1 }
 0x207   : > { %2101 = vmatpush2.msra.mxu0 %v1260_v24  ;;  %2172 = vmatpush2.msra.mxu1 %v1262_v25 }
 0x208   : > { %2102 = vmatprep.subr.mxu0 %v1253_v26  ;;  %2173 = vmatprep.subr.mxu1 %v1255_v27  ;;  %v2194_v26 = vsub.s32 0, %v3251_v10  ;;  %v2190_v27 = vld [vmem:[%s5359_s5] sm:$0xff] }
 0x209   : > { %2103 = vmatpush2.msra.mxu0 %v1252_v29  ;;  %2174 = vmatpush2.msra.mxu1 %v1254_v30  ;;  %v2202_v29 = vsub.s32 2, %v3251_v10 }
 0x20a   : > { %2104 = vmatprep.subr.mxu0 %v1245_v31  ;;  %2175 = vmatprep.subr.mxu1 %v1247_v32  ;;  %v2198_v31 = vsub.s32 1, %v3251_v10 }
 0x20b   : > { %2105 = vmatpush2.msra.mxu0 %v1244_v33  ;;  %2176 = vmatpush2.msra.mxu1 %v1246_v35  ;;  %v2195_v33 = vrot.slane %v2190_v27, %v2194_v26 }
 0x20c   : > { %2106 = vmatprep.subr.mxu0 %v1237_v36  ;;  %2177 = vmatprep.subr.mxu1 %v1239_v37  ;;  %v2203_v37 = vrot.slane %v2190_v27, %v2202_v29 }
 0x20d   : > { %2107 = vmatpush2.msra.mxu0 %v1236_v20  ;;  %2178 = vmatpush2.msra.mxu1 %v1238_v38  ;;  %v2206_v20 = vsub.s32 3, %v3251_v10 }
 0x20e   : > { %2108 = vmatprep.subr.mxu0 %v1229_v39  ;;  %2179 = vmatprep.subr.mxu1 %v1231_v41  ;;  %v2199_v41 = vrot.slane %v2190_v27, %v2198_v31 }
 0x20f   : > { %2109 = vmatpush2.msra.mxu0 %v1228_v42  ;;  %2180 = vmatpush2.msra.mxu1 %v1230_v43 }
 0x210   : > { %2110 = vmatprep.subr.mxu0 %v1221_v44  ;;  %2181 = vmatprep.subr.mxu1 %v1223_v45  ;;  %v2207_v45 = vrot.slane %v2190_v27, %v2206_v20 }
 0x211   : > { %2111 = vmatpush2.msra.mxu0 %v1220_v46  ;;  %2182 = vmatpush2.msra.mxu1 %v1222_v47 }
 0x212   : > { %2113 = vmatmul.mubr.f32.vlgmr.msra.gmra.mxu0 %v4829_v40  ;;  %2184 = vmatmul.mubr.f32.vlgmr.msra.gmra.mxu1 %v4829_v40  ;;  %v2328_v40 = vld [vmem:[%s5360_s6 + $0xe8] sm:$0xff] }
 0x213   : > { %2582 = vmatprep.subr.mxu0 %v2330_v48 }
 0x214   : > { %2583 = vmatpush3.msra.mxu0 %v2314_v49 }
 0x215   : > { %2584 = vmatprep.subr.mxu0 %v2329_v50 }
 0x216   : > { %2585 = vmatpush3.msra.mxu0 %v2313_v51 }
 0x217   : > { %2586 = vmatprep.subr.mxu0 %v2328_v40 }
 0x218   : > { %2587 = vmatpush3.msra.mxu0 %v2312_v52 }
 0x219   : > { %2588 = vmatprep.subr.mxu0 %v2327_v34  ;;  %v2210_v34 = vsub.s32 4, %v3251_v10 }
 0x21a   : > { %2589 = vmatpush3.msra.mxu0 %v2311_v53  ;;  %v2218_v53 = vsub.s32 6, %v3251_v10 }
 0x21b   : > { %2590 = vmatprep.subr.mxu0 %v2326_v54  ;;  %v2214_v54 = vsub.s32 5, %v3251_v10 }
 0x21c   : > { %2591 = vmatpush3.msra.mxu0 %v2310_v55 }
 0x21d   : > { %2592 = vmatprep.subr.mxu0 %v2325_v28 }
 0x21e   : > { %2593 = vmatpush3.msra.mxu0 %v2309_v56  ;;  %v2222_v56 = vsub.s32 7, %v3251_v10 }
 0x21f   : > { %2594 = vmatprep.subr.mxu0 %v2324_v57 }
 0x220   : > { %2595 = vmatpush3.msra.mxu0 %v2308_v58 }
 0x221   : > { %2596 = vmatprep.subr.mxu0 %v2323_v59  ;;  %v1819_v21 = vpop.f32.mrf.mxu0  ;;  %v1890_v22 = vpop.f32.mrf.mxu1  ;;  %v2211_v59 = vrot.slane %v2190_v27, %v2210_v34 }
 0x222   : > { %2597 = vmatpush3.msra.mxu0 %v2307_v60  ;;  %v2219_v60 = vrot.slane %v2190_v27, %v2218_v53 }
 0x223   : > { %2598 = vmatprep.subr.mxu0 %v2322_v61  ;;  %v1821_v23 = vpop.f32.mrf.mxu0  ;;  %v1892_v24 = vpop.f32.mrf.mxu1 }
 0x224   : > { %2599 = vmatpush3.msra.mxu0 %v2306_v62 }
 0x225   : > { %2600 = vmatprep.subr.mxu0 %v2321_v63 }
 0x226   : > { %2601 = vmatpush3.msra.mxu0 %v2305_v0  ;;  %v2215_v0 = vrot.slane %v2190_v27, %v2214_v54 }
 0x227   : > { %2602 = vmatprep.subr.mxu0 %v2320_v1 }
 0x228   : > { %2603 = vmatpush3.msra.mxu0 %v2304_v2 }
 0x229   : > { %2604 = vmatprep.subr.mxu0 %v2319_v3  ;;  %v2223_v3 = vrot.slane %v2190_v27, %v2222_v56 }
 0x22a   : > { %2605 = vmatpush3.msra.mxu0 %v2303_v4 }
 0x22b   : > { %2606 = vmatprep.subr.mxu0 %v2318_v5 }
 0x22c   : > { %2607 = vmatpush3.msra.mxu0 %v2302_v6 }
 0x22d   : > { %2608 = vmatprep.subr.mxu0 %v2317_v7 }
 0x22e   : > { %2609 = vmatpush3.msra.mxu0 %v2301_v8 }
 0x22f   : > { %2610 = vmatprep.subr.mxu0 %v2316_v9 }
 0x230   : > { %2611 = vmatpush3.msra.mxu0 %v2300_v11 }
 0x231   : > { %2612 = vmatprep.subr.mxu0 %v2315_v12 }
 0x232   : > { %2613 = vmatpush3.msra.mxu0 %v2299_v13 }
 0x291   : > { %v1972_v25 = vpop.f32.mrf.mxu0  ;;  %v2043_v30 = vpop.f32.mrf.mxu1 }
 0x292   : > { %v1973_v32 = vadd.f32 %v1972_v25, %v1677_v14  ;;  %v2044_v36 = vadd.f32 %v2043_v30, %v1748_v15  ;;  %v456_v15 = vld [vmem:[#allocation4 + $0x4] sm:$0xf] }
 0x293   : > { %v1974_v35 = vpop.f32.mrf.mxu0  ;;  %v2045_v38 = vpop.f32.mrf.mxu1 }
 0x294   : > { %v1975_v39 = vadd.f32 %v1974_v35, %v1679_v16  ;;  %v2232_v42 = vadd.f32 %v2195_v33, %v1973_v32  ;;  %v2234_v43 = vadd.f32 %v2203_v37, %v2044_v36  ;;  %v2046_v44 = vadd.f32 %v2045_v38, %v1750_v19 }
 0x295   : > { %v458_v16 = vmul.f32 %v456_v15, %v3257_v18 }
 0x296   : > { %v2233_v46 = vadd.f32 %v2199_v41, %v1975_v39  ;;  %v2566_v47 = vmul.f32 -1.442695, %v2232_v42  ;;  %v2568_v48 = vmul.f32 -1.442695, %v2234_v43  ;;  %v2235_v49 = vadd.f32 %v2207_v45, %v2046_v44 }
 0x298   : > { %v2567_v50 = vmul.f32 -1.442695, %v2233_v46  ;;  %2661 = vpow2.f32 %v2566_v47  ;;  %v2569_v51 = vmul.f32 -1.442695, %v2235_v49 }
 0x299   : > { %2663 = vpow2.f32 %v2568_v48 }
 0x29a   : > { %2665 = vpow2.f32 %v2567_v50 }
 0x29b   : > { %2667 = vpow2.f32 %v2569_v51 }
 0x2a5   : > { %v2662_v40 = vpop.eup %2661 }
 0x2a6   : > { %v2664_v52 = vpop.eup %2663  ;;  %v2246_v28 = vadd.f32 1.0, %v2662_v40 }
 0x2a7   : > { %v2666_v55 = vpop.eup %2665  ;;  %v2258_v57 = vadd.f32 1.0, %v2664_v52 }
 0x2a8   : > { %v2668_v58 = vpop.eup %2667  ;;  %v2247_v61 = vadd.f32 1.0, %v2666_v55  ;;  %2669 = vrcp.f32 %v2246_v28 }
 0x2a9   : > { %2671 = vrcp.f32 %v2258_v57  ;;  %v2259_v4 = vadd.f32 1.0, %v2668_v58 }
 0x2aa   : > { %2673 = vrcp.f32 %v2247_v61 }
 0x2b5   : > { %v2670_v19 = vpop.eup %2669 }
 0x2d2   : > { %v2114_v62 = vpop.f32.mrf.mxu0  ;;  %v2185_v63 = vpop.f32.mrf.mxu1 }
 0x2d3   : > { %v2115_v1 = vadd.f32 %v2114_v62, %v1819_v21  ;;  %v2186_v2 = vadd.f32 %v2185_v63, %v1890_v22  ;;  %v2672_v21 = vpop.eup %2671  ;;  %v2285_v22 = vrot.slane %v458_v16, %v3255_v17 }
 0x2d4   : > { %v2116_v5 = vpop.f32.mrf.mxu0  ;;  %v2187_v6 = vpop.f32.mrf.mxu1 }
 0x2d5   : > { %v2236_v7 = vadd.f32 %v2211_v59, %v2115_v1  ;;  %v2238_v8 = vadd.f32 %v2219_v60, %v2186_v2  ;;  %v2117_v9 = vadd.f32 %v2116_v5, %v1821_v23  ;;  %v2188_v10 = vadd.f32 %v2187_v6, %v1892_v24  ;;  %v2674_v25 = vpop.eup %2673 }
 0x2d6   : > { %v2289_v26 = vmul.f32 %v2672_v21, %v2285_v22  ;;  %v2286_v30 = vcombine.high %v2285_v22, %v2285_v22 }
 0x2d7   : > { %2675 = vtanh.f32 %v2236_v7  ;;  %v2570_v11 = vmul.f32 -1.442695, %v2238_v8  ;;  %v2237_v12 = vadd.f32 %v2215_v0, %v2117_v9  ;;  %v2239_v13 = vadd.f32 %v2223_v3, %v2188_v10 }
 0x2d8   : > { %2677 = vrcp.f32 %v2259_v4 }
 0x2d9   : > { %2679 = vpow2.f32 %v2570_v11  ;;  %v2571_v14 = vmul.f32 -1.442695, %v2239_v13 }
 0x2da   : > { %2681 = vtanh.f32 %v2237_v12 }
 0x2db   : > { %2683 = vpow2.f32 %v2571_v14 }
 0x2e4   : > { %v2676_v23 = vpop.eup %2675 }
 0x2e5   : > { %v2678_v24 = vpop.eup %2677  ;;  %v2291_v27 = vmul.f32 %v2676_v23, %v2670_v19 }
 0x2e6   : > { %v2680_v29 = vpop.eup %2679  ;;  %v2290_v36 = vmul.f32 %v2678_v24, %v2286_v30 }
 0x2e7   : > { %v2682_v31 = vpop.eup %2681  ;;  %v2293_v32 = vadd.f32 %v2291_v27, %v2289_v26  ;;  %v2272_v33 = vadd.f32 1.0, %v2680_v29 }
 0x2e8   : > { %v2684_v35 = vpop.eup %2683  ;;  %v2292_v37 = vmul.f32 %v2682_v31, %v2674_v25 }
 0x2e9   : > { %2685 = vtanh.f32 %v2293_v32  ;;  %v2273_v20 = vadd.f32 1.0, %v2684_v35 }
 0x2ea   : > { %2687 = vrcp.f32 %v2272_v33  ;;  %v2294_v18 = vadd.f32 %v2292_v37, %v2290_v36 }
 0x2eb   : > { %2689 = vrcp.f32 %v2273_v20 }
 0x2ec   : > { %2691 = vtanh.f32 %v2294_v18  ;;  %v2427_v17 = vcombine.low %v2293_v32, %v2294_v18 }
 0x2ee   : > { %2574 = vst.sshfl [vmem:[#allocation4 + $0x4] sm:$0x33 pattern:$0x76325410] %v2427_v17 }
 0x2f6   : > { %v2686_v38 = vpop.eup %2685 }
 0x2f7   : > { %v2688_v39 = vpop.eup %2687 }
 0x2f8   : > { %v2690_v41 = vpop.eup %2689  ;;  %v2297_v43 = vmul.f32 %v2688_v39, %v2686_v38 }
 0x2f9   : > { %v2692_v42 = vpop.eup %2691 }
 0x2fa   : > { %v2298_v44 = vmul.f32 %v2692_v42, %v2690_v41 }
 0x2fc   : > { %2402 = vmatprep.mubr.f32.mxu0 %v2298_v44  ;;  %v2413_v45 = vcombine.low %v2297_v43, %v2298_v44 }
 0x2fd   : > { %2403 = vmatmul.mubr.f32.vlgmr.msra.gmra.mxu0 %v2297_v43 }
 0x2fe   : > { %2573 = vst.sshfl [vmem:[#allocation2 + $0x4] sm:$0x33 pattern:$0x76325410] %v2413_v45 }
 0x2ff   : > { %2706 = shalt.err (!%p2703_p12)
}
 0x300   : > { %s2762_s26 = smov 64   ;;  %s2763_s27 = smov 4  }
 0x301   : > { %2618 = dma.vmem_to_hbm [thread:$0]  (%p2625_p5), %s2452_s20, 128, %s5365_s11, [#allocation3], %s2762_s26, %s2762_s26, %s2763_s27  }
 0x302   : > { %s2717_s14 = scalar_lea.vmem %s2465_s24, 128  ;;  %p2724_p2 = scmp.lt.s32.totalorder %s2465_s24, %s2465_s24 }
 0x303   : > { %p2718_p13 = scmp.ne.s32.totalorder %s2465_s24, %s2717_s14  ;;  %p2725_p3 = scmp.lt.s32.totalorder %s2717_s14, %s2717_s14 }
 0x305   : > { %p2719_p0 = pnand %p2718_p13, %p2625_p5  ;;  %p2726_p4 = por %p2725_p3, %p2724_p2 }
 0x307   : > { %p2720_p1 = pneg %p2719_p0 }
 0x309   : > { %p2727_p6 = pnand %p2726_p4, %p2720_p1 }
 0x30b   : > { %2730 = shalt.err (!%p2727_p6)
}
 0x30c   : > { %2620 = dma.vmem_to_hbm [thread:$0]  (%p2625_p5), %s2465_s24, 128, %s5366_s12, [#allocation5], %s2762_s26, %s2762_s26, %s2763_s27   ;;  %vm2408_vm0 = vcmask 50176  }
 0x30d   : > { %v2572_v47 = vld [vmem:[%s5361_s7] ss:$0 sm:$0xff] }
 0x3bd   : > { %v2614_v46 = vpop.f32.mrf.mxu0 }
 0x3bf   : > { %v2615_v48 = vpop.f32.mrf.mxu0 }
 0x3c0   : > { %v2616_v49 = vadd.f32 %v2615_v48, %v2614_v46 }
 0x3c2   : > { %v2405_v50 = vadd.f32 %v2616_v49, %v2572_v47 }
 0x3c4   : > { %2409 = vst.msk [vmem:[%s2852_s16] sm:$0x3] %vm2408_vm0, %v2405_v50 }
 0x3c5   : > { %2746 = dma.done.wait (%p2625_p5), [#allocation3], 128  }
 0x3c6   : > { %2748 = vsyncadd (%p2625_p5), [#allocation3], 4294967168 }
 0x3c7   : > { %2750 = dma.done.wait (%p2625_p5), [#allocation5], 128  }
 0x3c8   : > { %2752 = vsyncadd (%p2625_p5), [#allocation5], 4294967168 }
 0x3c9 PF: > { %s25_s21 = sadd.s32 1, %s2755_s21  }
 0x3ca   : > { %p22_p7 = scmp.ge.s32.totalorder %s25_s21, 6  }
 0x3cc   :  { %24 = sbr.rel (!%p22_p7) target bundleno = 2 (0x2), region = 116 }
 0x3d1   :  { %2491 = vsyncpa [#allocation3], 1 }
 0x3d2   :  { %2493 = vsyncpa [#allocation3 + $0x1], 1 }
 0x3d3   :  { %2494 = vsyncpa [#allocation5], 1 }

</bundles_post_ra>
